<compile_context>
chip_gen: v7x
topology: tpu7x:2x2x1
jax: 0.10.0
libtpu: 0.0.40
codegen_flags: <defaults>
</compile_context>

<pallas_src>
import jax
import jax.numpy as jnp
from jax import lax
from jax.experimental import pallas as pl
from jax.experimental.pallas import tpu as pltpu

# ----- small, TPU-friendly problem sizes (module defaults: fea_dim=1024, size 'small' -> 64) -----
FEA_DIM = 128          # size[0]  (reduced from 1024 for a small synthetic run)
CMID    = 64           # size[1]  ('small')
NCLS    = 2            # n_classes
H = W   = 16
DILATIONS = (6, 12, 18, 24)
BN_EPS  = 1e-5


def _live_off_center_taps():
    """(conv_idx, tap_idx, dy, dx) for every off-center dilated tap whose window overlaps the
    valid HxW region.  Windows lying entirely in the zero padding contribute exactly 0 and are
    skipped at trace time; the four center taps are merged into one weight (leaky_relu(h) == h)."""
    taps = []
    for ci, d in enumerate(DILATIONS):
        for ky in range(3):
            for kx in range(3):
                if ky == 1 and kx == 1:
                    continue                                   # handled by the merged center weight
                if (ky != 1 and d >= H) or (kx != 1 and d >= W):
                    continue                                   # whole window is in the zero pad
                taps.append((ci, ky * 3 + kx, (ky - 1) * d, (kx - 1) * d))
    return tuple(taps)


OFF_TAPS = _live_off_center_taps()                             # 16 taps for H = W = 16
PADC = max([max(abs(dy), abs(dx)) for _, _, dy, dx in OFF_TAPS] + [1])   # 12 (not 24) for H=W=16
HP, WP = H + 2 * PADC, W + 2 * PADC


# --------------------------------------------------------------------------------------
# Fused kernel: conv_nic (3x3 conv + folded BN + ReLU) -> dilated CAM convolutions.
#   xpad_ref : (H+2, W+2, FEA_DIM)  bf16   zero-padded input, channels-last
#   w1_ref   : (9*FEA_DIM, CMID)    bf16   im2col conv_nic weight (tap-major along K)
#   scale/bias: (1, CMID)           f32    folded BatchNorm affine
#   wc_ref   : (NCLS, CMID)         bf16   sum of the 4 dilated-conv center-tap weights
#   woff_ref : (N_OFF, NCLS, CMID)  bf16   surviving off-center tap weights (OFF_TAPS order)
#   cam_ref  : (NCLS, H*W)          f32    output (lane-dense)
#   hpad_ref : (HP, WP, CMID)       bf16   VMEM scratch holding the zero-padded hidden features
# --------------------------------------------------------------------------------------
def nicwss_kernel(xpad_ref, w1_ref, scale_ref, bias_ref, wc_ref, woff_ref, cam_ref, hpad_ref):
    # ---- stage 1: conv_nic = im2col + one MXU matmul, then folded BN + ReLU ----
    cols = [xpad_ref[ky:ky + H, kx:kx + W, :].reshape(H * W, FEA_DIM)
            for ky in range(3) for kx in range(3)]
    xcol = jnp.concatenate(cols, axis=1)                                    # (H*W, 9*FEA_DIM) bf16
    pre = jnp.dot(xcol, w1_ref[...], preferred_element_type=jnp.float32)    # (H*W, CMID) f32
    h = jnp.maximum(pre * scale_ref[...] + bias_ref[...], 0.0)              # BN (eval) + ReLU
    hb = h.astype(jnp.bfloat16)                                             # Dropout: identity (eval)

    # ---- stage 2: sum of dilated 3x3 convs on h (leaky_relu(h) == h because h >= 0) ----
    # Zero-padded h lives in VMEM scratch; only the surviving taps are evaluated.
    hpad_ref[...] = jnp.zeros_like(hpad_ref)
    hpad_ref[PADC:PADC + H, PADC:PADC + W, :] = hb.reshape(H, W, CMID)

    # merged center tap of all four dilations (reads h directly, no slicing needed)
    cam = lax.dot_general(wc_ref[...], hb, (((1,), (1,)), ((), ())),
                          preferred_element_type=jnp.float32)               # (NCLS, H*W)
    # surviving off-center taps
    for t, (_, _, dy, dx) in enumerate(OFF_TAPS):
        oy, ox = PADC + dy, PADC + dx
        win = hpad_ref[oy:oy + H, ox:ox + W, :].reshape(H * W, CMID)        # (H*W, CMID) bf16
        cam = cam + lax.dot_general(woff_ref[t], win, (((1,), (1,)), ((), ())),
                                    preferred_element_type=jnp.float32)
    cam_ref[...] = cam                                                      # lane-dense store


_VMEM = pl.BlockSpec(memory_space=pltpu.MemorySpace.VMEM)


@jax.jit
def nicwss_forward(x_chw, w1_flat, scale, bias, wc, woff):
    """x_chw: (FEA_DIM, H, W) f32 -> cam: (1, NCLS, H, W) f32 (matches the PyTorch module)."""
    x = jnp.transpose(x_chw, (1, 2, 0))                                     # (H, W, C)
    xpad = jnp.pad(x, ((1, 1), (1, 1), (0, 0))).astype(jnp.bfloat16)        # SAME pad for 3x3

    cam_t = pl.pallas_call(
        nicwss_kernel,
        out_shape=jax.ShapeDtypeStruct((NCLS, H * W), jnp.float32),
        in_specs=[_VMEM] * 6,
        out_specs=_VMEM,
        scratch_shapes=[pltpu.VMEM((HP, WP, CMID), jnp.bfloat16)],
    )(xpad, w1_flat, scale, bias, wc, woff)

    return cam_t.reshape(NCLS, H, W)[None]                                  # (1, NCLS, H, W)


def init_params(key):
    """Deterministic synthetic parameters (shapes follow the module __init__)."""
    k1, k2, k3, k4, k5, k6 = jax.random.split(key, 6)
    # conv_nic Conv2d weight, stored per-tap as (9, Cin, Cout), tap = ky*3+kx
    w1 = jax.random.normal(k1, (9, FEA_DIM, CMID), jnp.float32) * 0.05
    # BatchNorm2d(CMID) eval-mode parameters
    gamma = jax.random.uniform(k2, (CMID,), jnp.float32, 0.5, 1.5)
    beta  = jax.random.normal(k3, (CMID,), jnp.float32) * 0.1
    rmean = jax.random.normal(k4, (CMID,), jnp.float32) * 0.1
    rvar  = jax.random.uniform(k5, (CMID,), jnp.float32, 0.5, 1.5)
    # conv2d_list weights: normal(0, 0.01) as in the module's __init__, per-tap (4, 9, Cin, Cout)
    w2 = jax.random.normal(k6, (4, 9, CMID, NCLS), jnp.float32) * 0.01
    return w1, gamma, beta, rmean, rvar, w2


def prepare_kernel_params(w1, gamma, beta, rmean, rvar, w2):
    """Fold BN, merge center taps, drop dead taps, transpose/cast weights for the kernel."""
    # conv_nic weight as one (9*FEA_DIM, CMID) im2col matrix; K ordered tap-major to match xcol.
    w1_flat = w1.reshape(9 * FEA_DIM, CMID).astype(jnp.bfloat16)
    # BatchNorm (eval) folded to scale/bias, applied to the f32 matmul accumulator.
    inv_std = gamma / jnp.sqrt(rvar + BN_EPS)
    scale = inv_std.reshape(1, CMID)
    bias  = (beta - rmean * inv_std).reshape(1, CMID)
    # CAM weights: merged center tap (exact because leaky_relu(h) == h) + live off-center taps,
    # transposed to (NCLS, CMID) so the kernel emits a lane-dense (NCLS, H*W) CAM.
    wc = jnp.sum(w2[:, 4], axis=0).T.astype(jnp.bfloat16)                   # (NCLS, CMID)
    woff = jnp.stack([w2[ci, tap].T for ci, tap, _, _ in OFF_TAPS],
                     axis=0).astype(jnp.bfloat16)                           # (N_OFF, NCLS, CMID)
    return w1_flat, scale, bias, wc, woff


def reference(x_chw, w1, gamma, beta, rmean, rvar, w2):
    """Pure-JAX f32 reference of the original module forward (for a correctness check)."""
    x = jnp.transpose(x_chw, (1, 2, 0))[None]                               # NHWC
    dn = ('NHWC', 'HWIO', 'NHWC')
    y = lax.conv_general_dilated(x, w1.reshape(3, 3, FEA_DIM, CMID), (1, 1), 'SAME',
                                 dimension_numbers=dn, precision=lax.Precision.HIGHEST)
    y = gamma * (y - rmean) / jnp.sqrt(rvar + BN_EPS) + beta
    h = jnp.maximum(y, 0.0)
    hl = jnp.where(h > 0, h, 0.01 * h)                                      # F.leaky_relu
    cam = None
    for ci, d in enumerate(DILATIONS):
        src = h if ci == 0 else hl
        c = lax.conv_general_dilated(src, w2[ci].reshape(3, 3, CMID, NCLS), (1, 1), 'SAME',
                                     rhs_dilation=(d, d), dimension_numbers=dn,
                                     precision=lax.Precision.HIGHEST)
        cam = c if cam is None else cam + c
    return jnp.transpose(cam[0], (2, 0, 1))[None]                           # (1, NCLS, H, W)


if __name__ == "__main__":
    key = jax.random.PRNGKey(0)
    pkey, xkey = jax.random.split(key)
    w1, gamma, beta, rmean, rvar, w2 = init_params(pkey)
    kparams = prepare_kernel_params(w1, gamma, beta, rmean, rvar, w2)
    # Module forward takes an un-batched feature map of shape (C, H, W).
    x = jax.random.normal(xkey, (FEA_DIM, H, W), jnp.float32)

    cam = jax.block_until_ready(nicwss_forward(x, *kparams))
    assert cam.shape == (1, NCLS, H, W), cam.shape

    ref = reference(x, w1, gamma, beta, rmean, rvar, w2)
    max_err = float(jnp.max(jnp.abs(cam - ref)))
    # bf16 MXU operands with f32 accumulation vs. f32 HIGHEST reference.
    assert max_err < 5e-2, f"max abs err {max_err}"
    print("KERNEL_OK")
</pallas_src>

<mosaic_0001>
module attributes {stable_mosaic.version = 11 : i64} {
  func.func @nicwss_kernel(%arg0: memref<18x18x128xbf16, #tpu.memory_space<vmem>>, %arg1: memref<1152x64xbf16, #tpu.memory_space<vmem>>, %arg2: memref<1x64xf32, #tpu.memory_space<vmem>>, %arg3: memref<1x64xf32, #tpu.memory_space<vmem>>, %arg4: memref<2x64xbf16, #tpu.memory_space<vmem>>, %arg5: memref<16x2x64xbf16, #tpu.memory_space<vmem>>, %arg6: memref<2x256xf32, #tpu.memory_space<vmem>>, %arg7: memref<40x40x64xbf16, #tpu.memory_space<vmem>>) attributes {dimension_semantics = [], scalar_prefetch = 0 : i64, scratch_operands = 1 : i64, tpu.core_type = #tpu.core_type<tc>} {
    %c0 = arith.constant 0 : index
    %c0_0 = arith.constant 0 : index
    %c0_1 = arith.constant 0 : index
    %0 = vector.load %arg0[%c0, %c0_0, %c0_1] : memref<18x18x128xbf16, #tpu.memory_space<vmem>>, vector<16x16x128xbf16>
    %1 = vector.shape_cast %0 : vector<16x16x128xbf16> to vector<256x128xbf16>
    %c0_2 = arith.constant 0 : index
    %c1 = arith.constant 1 : index
    %c0_3 = arith.constant 0 : index
    %2 = vector.load %arg0[%c0_2, %c1, %c0_3] : memref<18x18x128xbf16, #tpu.memory_space<vmem>>, vector<16x16x128xbf16>
    %3 = vector.shape_cast %2 : vector<16x16x128xbf16> to vector<256x128xbf16>
    %c0_4 = arith.constant 0 : index
    %c2 = arith.constant 2 : index
    %c0_5 = arith.constant 0 : index
    %4 = vector.load %arg0[%c0_4, %c2, %c0_5] : memref<18x18x128xbf16, #tpu.memory_space<vmem>>, vector<16x16x128xbf16>
    %5 = vector.shape_cast %4 : vector<16x16x128xbf16> to vector<256x128xbf16>
    %c1_6 = arith.constant 1 : index
    %c0_7 = arith.constant 0 : index
    %c0_8 = arith.constant 0 : index
    %6 = vector.load %arg0[%c1_6, %c0_7, %c0_8] : memref<18x18x128xbf16, #tpu.memory_space<vmem>>, vector<16x16x128xbf16>
    %7 = vector.shape_cast %6 : vector<16x16x128xbf16> to vector<256x128xbf16>
    %c1_9 = arith.constant 1 : index
    %c1_10 = arith.constant 1 : index
    %c0_11 = arith.constant 0 : index
    %8 = vector.load %arg0[%c1_9, %c1_10, %c0_11] : memref<18x18x128xbf16, #tpu.memory_space<vmem>>, vector<16x16x128xbf16>
    %9 = vector.shape_cast %8 : vector<16x16x128xbf16> to vector<256x128xbf16>
    %c1_12 = arith.constant 1 : index
    %c2_13 = arith.constant 2 : index
    %c0_14 = arith.constant 0 : index
    %10 = vector.load %arg0[%c1_12, %c2_13, %c0_14] : memref<18x18x128xbf16, #tpu.memory_space<vmem>>, vector<16x16x128xbf16>
    %11 = vector.shape_cast %10 : vector<16x16x128xbf16> to vector<256x128xbf16>
    %c2_15 = arith.constant 2 : index
    %c0_16 = arith.constant 0 : index
    %c0_17 = arith.constant 0 : index
    %12 = vector.load %arg0[%c2_15, %c0_16, %c0_17] : memref<18x18x128xbf16, #tpu.memory_space<vmem>>, vector<16x16x128xbf16>
    %13 = vector.shape_cast %12 : vector<16x16x128xbf16> to vector<256x128xbf16>
    %c2_18 = arith.constant 2 : index
    %c1_19 = arith.constant 1 : index
    %c0_20 = arith.constant 0 : index
    %14 = vector.load %arg0[%c2_18, %c1_19, %c0_20] : memref<18x18x128xbf16, #tpu.memory_space<vmem>>, vector<16x16x128xbf16>
    %15 = vector.shape_cast %14 : vector<16x16x128xbf16> to vector<256x128xbf16>
    %c2_21 = arith.constant 2 : index
    %c2_22 = arith.constant 2 : index
    %c0_23 = arith.constant 0 : index
    %16 = vector.load %arg0[%c2_21, %c2_22, %c0_23] : memref<18x18x128xbf16, #tpu.memory_space<vmem>>, vector<16x16x128xbf16>
    %17 = vector.shape_cast %16 : vector<16x16x128xbf16> to vector<256x128xbf16>
    %18 = tpu.concatenate %1, %3, %5, %7, %9, %11, %13, %15, %17 in 1 : vector<256x128xbf16>, vector<256x128xbf16>, vector<256x128xbf16>, vector<256x128xbf16>, vector<256x128xbf16>, vector<256x128xbf16>, vector<256x128xbf16>, vector<256x128xbf16>, vector<256x128xbf16> -> vector<256x1152xbf16>
    %c0_24 = arith.constant 0 : index
    %c0_25 = arith.constant 0 : index
    %19 = vector.load %arg1[%c0_24, %c0_25] : memref<1152x64xbf16, #tpu.memory_space<vmem>>, vector<1152x64xbf16>
    %cst = arith.constant dense<0.000000e+00> : vector<256x64xf32>
    %20 = tpu.matmul %18, %19, %cst {dimension_numbers = #tpu.dot_dimension_numbers<[1], [0], [0], [1], [0, 0, 1, 1], [], []>} : vector<256x1152xbf16>, vector<1152x64xbf16>, vector<256x64xf32> -> vector<256x64xf32>
    %c0_26 = arith.constant 0 : index
    %c0_27 = arith.constant 0 : index
    %21 = vector.load %arg2[%c0_26, %c0_27] : memref<1x64xf32, #tpu.memory_space<vmem>>, vector<1x64xf32>
    %22 = vector.broadcast %21 : vector<1x64xf32> to vector<256x64xf32>
    %23 = arith.mulf %20, %22 : vector<256x64xf32>
    %c0_28 = arith.constant 0 : index
    %c0_29 = arith.constant 0 : index
    %24 = vector.load %arg3[%c0_28, %c0_29] : memref<1x64xf32, #tpu.memory_space<vmem>>, vector<1x64xf32>
    %25 = vector.broadcast %24 : vector<1x64xf32> to vector<256x64xf32>
    %26 = arith.addf %23, %25 : vector<256x64xf32>
    %cst_30 = arith.constant 0.000000e+00 : f32
    %27 = vector.broadcast %cst_30 : f32 to vector<256x64xf32>
    %28 = arith.maximumf %26, %27 : vector<256x64xf32>
    %29 = arith.truncf %28 : vector<256x64xf32> to vector<256x64xbf16>
    %cst_31 = arith.constant 0.000000e+00 : bf16
    %30 = vector.broadcast %cst_31 : bf16 to vector<40x40x64xbf16>
    %c0_32 = arith.constant 0 : index
    %c0_33 = arith.constant 0 : index
    %c0_34 = arith.constant 0 : index
    %31 = vector.load %arg7[%c0_32, %c0_33, %c0_34] : memref<40x40x64xbf16, #tpu.memory_space<vmem>>, vector<40x40x64xbf16>
    tpu.vector_store %arg7[%c0_32, %c0_33, %c0_34], %30 {strides = array<i32>} : memref<40x40x64xbf16, #tpu.memory_space<vmem>>, vector<40x40x64xbf16>,
    %32 = vector.shape_cast %29 : vector<256x64xbf16> to vector<16x16x64xbf16>
    %c12 = arith.constant 12 : index
    %c12_35 = arith.constant 12 : index
    %c0_36 = arith.constant 0 : index
    %33 = vector.load %arg7[%c12, %c12_35, %c0_36] : memref<40x40x64xbf16, #tpu.memory_space<vmem>>, vector<16x16x64xbf16>
    tpu.vector_store %arg7[%c12, %c12_35, %c0_36], %32 {strides = array<i32>} : memref<40x40x64xbf16, #tpu.memory_space<vmem>>, vector<16x16x64xbf16>,
    %c0_37 = arith.constant 0 : index
    %c0_38 = arith.constant 0 : index
    %34 = vector.load %arg4[%c0_37, %c0_38] : memref<2x64xbf16, #tpu.memory_space<vmem>>, vector<2x64xbf16>
    %cst_39 = arith.constant dense<0.000000e+00> : vector<2x256xf32>
    %35 = tpu.matmul %34, %29, %cst_39 {dimension_numbers = #tpu.dot_dimension_numbers<[1], [1], [0], [0], [0, 0, 1, 0], [], []>} : vector<2x64xbf16>, vector<256x64xbf16>, vector<2x256xf32> -> vector<2x256xf32>
    %c6 = arith.constant 6 : index
    %c6_40 = arith.constant 6 : index
    %c0_41 = arith.constant 0 : index
    %36 = vector.load %arg7[%c6, %c6_40, %c0_41] : memref<40x40x64xbf16, #tpu.memory_space<vmem>>, vector<16x16x64xbf16>
    %37 = vector.shape_cast %36 : vector<16x16x64xbf16> to vector<256x64xbf16>
    %c0_42 = arith.constant 0 : index
    %c0_43 = arith.constant 0 : index
    %c0_44 = arith.constant 0 : index
    %38 = vector.load %arg5[%c0_42, %c0_43, %c0_44] : memref<16x2x64xbf16, #tpu.memory_space<vmem>>, vector<1x2x64xbf16>
    %39 = vector.shape_cast %38 : vector<1x2x64xbf16> to vector<2x64xbf16>
    %cst_45 = arith.constant dense<0.000000e+00> : vector<2x256xf32>
    %40 = tpu.matmul %39, %37, %cst_45 {dimension_numbers = #tpu.dot_dimension_numbers<[1], [1], [0], [0], [0, 0, 1, 0], [], []>} : vector<2x64xbf16>, vector<256x64xbf16>, vector<2x256xf32> -> vector<2x256xf32>
    %41 = arith.addf %35, %40 : vector<2x256xf32>
    %c6_46 = arith.constant 6 : index
    %c12_47 = arith.constant 12 : index
    %c0_48 = arith.constant 0 : index
    %42 = vector.load %arg7[%c6_46, %c12_47, %c0_48] : memref<40x40x64xbf16, #tpu.memory_space<vmem>>, vector<16x16x64xbf16>
    %43 = vector.shape_cast %42 : vector<16x16x64xbf16> to vector<256x64xbf16>
    %c1_49 = arith.constant 1 : index
    %c0_50 = arith.constant 0 : index
    %c0_51 = arith.constant 0 : index
    %44 = vector.load %arg5[%c1_49, %c0_50, %c0_51] : memref<16x2x64xbf16, #tpu.memory_space<vmem>>, vector<1x2x64xbf16>
    %45 = vector.shape_cast %44 : vector<1x2x64xbf16> to vector<2x64xbf16>
    %cst_52 = arith.constant dense<0.000000e+00> : vector<2x256xf32>
    %46 = tpu.matmul %45, %43, %cst_52 {dimension_numbers = #tpu.dot_dimension_numbers<[1], [1], [0], [0], [0, 0, 1, 0], [], []>} : vector<2x64xbf16>, vector<256x64xbf16>, vector<2x256xf32> -> vector<2x256xf32>
    %47 = arith.addf %41, %46 : vector<2x256xf32>
    %c6_53 = arith.constant 6 : index
    %c18 = arith.constant 18 : index
    %c0_54 = arith.constant 0 : index
    %48 = vector.load %arg7[%c6_53, %c18, %c0_54] : memref<40x40x64xbf16, #tpu.memory_space<vmem>>, vector<16x16x64xbf16>
    %49 = vector.shape_cast %48 : vector<16x16x64xbf16> to vector<256x64xbf16>
    %c2_55 = arith.constant 2 : index
    %c0_56 = arith.constant 0 : index
    %c0_57 = arith.constant 0 : index
    %50 = vector.load %arg5[%c2_55, %c0_56, %c0_57] : memref<16x2x64xbf16, #tpu.memory_space<vmem>>, vector<1x2x64xbf16>
    %51 = vector.shape_cast %50 : vector<1x2x64xbf16> to vector<2x64xbf16>
    %cst_58 = arith.constant dense<0.000000e+00> : vector<2x256xf32>
    %52 = tpu.matmul %51, %49, %cst_58 {dimension_numbers = #tpu.dot_dimension_numbers<[1], [1], [0], [0], [0, 0, 1, 0], [], []>} : vector<2x64xbf16>, vector<256x64xbf16>, vector<2x256xf32> -> vector<2x256xf32>
    %53 = arith.addf %47, %52 : vector<2x256xf32>
    %c12_59 = arith.constant 12 : index
    %c6_60 = arith.constant 6 : index
    %c0_61 = arith.constant 0 : index
    %54 = vector.load %arg7[%c12_59, %c6_60, %c0_61] : memref<40x40x64xbf16, #tpu.memory_space<vmem>>, vector<16x16x64xbf16>
    %55 = vector.shape_cast %54 : vector<16x16x64xbf16> to vector<256x64xbf16>
    %c3 = arith.constant 3 : index
    %c0_62 = arith.constant 0 : index
    %c0_63 = arith.constant 0 : index
    %56 = vector.load %arg5[%c3, %c0_62, %c0_63] : memref<16x2x64xbf16, #tpu.memory_space<vmem>>, vector<1x2x64xbf16>
    %57 = vector.shape_cast %56 : vector<1x2x64xbf16> to vector<2x64xbf16>
    %cst_64 = arith.constant dense<0.000000e+00> : vector<2x256xf32>
    %58 = tpu.matmul %57, %55, %cst_64 {dimension_numbers = #tpu.dot_dimension_numbers<[1], [1], [0], [0], [0, 0, 1, 0], [], []>} : vector<2x64xbf16>, vector<256x64xbf16>, vector<2x256xf32> -> vector<2x256xf32>
    %59 = arith.addf %53, %58 : vector<2x256xf32>
    %c12_65 = arith.constant 12 : index
    %c18_66 = arith.constant 18 : index
    %c0_67 = arith.constant 0 : index
    %60 = vector.load %arg7[%c12_65, %c18_66, %c0_67] : memref<40x40x64xbf16, #tpu.memory_space<vmem>>, vector<16x16x64xbf16>
    %61 = vector.shape_cast %60 : vector<16x16x64xbf16> to vector<256x64xbf16>
    %c4 = arith.constant 4 : index
    %c0_68 = arith.constant 0 : index
    %c0_69 = arith.constant 0 : index
    %62 = vector.load %arg5[%c4, %c0_68, %c0_69] : memref<16x2x64xbf16, #tpu.memory_space<vmem>>, vector<1x2x64xbf16>
    %63 = vector.shape_cast %62 : vector<1x2x64xbf16> to vector<2x64xbf16>
    %cst_70 = arith.constant dense<0.000000e+00> : vector<2x256xf32>
    %64 = tpu.matmul %63, %61, %cst_70 {dimension_numbers = #tpu.dot_dimension_numbers<[1], [1], [0], [0], [0, 0, 1, 0], [], []>} : vector<2x64xbf16>, vector<256x64xbf16>, vector<2x256xf32> -> vector<2x256xf32>
    %65 = arith.addf %59, %64 : vector<2x256xf32>
    %c18_71 = arith.constant 18 : index
    %c6_72 = arith.constant 6 : index
    %c0_73 = arith.constant 0 : index
    %66 = vector.load %arg7[%c18_71, %c6_72, %c0_73] : memref<40x40x64xbf16, #tpu.memory_space<vmem>>, vector<16x16x64xbf16>
    %67 = vector.shape_cast %66 : vector<16x16x64xbf16> to vector<256x64xbf16>
    %c5 = arith.constant 5 : index
    %c0_74 = arith.constant 0 : index
    %c0_75 = arith.constant 0 : index
    %68 = vector.load %arg5[%c5, %c0_74, %c0_75] : memref<16x2x64xbf16, #tpu.memory_space<vmem>>, vector<1x2x64xbf16>
    %69 = vector.shape_cast %68 : vector<1x2x64xbf16> to vector<2x64xbf16>
    %cst_76 = arith.constant dense<0.000000e+00> : vector<2x256xf32>
    %70 = tpu.matmul %69, %67, %cst_76 {dimension_numbers = #tpu.dot_dimension_numbers<[1], [1], [0], [0], [0, 0, 1, 0], [], []>} : vector<2x64xbf16>, vector<256x64xbf16>, vector<2x256xf32> -> vector<2x256xf32>
    %71 = arith.addf %65, %70 : vector<2x256xf32>
    %c18_77 = arith.constant 18 : index
    %c12_78 = arith.constant 12 : index
    %c0_79 = arith.constant 0 : index
    %72 = vector.load %arg7[%c18_77, %c12_78, %c0_79] : memref<40x40x64xbf16, #tpu.memory_space<vmem>>, vector<16x16x64xbf16>
    %73 = vector.shape_cast %72 : vector<16x16x64xbf16> to vector<256x64xbf16>
    %c6_80 = arith.constant 6 : index
    %c0_81 = arith.constant 0 : index
    %c0_82 = arith.constant 0 : index
    %74 = vector.load %arg5[%c6_80, %c0_81, %c0_82] : memref<16x2x64xbf16, #tpu.memory_space<vmem>>, vector<1x2x64xbf16>
    %75 = vector.shape_cast %74 : vector<1x2x64xbf16> to vector<2x64xbf16>
    %cst_83 = arith.constant dense<0.000000e+00> : vector<2x256xf32>
    %76 = tpu.matmul %75, %73, %cst_83 {dimension_numbers = #tpu.dot_dimension_numbers<[1], [1], [0], [0], [0, 0, 1, 0], [], []>} : vector<2x64xbf16>, vector<256x64xbf16>, vector<2x256xf32> -> vector<2x256xf32>
    %77 = arith.addf %71, %76 : vector<2x256xf32>
    %c18_84 = arith.constant 18 : index
    %c18_85 = arith.constant 18 : index
    %c0_86 = arith.constant 0 : index
    %78 = vector.load %arg7[%c18_84, %c18_85, %c0_86] : memref<40x40x64xbf16, #tpu.memory_space<vmem>>, vector<16x16x64xbf16>
    %79 = vector.shape_cast %78 : vector<16x16x64xbf16> to vector<256x64xbf16>
    %c7 = arith.constant 7 : index
    %c0_87 = arith.constant 0 : index
    %c0_88 = arith.constant 0 : index
    %80 = vector.load %arg5[%c7, %c0_87, %c0_88] : memref<16x2x64xbf16, #tpu.memory_space<vmem>>, vector<1x2x64xbf16>
    %81 = vector.shape_cast %80 : vector<1x2x64xbf16> to vector<2x64xbf16>
    %cst_89 = arith.constant dense<0.000000e+00> : vector<2x256xf32>
    %82 = tpu.matmul %81, %79, %cst_89 {dimension_numbers = #tpu.dot_dimension_numbers<[1], [1], [0], [0], [0, 0, 1, 0], [], []>} : vector<2x64xbf16>, vector<256x64xbf16>, vector<2x256xf32> -> vector<2x256xf32>
    %83 = arith.addf %77, %82 : vector<2x256xf32>
    %c0_90 = arith.constant 0 : index
    %c0_91 = arith.constant 0 : index
    %c0_92 = arith.constant 0 : index
    %84 = vector.load %arg7[%c0_90, %c0_91, %c0_92] : memref<40x40x64xbf16, #tpu.memory_space<vmem>>, vector<16x16x64xbf16>
    %85 = vector.shape_cast %84 : vector<16x16x64xbf16> to vector<256x64xbf16>
    %c8 = arith.constant 8 : index
    %c0_93 = arith.constant 0 : index
    %c0_94 = arith.constant 0 : index
    %86 = vector.load %arg5[%c8, %c0_93, %c0_94] : memref<16x2x64xbf16, #tpu.memory_space<vmem>>, vector<1x2x64xbf16>
    %87 = vector.shape_cast %86 : vector<1x2x64xbf16> to vector<2x64xbf16>
    %cst_95 = arith.constant dense<0.000000e+00> : vector<2x256xf32>
    %88 = tpu.matmul %87, %85, %cst_95 {dimension_numbers = #tpu.dot_dimension_numbers<[1], [1], [0], [0], [0, 0, 1, 0], [], []>} : vector<2x64xbf16>, vector<256x64xbf16>, vector<2x256xf32> -> vector<2x256xf32>
    %89 = arith.addf %83, %88 : vector<2x256xf32>
    %c0_96 = arith.constant 0 : index
    %c12_97 = arith.constant 12 : index
    %c0_98 = arith.constant 0 : index
    %90 = vector.load %arg7[%c0_96, %c12_97, %c0_98] : memref<40x40x64xbf16, #tpu.memory_space<vmem>>, vector<16x16x64xbf16>
    %91 = vector.shape_cast %90 : vector<16x16x64xbf16> to vector<256x64xbf16>
    %c9 = arith.constant 9 : index
    %c0_99 = arith.constant 0 : index
    %c0_100 = arith.constant 0 : index
    %92 = vector.load %arg5[%c9, %c0_99, %c0_100] : memref<16x2x64xbf16, #tpu.memory_space<vmem>>, vector<1x2x64xbf16>
    %93 = vector.shape_cast %92 : vector<1x2x64xbf16> to vector<2x64xbf16>
    %cst_101 = arith.constant dense<0.000000e+00> : vector<2x256xf32>
    %94 = tpu.matmul %93, %91, %cst_101 {dimension_numbers = #tpu.dot_dimension_numbers<[1], [1], [0], [0], [0, 0, 1, 0], [], []>} : vector<2x64xbf16>, vector<256x64xbf16>, vector<2x256xf32> -> vector<2x256xf32>
    %95 = arith.addf %89, %94 : vector<2x256xf32>
    %c0_102 = arith.constant 0 : index
    %c24 = arith.constant 24 : index
    %c0_103 = arith.constant 0 : index
    %96 = vector.load %arg7[%c0_102, %c24, %c0_103] : memref<40x40x64xbf16, #tpu.memory_space<vmem>>, vector<16x16x64xbf16>
    %97 = vector.shape_cast %96 : vector<16x16x64xbf16> to vector<256x64xbf16>
    %c10 = arith.constant 10 : index
    %c0_104 = arith.constant 0 : index
    %c0_105 = arith.constant 0 : index
    %98 = vector.load %arg5[%c10, %c0_104, %c0_105] : memref<16x2x64xbf16, #tpu.memory_space<vmem>>, vector<1x2x64xbf16>
    %99 = vector.shape_cast %98 : vector<1x2x64xbf16> to vector<2x64xbf16>
    %cst_106 = arith.constant dense<0.000000e+00> : vector<2x256xf32>
    %100 = tpu.matmul %99, %97, %cst_106 {dimension_numbers = #tpu.dot_dimension_numbers<[1], [1], [0], [0], [0, 0, 1, 0], [], []>} : vector<2x64xbf16>, vector<256x64xbf16>, vector<2x256xf32> -> vector<2x256xf32>
    %101 = arith.addf %95, %100 : vector<2x256xf32>
    %c12_107 = arith.constant 12 : index
    %c0_108 = arith.constant 0 : index
    %c0_109 = arith.constant 0 : index
    %102 = vector.load %arg7[%c12_107, %c0_108, %c0_109] : memref<40x40x64xbf16, #tpu.memory_space<vmem>>, vector<16x16x64xbf16>
    %103 = vector.shape_cast %102 : vector<16x16x64xbf16> to vector<256x64xbf16>
    %c11 = arith.constant 11 : index
    %c0_110 = arith.constant 0 : index
    %c0_111 = arith.constant 0 : index
    %104 = vector.load %arg5[%c11, %c0_110, %c0_111] : memref<16x2x64xbf16, #tpu.memory_space<vmem>>, vector<1x2x64xbf16>
    %105 = vector.shape_cast %104 : vector<1x2x64xbf16> to vector<2x64xbf16>
    %cst_112 = arith.constant dense<0.000000e+00> : vector<2x256xf32>
    %106 = tpu.matmul %105, %103, %cst_112 {dimension_numbers = #tpu.dot_dimension_numbers<[1], [1], [0], [0], [0, 0, 1, 0], [], []>} : vector<2x64xbf16>, vector<256x64xbf16>, vector<2x256xf32> -> vector<2x256xf32>
    %107 = arith.addf %101, %106 : vector<2x256xf32>
    %c12_113 = arith.constant 12 : index
    %c24_114 = arith.constant 24 : index
    %c0_115 = arith.constant 0 : index
    %108 = vector.load %arg7[%c12_113, %c24_114, %c0_115] : memref<40x40x64xbf16, #tpu.memory_space<vmem>>, vector<16x16x64xbf16>
    %109 = vector.shape_cast %108 : vector<16x16x64xbf16> to vector<256x64xbf16>
    %c12_116 = arith.constant 12 : index
    %c0_117 = arith.constant 0 : index
    %c0_118 = arith.constant 0 : index
    %110 = vector.load %arg5[%c12_116, %c0_117, %c0_118] : memref<16x2x64xbf16, #tpu.memory_space<vmem>>, vector<1x2x64xbf16>
    %111 = vector.shape_cast %110 : vector<1x2x64xbf16> to vector<2x64xbf16>
    %cst_119 = arith.constant dense<0.000000e+00> : vector<2x256xf32>
    %112 = tpu.matmul %111, %109, %cst_119 {dimension_numbers = #tpu.dot_dimension_numbers<[1], [1], [0], [0], [0, 0, 1, 0], [], []>} : vector<2x64xbf16>, vector<256x64xbf16>, vector<2x256xf32> -> vector<2x256xf32>
    %113 = arith.addf %107, %112 : vector<2x256xf32>
    %c24_120 = arith.constant 24 : index
    %c0_121 = arith.constant 0 : index
    %c0_122 = arith.constant 0 : index
    %114 = vector.load %arg7[%c24_120, %c0_121, %c0_122] : memref<40x40x64xbf16, #tpu.memory_space<vmem>>, vector<16x16x64xbf16>
    %115 = vector.shape_cast %114 : vector<16x16x64xbf16> to vector<256x64xbf16>
    %c13 = arith.constant 13 : index
    %c0_123 = arith.constant 0 : index
    %c0_124 = arith.constant 0 : index
    %116 = vector.load %arg5[%c13, %c0_123, %c0_124] : memref<16x2x64xbf16, #tpu.memory_space<vmem>>, vector<1x2x64xbf16>
    %117 = vector.shape_cast %116 : vector<1x2x64xbf16> to vector<2x64xbf16>
    %cst_125 = arith.constant dense<0.000000e+00> : vector<2x256xf32>
    %118 = tpu.matmul %117, %115, %cst_125 {dimension_numbers = #tpu.dot_dimension_numbers<[1], [1], [0], [0], [0, 0, 1, 0], [], []>} : vector<2x64xbf16>, vector<256x64xbf16>, vector<2x256xf32> -> vector<2x256xf32>
    %119 = arith.addf %113, %118 : vector<2x256xf32>
    %c24_126 = arith.constant 24 : index
    %c12_127 = arith.constant 12 : index
    %c0_128 = arith.constant 0 : index
    %120 = vector.load %arg7[%c24_126, %c12_127, %c0_128] : memref<40x40x64xbf16, #tpu.memory_space<vmem>>, vector<16x16x64xbf16>
    %121 = vector.shape_cast %120 : vector<16x16x64xbf16> to vector<256x64xbf16>
    %c14 = arith.constant 14 : index
    %c0_129 = arith.constant 0 : index
    %c0_130 = arith.constant 0 : index
    %122 = vector.load %arg5[%c14, %c0_129, %c0_130] : memref<16x2x64xbf16, #tpu.memory_space<vmem>>, vector<1x2x64xbf16>
    %123 = vector.shape_cast %122 : vector<1x2x64xbf16> to vector<2x64xbf16>
    %cst_131 = arith.constant dense<0.000000e+00> : vector<2x256xf32>
    %124 = tpu.matmul %123, %121, %cst_131 {dimension_numbers = #tpu.dot_dimension_numbers<[1], [1], [0], [0], [0, 0, 1, 0], [], []>} : vector<2x64xbf16>, vector<256x64xbf16>, vector<2x256xf32> -> vector<2x256xf32>
    %125 = arith.addf %119, %124 : vector<2x256xf32>
    %c24_132 = arith.constant 24 : index
    %c24_133 = arith.constant 24 : index
    %c0_134 = arith.constant 0 : index
    %126 = vector.load %arg7[%c24_132, %c24_133, %c0_134] : memref<40x40x64xbf16, #tpu.memory_space<vmem>>, vector<16x16x64xbf16>
    %127 = vector.shape_cast %126 : vector<16x16x64xbf16> to vector<256x64xbf16>
    %c15 = arith.constant 15 : index
    %c0_135 = arith.constant 0 : index
    %c0_136 = arith.constant 0 : index
    %128 = vector.load %arg5[%c15, %c0_135, %c0_136] : memref<16x2x64xbf16, #tpu.memory_space<vmem>>, vector<1x2x64xbf16>
    %129 = vector.shape_cast %128 : vector<1x2x64xbf16> to vector<2x64xbf16>
    %cst_137 = arith.constant dense<0.000000e+00> : vector<2x256xf32>
    %130 = tpu.matmul %129, %127, %cst_137 {dimension_numbers = #tpu.dot_dimension_numbers<[1], [1], [0], [0], [0, 0, 1, 0], [], []>} : vector<2x64xbf16>, vector<256x64xbf16>, vector<2x256xf32> -> vector<2x256xf32>
    %131 = arith.addf %125, %130 : vector<2x256xf32>
    %c0_138 = arith.constant 0 : index
    %c0_139 = arith.constant 0 : index
    %132 = vector.load %arg6[%c0_138, %c0_139] : memref<2x256xf32, #tpu.memory_space<vmem>>, vector<2x256xf32>
    tpu.vector_store %arg6[%c0_138, %c0_139], %131 {strides = array<i32>} : memref<2x256xf32, #tpu.memory_space<vmem>>, vector<2x256xf32>,
    return
  }
}

</mosaic_0001>

<bundles_post_ra>
// kernel: nicwss_forward.1
= control target key start
LH: loop header
LB: loop body
LE: loop exit
PB: predicated region body
PF: predicated region fallthrough
CT: control target
= control target key end

     0   :  { %vm72_vm0 = vsmask.f32 3328  ;;  %vm73_vm1 = vsmask.f32 7440  ;;  %vm523_vm2 = vcmask 1042432   ;;  %vm524_vm3 = vcmask 1046532   ;;  %s16172_s1 = inlined_call_operand.vmem [shape: bf16[1152,64], index: 1, kind: input, shape index: {}]   ;;  %s16173_s0 = inlined_call_operand.vmem [shape: bf16[18,18,128], index: 0, kind: input, shape index: {}]   ;;  %s16174_s5 = inlined_call_operand.vmem [shape: bf16[16,2,64], index: 5, kind: input, shape index: {}]   ;;  %s16175_s2 = inlined_call_operand.vmem [shape: f32[1,64], index: 2, kind: input, shape index: {}]   ;;  %s16176_s3 = inlined_call_operand.vmem [shape: f32[1,64], index: 3, kind: input, shape index: {}]   ;;  %s16177_s4 = inlined_call_operand.vmem [shape: bf16[2,64], index: 4, kind: input, shape index: {}]   ;;  %s16178_s6 = inlined_call_operand.vmem [shape: f32[2,256], index: 6, kind: output, shape index: {}]  }
   0x1   :  { %v11231_v0 = vld [vmem:[%s16172_s1 + $0x40] sm:$0xff]   ;;  %v11233_v2 = vld [vmem:[%s16172_s1 + $0x48] sm:$0xff]   ;;  %v11235_v4 = vld [vmem:[%s16172_s1 + $0x50] sm:$0xff]   ;;  %v16209_v26 = vmov 0  ;;  %vm3987_vm6 = vcmask 519168   ;;  %vm4548_vm7 = vcmask 1040384  }
   0x2   :  { %v11232_v1 = vld [vmem:[%s16172_s1] sm:$0xff]   ;;  %10206 = vmatprep.subr.bf16.mxu0 %v11231_v0  ;;  %v11234_v3 = vld [vmem:[%s16172_s1 + $0x8] sm:$0xff]   ;;  %v11236_v5 = vld [vmem:[%s16172_s1 + $0x10] sm:$0xff]   ;;  %vm4549_vm8 = vcmask 1044484   ;;  %vm4712_vm9 = vcmask 523264   ;;  %vm4268_vm11 = vcmask 1041408  }
   0x3   :  { %10207 = vmatpush3.bf16.msra.mxu0 %v11232_v1  ;;  %v11237_v6 = vld [vmem:[%s16172_s1 + $0x58] sm:$0xff]   ;;  %v11239_v8 = vld [vmem:[%s16172_s1 + $0x60] sm:$0xff]   ;;  %v11241_v10 = vld [vmem:[%s16172_s1 + $0x68] sm:$0xff]   ;;  %vm4269_vm12 = vcmask 1045508   ;;  %vm4400_vm13 = vcmask 519170   ;;  %vm4403_vm14 = vcmask 517120  }
   0x4   :  { %10208 = vmatprep.subr.bf16.mxu0 %v11233_v2  ;;  %v11238_v7 = vld [vmem:[%s16172_s1 + $0x18] sm:$0xff]   ;;  %v11240_v9 = vld [vmem:[%s16172_s1 + $0x20] sm:$0xff]   ;;  %v56_v13 = vld [vmem:[%s16173_s0 + $0x8] sm:$0x1] }
   0x5   :  { %v11563_v11 = vld [vmem:[%s16173_s0] sm:$0xf]  ;;  %v11568_v12 = vld [vmem:[%s16173_s0 + $0x4] sm:$0xf]  ;;  %v11242_v18 = vld [vmem:[%s16172_s1 + $0x28] sm:$0xff]   ;;  %v95_v19 = vshll.u32 %v56_v13, 16 }
   0x6   :  { %v76_v14 = vshrl.u32 %v11563_v11, 16  ;;  %v79_v15 = vshll.u32 %v11563_v11, 16  ;;  %v85_v16 = vshll.u32 %v11568_v12, 16  ;;  %v89_v17 = vshrl.u32 %v11568_v12, 16  ;;  %vm11583_vm4 = vmor %vm523_vm2, %vm524_vm3  ;;  %v11243_v27 = vld [vmem:[%s16172_s1 + $0x70] sm:$0xff]   ;;  %v11245_v47 = vld [vmem:[%s16172_s1 + $0x78] sm:$0xff]  }
   0x7   :  { %10209 = vmatpush3.bf16.msra.mxu0 %v11234_v3  ;;  %v528_v20 = vrot.slane %v11568_v12, 5  ;;  %v531_v21 = vrot.slane %v56_v13, 5  ;;  %v16210_v26 = vsel %vm11583_vm4, 4294967295, %v16209_v26  ;;  %v97_v28 = vrot.slane %v95_v19, 5  ;;  %v11595_v32 = vld [vmem:[%s16173_s0 + $0xc] sm:$0xf]  ;;  %vm11610_vm5 = vmor %vm72_vm0, %vm73_vm1 }
   0x8   :  { %10210 = vmatprep.subr.bf16.mxu0 %v11235_v4  ;;  %v78_v22 = vrot.slane %v76_v14, 4  ;;  %v81_v23 = vrot.slane %v79_v15, 5  ;;  %v87_v24 = vrot.slane %v85_v16, 5  ;;  %v91_v25 = vrot.slane %v89_v17, 4  ;;  %16211 = vst [vmem:[#allocation3_spill] sm:$0xff] %v16210_v26  ;;  %v11244_v35 = vld [vmem:[%s16172_s1 + $0x30] sm:$0xff]   ;;  %vm14457_vm10 = vmor %vm4548_vm7, %vm4549_vm8 }
   0x9   :  { %v530_v29 = vrot.slane %v528_v20, 4  ;;  %v11600_v33 = vld [vmem:[%s16173_s0 + $0x10] sm:$0xf]  ;;  %v57_v34 = vld [vmem:[%s16173_s0 + $0x14] sm:$0x1]  ;;  %v100_v38 = vshrl.u32 %v11595_v32, 16  ;;  %v9475_v2 = vcombine.low %v11563_v11, %v11568_v12  ;;  %vm14609_vm15 = vmor %vm4268_vm11, %vm4269_vm12 }
   0xa   :  { %v82_v30 = vor.u32 %v81_v23, %v78_v22  ;;  %v92_v31 = vor.u32 %v91_v25, %v87_v24  ;;  %v103_v39 = vshll.u32 %v11595_v32, 16  ;;  %v109_v40 = vshll.u32 %v11600_v33, 16  ;;  %v11624_v41 = vld [vmem:[%s16173_s0 + $0x18] sm:$0xf]  ;;  %v11630_v46 = vld [vmem:[%s16173_s0 + $0x1c] sm:$0xf] }
   0xb   :  { %10211 = vmatpush3.bf16.msra.mxu0 %v11236_v5  ;;  %v11616_v37 = vsel %vm11583_vm4, %v530_v29, %v531_v21  ;;  %v113_v44 = vshrl.u32 %v11600_v33, 16  ;;  %v119_v45 = vshll.u32 %v57_v34, 16  ;;  %v102_v48 = vrot.slane %v100_v38, 4  ;;  %v58_v51 = vld [vmem:[%s16173_s0 + $0x20] sm:$0x1]  ;;  %v11246_v60 = vld [vmem:[%s16172_s1 + $0x38] sm:$0xff]  }
   0xc   :  { %10212 = vmatprep.subr.bf16.mxu0 %v11237_v6  ;;  %v83_v42 = vrot.slane %v82_v30, 4  ;;  %v93_v43 = vrot.slane %v92_v31, 4  ;;  %v105_v49 = vrot.slane %v103_v39, 5  ;;  %v111_v50 = vrot.slane %v109_v40, 5  ;;  %v11652_v1 = vld [vmem:[%s16173_s0 + $0x24] sm:$0xf] }
   0xd   :  { %v115_v54 = vrot.slane %v113_v44, 4  ;;  %v121_v55 = vrot.slane %v119_v45, 5  ;;  %v124_v58 = vshrl.u32 %v11624_v41, 16  ;;  %v127_v59 = vshll.u32 %v11624_v41, 16  ;;  %v11248_v3 = vld [vmem:[%s16172_s1 + $0xc0] sm:$0xff]   ;;  %v11252_v29 = vld [vmem:[%s16172_s1 + $0xc8] sm:$0xff]  }
   0xe   :  { %v88_v52 = vsel %vm11610_vm5, %v83_v42, %v87_v24  ;;  %v98_v53 = vsel %vm11610_vm5, %v93_v43, %v97_v28  ;;  %v106_v57 = vor.u32 %v105_v49, %v102_v48  ;;  %v133_v62 = vshll.u32 %v11630_v46, 16  ;;  %v59_v16 = vld [vmem:[%s16173_s0 + $0x2c] sm:$0x1]  ;;  %v11677_v19 = vld [vmem:[%s16173_s0 + $0x30] sm:$0xf] }
   0xf   :  { %10213 = vmatpush3.bf16.msra.mxu0 %v11238_v7  ;;  %v9491_v56 = vcombine.low %v88_v52, %v98_v53  ;;  %v116_v61 = vor.u32 %v115_v54, %v111_v50  ;;  %v137_v63 = vshrl.u32 %v11630_v46, 16  ;;  %v143_v0 = vshll.u32 %v58_v51, 16  ;;  %v11662_v7 = vld [vmem:[%s16173_s0 + $0x28] sm:$0xf]  ;;  %v11686_v25 = vld [vmem:[%s16173_s0 + $0x34] sm:$0xf] }
  0x10   :  { %10214 = vmatprep.subr.bf16.mxu0 %v11239_v8  ;;  %v107_v4 = vrot.slane %v106_v57, 4  ;;  %v126_v5 = vrot.slane %v124_v58, 4  ;;  %v129_v6 = vrot.slane %v127_v59, 5  ;;  %v11249_v8 = vld [vmem:[%s16172_s1 + $0x80] sm:$0xff]   ;;  %v148_v17 = vshrl.u32 %v11652_v1, 16  ;;  %v11253_v42 = vld [vmem:[%s16172_s1 + $0x88] sm:$0xff]  }
  0x11   :  { %3088 = vmatprep.mubr.bf16.mxu0 %v9491_v56  ;;  %v139_v13 = vrot.slane %v137_v63, 4  ;;  %v145_v11 = vrot.slane %v143_v0, 5  ;;  %v157_v23 = vshll.u32 %v11662_v7, 16  ;;  %v161_v24 = vshrl.u32 %v11662_v7, 16  ;;  %v60_v51 = vld [vmem:[%s16173_s0 + $0x38] sm:$0x1] }
  0x12   :  { %v112_v14 = vsel %vm11610_vm5, %v107_v4, %v111_v50  ;;  %v130_v15 = vor.u32 %v129_v6, %v126_v5  ;;  %v150_v30 = vrot.slane %v148_v17, 4  ;;  %v167_v39 = vshll.u32 %v59_v16, 16  ;;  %v11256_v50 = vld [vmem:[%s16172_s1 + $0xd0] sm:$0xff]   ;;  %v11714_v54 = vld [vmem:[%s16173_s0 + $0x3c] sm:$0xf] }
  0x13   :  { %10215 = vmatpush3.bf16.msra.mxu0 %v11240_v9  ;;  %v117_v9 = vrot.slane %v116_v61, 4  ;;  %v163_v38 = vrot.slane %v161_v24, 4  ;;  %v172_v43 = vshrl.u32 %v11677_v19, 16  ;;  %v175_v44 = vshll.u32 %v11677_v19, 16  ;;  %v11257_v53 = vld [vmem:[%s16172_s1 + $0x90] sm:$0xff]   ;;  %v11260_v58 = vld [vmem:[%s16172_s1 + $0xd8] sm:$0xff]  }
  0x14   :  { %10216 = vmatprep.subr.bf16.mxu0 %v11241_v10  ;;  %v135_v10 = vrot.slane %v133_v62, 5  ;;  %v131_v28 = vrot.slane %v130_v15, 4  ;;  %v181_v49 = vshll.u32 %v11686_v25, 16  ;;  %v185_v52 = vshrl.u32 %v11686_v25, 16  ;;  %v11721_v57 = vld [vmem:[%s16173_s0 + $0x40] sm:$0xf] }
  0x15   :  { %v122_v21 = vsel %vm11610_vm5, %v117_v9, %v121_v55  ;;  %v9476_v55 = vcombine.low %v11595_v32, %v11600_v33  ;;  %v169_v56 = vrot.slane %v167_v39, 5  ;;  %v177_v61 = vrot.slane %v175_v44, 5  ;;  %v11261_v6 = vld [vmem:[%s16172_s1 + $0x98] sm:$0xff]   ;;  %v11265_v15 = vld [vmem:[%s16172_s1 + $0xa0] sm:$0xff]   ;;  %v11269_v39 = vld [vmem:[%s16172_s1 + $0xa8] sm:$0xff]  }
  0x16   :  { %v140_v22 = vor.u32 %v139_v13, %v135_v10  ;;  %v136_v40 = vsel %vm11610_vm5, %v131_v28, %v135_v10  ;;  %v183_v0 = vrot.slane %v181_v49, 5  ;;  %v191_v32 = vshll.u32 %v60_v51, 16  ;;  %v11783_v51 = vld [vmem:[%s16173_s0 + $0x54] sm:$0xf] }
  0x17   :  { %10217 = vmatpush3.bf16.msra.mxu0 %v11242_v18  ;;  %v151_v18 = vshll.u32 %v11652_v1, 16  ;;  %v196_v33 = vshrl.u32 %v11714_v54, 16  ;;  %v199_v4 = vshll.u32 %v11714_v54, 16  ;;  %v205_v5 = vshll.u32 %v11721_v57, 16 }
  0x18   :  { %10218 = vmatprep.subr.bf16.mxu0 %v11243_v27  ;;  %v9492_v27 = vcombine.low %v112_v14, %v122_v21  ;;  %v141_v34 = vrot.slane %v140_v22, 4  ;;  %v209_v13 = vshrl.u32 %v11721_v57, 16  ;;  %v11743_v14 = vld [vmem:[%s16173_s0 + $0x48] sm:$0xf]  ;;  %v9477_v16 = vcombine.low %v11624_v41, %v11630_v46  ;;  %v11756_v22 = vld [vmem:[%s16173_s0 + $0x4c] sm:$0xf] }
  0x19   :  { %v153_v31 = vrot.slane %v151_v18, 5  ;;  %v193_v17 = vrot.slane %v191_v32, 5  ;;  %v61_v18 = vld [vmem:[%s16173_s0 + $0x44] sm:$0x1]  ;;  %v198_v21 = vrot.slane %v196_v33, 4  ;;  %v207_v28 = vrot.slane %v205_v5, 5 }
  0x1a   :  { %v146_v45 = vsel %vm11610_vm5, %v141_v34, %v145_v11  ;;  %v11264_v11 = vld [vmem:[%s16172_s1 + $0xe0] sm:$0xff]   ;;  %v11268_v41 = vld [vmem:[%s16172_s1 + $0xe8] sm:$0xff]   ;;  %v215_v34 = vshll.u32 %v61_v18, 16 }
  0x1b   :  { %10219 = vmatpush3.bf16.msra.mxu0 %v11244_v35  ;;  %v159_v35 = vrot.slane %v157_v23, 5  ;;  %v9493_v59 = vcombine.low %v136_v40, %v146_v45  ;;  %v11272_v45 = vld [vmem:[%s16172_s1 + $0xf0] sm:$0xff]  }
  0x1c   :  { %10220 = vmatprep.subr.bf16.mxu0 %v11245_v47  ;;  %v154_v47 = vor.u32 %v153_v31, %v150_v30  ;;  %v220_v30 = vshrl.u32 %v11743_v14, 16  ;;  %v223_v31 = vshll.u32 %v11743_v14, 16 }
  0x1d   :  { %v164_v48 = vor.u32 %v163_v38, %v159_v35  ;;  %v233_v38 = vshrl.u32 %v11756_v22, 16 }
  0x1e   :  { %v155_v62 = vrot.slane %v154_v47, 4  ;;  %v62_v47 = vld [vmem:[%s16173_s0 + $0x50] sm:$0x1]  ;;  %v222_v49 = vrot.slane %v220_v30, 4 }
  0x1f   :  { %10221 = vmatpush3.bf16.msra.mxu0 %v11246_v60  ;;  %v174_v60 = vrot.slane %v172_v43, 4  ;;  %v165_v63 = vrot.slane %v164_v48, 4  ;;  %v9478_v48 = vcombine.low %v11652_v1, %v11662_v7  ;;  %v11791_v1 = vld [vmem:[%s16173_s0 + $0x58] sm:$0xf] }
  0x20   :  { %10318 = vmatprep.subr.bf16.mxu0 %v11248_v3  ;;  %v11276_v7 = vld [vmem:[%s16172_s1 + $0xf8] sm:$0xff]   ;;  %v253_v32 = vshll.u32 %v11791_v1, 16  ;;  %v257_v33 = vshrl.u32 %v11791_v1, 16 }
  0x21   :  { %v178_v3 = vor.u32 %v177_v61, %v174_v60  ;;  %v170_v9 = vsel %vm11610_vm5, %v165_v63, %v169_v56  ;;  %v11273_v56 = vld [vmem:[%s16172_s1 + $0xb0] sm:$0xff]   ;;  %v217_v60 = vrot.slane %v215_v34, 5  ;;  %v244_v63 = vshrl.u32 %v11783_v51, 16 }
  0x22   :  { %3089 = vmatmul.mubr.bf16.vlgmr.msra.gmra.mrb[0].mxu0 %v9475_v2  ;;  %v187_v2 = vrot.slane %v185_v52, 4  ;;  %v255_v18 = vrot.slane %v253_v32, 5  ;;  %v9480_v34 = vcombine.low %v11714_v54, %v11721_v57  ;;  %v11851_v54 = vld [vmem:[%s16173_s0 + $0x70] sm:$0xf] }
  0x23   :  { %10319 = vmatpush3.bf16.msra.mxu0 %v11249_v8  ;;  %3096 = vmatprep.mubr.bf16.mxu0 %v9492_v27  ;;  %v160_v8 = vsel %vm11610_vm5, %v155_v62, %v159_v35  ;;  %v179_v24 = vrot.slane %v178_v3, 4  ;;  %v201_v27 = vrot.slane %v199_v4, 5  ;;  %v229_v35 = vshll.u32 %v11756_v22, 16  ;;  %v11277_v3 = vld [vmem:[%s16172_s1 + $0xb8] sm:$0xff]  }
  0x24   :  { %10320 = vmatprep.subr.bf16.mxu0 %v11252_v29  ;;  %v188_v10 = vor.u32 %v187_v2, %v183_v0  ;;  %v9494_v23 = vcombine.low %v160_v8, %v170_v9  ;;  %v211_v29 = vrot.slane %v209_v13, 4  ;;  %v239_v62 = vshll.u32 %v62_v47, 16  ;;  %v11815_v9 = vld [vmem:[%s16173_s0 + $0x5c] sm:$0x1] }
  0x25   :  { %v184_v40 = vsel %vm11610_vm5, %v179_v24, %v183_v0  ;;  %v202_v43 = vor.u32 %v201_v27, %v198_v21  ;;  %v247_v0 = vshll.u32 %v11783_v51, 16  ;;  %v9479_v8 = vcombine.low %v11677_v19, %v11686_v25  ;;  %v11825_v19 = vld [vmem:[%s16173_s0 + $0x64] sm:$0xf] }
  0x26   :  { %v189_v46 = vrot.slane %v188_v10, 4  ;;  %v212_v44 = vor.u32 %v211_v29, %v207_v28  ;;  %v241_v13 = vrot.slane %v239_v62, 5  ;;  %v259_v21 = vrot.slane %v257_v33, 4  ;;  %v11877_v33 = vld [vmem:[%s16173_s0 + $0x74] sm:$0x1] }
  0x27   :  { %10321 = vmatpush3.bf16.msra.mxu0 %v11253_v42  ;;  %v263_v27 = vshll.u32 %v11815_v9, 16  ;;  %v277_v30 = vshll.u32 %v11825_v19, 16 }
  0x28   :  { %10322 = vmatprep.subr.bf16.mxu0 %v11256_v50  ;;  %v194_v42 = vsel %vm11610_vm5, %v189_v46, %v193_v17  ;;  %v225_v50 = vrot.slane %v223_v31, 5  ;;  %v281_v31 = vshrl.u32 %v11825_v19, 16 }
  0x29   :  { %v9495_v52 = vcombine.low %v184_v40, %v194_v42  ;;  %v11841_v42 = vld [vmem:[%s16173_s0 + $0x68] sm:$0x1] }
  0x2a   :  { %3097 = vmatmul.mubr.bf16.gmra.mrb[4].mxu0 %v9476_v55  ;;  %v235_v55 = vrot.slane %v233_v38, 4  ;;  %v226_v61 = vor.u32 %v225_v50, %v222_v49  ;;  %v265_v38 = vrot.slane %v263_v27, 5  ;;  %v283_v47 = vrot.slane %v281_v31, 4 }
  0x2b   :  { %3104 = vmatprep.mubr.bf16.mxu0 %v9493_v59  ;;  %10323 = vmatpush3.bf16.msra.mxu0 %v11257_v53  ;;  %v231_v53 = vrot.slane %v229_v35, 5  ;;  %v213_v59 = vrot.slane %v212_v44, 4  ;;  %v287_v57 = vshll.u32 %v11841_v42, 16 }
  0x2c   :  { %10324 = vmatprep.subr.bf16.mxu0 %v11260_v58  ;;  %v203_v58 = vrot.slane %v202_v43, 4  ;;  %v227_v10 = vrot.slane %v226_v61, 4 }
  0x2d   :  { %v236_v2 = vor.u32 %v235_v55, %v231_v53  ;;  %v218_v5 = vsel %vm11610_vm5, %v213_v59, %v217_v60  ;;  %v305_v59 = vshrl.u32 %v11851_v54, 16  ;;  %v9481_v60 = vcombine.low %v11743_v14, %v11756_v22 }
  0x2e   :  { %v208_v4 = vsel %vm11610_vm5, %v203_v58, %v207_v28  ;;  %v232_v25 = vsel %vm11610_vm5, %v227_v10, %v231_v53  ;;  %v301_v58 = vshll.u32 %v11851_v54, 16  ;;  %v311_v10 = vshll.u32 %v11877_v33, 16 }
  0x2f   :  { %10325 = vmatpush3.bf16.msra.mxu0 %v11261_v6  ;;  %v11280_v6 = vld [vmem:[%s16172_s1 + $0x140] sm:$0xff]   ;;  %v237_v17 = vrot.slane %v236_v2, 4  ;;  %v11872_v2 = vld [vmem:[%s16173_s0 + $0x7c] sm:$0xf] }
  0x30   :  { %10326 = vmatprep.subr.bf16.mxu0 %v11264_v11  ;;  %v246_v11 = vrot.slane %v244_v63, 4  ;;  %v289_v63 = vrot.slane %v287_v57, 5  ;;  %v303_v22 = vrot.slane %v301_v58, 5 }
  0x31   :  { %v242_v28 = vsel %vm11610_vm5, %v237_v17, %v241_v13  ;;  %v11891_v17 = vld [vmem:[%s16173_s0 + $0x80] sm:$0x1] }
  0x32   :  { %3105 = vmatmul.mubr.bf16.gmra.mrb[8].mxu0 %v9477_v16  ;;  %v9496_v16 = vcombine.low %v208_v4, %v218_v5  ;;  %v9497_v35 = vcombine.low %v232_v25, %v242_v28  ;;  %v11896_v25 = vld [vmem:[%s16173_s0 + $0x84] sm:$0xf] }
  0x33   :  { %3112 = vmatprep.mubr.bf16.mxu0 %v9494_v23  ;;  %10327 = vmatpush3.bf16.msra.mxu0 %v11265_v15  ;;  %v249_v15 = vrot.slane %v247_v0, 5  ;;  %v11820_v23 = vld [vmem:[%s16173_s0 + $0x60] sm:$0xf] }
  0x34   :  { %10328 = vmatprep.subr.bf16.mxu0 %v11268_v41  ;;  %v260_v41 = vor.u32 %v259_v21, %v255_v18  ;;  %v268_v46 = vshrl.u32 %v11820_v23, 16  ;;  %v271_v29 = vshll.u32 %v11820_v23, 16 }
  0x35   :  { %v250_v24 = vor.u32 %v249_v15, %v246_v11 }
  0x36   :  { %v261_v40 = vrot.slane %v260_v41, 4  ;;  %v270_v43 = vrot.slane %v268_v46, 4  ;;  %v273_v44 = vrot.slane %v271_v29, 5  ;;  %v313_v46 = vrot.slane %v311_v10, 5 }
  0x37   :  { %10329 = vmatpush3.bf16.msra.mxu0 %v11269_v39  ;;  %v251_v39 = vrot.slane %v250_v24, 4  ;;  %v9482_v24 = vcombine.low %v11783_v51, %v11791_v1  ;;  %v335_v29 = vshll.u32 %v11891_v17, 16  ;;  %v459_v51 = vld [vmem:[%s16173_s0] sm:$0xe] }
  0x38   :  { %10330 = vmatprep.subr.bf16.mxu0 %v11272_v45  ;;  %v279_v45 = vrot.slane %v277_v30, 5  ;;  %v266_v50 = vsel %vm11610_vm5, %v261_v40, %v265_v38  ;;  %v11904_v30 = vld [vmem:[%s16173_s0 + $0x88] sm:$0xf]  ;;  %v343_v38 = vshll.u32 %v11896_v25, 16  ;;  %v9299_v57 = vrot.slane %v459_v51, 9 }
  0x39   :  { %v256_v49 = vsel %vm11610_vm5, %v251_v39, %v255_v18  ;;  %v349_v40 = vshll.u32 %v11904_v30, 16  ;;  %v11980_v51 = vld [vmem:[%s16173_s0 + $0xa4] sm:$0x1] }
  0x3a   :  { %3113 = vmatmul.mubr.bf16.gmra.mrb[12].mxu0 %v9478_v48  ;;  %v11846_v48 = vld [vmem:[%s16173_s0 + $0x6c] sm:$0xf]  ;;  %v284_v55 = vor.u32 %v283_v47, %v279_v45  ;;  %v9498_v61 = vcombine.low %v256_v49, %v266_v50  ;;  %v337_v50 = vrot.slane %v335_v29, 5 }
  0x3b   :  { %3120 = vmatprep.mubr.bf16.mxu0 %v9495_v52  ;;  %10331 = vmatpush3.bf16.msra.mxu0 %v11273_v56  ;;  %v274_v52 = vor.u32 %v273_v44, %v270_v43  ;;  %v292_v53 = vshrl.u32 %v11846_v48, 16  ;;  %v295_v56 = vshll.u32 %v11846_v48, 16  ;;  %v353_v43 = vshrl.u32 %v11904_v30, 16 }
  0x3c   :  { %10332 = vmatprep.subr.bf16.mxu0 %v11276_v7  ;;  %v11867_v7 = vld [vmem:[%s16173_s0 + $0x78] sm:$0xf]  ;;  %v285_v32 = vrot.slane %v284_v55, 4  ;;  %v9483_v44 = vcombine.low %v11820_v23, %v11825_v19  ;;  %v351_v58 = vrot.slane %v349_v40, 5  ;;  %v11928_v23 = vsel %vm11583_vm4, %v9299_v57, %v528_v20 }
  0x3d   :  { %v275_v62 = vrot.slane %v274_v52, 4  ;;  %v294_v0 = vrot.slane %v292_v53, 4  ;;  %v297_v14 = vrot.slane %v295_v56, 5  ;;  %v316_v4 = vshrl.u32 %v11867_v7, 16  ;;  %v11922_v56 = vld [vmem:[%s16173_s0 + $0x8c] sm:$0x1] }
  0x3e   :  { %v319_v5 = vshll.u32 %v11867_v7, 16  ;;  %v290_v11 = vsel %vm11610_vm5, %v285_v32, %v289_v63  ;;  %v345_v53 = vrot.slane %v343_v38, 5  ;;  %v11940_v63 = vld [vmem:[%s16173_s0 + $0x94] sm:$0xf]  ;;  %v359_v20 = vshll.u32 %v11922_v56, 16 }
  0x3f   :  { %10333 = vmatpush3.bf16.msra.mxu0 %v11277_v3  ;;  %v307_v3 = vrot.slane %v305_v59, 4  ;;  %v280_v13 = vsel %vm11610_vm5, %v275_v62, %v279_v45  ;;  %v298_v15 = vor.u32 %v297_v14, %v294_v0  ;;  %v318_v18 = vrot.slane %v316_v4, 4 }
  0x40   :  { %10430 = vmatprep.subr.bf16.mxu0 %v11280_v6  ;;  %v325_v6 = vshll.u32 %v11872_v2, 16  ;;  %v321_v21 = vrot.slane %v319_v5, 5  ;;  %v9499_v41 = vcombine.low %v280_v13, %v290_v11  ;;  %v355_v59 = vrot.slane %v353_v43, 4  ;;  %v11961_v11 = vld [vmem:[%s16173_s0 + $0xa0] sm:$0xf] }
  0x41   :  { %v299_v31 = vrot.slane %v298_v15, 4  ;;  %v9507_v62 = vcombine.low %v11928_v23, %v11616_v37  ;;  %v373_v4 = vshll.u32 %v11940_v63, 16  ;;  %v377_v5 = vshrl.u32 %v11940_v63, 16  ;;  %v11288_v37 = vld [vmem:[%s16172_s1 + $0x150] sm:$0xff]   ;;  %v12229_v23 = vld [vmem:[%s16173_s0 + $0x24] sm:$0xf] }
  0x42   :  { %3121 = vmatmul.mubr.bf16.gmra.mrb[16].mxu0 %v9479_v8  ;;  %v329_v8 = vshrl.u32 %v11872_v2, 16  ;;  %v327_v27 = vrot.slane %v325_v6, 5  ;;  %v322_v39 = vor.u32 %v321_v21, %v318_v18  ;;  %v356_v14 = vor.u32 %v355_v59, %v351_v58  ;;  %v11954_v6 = vld [vmem:[%s16173_s0 + $0x9c] sm:$0xf]  ;;  %v11966_v18 = vld [vmem:[%s16173_s0 + $0x98] sm:$0x1] }
  0x43   :  { %3128 = vmatprep.mubr.bf16.mxu0 %v9496_v16  ;;  %v308_v16 = vor.u32 %v307_v3, %v303_v22  ;;  %v304_v45 = vsel %vm11610_vm5, %v299_v31, %v303_v22  ;;  %v361_v13 = vrot.slane %v359_v20, 5  ;;  %v401_v29 = vshrl.u32 %v11961_v11, 16 }
  0x44   :  { %v331_v28 = vrot.slane %v329_v8, 4  ;;  %v323_v49 = vrot.slane %v322_v39, 4  ;;  %v9484_v8 = vcombine.low %v11846_v48, %v11851_v54  ;;  %v388_v48 = vshrl.u32 %v11954_v6, 16 }
  0x45   :  { %v9485_v57 = vcombine.low %v11867_v7, %v11872_v2 }
  0x46   :  { %v332_v1 = vor.u32 %v331_v28, %v327_v27  ;;  %v328_v12 = vsel %vm11610_vm5, %v323_v49, %v327_v27  ;;  %v375_v27 = vrot.slane %v373_v4, 5  ;;  %v379_v28 = vrot.slane %v377_v5, 4 }
  0x48   :  { %v333_v55 = vrot.slane %v332_v1, 4  ;;  %v380_v39 = vor.u32 %v379_v28, %v375_v27  ;;  %v390_v1 = vrot.slane %v388_v48, 4 }
  0x4a   :  { %3129 = vmatmul.mubr.bf16.gmra.mrb[20].mxu0 %v9480_v34  ;;  %v309_v34 = vrot.slane %v308_v16, 4  ;;  %v338_v32 = vsel %vm11610_vm5, %v333_v55, %v337_v50  ;;  %v357_v16 = vrot.slane %v356_v14, 4  ;;  %v381_v55 = vrot.slane %v380_v39, 4 }
  0x4b   :  { %3136 = vmatprep.mubr.bf16.mxu0 %v9497_v35  ;;  %v340_v35 = vshrl.u32 %v11896_v25, 16  ;;  %v9501_v10 = vcombine.low %v328_v12, %v338_v32 }
  0x4c   :  { %v314_v47 = vsel %vm11610_vm5, %v309_v34, %v313_v46  ;;  %v397_v46 = vshll.u32 %v11961_v11, 16  ;;  %v383_v34 = vshll.u32 %v11966_v18, 16  ;;  %v362_v38 = vsel %vm11610_vm5, %v357_v16, %v361_v13  ;;  %v12012_v13 = vld [vmem:[%s16173_s0 + $0xb4] sm:$0xf] }
  0x4d   :  { %v342_v52 = vrot.slane %v340_v35, 4  ;;  %v436_v48 = vshrl.u32 %v12012_v13, 16 }
  0x4e   :  { %v399_v43 = vrot.slane %v397_v46, 5  ;;  %v385_v50 = vrot.slane %v383_v34, 5 }
  0x4f   :  { %v346_v0 = vor.u32 %v345_v53, %v342_v52  ;;  %v407_v52 = vshll.u32 %v11980_v51, 16 }
  0x50   :  { %v386_v14 = vsel %vm11610_vm5, %v381_v55, %v385_v50 }
  0x51   :  { %v347_v15 = vrot.slane %v346_v0, 4  ;;  %v12000_v0 = vld [vmem:[%s16173_s0 + $0xb0] sm:$0x1] }
  0x52   :  { %3137 = vmatmul.mubr.bf16.gmra.mrb[24].mxu0 %v9481_v60  ;;  %v9500_v60 = vcombine.low %v304_v45, %v314_v47  ;;  %v11985_v45 = vld [vmem:[%s16173_s0 + $0xa8] sm:$0xf]  ;;  %v11990_v47 = vld [vmem:[%s16173_s0 + $0xac] sm:$0xf] }
  0x53   :  { %3144 = vmatprep.mubr.bf16.mxu0 %v9498_v61  ;;  %v11933_v61 = vld [vmem:[%s16173_s0 + $0x90] sm:$0xf]  ;;  %v352_v35 = vsel %vm11610_vm5, %v347_v15, %v351_v58  ;;  %v412_v58 = vshrl.u32 %v11985_v45, 16  ;;  %v415_v12 = vshll.u32 %v11985_v45, 16  ;;  %v421_v20 = vshll.u32 %v11990_v47, 16 }
  0x54   :  { %v364_v22 = vshrl.u32 %v11933_v61, 16  ;;  %v367_v3 = vshll.u32 %v11933_v61, 16  ;;  %v9502_v53 = vcombine.low %v352_v35, %v362_v38  ;;  %v425_v7 = vshrl.u32 %v11990_v47, 16  ;;  %v12036_v35 = vld [vmem:[%s16173_s0 + $0xbc] sm:$0x1] }
  0x55   :  { %v12014_v15 = vrot.slane %v421_v20, 5 }
  0x56   :  { %v366_v21 = vrot.slane %v364_v22, 4  ;;  %v409_v22 = vrot.slane %v407_v52, 5  ;;  %v427_v16 = vrot.slane %v425_v7, 4  ;;  %v455_v7 = vshll.u32 %v12036_v35, 16 }
  0x58   :  { %v428_v34 = vor.u32 %v427_v16, %v12014_v15  ;;  %v608_v16 = vrot.slane %v11922_v56, 5 }
  0x5a   :  { %3145 = vmatmul.mubr.bf16.gmra.mrb[28].mxu0 %v9482_v24  ;;  %v369_v24 = vrot.slane %v367_v3, 5  ;;  %v414_v3 = vrot.slane %v412_v58, 4 }
  0x5b   :  { %3152 = vmatprep.mubr.bf16.mxu0 %v9499_v41  ;;  %v391_v41 = vshll.u32 %v11954_v6, 16 }
  0x5c   :  { %v370_v31 = vor.u32 %v369_v24, %v366_v21  ;;  %v9486_v21 = vcombine.low %v11896_v25, %v11904_v30  ;;  %v12021_v24 = vld [vmem:[%s16173_s0 + $0xb8] sm:$0xf] }
  0x5d   :  { %v393_v40 = vrot.slane %v391_v41, 5  ;;  %v439_v41 = vshll.u32 %v12012_v13, 16  ;;  %v445_v38 = vshll.u32 %v12021_v24, 16  ;;  %v449_v39 = vshrl.u32 %v12021_v24, 16 }
  0x5e   :  { %v371_v49 = vrot.slane %v370_v31, 4 }
  0x5f   :  { %v394_v59 = vor.u32 %v393_v40, %v390_v1  ;;  %v591_v40 = vrot.slane %v11851_v54, 5  ;;  %v441_v50 = vrot.slane %v439_v41, 5  ;;  %v470_v54 = vld [vmem:[%s16173_s0 + $0x84] sm:$0xe]  ;;  %v451_v20 = vrot.slane %v449_v39, 4 }
  0x60   :  { %v376_v32 = vsel %vm11610_vm5, %v371_v49, %v375_v27  ;;  %v468_v27 = vld [vmem:[%s16173_s0 + $0x6c] sm:$0xe]  ;;  %v438_v49 = vrot.slane %v436_v48, 4  ;;  %v457_v41 = vrot.slane %v455_v7, 5  ;;  %v629_v7 = vrot.slane %v12000_v0, 5 }
  0x61   :  { %v395_v4 = vrot.slane %v394_v59, 4  ;;  %v9503_v28 = vcombine.low %v376_v32, %v386_v14  ;;  %v9308_v1 = vrot.slane %v468_v27, 9  ;;  %v593_v58 = vrot.slane %v591_v40, 4 }
  0x62   :  { %3153 = vmatmul.mubr.bf16.gmra.mrb[32].mxu0 %v9483_v44  ;;  %v403_v44 = vrot.slane %v401_v29, 4  ;;  %v442_v14 = vor.u32 %v441_v50, %v438_v49 }
  0x63   :  { %3160 = vmatprep.mubr.bf16.mxu0 %v9500_v60  ;;  %v400_v46 = vsel %vm11610_vm5, %v395_v4, %v399_v43  ;;  %v12049_v55 = vsel %vm11583_vm4, %v9308_v1, %v591_v40  ;;  %v622_v40 = vrot.slane %v11980_v51, 5 }
  0x64   :  { %v404_v60 = vor.u32 %v403_v44, %v399_v43  ;;  %v594_v43 = vrot.slane %v11877_v33, 5  ;;  %v469_v44 = vld [vmem:[%s16173_s0 + $0x78] sm:$0xe]  ;;  %v429_v33 = vrot.slane %v428_v34, 4  ;;  %v443_v48 = vrot.slane %v442_v14, 4 }
  0x65   :  { %v9309_v59 = vrot.slane %v469_v44, 9  ;;  %v472_v34 = vld [vmem:[%s16173_s0 + $0x9c] sm:$0xe] }
  0x66   :  { %v405_v5 = vrot.slane %v404_v60, 4  ;;  %v598_v60 = vrot.slane %v11872_v2, 5  ;;  %v12059_v32 = vsel %vm11583_vm4, %v593_v58, %v594_v43  ;;  %v9310_v2 = vrot.slane %v470_v54, 9 }
  0x67   :  { %v9312_v1 = vrot.slane %v472_v34, 9  ;;  %v626_v58 = vrot.slane %v11990_v47, 5 }
  0x68   :  { %v410_v25 = vsel %vm11610_vm5, %v405_v5, %v409_v22  ;;  %v9516_v22 = vcombine.low %v12049_v55, %v12059_v32  ;;  %v600_v4 = vrot.slane %v598_v60, 4  ;;  %v471_v5 = vld [vmem:[%s16173_s0 + $0x90] sm:$0xe]  ;;  %v12473_v55 = vld [vmem:[%s16173_s0 + $0x9c] sm:$0xf] }
  0x69   :  { %v9504_v52 = vcombine.low %v400_v46, %v410_v25  ;;  %v9311_v46 = vrot.slane %v471_v5, 9  ;;  %v612_v25 = vrot.slane %v11940_v63, 5  ;;  %v12478_v32 = vld [vmem:[%s16173_s0 + $0xa0] sm:$0xf] }
  0x6a   :  { %3161 = vmatmul.mubr.bf16.gmra.mrb[36].mxu0 %v9484_v8  ;;  %v417_v8 = vrot.slane %v415_v12, 5  ;;  %v601_v12 = vrot.slane %v11891_v17, 5  ;;  %v605_v17 = vrot.slane %v11904_v30, 5 }
  0x6b   :  { %3168 = vmatprep.mubr.bf16.mxu0 %v9501_v10  ;;  %v431_v10 = vshll.u32 %v12000_v0, 16 }
  0x6c   :  { %v418_v29 = vor.u32 %v417_v8, %v414_v3  ;;  %v12065_v3 = vsel %vm11583_vm4, %v9309_v59, %v598_v60  ;;  %v12083_v30 = vsel %vm11583_vm4, %v9310_v2, %v605_v17  ;;  %v473_v59 = vld [vmem:[%s16173_s0 + $0xa8] sm:$0xe]  ;;  %v9489_v60 = vcombine.low %v11985_v45, %v11990_v47 }
  0x6d   :  { %v433_v31 = vrot.slane %v431_v10, 5  ;;  %v12076_v10 = vsel %vm11583_vm4, %v600_v4, %v601_v12  ;;  %v9313_v12 = vrot.slane %v473_v59, 9 }
  0x6e   :  { %v9517_v27 = vcombine.low %v12065_v3, %v12076_v10  ;;  %v9535_v3 = vcombine.low %v12473_v55, %v12478_v32 }
  0x6f   :  { %v12145_v5 = vsel %vm11583_vm4, %v9313_v12, %v626_v58 }
  0x72   :  { %3169 = vmatmul.mubr.bf16.gmra.mrb[40].mxu0 %v9485_v57  ;;  %v9487_v57 = vcombine.low %v11933_v61, %v11940_v63  ;;  %v447_v61 = vrot.slane %v445_v38, 5  ;;  %v619_v38 = vrot.slane %v11961_v11, 5  ;;  %v12104_v63 = vsel %vm11583_vm4, %v9311_v46, %v612_v25 }
  0x73   :  { %3176 = vmatprep.mubr.bf16.mxu0 %v9502_v53  ;;  %v419_v53 = vrot.slane %v418_v29, 4  ;;  %v615_v29 = vrot.slane %v11966_v18, 5  ;;  %v614_v18 = vrot.slane %v612_v25, 4  ;;  %v636_v46 = vrot.slane %v12036_v35, 5  ;;  %v12174_v35 = vld [vmem:[%s16173_s0 + $0x18] sm:$0xf] }
  0x74   :  { %v621_v44 = vrot.slane %v619_v38, 4  ;;  %v12108_v49 = vsel %vm11583_vm4, %v9312_v1, %v619_v38  ;;  %v448_v54 = vsel %vm11610_vm5, %v443_v48, %v447_v61  ;;  %v9490_v25 = vcombine.low %v12012_v13, %v12021_v24  ;;  %v12179_v13 = vld [vmem:[%s16173_s0 + $0x1c] sm:$0xf] }
  0x75   :  { %v424_v8 = vsel %vm11610_vm5, %v419_v53, %v12014_v15  ;;  %v434_v15 = vsel %vm11610_vm5, %v429_v33, %v433_v31  ;;  %v9488_v31 = vcombine.low %v11954_v6, %v11961_v11  ;;  %v12112_v6 = vsel %vm11583_vm4, %v614_v18, %v615_v29  ;;  %v12128_v53 = vld [vmem:[%s16173_s0 + $0x10] sm:$0xf] }
  0x76   :  { %v12116_v11 = vsel %vm11583_vm4, %v621_v44, %v622_v40  ;;  %v9519_v51 = vcombine.low %v12104_v63, %v12112_v6  ;;  %v697_v2 = vshll.u32 %v12128_v53, 16  ;;  %v460_v44 = vld [vmem:[%s16173_s0 + $0xc] sm:$0xe] }
  0x77   :  { %v9520_v50 = vcombine.low %v12108_v49, %v12116_v11  ;;  %v9300_v59 = vrot.slane %v460_v44, 9  ;;  %v12257_v44 = vld [vmem:[%s16173_s0 + $0x30] sm:$0xf] }
  0x7a   :  { %3177 = vmatmul.mubr.bf16.gmra.mrb[44].mxu0 %v9486_v21  ;;  %v452_v21 = vor.u32 %v451_v20, %v447_v61  ;;  %v628_v20 = vrot.slane %v626_v58, 4  ;;  %v701_v61 = vshrl.u32 %v12128_v53, 16 }
  0x7b   :  { %3184 = vmatprep.mubr.bf16.mxu0 %v9503_v28  ;;  %v607_v28 = vrot.slane %v605_v17, 4 }
  0x7c   :  { %v453_v43 = vrot.slane %v452_v21, 4  ;;  %v703_v21 = vrot.slane %v701_v61, 4 }
  0x7d   :  { %v12089_v56 = vsel %vm11583_vm4, %v607_v28, %v608_v16  ;;  %v699_v16 = vrot.slane %v697_v2, 5  ;;  %v633_v28 = vrot.slane %v12021_v24, 5  ;;  %v12184_v24 = vld [vmem:[%s16173_s0 + $0x14] sm:$0x1]  ;;  %v11284_v2 = vld [vmem:[%s16172_s1 + $0x148] sm:$0xff]  }
  0x7e   :  { %v9518_v39 = vcombine.low %v12083_v30, %v12089_v56  ;;  %v458_v33 = vsel %vm11610_vm5, %v453_v43, %v457_v41  ;;  %v707_v58 = vshll.u32 %v12184_v24, 16 }
  0x7f   :  { %v9506_v17 = vcombine.low %v448_v54, %v458_v33  ;;  %v635_v41 = vrot.slane %v633_v28, 4  ;;  %v704_v38 = vor.u32 %v703_v21, %v699_v16  ;;  %v9524_v33 = vcombine.low %v12174_v35, %v12179_v13  ;;  %v11285_v21 = vld [vmem:[%s16172_s1 + $0x108] sm:$0xff]  }
  0x80   :  { %v709_v54 = vrot.slane %v707_v58, 5  ;;  %v11293_v58 = vld [vmem:[%s16172_s1 + $0x118] sm:$0xff]  }
  0x81   :  { %v12167_v1 = vsel %vm11583_vm4, %v635_v41, %v636_v46  ;;  %v705_v18 = vrot.slane %v704_v38, 4  ;;  %v11292_v38 = vld [vmem:[%s16172_s1 + $0x158] sm:$0xff]  }
  0x82   :  { %3185 = vmatmul.mubr.bf16.gmra.mrb[48].mxu0 %v9487_v57  ;;  %v9505_v57 = vcombine.low %v424_v8, %v434_v15  ;;  %v12149_v8 = vsel %vm11583_vm4, %v628_v20, %v629_v7  ;;  %v474_v15 = vld [vmem:[%s16173_s0 + $0xb4] sm:$0xe]  ;;  %v11448_v20 = vld [vmem:[%s16173_s0 + $0x14] sm:$0x1] }
  0x83   :  { %3192 = vmatprep.mubr.bf16.mxu0 %v9504_v52  ;;  %v9315_v52 = vld [vmem:[%s16173_s0 + $0xc] sm:$0xf]  ;;  %v9521_v45 = vcombine.low %v12145_v5, %v12149_v8  ;;  %v9314_v48 = vrot.slane %v474_v15, 9  ;;  %v538_v7 = vrot.slane %v11448_v20, 5  ;;  %v9364_v5 = vld [vmem:[%s16173_s0 + $0x18] sm:$0xe] }
  0x84   :  { %v688_v14 = vshrl.u32 %v9315_v52, 16  ;;  %v691_v4 = vshll.u32 %v9315_v52, 16  ;;  %v9523_v29 = vcombine.low %v9315_v52, %v12128_v53 }
  0x86   :  { %v690_v47 = vrot.slane %v688_v14, 4  ;;  %v693_v0 = vrot.slane %v691_v4, 5  ;;  %v710_v4 = vsel %vm11610_vm5, %v705_v18, %v709_v54  ;;  %v12268_v54 = vld [vmem:[%s16173_s0 + $0x34] sm:$0xf] }
  0x88   :  { %v694_v34 = vor.u32 %v693_v0, %v690_v47  ;;  %v11449_v0 = vld [vmem:[%s16173_s0 + $0x1c] sm:$0xf] }
  0x8a   :  { %3193 = vmatmul.mubr.bf16.gmra.mrb[52].mxu0 %v9488_v31  ;;  %v12163_v31 = vsel %vm11583_vm4, %v9314_v48, %v633_v28  ;;  %v695_v43 = vrot.slane %v694_v34, 4  ;;  %v461_v28 = vld [vmem:[%s16173_s0 + $0x18] sm:$0xe]  ;;  %v11289_v34 = vld [vmem:[%s16172_s1 + $0x110] sm:$0xff]  }
  0x8b   :  { %3200 = vmatprep.mubr.bf16.mxu0 %v9505_v57  ;;  %v11447_v57 = vld [vmem:[%s16173_s0 + $0x10] sm:$0xf]  ;;  %v9301_v41 = vrot.slane %v461_v28, 9  ;;  %v11301_v28 = vld [vmem:[%s16172_s1 + $0x128] sm:$0xff]  }
  0x8c   :  { %v535_v52 = vrot.slane %v11447_v57, 5  ;;  %v700_v14 = vsel %vm11610_vm5, %v695_v43, %v699_v16  ;;  %v542_v16 = vrot.slane %v11449_v0, 5  ;;  %v11451_v57 = vld [vmem:[%s16173_s0 + $0x28] sm:$0xf] }
  0x8d   :  { %v12208_v61 = vcombine.low %v700_v14, %v710_v4  ;;  %v11452_v14 = vld [vmem:[%s16173_s0 + $0x2c] sm:$0x1] }
  0x8e   :  { %v537_v12 = vrot.slane %v535_v52, 4  ;;  %v544_v46 = vrot.slane %v542_v16, 4  ;;  %v543_v43 = vsel %vm11583_vm4, %v9301_v41, %v542_v16  ;;  %v552_v4 = vrot.slane %v11452_v14, 5  ;;  %v12294_v16 = vld [vmem:[%s16173_s0 + $0x3c] sm:$0xf]  ;;  %v11304_v41 = vld [vmem:[%s16172_s1 + $0x170] sm:$0xff]  }
  0x8f   :  { %v11311_v14 = vld [vmem:[%s16172_s1 + $0x1c0] sm:$0xff]  }
  0x90   :  { %v539_v47 = vsel %vm11583_vm4, %v537_v12, %v538_v7  ;;  %v9526_v12 = vcombine.low %v12257_v44, %v12268_v54 }
  0x92   :  { %3201 = vmatmul.mubr.bf16.gmra.mrb[56].mxu0 %v9489_v60  ;;  %v11281_v60 = vld [vmem:[%s16172_s1 + $0x100] sm:$0xff]  }
  0x93   :  { %3208 = vmatprep.mubr.bf16.mxu0 %v9506_v17  ;;  %v536_v17 = vsel %vm11583_vm4, %v9300_v59, %v535_v52  ;;  %v549_v52 = vrot.slane %v11451_v57, 5  ;;  %v11296_v59 = vld [vmem:[%s16172_s1 + $0x160] sm:$0xff]   ;;  %v11308_v57 = vld [vmem:[%s16172_s1 + $0x178] sm:$0xff]  }
  0x94   :  { %v9508_v15 = vcombine.low %v536_v17, %v539_v47  ;;  %v11300_v17 = vld [vmem:[%s16172_s1 + $0x168] sm:$0xff]  }
  0x95   :  { %v551_v7 = vrot.slane %v549_v52, 4 }
  0x97   :  { %v553_v0 = vsel %vm11583_vm4, %v551_v7, %v552_v4  ;;  %v464_v7 = vld [vmem:[%s16173_s0 + $0x3c] sm:$0xe] }
  0x9a   :  { %3209 = vmatmul.mubr.bf16.gmra.mrb[60].mxu0 %v9490_v25  ;;  %v11450_v25 = vld [vmem:[%s16173_s0 + $0x20] sm:$0x1] }
  0x9b   :  { %3249 = vmatprep.mubr.bf16.mxu0 %v9523_v29  ;;  %v545_v29 = vrot.slane %v11450_v25, 5 }
  0x9d   :  { %v546_v18 = vsel %vm11583_vm4, %v544_v46, %v545_v29 }
  0xa2   :  { %3250 = vmatmul.mubr.bf16.vlgmr.msra.gmra.mrb[64].mxu0 %v9507_v62  ;;  %v12234_v62 = vld [vmem:[%s16173_s0 + $0x28] sm:$0xf] }
  0xa3   :  { %10431 = vmatpush3.bf16.msra.mxu0 %v11281_v60  ;;  %3257 = vmatprep.mubr.bf16.mxu0 %v9524_v33  ;;  %v9525_v48 = vcombine.low %v12229_v23, %v12234_v62  ;;  %v462_v33 = vld [vmem:[%s16173_s0 + $0x24] sm:$0xe]  ;;  %v9509_v60 = vcombine.low %v543_v43, %v546_v18  ;;  %v11305_v18 = vld [vmem:[%s16172_s1 + $0x130] sm:$0xff]  }
  0xa4   :  { %10432 = vmatprep.subr.bf16.mxu0 %v11284_v2  ;;  %v9302_v20 = vrot.slane %v462_v33, 9  ;;  %v11297_v2 = vld [vmem:[%s16172_s1 + $0x120] sm:$0xff]   ;;  %v12331_v33 = vld [vmem:[%s16173_s0 + $0x48] sm:$0xf] }
  0xa6   :  { %v550_v47 = vsel %vm11583_vm4, %v9302_v20, %v549_v52  ;;  %v12342_v20 = vld [vmem:[%s16173_s0 + $0x4c] sm:$0xf] }
  0xa7   :  { %10433 = vmatpush3.bf16.msra.mxu0 %v11285_v21  ;;  %v11453_v21 = vld [vmem:[%s16173_s0 + $0x34] sm:$0xf]  ;;  %v9510_v46 = vcombine.low %v550_v47, %v553_v0  ;;  %v11456_v0 = vld [vmem:[%s16173_s0 + $0x44] sm:$0x1] }
  0xa8   :  { %10434 = vmatprep.subr.bf16.mxu0 %v11288_v37  ;;  %v556_v37 = vrot.slane %v11453_v21, 5  ;;  %v566_v21 = vrot.slane %v11456_v0, 5 }
  0xaa   :  { %3258 = vmatmul.mubr.bf16.gmra.mrb[68].mxu0 %v9508_v15  ;;  %v12305_v15 = vld [vmem:[%s16173_s0 + $0x40] sm:$0xf] }
  0xab   :  { %3265 = vmatprep.mubr.bf16.mxu0 %v9525_v48  ;;  %10435 = vmatpush3.bf16.msra.mxu0 %v11289_v34  ;;  %v463_v48 = vld [vmem:[%s16173_s0 + $0x30] sm:$0xe]  ;;  %v9527_v25 = vcombine.low %v12294_v16, %v12305_v15  ;;  %v558_v34 = vrot.slane %v556_v37, 4 }
  0xac   :  { %10436 = vmatprep.subr.bf16.mxu0 %v11292_v38  ;;  %v9303_v29 = vrot.slane %v463_v48, 9  ;;  %v11454_v38 = vld [vmem:[%s16173_s0 + $0x38] sm:$0x1]  ;;  %v11457_v48 = vld [vmem:[%s16173_s0 + $0x4c] sm:$0xf] }
  0xad   :  { %v559_v43 = vrot.slane %v11454_v38, 5 }
  0xae   :  { %v557_v52 = vsel %vm11583_vm4, %v9303_v29, %v556_v37  ;;  %v465_v29 = vld [vmem:[%s16173_s0 + $0x48] sm:$0xe] }
  0xaf   :  { %10437 = vmatpush3.bf16.msra.mxu0 %v11293_v58  ;;  %v560_v58 = vsel %vm11583_vm4, %v558_v34, %v559_v43  ;;  %v9305_v43 = vrot.slane %v465_v29, 9  ;;  %v12416_v29 = vld [vmem:[%s16173_s0 + $0x70] sm:$0xf] }
  0xb0   :  { %10438 = vmatprep.subr.bf16.mxu0 %v11296_v59  ;;  %v11455_v59 = vld [vmem:[%s16173_s0 + $0x40] sm:$0xf]  ;;  %v9511_v4 = vcombine.low %v557_v52, %v560_v58 }
  0xb2   :  { %3266 = vmatmul.mubr.bf16.gmra.mrb[72].mxu0 %v9509_v60  ;;  %v563_v60 = vrot.slane %v11455_v59, 5 }
  0xb3   :  { %3273 = vmatprep.mubr.bf16.mxu0 %v9526_v12  ;;  %10439 = vmatpush3.bf16.msra.mxu0 %v11297_v2  ;;  %v11309_v12 = vld [vmem:[%s16172_s1 + $0x138] sm:$0xff]   ;;  %v9528_v2 = vcombine.low %v12331_v33, %v12342_v20 }
  0xb4   :  { %10440 = vmatprep.subr.bf16.mxu0 %v11300_v17  ;;  %v9304_v17 = vrot.slane %v464_v7, 9  ;;  %v565_v47 = vrot.slane %v563_v60, 4  ;;  %v12390_v7 = vld [vmem:[%s16173_s0 + $0x60] sm:$0xf] }
  0xb6   :  { %v564_v37 = vsel %vm11583_vm4, %v9304_v17, %v563_v60  ;;  %v11459_v60 = vld [vmem:[%s16173_s0 + $0x58] sm:$0xf] }
  0xb7   :  { %10441 = vmatpush3.bf16.msra.mxu0 %v11301_v28  ;;  %v567_v28 = vsel %vm11583_vm4, %v565_v47, %v566_v21  ;;  %v580_v21 = vrot.slane %v11815_v9, 5  ;;  %v467_v9 = vld [vmem:[%s16173_s0 + $0x60] sm:$0xe] }
  0xb8   :  { %10442 = vmatprep.subr.bf16.mxu0 %v11304_v41  ;;  %v570_v41 = vrot.slane %v11457_v48, 5  ;;  %v9512_v34 = vcombine.low %v564_v37, %v567_v28  ;;  %v584_v48 = vrot.slane %v11825_v19, 5 }
  0xba   :  { %3274 = vmatmul.mubr.bf16.gmra.mrb[76].mxu0 %v9510_v46  ;;  %v12365_v46 = vld [vmem:[%s16173_s0 + $0x54] sm:$0xf]  ;;  %v571_v58 = vsel %vm11583_vm4, %v9305_v43, %v570_v41  ;;  %v9307_v43 = vrot.slane %v467_v9, 9  ;;  %v586_v19 = vrot.slane %v584_v48, 4  ;;  %v12497_v9 = vld [vmem:[%s16173_s0 + $0xac] sm:$0xf] }
  0xbb   :  { %3281 = vmatprep.mubr.bf16.mxu0 %v9527_v25  ;;  %10443 = vmatpush3.bf16.msra.mxu0 %v11305_v18  ;;  %v12370_v25 = vld [vmem:[%s16173_s0 + $0x58] sm:$0xf]  ;;  %v572_v18 = vrot.slane %v570_v41, 4  ;;  %v12411_v41 = vld [vmem:[%s16173_s0 + $0x6c] sm:$0xf] }
  0xbc   :  { %10444 = vmatprep.subr.bf16.mxu0 %v11308_v57  ;;  %v9529_v38 = vcombine.low %v12365_v46, %v12370_v25  ;;  %v11458_v57 = vld [vmem:[%s16173_s0 + $0x50] sm:$0x1] }
  0xbd   :  { %v573_v52 = vrot.slane %v11458_v57, 5  ;;  %v585_v57 = vsel %vm11583_vm4, %v9307_v43, %v584_v48  ;;  %v12492_v48 = vld [vmem:[%s16173_s0 + $0xa8] sm:$0xf] }
  0xbe   :  { %v9536_v30 = vcombine.low %v12492_v48, %v12497_v9 }
  0xbf   :  { %10445 = vmatpush3.bf16.msra.mxu0 %v11309_v12  ;;  %v574_v59 = vsel %vm11583_vm4, %v572_v18, %v573_v52  ;;  %v577_v12 = vrot.slane %v11459_v60, 5  ;;  %v587_v18 = vrot.slane %v11841_v42, 5 }
  0xc0   :  { %10542 = vmatprep.subr.bf16.mxu0 %v11311_v14  ;;  %v12395_v14 = vld [vmem:[%s16173_s0 + $0x64] sm:$0xf] }
  0xc1   :  { %v9530_v17 = vcombine.low %v12390_v7, %v12395_v14  ;;  %v579_v0 = vrot.slane %v577_v12, 4  ;;  %v588_v52 = vsel %vm11583_vm4, %v586_v19, %v587_v18  ;;  %v12511_v18 = vld [vmem:[%s16173_s0 + $0xb4] sm:$0xf] }
  0xc2   :  { %3282 = vmatmul.mubr.bf16.gmra.mrb[80].mxu0 %v9511_v4  ;;  %v466_v4 = vld [vmem:[%s16173_s0 + $0x54] sm:$0xe]  ;;  %v9515_v60 = vcombine.low %v585_v57, %v588_v52  ;;  %v12516_v57 = vld [vmem:[%s16173_s0 + $0xb8] sm:$0xf] }
  0xc3   :  { %3289 = vmatprep.mubr.bf16.mxu0 %v9528_v2  ;;  %v9513_v2 = vcombine.low %v571_v58, %v574_v59  ;;  %v9306_v47 = vrot.slane %v466_v4, 9  ;;  %v581_v28 = vsel %vm11583_vm4, %v579_v0, %v580_v21  ;;  %v12431_v58 = vld [vmem:[%s16173_s0 + $0x78] sm:$0xf]  ;;  %v12436_v59 = vld [vmem:[%s16173_s0 + $0x7c] sm:$0xf]  ;;  %v9537_v63 = vcombine.low %v12511_v18, %v12516_v57 }
  0xc4   :  { %v9532_v42 = vcombine.low %v12431_v58, %v12436_v59  ;;  %v12448_v4 = vld [vmem:[%s16173_s0 + $0x88] sm:$0xf] }
  0xc5   :  { %v578_v37 = vsel %vm11583_vm4, %v9306_v47, %v577_v12  ;;  %v12443_v12 = vld [vmem:[%s16173_s0 + $0x84] sm:$0xf]  ;;  %v12463_v47 = vld [vmem:[%s16173_s0 + $0x94] sm:$0xf] }
  0xca   :  { %3290 = vmatmul.mubr.bf16.gmra.mrb[84].mxu0 %v9512_v34  ;;  %v9514_v34 = vcombine.low %v578_v37, %v581_v28 }
  0xcb   :  { %3297 = vmatprep.mubr.bf16.mxu0 %v9529_v38  ;;  %v9531_v38 = vcombine.low %v12411_v41, %v12416_v29 }
  0xd2   :  { %3298 = vmatmul.mubr.bf16.gmra.mrb[88].mxu0 %v9513_v2  ;;  %v9533_v2 = vcombine.low %v12443_v12, %v12448_v4 }
  0xd3   :  { %3305 = vmatprep.mubr.bf16.mxu0 %v9530_v17  ;;  %v12458_v17 = vld [vmem:[%s16173_s0 + $0x90] sm:$0xf] }
  0xd4   :  { %v9534_v0 = vcombine.low %v12458_v17, %v12463_v47 }
  0xda   :  { %3306 = vmatmul.mubr.bf16.gmra.mrb[92].mxu0 %v9514_v34 }
  0xdb   :  { %3313 = vmatprep.mubr.bf16.mxu0 %v9531_v38 }
  0xe2   :  { %3314 = vmatmul.mubr.bf16.gmra.mrb[96].mxu0 %v9515_v60 }
  0xe3   :  { %3321 = vmatprep.mubr.bf16.mxu0 %v9532_v42 }
  0xea   :  { %3322 = vmatmul.mubr.bf16.gmra.mrb[100].mxu0 %v9516_v22 }
  0xeb   :  { %3329 = vmatprep.mubr.bf16.mxu0 %v9533_v2 }
  0xf2   :  { %3330 = vmatmul.mubr.bf16.gmra.mrb[104].mxu0 %v9517_v27 }
  0xf3   :  { %3337 = vmatprep.mubr.bf16.mxu0 %v9534_v0  ;;  %v12530_v0 = vld [vmem:[%s16173_s0 + $0xc0] sm:$0xf] }
  0xf5   :  { %v10222_v22 = vpop.f32.mrb[0].mxu0 }
  0xf6   :  { %v10223_v21 = vpop.f32.mrb[1].mxu0 }
  0xf7   :  { %v12480_v37 = vadd.f32 %v10223_v21, %v10222_v22  ;;  %v10225_v28 = vpop.f32.mrb[2].mxu0  ;;  %v12535_v22 = vld [vmem:[%s16173_s0 + $0xc4] sm:$0xf]  ;;  %v1137_v21 = vrot.slane %v12128_v53, 5  ;;  %v715_v53 = vshll.u32 %v12174_v35, 16 }
  0xf8   :  { %v10226_v10 = vpop.f32.mrb[3].mxu0 }
  0xf9   :  { %v12484_v27 = vadd.f32 %v10226_v10, %v10225_v28  ;;  %v9538_v10 = vcombine.low %v12530_v0, %v12535_v22 }
  0xfa   :  { %3338 = vmatmul.mubr.bf16.gmra.mrb[108].mxu0 %v9518_v39 }
  0xfb   :  { %3345 = vmatprep.mubr.bf16.mxu0 %v9535_v3  ;;  %v9363_v3 = vld [vmem:[%s16173_s0 + $0xc] sm:$0xe] }
  0xfd   :  { %v10228_v34 = vpop.f32.mrb[4].mxu0 }
  0xfe   :  { %v10229_v38 = vpop.f32.mrb[5].mxu0 }
  0xff   :  { %v12499_v43 = vadd.f32 %v10229_v38, %v10228_v34  ;;  %v10231_v19 = vpop.f32.mrb[6].mxu0  ;;  %v712_v34 = vshrl.u32 %v12174_v35, 16  ;;  %v1144_v35 = vrot.slane %v12179_v13, 5 }
 0x100   :  { %v10232_v56 = vpop.f32.mrb[7].mxu0 }
 0x101   :  { %v12503_v39 = vadd.f32 %v10232_v56, %v10231_v19  ;;  %v9379_v19 = vrot.slane %v9363_v3, 9  ;;  %v1140_v56 = vrot.slane %v12184_v24, 5 }
 0x102   :  { %3346 = vmatmul.mubr.bf16.gmra.mrb[112].mxu0 %v9519_v51 }
 0x103   :  { %3353 = vmatprep.mubr.bf16.mxu0 %v9536_v30  ;;  %v1139_v30 = vrot.slane %v1137_v21, 4 }
 0x105   :  { %v10234_v52 = vpop.f32.mrb[8].mxu0  ;;  %v1141_v24 = vsel %vm11583_vm4, %v1139_v30, %v1140_v56  ;;  %v9380_v30 = vrot.slane %v9364_v5, 9  ;;  %v1146_v56 = vrot.slane %v1144_v35, 4 }
 0x106   :  { %v10235_v60 = vpop.f32.mrb[9].mxu0 }
 0x107   :  { %v12518_v42 = vadd.f32 %v10235_v60, %v10234_v52  ;;  %v10237_v2 = vpop.f32.mrb[10].mxu0  ;;  %v725_v60 = vshrl.u32 %v12179_v13, 16  ;;  %v1145_v5 = vsel %vm11583_vm4, %v9380_v30, %v1144_v35 }
 0x108   :  { %v10238_v6 = vpop.f32.mrb[11].mxu0 }
 0x109   :  { %16214 = vst [vmem:[#allocation4_spill] sm:$0xff] %v12518_v42  ;;  %v12522_v51 = vadd.f32 %v10238_v6, %v10237_v2  ;;  %v721_v2 = vshll.u32 %v12179_v13, 16  ;;  %v1138_v6 = vsel %vm11583_vm4, %v9379_v19, %v1137_v21  ;;  %v736_v21 = vshrl.u32 %v12229_v23, 16 }
 0x10a   :  { %3354 = vmatmul.mubr.bf16.gmra.mrb[116].mxu0 %v9520_v50 }
 0x10b   :  { %16215 = vst [vmem:[#allocation5_spill] sm:$0xff] %v12522_v51  ;;  %3361 = vmatprep.mubr.bf16.mxu0 %v9537_v63  ;;  %v714_v63 = vrot.slane %v712_v34, 4 }
 0x10d   :  { %v10240_v28 = vpop.f32.mrb[12].mxu0 }
 0x10e   :  { %v10241_v49 = vpop.f32.mrb[13].mxu0 }
 0x10f   :  { %v12541_v11 = vadd.f32 %v10241_v49, %v10240_v28  ;;  %v10243_v50 = vpop.f32.mrb[14].mxu0  ;;  %v717_v28 = vrot.slane %v715_v53, 5  ;;  %v9348_v49 = vld [vmem:[%s16173_s0 + $0x20] sm:$0x1] }
 0x110   :  { %v10244_v38 = vpop.f32.mrb[15].mxu0  ;;  %v1147_v53 = vrot.slane %v9348_v49, 5 }
 0x111   :  { %16216 = vst [vmem:[#allocation6_spill] sm:$0xff] %v12541_v11  ;;  %v12548_v52 = vadd.f32 %v10244_v38, %v10243_v50  ;;  %v727_v50 = vrot.slane %v725_v60, 4  ;;  %v9555_v38 = vcombine.low %v1138_v6, %v1141_v24  ;;  %v749_v11 = vshrl.u32 %v12234_v62, 16 }
 0x112   :  { %3362 = vmatmul.mubr.bf16.gmra.mrb[120].mxu0 %v9521_v45  ;;  %v12566_v45 = vrot.slane %v721_v2, 5  ;;  %v16220_v60 = vcombine.low %v12163_v31, %v12167_v1  ;;  %v760_v24 = vshrl.u32 %v12257_v44, 16 }
 0x113   :  { %16217 = vst [vmem:[#allocation7_spill] sm:$0xff] %v12548_v52  ;;  %3369 = vmatprep.mubr.bf16.mxu0 %v9538_v10  ;;  %v739_v10 = vshll.u32 %v12229_v23, 16  ;;  %v718_v52 = vor.u32 %v717_v28, %v714_v63  ;;  %v731_v23 = vshll.u32 %v9348_v49, 16  ;;  %v1148_v63 = vsel %vm11583_vm4, %v1146_v56, %v1147_v53  ;;  %v9349_v49 = vld [vmem:[%s16173_s0 + $0x2c] sm:$0x1] }
 0x114   :  { %v728_v2 = vor.u32 %v727_v50, %v12566_v45  ;;  %v1151_v28 = vrot.slane %v12234_v62, 5  ;;  %v9365_v50 = vld [vmem:[%s16173_s0 + $0x24] sm:$0xe]  ;;  %v751_v35 = vrot.slane %v749_v11, 4  ;;  %v9556_v56 = vcombine.low %v1145_v5, %v1148_v63  ;;  %v11313_v11 = vld [vmem:[%s16172_s1 + $0x1c8] sm:$0xff]  }
 0x115   :  { %v10246_v3 = vpop.f32.mrb[16].mxu0  ;;  %v741_v6 = vrot.slane %v739_v10, 5  ;;  %v719_v1 = vrot.slane %v718_v52, 4  ;;  %v11312_v52 = vld [vmem:[%s16172_s1 + $0x180] sm:$0xff]   ;;  %v773_v53 = vshrl.u32 %v12268_v54, 16 }
 0x116   :  { %v10247_v8 = vpop.f32.mrb[17].mxu0  ;;  %v729_v10 = vrot.slane %v728_v2, 4  ;;  %v1154_v2 = vrot.slane %v9349_v49, 5 }
 0x117   :  { %v12570_v34 = vadd.f32 %v10247_v8, %v10246_v3  ;;  %v10249_v13 = vpop.f32.mrb[18].mxu0  ;;  %v745_v3 = vshll.u32 %v12234_v62, 16  ;;  %v738_v8 = vrot.slane %v736_v21, 4  ;;  %v724_v5 = vsel %vm11610_vm5, %v719_v1, %v12566_v45  ;;  %v9366_v45 = vld [vmem:[%s16173_s0 + $0x30] sm:$0xe] }
 0x118   :  { %v10250_v19 = vpop.f32.mrb[19].mxu0  ;;  %v797_v1 = vshrl.u32 %v12305_v15, 16 }
 0x119   :  { %16218 = vst [vmem:[#allocation8_spill] sm:$0xff] %v12570_v34  ;;  %v12572_v40 = vadd.f32 %v10250_v19, %v10249_v13  ;;  %v733_v13 = vrot.slane %v731_v23, 5  ;;  %v763_v19 = vshll.u32 %v12257_v44, 16  ;;  %v1153_v34 = vrot.slane %v1151_v28, 4 }
 0x11a   :  { %3370 = vmatmul.mubr.bf16.gmra.mrb[124].mxu0 %v16220_v60  ;;  %v12604_v23 = vrot.slane %v760_v24, 4  ;;  %v784_v24 = vshrl.u32 %v12294_v16, 16 }
 0x11b   :  { %16219 = vst [vmem:[#allocation9_spill] sm:$0xff] %v12572_v40  ;;  %3410 = vmatprep.mubr.bf16.mxu0 %v9555_v38  ;;  %v12592_v38 = vrot.slane %v745_v3, 5  ;;  %v9381_v40 = vrot.slane %v9365_v50, 9  ;;  %v742_v3 = vor.u32 %v741_v6, %v738_v8  ;;  %v734_v63 = vsel %vm11610_vm5, %v729_v10, %v733_v13  ;;  %v9350_v13 = vld [vmem:[%s16173_s0 + $0x38] sm:$0x1] }
 0x11c   :  { %v1158_v8 = vrot.slane %v12268_v54, 5  ;;  %v787_v6 = vshll.u32 %v12294_v16, 16  ;;  %v1155_v10 = vsel %vm11583_vm4, %v1153_v34, %v1154_v2  ;;  %v793_v34 = vshll.u32 %v12305_v15, 16 }
 0x11d   :  { %v10252_v31 = vpop.f32.mrb[20].mxu0  ;;  %v752_v50 = vor.u32 %v751_v35, %v12592_v38  ;;  %v11315_v35 = vld [vmem:[%s16172_s1 + $0x1d0] sm:$0xff]   ;;  %v743_v16 = vrot.slane %v742_v3, 4  ;;  %v1161_v42 = vrot.slane %v9350_v13, 5 }
 0x11e   :  { %v10253_v21 = vpop.f32.mrb[21].mxu0  ;;  %v1160_v51 = vrot.slane %v1158_v8, 4  ;;  %v11316_v3 = vld [vmem:[%s16172_s1 + $0x190] sm:$0xff]  }
 0x11f   :  { %v12595_v30 = vadd.f32 %v10253_v21, %v10252_v31  ;;  %v10255_v62 = vpop.f32.mrb[22].mxu0  ;;  %v769_v31 = vshll.u32 %v12268_v54, 16  ;;  %v755_v21 = vshll.u32 %v9349_v49, 16  ;;  %v1152_v49 = vsel %vm11583_vm4, %v9381_v40, %v1151_v28 }
 0x120   :  { %v10256_v60 = vpop.f32.mrb[23].mxu0  ;;  %v753_v40 = vrot.slane %v752_v50, 4  ;;  %v11317_v50 = vld [vmem:[%s16172_s1 + $0x1d8] sm:$0xff]  }
 0x121   :  { %16221 = vst [vmem:[#allocation10_spill] sm:$0xff] %v12595_v30  ;;  %v12606_v44 = vadd.f32 %v10256_v60, %v10255_v62  ;;  %v12616_v30 = vrot.slane %v763_v19, 5  ;;  %v9540_v19 = vcombine.low %v724_v5, %v734_v63  ;;  %v12638_v62 = vrot.slane %v769_v31, 5 }
 0x122   :  { %3411 = vmatmul.mubr.bf16.vlgmr.msra.gmra.mrb[128].mxu0 %v12208_v61  ;;  %v11314_v61 = vld [vmem:[%s16172_s1 + $0x188] sm:$0xff]   ;;  %v757_v28 = vrot.slane %v755_v21, 5  ;;  %v9382_v60 = vrot.slane %v9366_v45, 9  ;;  %v12646_v31 = vrot.slane %v784_v24, 4  ;;  %v808_v5 = vshrl.u32 %v12331_v33, 16 }
 0x123   :  { %16222 = vst [vmem:[#allocation11_spill] sm:$0xff] %v12606_v44  ;;  %10543 = vmatpush3.bf16.msra.mxu0 %v11312_v52  ;;  %3418 = vmatprep.mubr.bf16.mxu0 %v9556_v56  ;;  %v775_v52 = vrot.slane %v773_v53, 4  ;;  %v9557_v44 = vcombine.low %v1152_v49, %v1155_v10  ;;  %v12648_v53 = vrot.slane %v787_v6, 5  ;;  %v766_v24 = vor.u32 %v12616_v30, %v12604_v23 }
 0x124   :  { %10544 = vmatprep.subr.bf16.mxu0 %v11313_v11  ;;  %v758_v6 = vsel %vm11610_vm5, %v753_v40, %v757_v28  ;;  %v1159_v49 = vsel %vm11583_vm4, %v9382_v60, %v1158_v8  ;;  %v779_v10 = vshll.u32 %v9350_v13, 16  ;;  %v1162_v30 = vsel %vm11583_vm4, %v1160_v51, %v1161_v42  ;;  %v11318_v8 = vld [vmem:[%s16172_s1 + $0x198] sm:$0xff]   ;;  %v9444_v13 = vld [vmem:[%s16173_s0 + $0x24] sm:$0xe] }
 0x125   :  { %v10258_v54 = vpop.f32.mrb[24].mxu0  ;;  %v776_v45 = vor.u32 %v775_v52, %v12638_v62  ;;  %v799_v23 = vrot.slane %v797_v1, 4  ;;  %v811_v52 = vshll.u32 %v12331_v33, 16  ;;  %v1165_v42 = vrot.slane %v12305_v15, 5  ;;  %v11319_v51 = vld [vmem:[%s16172_s1 + $0x1e0] sm:$0xff]  }
 0x126   :  { %v10259_v56 = vpop.f32.mrb[25].mxu0  ;;  %v9460_v1 = vrot.slane %v9444_v13, 9  ;;  %v767_v28 = vrot.slane %v766_v24, 4  ;;  %v9367_v33 = vld [vmem:[%s16173_s0 + $0x3c] sm:$0xe]  ;;  %v790_v15 = vor.u32 %v12648_v53, %v12646_v31  ;;  %v11321_v13 = vld [vmem:[%s16172_s1 + $0x1e8] sm:$0xff]  }
 0x127   :  { %v12641_v2 = vadd.f32 %v10259_v56, %v10258_v54  ;;  %v10261_v11 = vpop.f32.mrb[26].mxu0  ;;  %10545 = vmatpush3.bf16.msra.mxu0 %v11314_v61  ;;  %v748_v61 = vsel %vm11610_vm5, %v743_v16, %v12592_v38  ;;  %v12671_v54 = vld [vmem:[%s16173_s0 + $0x28] sm:$0xf]  ;;  %v9428_v38 = vld [vmem:[%s16173_s0 + $0x2c] sm:$0x1]  ;;  %v777_v60 = vrot.slane %v776_v45, 4 }
 0x128   :  { %v10262_v63 = vpop.f32.mrb[27].mxu0  ;;  %10546 = vmatprep.subr.bf16.mxu0 %v11315_v35  ;;  %v12666_v35 = vrot.slane %v793_v34, 5  ;;  %v1756_v16 = vrot.slane %v9428_v38, 5  ;;  %v9541_v40 = vcombine.low %v748_v61, %v758_v6  ;;  %v11320_v6 = vld [vmem:[%s16172_s1 + $0x1a0] sm:$0xff]   ;;  %v9383_v53 = vrot.slane %v9367_v33, 9 }
 0x129   :  { %v12654_v21 = vadd.f32 %v10262_v63, %v10261_v11  ;;  %v781_v63 = vrot.slane %v779_v10, 5  ;;  %v1167_v10 = vrot.slane %v1165_v42, 4  ;;  %v813_v33 = vrot.slane %v811_v52, 5 }
 0x12a   :  { %3419 = vmatmul.mubr.bf16.gmra.mrb[132].mxu0 %v9540_v19  ;;  %v1753_v19 = vrot.slane %v12671_v54, 5  ;;  %v800_v24 = vor.u32 %v799_v23, %v12666_v35 }
 0x12b   :  { %3426 = vmatprep.mubr.bf16.mxu0 %v9557_v44  ;;  %10547 = vmatpush3.bf16.msra.mxu0 %v11316_v3  ;;  %v9351_v44 = vld [vmem:[%s16173_s0 + $0x44] sm:$0x1]  ;;  %v9558_v3 = vcombine.low %v1159_v49, %v1162_v30 }
 0x12c   :  { %10548 = vmatprep.subr.bf16.mxu0 %v11317_v50  ;;  %v1755_v34 = vrot.slane %v1753_v19, 4  ;;  %v12700_v50 = vsel %vm11583_vm4, %v9460_v1, %v1753_v19  ;;  %v803_v45 = vshll.u32 %v9351_v44, 16  ;;  %v1168_v30 = vrot.slane %v9351_v44, 5 }
 0x12d   :  { %v10264_v56 = vpop.f32.mrb[28].mxu0  ;;  %16223 = vst [vmem:[#allocation12_spill] sm:$0xff] %v12700_v50  ;;  %v832_v19 = vshrl.u32 %v12365_v46, 16  ;;  %v835_v44 = vshll.u32 %v12365_v46, 16  ;;  %v11322_v46 = vld [vmem:[%s16172_s1 + $0x1a8] sm:$0xff]   ;;  %v801_v52 = vrot.slane %v800_v24, 4 }
 0x12e   :  { %v10265_v11 = vpop.f32.mrb[29].mxu0  ;;  %v12710_v49 = vsel %vm11583_vm4, %v1755_v34, %v1756_v16  ;;  %v817_v16 = vshll.u32 %v12342_v20, 16  ;;  %v782_v34 = vsel %vm11610_vm5, %v777_v60, %v781_v63  ;;  %v856_v24 = vshrl.u32 %v12390_v7, 16 }
 0x12f   :  { %v12702_v38 = vadd.f32 %v10265_v11, %v10264_v56  ;;  %v10267_v61 = vpop.f32.mrb[30].mxu0  ;;  %10549 = vmatpush3.bf16.msra.mxu0 %v11318_v8  ;;  %16225 = vst [vmem:[#allocation14_spill] sm:$0xff] %v12710_v49  ;;  %v821_v8 = vshrl.u32 %v12342_v20, 16  ;;  %v810_v56 = vrot.slane %v808_v5, 4  ;;  %v791_v11 = vrot.slane %v790_v15, 4 }
 0x130   :  { %v10268_v31 = vpop.f32.mrb[31].mxu0  ;;  %10550 = vmatprep.subr.bf16.mxu0 %v11319_v51  ;;  %v772_v51 = vsel %vm11610_vm5, %v767_v28, %v12638_v62  ;;  %v1166_v5 = vsel %vm11583_vm4, %v9383_v53, %v1165_v42  ;;  %v1169_v62 = vsel %vm11583_vm4, %v1167_v10, %v1168_v30  ;;  %v9352_v28 = vld [vmem:[%s16173_s0 + $0x50] sm:$0x1]  ;;  %v12745_v60 = vrot.slane %v832_v19, 4 }
 0x131   :  { %16224 = vst [vmem:[#allocation13_spill] sm:$0xff] %v12702_v38  ;;  %v12719_v1 = vadd.f32 %v10268_v31, %v10267_v61  ;;  %v9368_v61 = vld [vmem:[%s16173_s0 + $0x48] sm:$0xe]  ;;  %v1172_v31 = vrot.slane %v12342_v20, 5  ;;  %v11323_v20 = vld [vmem:[%s16172_s1 + $0x1f0] sm:$0xff]   ;;  %v12748_v42 = vrot.slane %v817_v16, 5  ;;  %v9542_v53 = vcombine.low %v772_v51, %v782_v34 }
 0x132   :  { %3427 = vmatmul.mubr.bf16.gmra.mrb[136].mxu0 %v9541_v40  ;;  %v805_v40 = vrot.slane %v803_v45, 5  ;;  %v823_v15 = vrot.slane %v821_v8, 4  ;;  %v9384_v10 = vrot.slane %v9368_v61, 9  ;;  %v1175_v49 = vrot.slane %v9352_v28, 5  ;;  %v11324_v19 = vld [vmem:[%s16172_s1 + $0x1b0] sm:$0xff]   ;;  %v11325_v61 = vld [vmem:[%s16172_s1 + $0x1f8] sm:$0xff]  }
 0x133   :  { %16226 = vst [vmem:[#allocation15_spill] sm:$0xff] %v12719_v1  ;;  %3434 = vmatprep.mubr.bf16.mxu0 %v9558_v3  ;;  %10551 = vmatpush3.bf16.msra.mxu0 %v11320_v6  ;;  %v845_v3 = vshrl.u32 %v12370_v25, 16  ;;  %v12750_v6 = vrot.slane %v835_v44, 5  ;;  %v1174_v23 = vrot.slane %v1172_v31, 4  ;;  %v859_v8 = vshll.u32 %v12390_v7, 16 }
 0x134   :  { %10552 = vmatprep.subr.bf16.mxu0 %v11321_v13  ;;  %v9559_v13 = vcombine.low %v1166_v5, %v1169_v62  ;;  %v796_v44 = vsel %vm11610_vm5, %v791_v11, %v12666_v35  ;;  %v806_v51 = vsel %vm11610_vm5, %v801_v52, %v805_v40  ;;  %v814_v34 = vor.u32 %v813_v33, %v810_v56  ;;  %v9369_v56 = vld [vmem:[%s16173_s0 + $0x54] sm:$0xe]  ;;  %v12779_v33 = vld [vmem:[%s16173_s0 + $0x40] sm:$0xf]  ;;  %v9430_v11 = vld [vmem:[%s16173_s0 + $0x44] sm:$0x1] }
 0x135   :  { %v10270_v63 = vpop.f32.mrb[32].mxu0  ;;  %v827_v5 = vshll.u32 %v9352_v28, 16  ;;  %v841_v62 = vshll.u32 %v12370_v25, 16  ;;  %v1173_v35 = vsel %vm11583_vm4, %v9384_v10, %v1172_v31  ;;  %v1176_v52 = vsel %vm11583_vm4, %v1174_v23, %v1175_v49  ;;  %v11326_v31 = vld [vmem:[%s16172_s1 + $0x1b8] sm:$0xff]   ;;  %v12801_v49 = vld [vmem:[%s16172_s1 + $0x200] sm:$0xff]  }
 0x136   :  { %v10271_v45 = vpop.f32.mrb[33].mxu0  ;;  %v1179_v40 = vrot.slane %v12370_v25, 5  ;;  %v9446_v28 = vld [vmem:[%s16173_s0 + $0x3c] sm:$0xe]  ;;  %v9353_v25 = vld [vmem:[%s16173_s0 + $0x5c] sm:$0x1] }
 0x137   :  { %v10273_v30 = vpop.f32.mrb[34].mxu0  ;;  %10553 = vmatpush3.bf16.msra.mxu0 %v11322_v46  ;;  %v12756_v50 = vadd.f32 %v10271_v45, %v10270_v63  ;;  %v824_v46 = vor.u32 %v823_v15, %v12748_v42  ;;  %v1770_v63 = vrot.slane %v9430_v11, 5  ;;  %v869_v15 = vshrl.u32 %v12395_v14, 16 }
 0x138   :  { %v10274_v16 = vpop.f32.mrb[35].mxu0  ;;  %10554 = vmatprep.subr.bf16.mxu0 %v11323_v20  ;;  %v1767_v20 = vrot.slane %v12779_v33, 5  ;;  %v9543_v45 = vcombine.low %v796_v44, %v806_v51  ;;  %v9462_v23 = vrot.slane %v9446_v28, 9  ;;  %v9560_v44 = vcombine.low %v1173_v35, %v1176_v52 }
 0x139   :  { %16227 = vst [vmem:[#allocation16_spill] sm:$0xff] %v12756_v50  ;;  %v12769_v7 = vadd.f32 %v10274_v16, %v10273_v30  ;;  %v825_v30 = vrot.slane %v824_v46, 4  ;;  %v829_v51 = vrot.slane %v827_v5, 5  ;;  %v1181_v1 = vrot.slane %v1179_v40, 4 }
 0x13a   :  { %3435 = vmatmul.mubr.bf16.gmra.mrb[140].mxu0 %v9542_v53  ;;  %v815_v53 = vrot.slane %v814_v34, 4  ;;  %v1769_v16 = vrot.slane %v1767_v20, 4  ;;  %v9385_v34 = vrot.slane %v9369_v56, 9  ;;  %v1182_v38 = vrot.slane %v9353_v25, 5 }
 0x13b   :  { %16228 = vst [vmem:[#allocation17_spill] sm:$0xff] %v12769_v7  ;;  %3442 = vmatprep.mubr.bf16.mxu0 %v9559_v13  ;;  %10555 = vmatpush3.bf16.msra.mxu0 %v11324_v19  ;;  %v12803_v13 = vrot.slane %v841_v62, 5  ;;  %v847_v19 = vrot.slane %v845_v3, 4  ;;  %v12807_v7 = vsel %vm11583_vm4, %v9462_v23, %v1767_v20  ;;  %v858_v3 = vrot.slane %v856_v24, 4 }
 0x13c   :  { %10556 = vmatprep.subr.bf16.mxu0 %v11325_v61  ;;  %16229 = vst [vmem:[#allocation18_spill] sm:$0xff] %v12807_v7  ;;  %v12813_v46 = vsel %vm11583_vm4, %v1769_v16, %v1770_v63  ;;  %v880_v62 = vshrl.u32 %v12411_v41, 16  ;;  %v838_v5 = vor.u32 %v12750_v6, %v12745_v60  ;;  %v851_v28 = vshll.u32 %v9353_v25, 16 }
 0x13d   :  { %v10276_v10 = vpop.f32.mrb[36].mxu0  ;;  %16230 = vst [vmem:[#allocation19_spill] sm:$0xff] %v12813_v46  ;;  %v865_v20 = vshll.u32 %v12395_v14, 16  ;;  %v861_v63 = vrot.slane %v859_v8, 5  ;;  %v883_v24 = vshll.u32 %v12411_v41, 16  ;;  %v893_v23 = vshrl.u32 %v12416_v29, 16 }
 0x13e   :  { %v10277_v11 = vpop.f32.mrb[37].mxu0  ;;  %v820_v60 = vsel %vm11610_vm5, %v815_v53, %v12748_v42  ;;  %v1180_v6 = vsel %vm11583_vm4, %v9385_v34, %v1179_v40  ;;  %v1183_v25 = vsel %vm11583_vm4, %v1181_v1, %v1182_v38  ;;  %v1186_v8 = vrot.slane %v12395_v14, 5  ;;  %v9370_v42 = vld [vmem:[%s16173_s0 + $0x60] sm:$0xe] }
 0x13f   :  { %v12809_v61 = vadd.f32 %v10277_v11, %v10276_v10  ;;  %v10279_v50 = vpop.f32.mrb[38].mxu0  ;;  %10557 = vmatpush3.bf16.msra.mxu0 %v11326_v31  ;;  %v848_v31 = vor.u32 %v847_v19, %v12803_v13  ;;  %v12837_v41 = vrot.slane %v880_v62, 4  ;;  %v839_v10 = vrot.slane %v838_v5, 4 }
 0x140   :  { %v10280_v35 = vpop.f32.mrb[39].mxu0  ;;  %10984 = vmatprep.subr.bf16.mxu0 %v12801_v49  ;;  %v853_v19 = vrot.slane %v851_v28, 5  ;;  %v12845_v40 = vrot.slane %v865_v20, 5  ;;  %v871_v16 = vrot.slane %v869_v15, 4  ;;  %v12847_v38 = vrot.slane %v883_v24, 5 }
 0x141   :  { %v12821_v52 = vadd.f32 %v10280_v35, %v10279_v50  ;;  %v830_v50 = vsel %vm11610_vm5, %v825_v30, %v829_v51  ;;  %v849_v30 = vrot.slane %v848_v31, 4  ;;  %v904_v14 = vshrl.u32 %v12431_v58, 16 }
 0x142   :  { %3443 = vmatmul.mubr.bf16.gmra.mrb[144].mxu0 %v9543_v45  ;;  %v9354_v45 = vld [vmem:[%s16173_s0 + $0x68] sm:$0x1]  ;;  %v9544_v11 = vcombine.low %v820_v60, %v830_v50  ;;  %v9386_v62 = vrot.slane %v9370_v42, 9  ;;  %v1188_v35 = vrot.slane %v1186_v8, 4  ;;  %v907_v56 = vshll.u32 %v12431_v58, 16 }
 0x143   :  { %3450 = vmatprep.mubr.bf16.mxu0 %v9560_v44  ;;  %v9561_v44 = vcombine.low %v1180_v6, %v1183_v25  ;;  %v1189_v5 = vrot.slane %v9354_v45, 5  ;;  %v844_v15 = vsel %vm11610_vm5, %v839_v10, %v12803_v13  ;;  %v862_v20 = vor.u32 %v861_v63, %v858_v3  ;;  %v12867_v42 = vld [vmem:[%s16173_s0 + $0x58] sm:$0xf]  ;;  %v12872_v13 = vld [vmem:[%s16173_s0 + $0x5c] sm:$0x1] }
 0x144   :  { %v854_v60 = vsel %vm11610_vm5, %v849_v30, %v853_v19  ;;  %v872_v50 = vor.u32 %v871_v16, %v12845_v40  ;;  %v889_v6 = vshll.u32 %v12416_v29, 16  ;;  %v875_v25 = vshll.u32 %v9354_v45, 16  ;;  %v9448_v10 = vld [vmem:[%s16173_s0 + $0x54] sm:$0xe] }
 0x145   :  { %v10282_v53 = vpop.f32.mrb[40].mxu0  ;;  %v1193_v58 = vrot.slane %v12416_v29, 5  ;;  %v1187_v3 = vsel %vm11583_vm4, %v9386_v62, %v1186_v8  ;;  %v1190_v63 = vsel %vm11583_vm4, %v1188_v35, %v1189_v5  ;;  %v9371_v29 = vld [vmem:[%s16173_s0 + $0x6c] sm:$0xe]  ;;  %v1781_v45 = vrot.slane %v12867_v42, 5 }
 0x146   :  { %v10283_v1 = vpop.f32.mrb[41].mxu0  ;;  %v928_v30 = vshrl.u32 %v12443_v12, 16  ;;  %v9545_v19 = vcombine.low %v844_v15, %v854_v60  ;;  %v863_v16 = vrot.slane %v862_v20, 4  ;;  %v9355_v8 = vld [vmem:[%s16173_s0 + $0x74] sm:$0x1]  ;;  %v895_v62 = vrot.slane %v893_v23, 4 }
 0x147   :  { %v12850_v51 = vadd.f32 %v10283_v1, %v10282_v53  ;;  %v10285_v34 = vpop.f32.mrb[42].mxu0  ;;  %v1784_v53 = vrot.slane %v12872_v13, 5  ;;  %v9464_v1 = vrot.slane %v9448_v10, 9  ;;  %v1783_v35 = vrot.slane %v1781_v45, 4 }
 0x148   :  { %v10286_v28 = vpop.f32.mrb[43].mxu0  ;;  %v877_v31 = vrot.slane %v875_v25, 5  ;;  %v9387_v46 = vrot.slane %v9371_v29, 9  ;;  %v1195_v60 = vrot.slane %v1193_v58, 4  ;;  %v931_v23 = vshll.u32 %v12443_v12, 16 }
 0x149   :  { %v12857_v24 = vadd.f32 %v10286_v28, %v10285_v34  ;;  %v12890_v34 = vrot.slane %v889_v6, 5  ;;  %v9562_v28 = vcombine.low %v1187_v3, %v1190_v63  ;;  %v12894_v7 = vsel %vm11583_vm4, %v9464_v1, %v1781_v45 }
 0x14a   :  { %3451 = vmatmul.mubr.bf16.gmra.mrb[148].mxu0 %v9544_v11  ;;  %16232 = vst [vmem:[#allocation21_spill] sm:$0xff] %v12894_v7  ;;  %v906_v6 = vrot.slane %v904_v14, 4  ;;  %v886_v25 = vor.u32 %v12847_v38, %v12837_v41  ;;  %v899_v45 = vshll.u32 %v9355_v8, 16  ;;  %v913_v1 = vshll.u32 %v12436_v59, 16 }
 0x14b   :  { %16231 = vst [vmem:[#allocation20_spill] sm:$0xff] %v12857_v24  ;;  %3458 = vmatprep.mubr.bf16.mxu0 %v9561_v44  ;;  %v873_v44 = vrot.slane %v872_v50, 4  ;;  %v1196_v24 = vrot.slane %v9355_v8, 5  ;;  %v12900_v50 = vsel %vm11583_vm4, %v1783_v35, %v1784_v53  ;;  %v896_v29 = vor.u32 %v895_v62, %v12890_v34 }
 0x14c   :  { %16233 = vst [vmem:[#allocation22_spill] sm:$0xff] %v12900_v50  ;;  %v12911_v53 = vrot.slane %v928_v30, 4  ;;  %v941_v14 = vshrl.u32 %v12448_v4, 16  ;;  %v868_v12 = vsel %vm11610_vm5, %v863_v16, %v12845_v40  ;;  %v1194_v38 = vsel %vm11583_vm4, %v9387_v46, %v1193_v58  ;;  %v9372_v40 = vld [vmem:[%s16173_s0 + $0x78] sm:$0xe] }
 0x14d   :  { %v10288_v11 = vpop.f32.mrb[44].mxu0  ;;  %v878_v41 = vsel %vm11610_vm5, %v873_v44, %v877_v31  ;;  %v1197_v8 = vsel %vm11583_vm4, %v1195_v60, %v1196_v24  ;;  %v12924_v30 = vrot.slane %v931_v23, 5  ;;  %v887_v62 = vrot.slane %v886_v25, 4 }
 0x14e   :  { %v10289_v5 = vpop.f32.mrb[45].mxu0  ;;  %v897_v16 = vrot.slane %v896_v29, 4  ;;  %v901_v44 = vrot.slane %v899_v45, 5  ;;  %v12932_v46 = vrot.slane %v913_v1, 5  ;;  %v16234_v24 = vshrl.u32 %v12436_v59, 16 }
 0x14f   :  { %v12896_v15 = vadd.f32 %v10289_v5, %v10288_v11  ;;  %v10291_v20 = vpop.f32.mrb[46].mxu0  ;;  %v909_v11 = vrot.slane %v907_v56, 5  ;;  %v1200_v56 = vrot.slane %v12436_v59, 5  ;;  %v952_v35 = vshrl.u32 %v12458_v17, 16 }
 0x150   :  { %v10292_v10 = vpop.f32.mrb[47].mxu0  ;;  %v919_v58 = vrot.slane %v16234_v24, 4  ;;  %v955_v5 = vshll.u32 %v12458_v17, 16  ;;  %v9563_v60 = vcombine.low %v1194_v38, %v1197_v8  ;;  %v9388_v25 = vrot.slane %v9372_v40, 9 }
 0x151   :  { %v12907_v63 = vadd.f32 %v10292_v10, %v10291_v20  ;;  %v9546_v20 = vcombine.low %v868_v12, %v878_v41  ;;  %v1202_v3 = vrot.slane %v1200_v56, 4  ;;  %v976_v45 = vshrl.u32 %v12473_v55, 16 }
 0x152   :  { %3459 = vmatmul.mubr.bf16.gmra.mrb[152].mxu0 %v9545_v19  ;;  %v9356_v19 = vld [vmem:[%s16173_s0 + $0x80] sm:$0x1]  ;;  %v892_v59 = vsel %vm11610_vm5, %v887_v62, %v12890_v34  ;;  %v910_v24 = vor.u32 %v909_v11, %v906_v6  ;;  %v902_v12 = vsel %vm11610_vm5, %v897_v16, %v901_v44  ;;  %v920_v41 = vor.u32 %v919_v58, %v12932_v46  ;;  %v12960_v34 = vld [vmem:[%s16173_s0 + $0x74] sm:$0x1]  ;;  %v9450_v62 = vld [vmem:[%s16173_s0 + $0x6c] sm:$0xe] }
 0x153   :  { %3466 = vmatprep.mubr.bf16.mxu0 %v9562_v28  ;;  %v1203_v50 = vrot.slane %v9356_v19, 5  ;;  %v937_v38 = vshll.u32 %v12448_v4, 16  ;;  %v923_v8 = vshll.u32 %v9356_v19, 16  ;;  %v1207_v40 = vrot.slane %v12448_v4, 5  ;;  %v9373_v4 = vld [vmem:[%s16173_s0 + $0x84] sm:$0xe] }
 0x154   :  { %v1201_v6 = vsel %vm11583_vm4, %v9388_v25, %v1200_v56  ;;  %v1798_v16 = vrot.slane %v12960_v34, 5  ;;  %v979_v44 = vshll.u32 %v12473_v55, 16  ;;  %v9547_v58 = vcombine.low %v892_v59, %v902_v12 }
 0x155   :  { %v10294_v31 = vpop.f32.mrb[48].mxu0  ;;  %v1204_v11 = vsel %vm11583_vm4, %v1202_v3, %v1203_v50  ;;  %v9357_v50 = vld [vmem:[%s16173_s0 + $0x8c] sm:$0x1]  ;;  %v9466_v3 = vrot.slane %v9450_v62, 9  ;;  %v925_v7 = vrot.slane %v923_v8, 5  ;;  %v1209_v12 = vrot.slane %v1207_v40, 4 }
 0x156   :  { %v10295_v28 = vpop.f32.mrb[49].mxu0  ;;  %v9564_v29 = vcombine.low %v1201_v6, %v1204_v11  ;;  %v12993_v11 = vrot.slane %v976_v45, 4  ;;  %v13006_v45 = vrot.slane %v979_v44, 5 }
 0x157   :  { %v12938_v23 = vadd.f32 %v10295_v28, %v10294_v31  ;;  %v10297_v10 = vpop.f32.mrb[50].mxu0  ;;  %v12955_v31 = vld [vmem:[%s16173_s0 + $0x70] sm:$0xf]  ;;  %v911_v28 = vrot.slane %v910_v24, 4 }
 0x158   :  { %v10298_v1 = vpop.f32.mrb[51].mxu0  ;;  %v1795_v19 = vrot.slane %v12955_v31, 5 }
 0x159   :  { %16235 = vst [vmem:[#allocation23_spill] sm:$0xff] %v12938_v23  ;;  %v12945_v17 = vadd.f32 %v10298_v1, %v10297_v10  ;;  %v943_v10 = vrot.slane %v941_v14, 4  ;;  %v1210_v23 = vrot.slane %v9357_v50, 5  ;;  %v957_v14 = vrot.slane %v955_v5, 5 }
 0x15a   :  { %3467 = vmatmul.mubr.bf16.gmra.mrb[156].mxu0 %v9546_v20  ;;  %v921_v20 = vrot.slane %v920_v41, 4  ;;  %v1797_v25 = vrot.slane %v1795_v19, 4  ;;  %v12982_v55 = vsel %vm11583_vm4, %v9466_v3, %v1795_v19  ;;  %v934_v19 = vor.u32 %v12924_v30, %v12911_v53 }
 0x15b   :  { %16236 = vst [vmem:[#allocation24_spill] sm:$0xff] %v12945_v17  ;;  %3474 = vmatprep.mubr.bf16.mxu0 %v9563_v60  ;;  %v12978_v60 = vrot.slane %v937_v38, 5  ;;  %v9389_v17 = vrot.slane %v9373_v4, 9  ;;  %16237 = vst [vmem:[#allocation25_spill] sm:$0xff] %v12982_v55  ;;  %v954_v38 = vrot.slane %v952_v35, 4  ;;  %v916_v35 = vsel %vm11610_vm5, %v911_v28, %v12932_v46 }
 0x15c   :  { %v12988_v41 = vsel %vm11583_vm4, %v1797_v25, %v1798_v16  ;;  %v926_v5 = vsel %vm11610_vm5, %v921_v20, %v925_v7  ;;  %v947_v16 = vshll.u32 %v9357_v50, 16  ;;  %v1211_v53 = vsel %vm11583_vm4, %v1209_v12, %v1210_v23  ;;  %v9358_v7 = vld [vmem:[%s16173_s0 + $0x98] sm:$0x1] }
 0x15d   :  { %v10300_v56 = vpop.f32.mrb[52].mxu0  ;;  %16238 = vst [vmem:[#allocation26_spill] sm:$0xff] %v12988_v41  ;;  %v944_v3 = vor.u32 %v943_v10, %v12978_v60  ;;  %v1208_v25 = vsel %vm11583_vm4, %v9389_v17, %v1207_v40  ;;  %v1214_v30 = vrot.slane %v12463_v47, 5  ;;  %v1003_v46 = vshll.u32 %v12492_v48, 16 }
 0x15e   :  { %v10301_v1 = vpop.f32.mrb[53].mxu0  ;;  %v9548_v40 = vcombine.low %v916_v35, %v926_v5  ;;  %v935_v28 = vrot.slane %v934_v19, 4  ;;  %v9565_v20 = vcombine.low %v1208_v25, %v1211_v53  ;;  %v949_v10 = vrot.slane %v947_v16, 5 }
 0x15f   :  { %v12984_v59 = vadd.f32 %v10301_v1, %v10300_v56  ;;  %v10303_v24 = vpop.f32.mrb[54].mxu0  ;;  %v961_v56 = vshll.u32 %v12463_v47, 16  ;;  %v945_v23 = vrot.slane %v944_v3, 4  ;;  %v1216_v62 = vrot.slane %v1214_v30, 4 }
 0x160   :  { %v10304_v6 = vpop.f32.mrb[55].mxu0  ;;  %v1217_v41 = vrot.slane %v9358_v7, 5  ;;  %v13030_v44 = vrot.slane %v1003_v46, 5  ;;  %v1024_v19 = vshrl.u32 %v12511_v18, 16  ;;  %v958_v35 = vor.u32 %v957_v14, %v954_v38  ;;  %v13052_v38 = vld [vmem:[%s16173_s0 + $0x8c] sm:$0x1] }
 0x161   :  { %v12995_v4 = vadd.f32 %v10304_v6, %v10303_v24  ;;  %v13022_v1 = vrot.slane %v961_v56, 5  ;;  %v1027_v5 = vshll.u32 %v12511_v18, 16  ;;  %v985_v56 = vshll.u32 %v12478_v32, 16  ;;  %v13047_v18 = vld [vmem:[%s16173_s0 + $0x88] sm:$0xf] }
 0x162   :  { %3475 = vmatmul.mubr.bf16.gmra.mrb[160].mxu0 %v9547_v58  ;;  %v1000_v58 = vshrl.u32 %v12492_v48, 16  ;;  %v16239_v48 = vshrl.u32 %v12463_v47, 16  ;;  %v940_v25 = vsel %vm11610_vm5, %v935_v28, %v12978_v60  ;;  %v950_v53 = vsel %vm11610_vm5, %v945_v23, %v949_v10  ;;  %v9375_v23 = vld [vmem:[%s16173_s0 + $0x9c] sm:$0xe] }
 0x163   :  { %3482 = vmatprep.mubr.bf16.mxu0 %v9564_v29  ;;  %v9374_v29 = vld [vmem:[%s16173_s0 + $0x90] sm:$0xe]  ;;  %v971_v46 = vshll.u32 %v9358_v7, 16  ;;  %v1218_v14 = vsel %vm11583_vm4, %v1216_v62, %v1217_v41  ;;  %v9452_v7 = vld [vmem:[%s16173_s0 + $0x84] sm:$0xe]  ;;  %v959_v28 = vrot.slane %v958_v35, 4  ;;  %v9549_v41 = vcombine.low %v940_v25, %v950_v53 }
 0x164   :  { %v967_v24 = vrot.slane %v16239_v48, 4  ;;  %v9390_v8 = vrot.slane %v9374_v29, 9  ;;  %v13028_v55 = vrot.slane %v1000_v58, 4  ;;  %v1809_v29 = vrot.slane %v13047_v18, 5  ;;  %v9359_v62 = vld [vmem:[%s16173_s0 + $0xa4] sm:$0x1] }
 0x165   :  { %v10306_v17 = vpop.f32.mrb[56].mxu0  ;;  %v16242_v10 = vshrl.u32 %v12478_v32, 16  ;;  %v973_v35 = vrot.slane %v971_v46, 5  ;;  %v9391_v53 = vrot.slane %v9375_v23, 9 }
 0x166   :  { %v10307_v50 = vpop.f32.mrb[57].mxu0  ;;  %v968_v58 = vor.u32 %v967_v24, %v13022_v1  ;;  %v1215_v60 = vsel %vm11583_vm4, %v9390_v8, %v1214_v30  ;;  %v1221_v8 = vrot.slane %v12478_v32, 5  ;;  %v9468_v30 = vrot.slane %v9452_v7, 9 }
 0x167   :  { %v13026_v12 = vadd.f32 %v10307_v50, %v10306_v17  ;;  %v10309_v6 = vpop.f32.mrb[58].mxu0  ;;  %v1812_v17 = vrot.slane %v13052_v38, 5  ;;  %v991_v48 = vrot.slane %v16242_v10, 4  ;;  %v1811_v24 = vrot.slane %v1809_v29, 4 }
 0x168   :  { %v10310_v3 = vpop.f32.mrb[59].mxu0  ;;  %v13078_v16 = vsel %vm11583_vm4, %v9468_v30, %v1809_v29  ;;  %v1048_v29 = vshrl.u32 %v12530_v0, 16  ;;  %v1051_v30 = vshll.u32 %v12530_v0, 16  ;;  %v9360_v0 = vld [vmem:[%s16173_s0 + $0xb0] sm:$0x1] }
 0x169   :  { %16240 = vst [vmem:[#allocation27_spill] sm:$0xff] %v13026_v12  ;;  %v13035_v47 = vadd.f32 %v10310_v3, %v10309_v6  ;;  %v969_v3 = vrot.slane %v968_v58, 4  ;;  %16243 = vst [vmem:[#allocation29_spill] sm:$0xff] %v13078_v16  ;;  %v13086_v32 = vsel %vm11583_vm4, %v1811_v24, %v1812_v17  ;;  %v11460_v58 = vld [vmem:[%s16173_s0 + $0xac] sm:$0xf]  ;;  %v13097_v17 = vrot.slane %v1027_v5, 5 }
 0x16a   :  { %3483 = vmatmul.mubr.bf16.gmra.mrb[164].mxu0 %v9548_v40  ;;  %v13063_v40 = vrot.slane %v1024_v19, 4  ;;  %v9566_v19 = vcombine.low %v1215_v60, %v1218_v14  ;;  %16245 = vst [vmem:[#allocation31_spill] sm:$0xff] %v13086_v32  ;;  %v1224_v60 = vrot.slane %v9359_v62, 5  ;;  %v1009_v46 = vshll.u32 %v11460_v58, 16  ;;  %v9376_v24 = vld [vmem:[%s16173_s0 + $0xa8] sm:$0xe] }
 0x16b   :  { %16241 = vst [vmem:[#allocation28_spill] sm:$0xff] %v13035_v47  ;;  %3490 = vmatprep.mubr.bf16.mxu0 %v9565_v20  ;;  %v13072_v20 = vrot.slane %v985_v56, 5  ;;  %v982_v56 = vor.u32 %v13006_v45, %v12993_v11  ;;  %v1223_v47 = vrot.slane %v1221_v8, 4  ;;  %v995_v45 = vshll.u32 %v9359_v62, 16 }
 0x16c   :  { %v974_v62 = vsel %vm11610_vm5, %v969_v3, %v973_v35  ;;  %v16247_v3 = vshrl.u32 %v12497_v9, 16  ;;  %v13128_v32 = vrot.slane %v1051_v30, 5  ;;  %v9361_v9 = vld [vmem:[%s16173_s0 + $0xbc] sm:$0x1]  ;;  %v1006_v30 = vor.u32 %v13030_v44, %v13028_v55 }
 0x16d   :  { %v10312_v50 = vpop.f32.mrb[60].mxu0  ;;  %v992_v11 = vor.u32 %v991_v48, %v13072_v20  ;;  %v983_v5 = vrot.slane %v982_v56, 4  ;;  %v13126_v56 = vrot.slane %v1048_v29, 4  ;;  %v997_v14 = vrot.slane %v995_v45, 5 }
 0x16e   :  { %v10313_v6 = vpop.f32.mrb[61].mxu0  ;;  %v1015_v35 = vrot.slane %v16247_v3, 4 }
 0x16f   :  { %v13080_v7 = vadd.f32 %v10313_v6, %v10312_v50  ;;  %v10315_v25 = vpop.f32.mrb[62].mxu0  ;;  %v1228_v6 = vrot.slane %v11460_v58, 5  ;;  %v993_v58 = vrot.slane %v992_v11, 4  ;;  %v9392_v50 = vrot.slane %v9376_v24, 9 }
 0x170   :  { %v10316_v10 = vpop.f32.mrb[63].mxu0  ;;  %v988_v45 = vsel %vm11610_vm5, %v983_v5, %v13072_v20  ;;  %v1019_v24 = vshll.u32 %v9360_v0, 16  ;;  %v9377_v20 = vld [vmem:[%s16173_s0 + $0xb4] sm:$0xe]  ;;  %v1007_v5 = vrot.slane %v1006_v30, 4 }
 0x171   :  { %16244 = vst [vmem:[#allocation30_spill] sm:$0xff] %v13080_v7  ;;  %v13094_v23 = vadd.f32 %v10316_v10, %v10315_v25  ;;  %v964_v25 = vsel %vm11610_vm5, %v959_v28, %v13022_v1  ;;  %v1225_v1 = vsel %vm11583_vm4, %v1223_v47, %v1224_v60  ;;  %v13122_v28 = vrot.slane %v1009_v46, 5 }
 0x172   :  { %3491 = vmatmul.mubr.bf16.gmra.mrb[168].mxu0 %v9549_v41  ;;  %v13115_v41 = vld [vmem:[%s16173_s0 + $0xb8] sm:$0xf]  ;;  %v1230_v7 = vrot.slane %v1228_v6, 4  ;;  %v16248_v46 = vshrl.u32 %v12516_v57, 16  ;;  %v1229_v57 = vsel %vm11583_vm4, %v9392_v50, %v1228_v6  ;;  %v13166_v50 = vld [vmem:[%s16173_s0 + $0xa4] sm:$0x1] }
 0x173   :  { %16246 = vst [vmem:[#allocation32_spill] sm:$0xff] %v13094_v23  ;;  %3498 = vmatprep.mubr.bf16.mxu0 %v9566_v19  ;;  %v1033_v48 = vshll.u32 %v13115_v41, 16  ;;  %v1222_v19 = vsel %vm11583_vm4, %v9391_v53, %v1221_v8  ;;  %v9550_v23 = vcombine.low %v964_v25, %v974_v62  ;;  %v1231_v8 = vrot.slane %v9360_v0, 5 }
 0x174   :  { %v9567_v47 = vcombine.low %v1222_v19, %v1225_v1  ;;  %v1039_v29 = vrot.slane %v16248_v46, 4  ;;  %v1235_v44 = vrot.slane %v13115_v41, 5  ;;  %v1826_v6 = vrot.slane %v13166_v50, 5 }
 0x175   :  { %v10334_v10 = vpop.f32.mrb[64].mxu0  ;;  %v13133_v60 = vrot.slane %v1033_v48, 5  ;;  %v998_v48 = vsel %vm11610_vm5, %v993_v58, %v997_v14  ;;  %v1232_v55 = vsel %vm11583_vm4, %v1230_v7, %v1231_v8  ;;  %v13161_v14 = vld [vmem:[%s16173_s0 + $0xa0] sm:$0xf]  ;;  %v1021_v41 = vrot.slane %v1019_v24, 5 }
 0x176   :  { %v10335_v16 = vpop.f32.mrb[65].mxu0  ;;  %v9551_v3 = vcombine.low %v988_v45, %v998_v48  ;;  %v1237_v8 = vrot.slane %v1235_v44, 4 }
 0x177   :  { %v10336_v53 = vadd.f32 %v10335_v16, %v10334_v10  ;;  %v10337_v12 = vpop.f32.mrb[66].mxu0  ;;  %v1016_v16 = vor.u32 %v1015_v35, %v13122_v28  ;;  %v1040_v7 = vor.u32 %v1039_v29, %v13133_v60  ;;  %v9568_v35 = vcombine.low %v1229_v57, %v1232_v55  ;;  %v11462_v57 = vld [vmem:[%s16173_s0 + $0xc4] sm:$0xf]  ;;  %v13201_v55 = vld [vmem:[%s16173_s0 + $0x1c] sm:$0xf] }
 0x178   :  { %v10338_v11 = vpop.f32.mrb[67].mxu0 }
 0x179   :  { %v13144_v25 = vadd.f32 %v10336_v53, %v12480_v37  ;;  %v10339_v62 = vadd.f32 %v10338_v11, %v10337_v12  ;;  %v1030_v37 = vor.u32 %v13097_v17, %v13063_v40  ;;  %v1043_v12 = vshll.u32 %v9361_v9, 16  ;;  %v9454_v40 = vld [vmem:[%s16173_s0 + $0x9c] sm:$0xe] }
 0x17a   :  { %3499 = vmatmul.mubr.bf16.gmra.mrb[172].mxu0 %v9550_v23  ;;  %v1823_v17 = vrot.slane %v13161_v14, 5  ;;  %v1017_v0 = vrot.slane %v1016_v16, 4  ;;  %v9470_v19 = vrot.slane %v9454_v40, 9  ;;  %v1238_v53 = vrot.slane %v9361_v9, 5  ;;  %v13184_v16 = vld [vmem:[%s16173_s0 + $0x18] sm:$0xf] }
 0x17b   :  { %v13169_v23 = vadd.f32 %v10339_v62, %v12484_v27  ;;  %3506 = vmatprep.mubr.bf16.mxu0 %v9567_v47  ;;  %v9393_v27 = vrot.slane %v9377_v20, 9  ;;  %v1031_v47 = vrot.slane %v1030_v37, 4  ;;  %v1041_v62 = vrot.slane %v1040_v7, 4 }
 0x17c   :  { %v1825_v10 = vrot.slane %v1823_v17, 4  ;;  %v13179_v46 = vsel %vm11583_vm4, %v9470_v19, %v1823_v17  ;;  %v1045_v30 = vrot.slane %v1043_v12, 5  ;;  %v1012_v9 = vsel %vm11610_vm5, %v1007_v5, %v13122_v28  ;;  %v9378_v5 = vld [vmem:[%s16173_s0 + $0xc0] sm:$0xe]  ;;  %v9362_v19 = vld [vmem:[%s16173_s0 + $0xc8] sm:$0x1] }
 0x17d   :  { %v10340_v1 = vpop.f32.mrb[68].mxu0  ;;  %16249 = vst [vmem:[#allocation33_spill] sm:$0xff] %v13179_v46  ;;  %v1022_v48 = vsel %vm11610_vm5, %v1017_v0, %v1021_v41  ;;  %v1057_v20 = vshll.u32 %v11462_v57, 16  ;;  %v1236_v7 = vsel %vm11583_vm4, %v9393_v27, %v1235_v44  ;;  %v1242_v40 = vrot.slane %v11462_v57, 5 }
 0x17e   :  { %v10341_v58 = vpop.f32.mrb[69].mxu0  ;;  %v13188_v45 = vsel %vm11583_vm4, %v1825_v10, %v1826_v6  ;;  %v1239_v17 = vsel %vm11583_vm4, %v1237_v8, %v1238_v53  ;;  %v1036_v6 = vsel %vm11610_vm5, %v1031_v47, %v13133_v60  ;;  %v1300_v0 = vshll.u32 %v13184_v16, 16  ;;  %v13237_v47 = vld [vmem:[%s16173_s0 + $0x24] sm:$0xf] }
 0x17f   :  { %v10342_v29 = vadd.f32 %v10341_v58, %v10340_v1  ;;  %v10343_v11 = vpop.f32.mrb[70].mxu0  ;;  %16250 = vst [vmem:[#allocation34_spill] sm:$0xff] %v13188_v45  ;;  %v1046_v44 = vsel %vm11610_vm5, %v1041_v62, %v1045_v30  ;;  %v1306_v60 = vshll.u32 %v13201_v55, 16  ;;  %v1310_v1 = vshrl.u32 %v13201_v55, 16  ;;  %v9427_v30 = vld [vmem:[%s16173_s0 + $0x20] sm:$0x1] }
 0x180   :  { %v10344_v24 = vpop.f32.mrb[71].mxu0  ;;  %v16251_v27 = vshrl.u32 %v12535_v22, 16  ;;  %v9569_v8 = vcombine.low %v1236_v7, %v1239_v17  ;;  %v1244_v53 = vrot.slane %v1242_v40, 4  ;;  %v1245_v62 = vrot.slane %v9362_v19, 5 }
 0x181   :  { %v13206_v12 = vadd.f32 %v10342_v29, %v12499_v43  ;;  %v10345_v28 = vadd.f32 %v10344_v24, %v10343_v11  ;;  %v1297_v43 = vshrl.u32 %v13184_v16, 16  ;;  %v9553_v11 = vcombine.low %v1036_v6, %v1046_v44 }
 0x182   :  { %3507 = vmatmul.mubr.bf16.gmra.mrb[176].mxu0 %v9551_v3  ;;  %v13230_v3 = vrot.slane %v1057_v20, 5  ;;  %v1063_v10 = vrot.slane %v16251_v27, 4  ;;  %v1302_v22 = vrot.slane %v1300_v0, 5  ;;  %v1321_v6 = vshrl.u32 %v13237_v47, 16  ;;  %v16252_v27 = vld [vmem:[#allocation4_spill] sm:$0xff] }
 0x183   :  { %v13221_v41 = vadd.f32 %v10345_v28, %v12503_v39  ;;  %3514 = vmatprep.mubr.bf16.mxu0 %v9568_v35  ;;  %v9552_v39 = vcombine.low %v1012_v9, %v1022_v48  ;;  %v9394_v35 = vrot.slane %v9378_v5, 9  ;;  %v1299_v24 = vrot.slane %v1297_v43, 4 }
 0x184   :  { %v1054_v9 = vor.u32 %v13128_v32, %v13126_v56  ;;  %v13244_v48 = vrot.slane %v1306_v60, 5  ;;  %v1312_v28 = vrot.slane %v1310_v1, 4  ;;  %v1064_v17 = vor.u32 %v1063_v10, %v13230_v3  ;;  %v13261_v1 = vld [vmem:[%s16173_s0 + $0xb8] sm:$0xf]  ;;  %v13266_v10 = vld [vmem:[%s16173_s0 + $0xbc] sm:$0x1] }
 0x185   :  { %v10346_v58 = vpop.f32.mrb[72].mxu0  ;;  %v1067_v5 = vshll.u32 %v9362_v19, 16  ;;  %v1324_v44 = vshll.u32 %v13237_v47, 16  ;;  %v1243_v0 = vsel %vm11583_vm4, %v9394_v35, %v1242_v40  ;;  %v1246_v32 = vsel %vm11583_vm4, %v1244_v53, %v1245_v62  ;;  %v16253_v40 = vld [vmem:[#allocation5_spill] sm:$0xff] }
 0x186   :  { %v10347_v29 = vpop.f32.mrb[73].mxu0  ;;  %v1303_v56 = vor.u32 %v1302_v22, %v1299_v24  ;;  %v1330_v60 = vshll.u32 %v12671_v54, 16  ;;  %v1334_v19 = vshrl.u32 %v12671_v54, 16  ;;  %v1313_v35 = vor.u32 %v1312_v28, %v13244_v48  ;;  %v9456_v54 = vld [vmem:[%s16173_s0 + $0xb4] sm:$0xe] }
 0x187   :  { %v10348_v57 = vadd.f32 %v10347_v29, %v10346_v58  ;;  %v10349_v20 = vpop.f32.mrb[74].mxu0  ;;  %v1316_v58 = vshll.u32 %v9427_v30, 16  ;;  %v1837_v53 = vrot.slane %v13261_v1, 5  ;;  %v1840_v29 = vrot.slane %v13266_v10, 5 }
 0x188   :  { %v10350_v7 = vpop.f32.mrb[75].mxu0  ;;  %v1055_v62 = vrot.slane %v1054_v9, 4  ;;  %v1323_v30 = vrot.slane %v1321_v6, 4  ;;  %v1326_v24 = vrot.slane %v1324_v44, 5  ;;  %v9472_v22 = vrot.slane %v9456_v54, 9 }
 0x189   :  { %v13250_v37 = vadd.f32 %v10348_v57, %v16252_v27  ;;  %v10351_v43 = vadd.f32 %v10350_v7, %v10349_v20  ;;  %v9570_v20 = vcombine.low %v1243_v0, %v1246_v32  ;;  %v1065_v7 = vrot.slane %v1064_v17, 4 }
 0x18a   :  { %3515 = vmatmul.mubr.bf16.gmra.mrb[180].mxu0 %v9552_v39  ;;  %v1069_v27 = vrot.slane %v1067_v5, 5  ;;  %v1839_v28 = vrot.slane %v1837_v53, 4  ;;  %v13282_v45 = vrot.slane %v1330_v60, 5  ;;  %v1336_v46 = vrot.slane %v1334_v19, 4  ;;  %v13291_v5 = vld [vmem:[%s16173_s0 + $0x34] sm:$0xf] }
 0x18b   :  { %v13269_v39 = vadd.f32 %v10351_v43, %v16253_v40  ;;  %3522 = vmatprep.mubr.bf16.mxu0 %v9569_v8  ;;  %v13280_v8 = vld [vmem:[%s16173_s0 + $0x30] sm:$0xf]  ;;  %v1304_v40 = vrot.slane %v1303_v56, 4  ;;  %v13286_v9 = vsel %vm11583_vm4, %v9472_v22, %v1837_v53  ;;  %v1314_v0 = vrot.slane %v1313_v35, 4  ;;  %v16257_v35 = vld [vmem:[#allocation6_spill] sm:$0xff] }
 0x18c   :  { %16255 = vst [vmem:[#allocation5_spill] sm:$0xff] %v13286_v9  ;;  %v1318_v17 = vrot.slane %v1316_v58, 5  ;;  %v13295_v32 = vsel %vm11583_vm4, %v1839_v28, %v1840_v29  ;;  %v1327_v60 = vor.u32 %v1326_v24, %v1323_v30  ;;  %v1345_v19 = vshrl.u32 %v13280_v8, 16  ;;  %v16259_v28 = vld [vmem:[#allocation7_spill] sm:$0xff] }
 0x18d   :  { %16254 = vst [vmem:[#allocation4_spill] sm:$0xff] %v13269_v39  ;;  %v10352_v57 = vpop.f32.mrb[76].mxu0  ;;  %16256 = vst [vmem:[#allocation35_spill] sm:$0xff] %v13295_v32  ;;  %v1348_v54 = vshll.u32 %v13280_v8, 16  ;;  %v1337_v29 = vor.u32 %v1336_v46, %v13282_v45  ;;  %v1354_v30 = vshll.u32 %v13291_v5, 16  ;;  %v1358_v24 = vshrl.u32 %v13291_v5, 16 }
 0x18e   :  { %v10353_v43 = vpop.f32.mrb[77].mxu0  ;;  %v1319_v46 = vsel %vm11610_vm5, %v1314_v0, %v1318_v17 }
 0x18f   :  { %v10354_v6 = vadd.f32 %v10353_v43, %v10352_v57  ;;  %v10355_v44 = vpop.f32.mrb[78].mxu0  ;;  %v11463_v57 = vld [vmem:[%s16173_s0 + $0x2c] sm:$0x1]  ;;  %v1360_v53 = vrot.slane %v1358_v24, 4 }
 0x190   :  { %v10356_v56 = vpop.f32.mrb[79].mxu0  ;;  %v1340_v43 = vshll.u32 %v11463_v57, 16  ;;  %v1350_v57 = vrot.slane %v1348_v54, 5 }
 0x191   :  { %v13302_v58 = vadd.f32 %v10354_v6, %v16257_v35  ;;  %v10357_v22 = vadd.f32 %v10356_v56, %v10355_v44  ;;  %v1060_v6 = vsel %vm11610_vm5, %v1055_v62, %v13230_v3  ;;  %v1070_v44 = vsel %vm11610_vm5, %v1065_v7, %v1069_v27 }
 0x192   :  { %3523 = vmatmul.mubr.bf16.gmra.mrb[184].mxu0 %v9553_v11  ;;  %v1309_v11 = vsel %vm11610_vm5, %v1304_v40, %v13244_v48  ;;  %v1328_v56 = vrot.slane %v1327_v60, 4  ;;  %v1347_v35 = vrot.slane %v1345_v19, 4  ;;  %v9554_v62 = vcombine.low %v1060_v6, %v1070_v44  ;;  %v13333_v48 = vld [vmem:[%s16173_s0 + $0x3c] sm:$0xf] }
 0x193   :  { %16258 = vst [vmem:[#allocation6_spill] sm:$0xff] %v13302_v58  ;;  %v13311_v39 = vadd.f32 %v10357_v22, %v16259_v28  ;;  %3530 = vmatprep.mubr.bf16.mxu0 %v9570_v20  ;;  %v1342_v28 = vrot.slane %v1340_v43, 5  ;;  %v13326_v20 = vld [vmem:[%s16173_s0 + $0x38] sm:$0x1]  ;;  %v1338_v7 = vrot.slane %v1337_v29, 4  ;;  %v13328_v27 = vrot.slane %v1354_v30, 5 }
 0x194   :  { %16261 = vst [vmem:[#allocation36_spill] sm:$0xff] %v13326_v20  ;;  %v9587_v17 = vcombine.low %v1309_v11, %v1319_v46  ;;  %v1333_v19 = vsel %vm11610_vm5, %v1328_v56, %v13282_v45  ;;  %v1351_v54 = vor.u32 %v1350_v57, %v1347_v35  ;;  %v16262_v43 = vld [vmem:[#allocation8_spill] sm:$0xff]  ;;  %v1364_v30 = vshll.u32 %v13326_v20, 16  ;;  %v13351_v45 = vld [vmem:[%s16173_s0 + $0xd0] sm:$0xf] }
 0x195   :  { %16260 = vst [vmem:[#allocation7_spill] sm:$0xff] %v13311_v39  ;;  %v10358_v22 = vpop.f32.mrb[80].mxu0  ;;  %v1369_v24 = vshrl.u32 %v13333_v48, 16  ;;  %v1343_v44 = vsel %vm11610_vm5, %v1338_v7, %v1342_v28  ;;  %v1361_v11 = vor.u32 %v1360_v53, %v13328_v27  ;;  %v1372_v46 = vshll.u32 %v13333_v48, 16  ;;  %v13356_v56 = vld [vmem:[%s16173_s0 + $0xd4] sm:$0x1] }
 0x196   :  { %v10359_v3 = vpop.f32.mrb[81].mxu0  ;;  %v16264_v35 = vld [vmem:[#allocation9_spill] sm:$0xff]  ;;  %v1382_v53 = vshrl.u32 %v12779_v33, 16  ;;  %v9458_v28 = vld [vmem:[%s16173_s0 + $0xcc] sm:$0xe]  ;;  %v9571_v7 = vcombine.low %v13184_v16, %v13201_v55 }
 0x197   :  { %v10360_v40 = vadd.f32 %v10359_v3, %v10358_v22  ;;  %v10361_v0 = vpop.f32.mrb[82].mxu0  ;;  %v1378_v22 = vshll.u32 %v12779_v33, 16  ;;  %v1851_v3 = vrot.slane %v13351_v45, 5  ;;  %v1362_v32 = vrot.slane %v1361_v11, 4 }
 0x198   :  { %v10362_v60 = vpop.f32.mrb[83].mxu0  ;;  %v1371_v33 = vrot.slane %v1369_v24, 4  ;;  %v1374_v9 = vrot.slane %v1372_v46, 5  ;;  %v1384_v58 = vrot.slane %v1382_v53, 4  ;;  %v16268_v24 = vld [vmem:[#allocation10_spill] sm:$0xff] }
 0x199   :  { %v13339_v6 = vadd.f32 %v10360_v40, %v16262_v43  ;;  %v10363_v29 = vadd.f32 %v10362_v60, %v10361_v0  ;;  %v9474_v40 = vrot.slane %v9458_v28, 9  ;;  %v9588_v60 = vcombine.low %v1333_v19, %v1343_v44  ;;  %v11331_v19 = vld [vmem:[%s16172_s1 + $0x208] sm:$0xff]  }
 0x19a   :  { %3531 = vmatmul.mubr.bf16.gmra.mrb[188].mxu0 %v9554_v62  ;;  %v1854_v62 = vrot.slane %v13356_v56, 5  ;;  %v1352_v43 = vrot.slane %v1351_v54, 4  ;;  %v13373_v39 = vrot.slane %v1378_v22, 5  ;;  %v13385_v54 = vld [vmem:[%s16173_s0 + $0x48] sm:$0xf]  ;;  %v1375_v28 = vor.u32 %v1374_v9, %v1371_v33 }
 0x19b   :  { %16263 = vst [vmem:[#allocation8_spill] sm:$0xff] %v13339_v6  ;;  %v13359_v57 = vadd.f32 %v10363_v29, %v16264_v35  ;;  %3571 = vmatprep.mubr.bf16.mxu0 %v9587_v17  ;;  %v1366_v29 = vrot.slane %v1364_v30, 5  ;;  %v1853_v35 = vrot.slane %v1851_v3, 4  ;;  %v13395_v46 = vld [vmem:[%s16173_s0 + $0x4c] sm:$0xf] }
 0x19c   :  { %v1357_v22 = vsel %vm11610_vm5, %v1352_v43, %v13328_v27  ;;  %v1396_v27 = vshll.u32 %v13385_v54, 16  ;;  %v1402_v9 = vshll.u32 %v13395_v46, 16 }
 0x19d   :  { %16265 = vst [vmem:[#allocation9_spill] sm:$0xff] %v13359_v57  ;;  %v10364_v0 = vpop.f32.mrb[84].mxu0  ;;  %v13371_v57 = vsel %vm11583_vm4, %v9474_v40, %v1851_v3  ;;  %v13377_v16 = vsel %vm11583_vm4, %v1853_v35, %v1854_v62  ;;  %v1367_v53 = vsel %vm11610_vm5, %v1362_v32, %v1366_v29  ;;  %v1393_v40 = vshrl.u32 %v13385_v54, 16 }
 0x19e   :  { %v10365_v17 = vpop.f32.mrb[85].mxu0  ;;  %16266 = vst [vmem:[#allocation37_spill] sm:$0xff] %v13371_v57  ;;  %16267 = vst [vmem:[#allocation38_spill] sm:$0xff] %v13377_v16  ;;  %v1406_v32 = vshrl.u32 %v13395_v46, 16  ;;  %v9589_v35 = vcombine.low %v1357_v22, %v1367_v53  ;;  %v13426_v16 = vrot.slane %v1402_v9, 5 }
 0x19f   :  { %v10366_v6 = vadd.f32 %v10365_v17, %v10364_v0  ;;  %v10367_v20 = vpop.f32.mrb[86].mxu0  ;;  %v11334_v0 = vld [vmem:[%s16172_s1 + $0x210] sm:$0xff]   ;;  %v1376_v17 = vrot.slane %v1375_v28, 4  ;;  %v1426_v28 = vshll.u32 %v12867_v42, 16 }
 0x1a0   :  { %v10368_v55 = vpop.f32.mrb[87].mxu0  ;;  %v1408_v57 = vrot.slane %v1406_v32, 4  ;;  %v13439_v53 = vld [vmem:[%s16173_s0 + $0x50] sm:$0x1] }
 0x1a1   :  { %v13390_v44 = vadd.f32 %v10366_v6, %v16268_v24  ;;  %v10369_v11 = vadd.f32 %v10368_v55, %v10367_v20  ;;  %v11464_v6 = vld [vmem:[%s16173_s0 + $0x44] sm:$0x1]  ;;  %v1412_v9 = vshll.u32 %v13439_v53, 16 }
 0x1a2   :  { %3572 = vmatmul.mubr.bf16.vlgmr.msra.gmra.mrb[192].mxu0 %v9571_v7  ;;  %v1388_v3 = vshll.u32 %v11464_v6, 16  ;;  %v16270_v20 = vld [vmem:[#allocation11_spill] sm:$0xff]  ;;  %v1385_v7 = vor.u32 %v1384_v58, %v13373_v39  ;;  %v1395_v6 = vrot.slane %v1393_v40, 4 }
 0x1a3   :  { %16269 = vst [vmem:[#allocation10_spill] sm:$0xff] %v13390_v44  ;;  %v13406_v62 = vadd.f32 %v10369_v11, %v16270_v20  ;;  %10985 = vmatpush3.bf16.msra.mxu0 %v12801_v49  ;;  %3579 = vmatprep.mubr.bf16.mxu0 %v9588_v60  ;;  %v13420_v49 = vld [vmem:[%s16173_s0 + $0x54] sm:$0xf]  ;;  %v11465_v60 = vld [vmem:[%s16173_s0 + $0x28] sm:$0xf]  ;;  %v1398_v20 = vrot.slane %v1396_v27, 5  ;;  %v1409_v27 = vor.u32 %v1408_v57, %v13426_v16 }
 0x1a4   :  { %10986 = vmatprep.subr.bf16.mxu0 %v11331_v19  ;;  %v9572_v29 = vcombine.low %v13237_v47, %v11465_v60  ;;  %v1390_v33 = vrot.slane %v1388_v3, 5  ;;  %v1386_v11 = vrot.slane %v1385_v7, 4  ;;  %v1420_v44 = vshll.u32 %v13420_v49, 16  ;;  %v11337_v47 = vld [vmem:[%s16172_s1 + $0x218] sm:$0xff]  }
 0x1a5   :  { %16271 = vst [vmem:[#allocation11_spill] sm:$0xff] %v13406_v62  ;;  %v10370_v43 = vpop.f32.mrb[88].mxu0  ;;  %v1417_v62 = vshrl.u32 %v13420_v49, 16  ;;  %v1430_v3 = vshrl.u32 %v12867_v42, 16  ;;  %v1399_v40 = vor.u32 %v1398_v20, %v1395_v6  ;;  %v9573_v60 = vcombine.low %v13280_v8, %v13291_v5  ;;  %v16272_v6 = vld [vmem:[#allocation13_spill] sm:$0xff] }
 0x1a6   :  { %v10371_v58 = vpop.f32.mrb[89].mxu0  ;;  %v1436_v8 = vshll.u32 %v12872_v13, 16 }
 0x1a7   :  { %v10372_v55 = vadd.f32 %v10371_v58, %v10370_v43  ;;  %v10373_v24 = vpop.f32.mrb[90].mxu0  ;;  %10987 = vmatpush3.bf16.msra.mxu0 %v11331_v19  ;;  %v1419_v32 = vrot.slane %v1417_v62, 4  ;;  %v1422_v43 = vrot.slane %v1420_v44, 5  ;;  %v13456_v58 = vrot.slane %v1426_v28, 5  ;;  %v13468_v62 = vld [vmem:[%s16173_s0 + $0x64] sm:$0xf] }
 0x1a8   :  { %v10374_v30 = vpop.f32.mrb[91].mxu0  ;;  %10988 = vmatprep.subr.bf16.mxu0 %v11334_v0  ;;  %v1454_v13 = vshrl.u32 %v13468_v62, 16 }
 0x1a9   :  { %v13434_v22 = vadd.f32 %v10372_v55, %v12641_v2  ;;  %v10375_v19 = vadd.f32 %v10374_v30, %v10373_v24  ;;  %v1381_v2 = vsel %vm11610_vm5, %v1376_v17, %v13373_v39  ;;  %v1391_v30 = vsel %vm11610_vm5, %v1386_v11, %v1390_v33  ;;  %v13463_v17 = vld [vmem:[%s16173_s0 + $0x60] sm:$0xf]  ;;  %v11343_v11 = vld [vmem:[%s16172_s1 + $0x228] sm:$0xff]  }
 0x1aa   :  { %3580 = vmatmul.mubr.bf16.gmra.mrb[196].mxu0 %v9572_v29  ;;  %v1432_v39 = vrot.slane %v1430_v3, 4  ;;  %v9590_v57 = vcombine.low %v1381_v2, %v1391_v30  ;;  %v1400_v33 = vrot.slane %v1399_v40, 4  ;;  %v1410_v55 = vrot.slane %v1409_v27, 4  ;;  %v16273_v40 = vld [vmem:[#allocation15_spill] sm:$0xff] }
 0x1ab   :  { %v13444_v7 = vadd.f32 %v10375_v19, %v12654_v21  ;;  %3587 = vmatprep.mubr.bf16.mxu0 %v9589_v35  ;;  %10989 = vmatpush3.bf16.msra.mxu0 %v11334_v0  ;;  %v11340_v21 = vld [vmem:[%s16172_s1 + $0x220] sm:$0xff]   ;;  %v1414_v24 = vrot.slane %v1412_v9, 5  ;;  %v1423_v28 = vor.u32 %v1422_v43, %v1419_v32  ;;  %v1444_v2 = vshll.u32 %v13463_v17, 16  ;;  %v11346_v32 = vld [vmem:[%s16172_s1 + $0x230] sm:$0xff]  }
 0x1ac   :  { %10990 = vmatprep.subr.bf16.mxu0 %v11337_v47  ;;  %v1433_v3 = vor.u32 %v1432_v39, %v13456_v58  ;;  %v1450_v30 = vshll.u32 %v13468_v62, 16  ;;  %v1405_v9 = vsel %vm11610_vm5, %v1400_v33, %v13426_v16  ;;  %v11466_v39 = vld [vmem:[%s16173_s0 + $0x40] sm:$0xf]  ;;  %v1456_v33 = vrot.slane %v1454_v13, 4 }
 0x1ad   :  { %v10376_v42 = vpop.f32.mrb[92].mxu0 }
 0x1ae   :  { %v10377_v0 = vpop.f32.mrb[93].mxu0 }
 0x1af   :  { %v10378_v29 = vadd.f32 %v10377_v0, %v10376_v42  ;;  %v10379_v35 = vpop.f32.mrb[94].mxu0  ;;  %10991 = vmatpush3.bf16.msra.mxu0 %v11337_v47  ;;  %v1441_v47 = vshrl.u32 %v13463_v17, 16  ;;  %v1415_v42 = vsel %vm11610_vm5, %v1410_v55, %v1414_v24  ;;  %v9574_v0 = vcombine.low %v13333_v48, %v11466_v39  ;;  %v13507_v48 = vld [vmem:[%s16173_s0 + $0x6c] sm:$0xf] }
 0x1b0   :  { %v10380_v44 = vpop.f32.mrb[95].mxu0  ;;  %10992 = vmatprep.subr.bf16.mxu0 %v11340_v21 }
 0x1b1   :  { %v13475_v20 = vadd.f32 %v10378_v29, %v16272_v6  ;;  %v10381_v19 = vadd.f32 %v10380_v44, %v10379_v35  ;;  %v1438_v29 = vrot.slane %v1436_v8, 5  ;;  %v1443_v16 = vrot.slane %v1441_v47, 4 }
 0x1b2   :  { %3588 = vmatmul.mubr.bf16.gmra.mrb[200].mxu0 %v9573_v60  ;;  %v1434_v60 = vrot.slane %v1433_v3, 4  ;;  %v13497_v44 = vrot.slane %v1450_v30, 5  ;;  %v9591_v6 = vcombine.low %v1405_v9, %v1415_v42  ;;  %v16274_v3 = vld [vmem:[#allocation16_spill] sm:$0xff]  ;;  %v1465_v42 = vshrl.u32 %v13507_v48, 16 }
 0x1b3   :  { %v13483_v27 = vadd.f32 %v10381_v19, %v16273_v40  ;;  %3595 = vmatprep.mubr.bf16.mxu0 %v9590_v57  ;;  %10993 = vmatpush3.bf16.msra.mxu0 %v11340_v21  ;;  %v1424_v21 = vrot.slane %v1423_v28, 4  ;;  %v1446_v57 = vrot.slane %v1444_v2, 5  ;;  %v13502_v19 = vld [vmem:[%s16173_s0 + $0x68] sm:$0x1]  ;;  %v11349_v28 = vld [vmem:[%s16172_s1 + $0x238] sm:$0xff]  }
 0x1b4   :  { %10994 = vmatprep.subr.bf16.mxu0 %v11343_v11  ;;  %v1439_v13 = vsel %vm11610_vm5, %v1434_v60, %v1438_v29  ;;  %v1460_v9 = vshll.u32 %v13502_v19, 16 }
 0x1b5   :  { %v10382_v43 = vpop.f32.mrb[96].mxu0  ;;  %v1429_v30 = vsel %vm11610_vm5, %v1424_v21, %v13456_v58  ;;  %v1447_v40 = vor.u32 %v1446_v57, %v1443_v16  ;;  %v1478_v58 = vshrl.u32 %v12955_v31, 16  ;;  %v9575_v21 = vcombine.low %v13385_v54, %v13395_v46  ;;  %v13537_v54 = vld [vmem:[%s16173_s0 + $0x78] sm:$0xf] }
 0x1b6   :  { %v10383_v35 = vpop.f32.mrb[97].mxu0  ;;  %v9592_v60 = vcombine.low %v1429_v30, %v1439_v13  ;;  %v13542_v30 = vld [vmem:[%s16173_s0 + $0x7c] sm:$0xf] }
 0x1b7   :  { %v10384_v55 = vadd.f32 %v10383_v35, %v10382_v43  ;;  %v10385_v24 = vpop.f32.mrb[98].mxu0  ;;  %10995 = vmatpush3.bf16.msra.mxu0 %v11343_v11  ;;  %v1457_v11 = vor.u32 %v1456_v33, %v13497_v44  ;;  %v16275_v43 = vld [vmem:[#allocation17_spill] sm:$0xff]  ;;  %v1468_v35 = vshll.u32 %v13507_v48, 16  ;;  %v1448_v16 = vrot.slane %v1447_v40, 4 }
 0x1b8   :  { %v10386_v8 = vpop.f32.mrb[99].mxu0  ;;  %10996 = vmatprep.subr.bf16.mxu0 %v11346_v32  ;;  %v1462_v33 = vrot.slane %v1460_v9, 5  ;;  %v1484_v9 = vshll.u32 %v12960_v34, 16 }
 0x1b9   :  { %v13513_v47 = vadd.f32 %v10384_v55, %v16274_v3  ;;  %v10387_v2 = vadd.f32 %v10386_v8, %v10385_v24  ;;  %v1474_v55 = vshll.u32 %v12955_v31, 16  ;;  %v1458_v57 = vrot.slane %v1457_v11, 4 }
 0x1ba   :  { %3596 = vmatmul.mubr.bf16.gmra.mrb[204].mxu0 %v9574_v0  ;;  %v1467_v24 = vrot.slane %v1465_v42, 4  ;;  %v1470_v3 = vrot.slane %v1468_v35, 5  ;;  %v1489_v42 = vshrl.u32 %v13537_v54, 16  ;;  %v1498_v35 = vshll.u32 %v13542_v30, 16 }
 0x1bb   :  { %v13524_v39 = vadd.f32 %v10387_v2, %v16275_v43  ;;  %3603 = vmatprep.mubr.bf16.mxu0 %v9591_v6  ;;  %10997 = vmatpush3.bf16.msra.mxu0 %v11346_v32  ;;  %v1476_v2 = vrot.slane %v1474_v55, 5  ;;  %v1480_v43 = vrot.slane %v1478_v58, 4  ;;  %v1502_v55 = vshrl.u32 %v13542_v30, 16 }
 0x1bc   :  { %10998 = vmatprep.subr.bf16.mxu0 %v11349_v28  ;;  %v1471_v40 = vor.u32 %v1470_v3, %v1467_v24  ;;  %v1500_v3 = vrot.slane %v1498_v35, 5 }
 0x1bd   :  { %16276 = vst [vmem:[#allocation13_spill] sm:$0xff] %v13524_v39  ;;  %v10388_v0 = vpop.f32.mrb[100].mxu0  ;;  %v1481_v11 = vor.u32 %v1480_v43, %v1476_v2  ;;  %v1504_v43 = vrot.slane %v1502_v55, 4 }
 0x1be   :  { %v10389_v29 = vpop.f32.mrb[101].mxu0  ;;  %v1472_v34 = vrot.slane %v1471_v40, 4 }
 0x1bf   :  { %v10390_v8 = vadd.f32 %v10389_v29, %v10388_v0  ;;  %v10391_v6 = vpop.f32.mrb[102].mxu0  ;;  %10999 = vmatpush3.bf16.msra.mxu0 %v11349_v28  ;;  %v1453_v28 = vsel %vm11610_vm5, %v1448_v16, %v13497_v44  ;;  %v1482_v16 = vrot.slane %v1481_v11, 4  ;;  %v1522_v11 = vshll.u32 %v13047_v18, 16 }
 0x1c0   :  { %v10392_v39 = vpop.f32.mrb[103].mxu0 }
 0x1c1   :  { %v13532_v31 = vadd.f32 %v10390_v8, %v12809_v61  ;;  %v10393_v32 = vadd.f32 %v10392_v39, %v10391_v6  ;;  %v1463_v61 = vsel %vm11610_vm5, %v1458_v57, %v1462_v33  ;;  %v1492_v39 = vshll.u32 %v13537_v54, 16  ;;  %v13564_v33 = vld [vmem:[%s16173_s0 + $0x84] sm:$0xf] }
 0x1c2   :  { %3604 = vmatmul.mubr.bf16.gmra.mrb[208].mxu0 %v9575_v21  ;;  %v9593_v21 = vcombine.low %v1453_v28, %v1463_v61  ;;  %v1486_v57 = vrot.slane %v1484_v9, 5  ;;  %v1491_v8 = vrot.slane %v1489_v42, 4  ;;  %v13572_v28 = vld [vmem:[%s16173_s0 + $0x80] sm:$0x1]  ;;  %v1513_v61 = vshrl.u32 %v13564_v33, 16  ;;  %v16277_v42 = vld [vmem:[#allocation20_spill] sm:$0xff] }
 0x1c3   :  { %v13550_v13 = vadd.f32 %v10393_v32, %v12821_v52  ;;  %3611 = vmatprep.mubr.bf16.mxu0 %v9592_v60  ;;  %v11467_v52 = vld [vmem:[%s16173_s0 + $0x58] sm:$0xf]  ;;  %v1494_v6 = vrot.slane %v1492_v39, 5  ;;  %v1516_v40 = vshll.u32 %v13564_v33, 16  ;;  %v1526_v9 = vshrl.u32 %v13047_v18, 16 }
 0x1c4   :  { %v9576_v0 = vcombine.low %v13420_v49, %v11467_v52  ;;  %v1487_v35 = vsel %vm11610_vm5, %v1482_v16, %v1486_v57  ;;  %v1515_v18 = vrot.slane %v1513_v61, 4  ;;  %v1532_v61 = vshll.u32 %v13052_v38, 16 }
 0x1c5   :  { %v10394_v44 = vpop.f32.mrb[104].mxu0  ;;  %v1495_v55 = vor.u32 %v1494_v6, %v1491_v8 }
 0x1c6   :  { %v10395_v58 = vpop.f32.mrb[105].mxu0 }
 0x1c7   :  { %v10396_v60 = vadd.f32 %v10395_v58, %v10394_v44  ;;  %v10397_v29 = vpop.f32.mrb[106].mxu0  ;;  %v1505_v44 = vor.u32 %v1504_v43, %v1500_v3  ;;  %v1508_v58 = vshll.u32 %v13572_v28, 16  ;;  %v1496_v16 = vrot.slane %v1495_v55, 4 }
 0x1c8   :  { %v10398_v24 = vpop.f32.mrb[107].mxu0 }
 0x1c9   :  { %v13567_v32 = vadd.f32 %v10396_v60, %v12850_v51  ;;  %v10399_v49 = vadd.f32 %v10398_v24, %v10397_v29  ;;  %v1477_v51 = vsel %vm11610_vm5, %v1472_v34, %v1476_v2  ;;  %v1518_v29 = vrot.slane %v1516_v40, 5  ;;  %v13591_v2 = vld [vmem:[%s16173_s0 + $0x90] sm:$0xf] }
 0x1ca   :  { %3612 = vmatmul.mubr.bf16.gmra.mrb[212].mxu0 %v9576_v0  ;;  %v9577_v0 = vcombine.low %v13463_v17, %v13468_v62  ;;  %v1524_v24 = vrot.slane %v1522_v11, 5  ;;  %v1506_v57 = vrot.slane %v1505_v44, 4  ;;  %v1510_v8 = vrot.slane %v1508_v58, 5  ;;  %v13596_v17 = vld [vmem:[%s16173_s0 + $0x94] sm:$0xf] }
 0x1cb   :  { %v13579_v39 = vadd.f32 %v10399_v49, %v16277_v42  ;;  %3619 = vmatprep.mubr.bf16.mxu0 %v9593_v21  ;;  %v1528_v49 = vrot.slane %v1526_v9, 4  ;;  %v1519_v40 = vor.u32 %v1518_v29, %v1515_v18  ;;  %v1537_v9 = vshrl.u32 %v13591_v2, 16 }
 0x1cc   :  { %v1546_v55 = vshll.u32 %v13596_v17, 16  ;;  %v1550_v44 = vshrl.u32 %v13596_v17, 16  ;;  %v1511_v38 = vsel %vm11610_vm5, %v1506_v57, %v1510_v8 }
 0x1cd   :  { %16278 = vst [vmem:[#allocation15_spill] sm:$0xff] %v13579_v39  ;;  %v10400_v52 = vpop.f32.mrb[108].mxu0  ;;  %v9594_v39 = vcombine.low %v1477_v51, %v1487_v35  ;;  %v1529_v11 = vor.u32 %v1528_v49, %v1524_v24  ;;  %v1540_v51 = vshll.u32 %v13591_v2, 16  ;;  %v1539_v29 = vrot.slane %v1537_v9, 4 }
 0x1ce   :  { %v10401_v60 = vpop.f32.mrb[109].mxu0  ;;  %v1552_v57 = vrot.slane %v1550_v44, 4  ;;  %v16281_v44 = vld [vmem:[#allocation24_spill] sm:$0xff] }
 0x1cf   :  { %v10402_v21 = vadd.f32 %v10401_v60, %v10400_v52  ;;  %v10403_v42 = vpop.f32.mrb[110].mxu0  ;;  %v11468_v52 = vld [vmem:[%s16173_s0 + $0x70] sm:$0xf]  ;;  %v1530_v18 = vrot.slane %v1529_v11, 4  ;;  %v1542_v49 = vrot.slane %v1540_v51, 5 }
 0x1d0   :  { %v10404_v34 = vpop.f32.mrb[111].mxu0 }
 0x1d1   :  { %v13599_v6 = vadd.f32 %v10402_v21, %v12896_v15  ;;  %v10405_v43 = vadd.f32 %v10404_v34, %v10403_v42  ;;  %v1501_v15 = vsel %vm11610_vm5, %v1496_v16, %v1500_v3  ;;  %v13620_v3 = vld [vmem:[%s16173_s0 + $0x98] sm:$0x1]  ;;  %v1548_v16 = vrot.slane %v1546_v55, 5 }
 0x1d2   :  { %3620 = vmatmul.mubr.bf16.gmra.mrb[216].mxu0 %v9577_v0  ;;  %v9578_v0 = vcombine.low %v13507_v48, %v11468_v52  ;;  %v9595_v34 = vcombine.low %v1501_v15, %v1511_v38  ;;  %v13625_v48 = vld [vmem:[%s16173_s0 + $0x9c] sm:$0xf]  ;;  %v1543_v51 = vor.u32 %v1542_v49, %v1539_v29  ;;  %v1556_v55 = vshll.u32 %v13620_v3, 16 }
 0x1d3   :  { %v13605_v35 = vadd.f32 %v10405_v43, %v12907_v63  ;;  %3627 = vmatprep.mubr.bf16.mxu0 %v9594_v39  ;;  %v1534_v63 = vrot.slane %v1532_v61, 5  ;;  %v1520_v39 = vrot.slane %v1519_v40, 4  ;;  %v16279_v43 = vld [vmem:[#allocation23_spill] sm:$0xff]  ;;  %v1553_v38 = vor.u32 %v1552_v57, %v1548_v16 }
 0x1d4   :  { %v1564_v52 = vshll.u32 %v13625_v48, 16  ;;  %v1544_v49 = vrot.slane %v1543_v51, 4 }
 0x1d5   :  { %v10406_v58 = vpop.f32.mrb[112].mxu0  ;;  %v1525_v11 = vsel %vm11610_vm5, %v1520_v39, %v1524_v24  ;;  %v1535_v9 = vsel %vm11610_vm5, %v1530_v18, %v1534_v63  ;;  %v13645_v63 = vld [vmem:[%s16173_s0 + $0xa8] sm:$0xf]  ;;  %v9579_v18 = vcombine.low %v13537_v54, %v13542_v30  ;;  %v1554_v57 = vrot.slane %v1553_v38, 4 }
 0x1d6   :  { %v10407_v60 = vpop.f32.mrb[113].mxu0  ;;  %v9596_v29 = vcombine.low %v1525_v11, %v1535_v9  ;;  %v1588_v54 = vshll.u32 %v13645_v63, 16 }
 0x1d7   :  { %v10408_v21 = vadd.f32 %v10407_v60, %v10406_v58  ;;  %v10409_v42 = vpop.f32.mrb[114].mxu0  ;;  %v1561_v58 = vshrl.u32 %v13625_v48, 16  ;;  %v1574_v60 = vshrl.u32 %v13161_v14, 16 }
 0x1d8   :  { %v10410_v8 = vpop.f32.mrb[115].mxu0 }
 0x1d9   :  { %v13628_v61 = vadd.f32 %v10408_v21, %v16279_v43  ;;  %v10411_v40 = vadd.f32 %v10410_v8, %v10409_v42  ;;  %v1558_v21 = vrot.slane %v1556_v55, 5  ;;  %v13652_v42 = vld [vmem:[%s16173_s0 + $0xac] sm:$0xf]  ;;  %v1563_v8 = vrot.slane %v1561_v58, 4 }
 0x1da   :  { %3628 = vmatmul.mubr.bf16.gmra.mrb[220].mxu0 %v9578_v0  ;;  %v1570_v0 = vshll.u32 %v13161_v14, 16  ;;  %v1566_v43 = vrot.slane %v1564_v52, 5  ;;  %v1594_v51 = vshll.u32 %v13652_v42, 16  ;;  %v1598_v55 = vshrl.u32 %v13652_v42, 16 }
 0x1db   :  { %16280 = vst [vmem:[#allocation16_spill] sm:$0xff] %v13628_v61  ;;  %v13636_v15 = vadd.f32 %v10411_v40, %v16281_v44  ;;  %3635 = vmatprep.mubr.bf16.mxu0 %v9595_v34  ;;  %v1585_v61 = vshrl.u32 %v13645_v63, 16  ;;  %v1549_v58 = vsel %vm11610_vm5, %v1544_v49, %v1548_v16  ;;  %v1559_v52 = vsel %vm11610_vm5, %v1554_v57, %v1558_v21  ;;  %v13676_v16 = vld [vmem:[%s16173_s0 + $0xb0] sm:$0x1] }
 0x1dc   :  { %v1572_v44 = vrot.slane %v1570_v0, 5  ;;  %v1580_v0 = vshll.u32 %v13166_v50, 16 }
 0x1dd   :  { %16282 = vst [vmem:[#allocation17_spill] sm:$0xff] %v13636_v15  ;;  %v10412_v24 = vpop.f32.mrb[116].mxu0  ;;  %v1576_v15 = vrot.slane %v1574_v60, 4 }
 0x1de   :  { %v10413_v39 = vpop.f32.mrb[117].mxu0 }
 0x1df   :  { %v10414_v34 = vadd.f32 %v10413_v39, %v10412_v24  ;;  %v10415_v14 = vpop.f32.mrb[118].mxu0  ;;  %v1577_v60 = vor.u32 %v1576_v15, %v1572_v44  ;;  %v1587_v24 = vrot.slane %v1585_v61, 4  ;;  %v1590_v39 = vrot.slane %v1588_v54, 5  ;;  %v13681_v61 = vld [vmem:[%s16173_s0 + $0xb4] sm:$0xf] }
 0x1e0   :  { %v10416_v40 = vpop.f32.mrb[119].mxu0  ;;  %v9597_v15 = vcombine.low %v1549_v58, %v1559_v52  ;;  %v1609_v58 = vshrl.u32 %v13681_v61, 16  ;;  %v1612_v52 = vshll.u32 %v13681_v61, 16 }
 0x1e1   :  { %v13657_v11 = vadd.f32 %v10414_v34, %v12984_v59  ;;  %v10417_v9 = vadd.f32 %v10416_v40, %v10415_v14  ;;  %v1567_v59 = vor.u32 %v1566_v43, %v1563_v8  ;;  %v1596_v14 = vrot.slane %v1594_v51, 5 }
 0x1e2   :  { %3636 = vmatmul.mubr.bf16.gmra.mrb[224].mxu0 %v9579_v18  ;;  %v1600_v40 = vrot.slane %v1598_v55, 4  ;;  %v1578_v8 = vrot.slane %v1577_v60, 4  ;;  %v1582_v43 = vrot.slane %v1580_v0, 5  ;;  %v1591_v54 = vor.u32 %v1590_v39, %v1587_v24 }
 0x1e3   :  { %v13662_v38 = vadd.f32 %v10417_v9, %v12995_v4  ;;  %3643 = vmatprep.mubr.bf16.mxu0 %v9596_v29  ;;  %v11469_v4 = vld [vmem:[%s16173_s0 + $0x88] sm:$0xf]  ;;  %v1568_v57 = vrot.slane %v1567_v59, 4  ;;  %v16284_v9 = vld [vmem:[#allocation27_spill] sm:$0xff] }
 0x1e4   :  { %v9580_v29 = vcombine.low %v13564_v33, %v11469_v4  ;;  %v1601_v55 = vor.u32 %v1600_v40, %v1596_v14  ;;  %v1604_v4 = vshll.u32 %v13676_v16, 16  ;;  %v16286_v59 = vld [vmem:[#allocation28_spill] sm:$0xff]  ;;  %v1583_v24 = vsel %vm11610_vm5, %v1578_v8, %v1582_v43  ;;  %v16288_v8 = vld [vmem:[#allocation30_spill] sm:$0xff] }
 0x1e5   :  { %16283 = vst [vmem:[#allocation20_spill] sm:$0xff] %v13662_v38  ;;  %v10418_v34 = vpop.f32.mrb[120].mxu0  ;;  %v1573_v0 = vsel %vm11610_vm5, %v1568_v57, %v1572_v44  ;;  %v9581_v40 = vcombine.low %v13591_v2, %v13596_v17  ;;  %v13703_v44 = vld [vmem:[%s16173_s0 + $0xc0] sm:$0xf]  ;;  %v13708_v2 = vld [vmem:[%s16173_s0 + $0xc4] sm:$0xf] }
 0x1e6   :  { %v10419_v18 = vpop.f32.mrb[121].mxu0 }
 0x1e7   :  { %v10420_v50 = vadd.f32 %v10419_v18, %v10418_v34  ;;  %v10421_v49 = vpop.f32.mrb[122].mxu0  ;;  %v1618_v34 = vshll.u32 %v13261_v1, 16  ;;  %v1622_v18 = vshrl.u32 %v13261_v1, 16 }
 0x1e8   :  { %v10422_v21 = vpop.f32.mrb[123].mxu0 }
 0x1e9   :  { %v13684_v33 = vadd.f32 %v10420_v50, %v16284_v9  ;;  %v10423_v51 = vadd.f32 %v10422_v21, %v10421_v49  ;;  %v1602_v50 = vrot.slane %v1601_v55, 4  ;;  %v1606_v49 = vrot.slane %v1604_v4, 5 }
 0x1ea   :  { %3644 = vmatmul.mubr.bf16.gmra.mrb[228].mxu0 %v9580_v29  ;;  %v1592_v29 = vrot.slane %v1591_v54, 4  ;;  %v1611_v9 = vrot.slane %v1609_v58, 4  ;;  %v1620_v38 = vrot.slane %v1618_v34, 5  ;;  %v1628_v34 = vshll.u32 %v13266_v10, 16 }
 0x1eb   :  { %16285 = vst [vmem:[#allocation23_spill] sm:$0xff] %v13684_v33  ;;  %v13692_v60 = vadd.f32 %v10423_v51, %v16286_v59  ;;  %3651 = vmatprep.mubr.bf16.mxu0 %v9597_v15  ;;  %v1614_v33 = vrot.slane %v1612_v52, 5  ;;  %v1624_v51 = vrot.slane %v1622_v18, 4  ;;  %v1607_v4 = vsel %vm11610_vm5, %v1602_v50, %v1606_v49 }
 0x1ec   :  { %v1597_v55 = vsel %vm11610_vm5, %v1592_v29, %v1596_v14  ;;  %v1633_v18 = vshrl.u32 %v13703_v44, 16  ;;  %v1646_v14 = vshrl.u32 %v13708_v2, 16 }
 0x1ed   :  { %16287 = vst [vmem:[#allocation24_spill] sm:$0xff] %v13692_v60  ;;  %v10424_v39 = vpop.f32.mrb[124].mxu0  ;;  %v9598_v60 = vcombine.low %v1573_v0, %v1583_v24  ;;  %v1615_v58 = vor.u32 %v1614_v33, %v1611_v9  ;;  %v1625_v52 = vor.u32 %v1624_v51, %v1620_v38  ;;  %v16290_v0 = vld [vmem:[#allocation32_spill] sm:$0xff]  ;;  %v11470_v33 = vld [vmem:[%s16173_s0 + $0xa0] sm:$0xf]  ;;  %v9599_v10 = vcombine.low %v1597_v55, %v1607_v4 }
 0x1ee   :  { %v10425_v21 = vpop.f32.mrb[125].mxu0  ;;  %v1630_v51 = vrot.slane %v1628_v34, 5  ;;  %v13740_v55 = vld [vmem:[%s16173_s0 + $0xcc] sm:$0xf] }
 0x1ef   :  { %v10426_v59 = vadd.f32 %v10425_v21, %v10424_v39  ;;  %v10427_v15 = vpop.f32.mrb[126].mxu0  ;;  %v1636_v39 = vshll.u32 %v13703_v44, 16  ;;  %v1642_v21 = vshll.u32 %v13708_v2, 16  ;;  %v1616_v49 = vrot.slane %v1615_v58, 4 }
 0x1f0   :  { %v10428_v57 = vpop.f32.mrb[127].mxu0  ;;  %v1626_v9 = vrot.slane %v1625_v52, 4 }
 0x1f1   :  { %v13711_v43 = vadd.f32 %v10426_v59, %v16288_v8  ;;  %v10429_v54 = vadd.f32 %v10428_v57, %v10427_v15  ;;  %v1635_v59 = vrot.slane %v1633_v18, 4  ;;  %v1638_v57 = vrot.slane %v1636_v39, 5 }
 0x1f2   :  { %3652 = vmatmul.mubr.bf16.gmra.mrb[232].mxu0 %v9581_v40  ;;  %v9582_v40 = vcombine.low %v13625_v48, %v11470_v33  ;;  %v1644_v8 = vrot.slane %v1642_v21, 5  ;;  %v1621_v4 = vsel %vm11610_vm5, %v1616_v49, %v1620_v38  ;;  %v1631_v58 = vsel %vm11610_vm5, %v1626_v9, %v1630_v51 }
 0x1f3   :  { %16289 = vst [vmem:[#allocation27_spill] sm:$0xff] %v13711_v43  ;;  %v13720_v24 = vadd.f32 %v10429_v54, %v16290_v0  ;;  %3659 = vmatprep.mubr.bf16.mxu0 %v9598_v60  ;;  %v1648_v54 = vrot.slane %v1646_v14, 4  ;;  %v1639_v34 = vor.u32 %v1638_v57, %v1635_v59  ;;  %v1657_v39 = vshrl.u32 %v13740_v55, 16 }
 0x1f4   :  { %v1660_v21 = vshll.u32 %v13740_v55, 16  ;;  %v1666_v14 = vshll.u32 %v13351_v45, 16 }
 0x1f5   :  { %16291 = vst [vmem:[#allocation28_spill] sm:$0xff] %v13720_v24  ;;  %v10446_v29 = vpop.f32.mrb[128].mxu0  ;;  %v13732_v24 = vld [vmem:[%s16173_s0 + $0xc8] sm:$0x1]  ;;  %v1640_v49 = vrot.slane %v1639_v34, 4 }
 0x1f6   :  { %v10447_v50 = vpop.f32.mrb[129].mxu0  ;;  %v1652_v18 = vshll.u32 %v13732_v24, 16  ;;  %v1668_v57 = vrot.slane %v1666_v14, 5 }
 0x1f7   :  { %v10448_v60 = vadd.f32 %v10447_v50, %v10446_v29  ;;  %v10449_v15 = vpop.f32.mrb[130].mxu0  ;;  %v1670_v29 = vshrl.u32 %v13351_v45, 16 }
 0x1f8   :  { %v10450_v0 = vpop.f32.mrb[131].mxu0  ;;  %v1654_v51 = vrot.slane %v1652_v18, 5 }
 0x1f9   :  { %v13735_v43 = vadd.f32 %v10448_v60, %v13144_v25  ;;  %v10451_v48 = vadd.f32 %v10450_v0, %v10449_v15  ;;  %v1649_v25 = vor.u32 %v1648_v54, %v1644_v8  ;;  %v1659_v60 = vrot.slane %v1657_v39, 4 }
 0x1fa   :  { %3660 = vmatmul.mubr.bf16.gmra.mrb[236].mxu0 %v9582_v40  ;;  %v9583_v40 = vcombine.low %v13645_v63, %v13652_v42  ;;  %v1662_v15 = vrot.slane %v1660_v21, 5  ;;  %v1672_v54 = vrot.slane %v1670_v29, 4  ;;  %v1645_v63 = vsel %vm11610_vm5, %v1640_v49, %v1644_v8 }
 0x1fb   :  { %v13747_v52 = vadd.f32 %v10451_v48, %v13169_v23  ;;  %3667 = vmatprep.mubr.bf16.mxu0 %v9599_v10  ;;  %v9600_v23 = vcombine.low %v1621_v4, %v1631_v58  ;;  %v1650_v9 = vrot.slane %v1649_v25, 4  ;;  %v1676_v25 = vshll.u32 %v13356_v56, 16 }
 0x1fc   :  { %v1663_v58 = vor.u32 %v1662_v15, %v1659_v60  ;;  %v1673_v34 = vor.u32 %v1672_v54, %v1668_v57 }
 0x1fd   :  { %16292 = vst [vmem:[#allocation30_spill] sm:$0xff] %v13747_v52  ;;  %v10452_v38 = vpop.f32.mrb[132].mxu0  ;;  %v1655_v4 = vsel %vm11610_vm5, %v1650_v9, %v1654_v51 }
 0x1fe   :  { %v10453_v33 = vpop.f32.mrb[133].mxu0 }
 0x1ff   :  { %v10454_v50 = vadd.f32 %v10453_v33, %v10452_v38  ;;  %v10455_v10 = vpop.f32.mrb[134].mxu0  ;;  %v1664_v38 = vrot.slane %v1663_v58, 4  ;;  %v1674_v33 = vrot.slane %v1673_v34, 4  ;;  %v16294_v58 = vld [vmem:[#allocation6_spill] sm:$0xff] }
 0x200   :  { %v10456_v59 = vpop.f32.mrb[135].mxu0 }
 0x201   :  { %v13757_v0 = vadd.f32 %v10454_v50, %v13206_v12  ;;  %v10457_v48 = vadd.f32 %v10456_v59, %v10455_v10  ;;  %v9584_v12 = vcombine.low %v13681_v61, %v13261_v1  ;;  %v16293_v50 = vld [vmem:[#allocation4_spill] sm:$0xff]  ;;  %v1669_v56 = vsel %vm11610_vm5, %v1664_v38, %v1668_v57  ;;  %v11471_v61 = vld [vmem:[%s16173_s0 + $0x1c] sm:$0xf] }
 0x202   :  { %3668 = vmatmul.mubr.bf16.gmra.mrb[240].mxu0 %v9583_v40  ;;  %v1678_v40 = vrot.slane %v1676_v25, 5  ;;  %v1746_v49 = vrot.slane %v11471_v61, 5  ;;  %v9585_v59 = vcombine.low %v13703_v44, %v13708_v2  ;;  %v9586_v38 = vcombine.low %v13740_v55, %v13351_v45  ;;  %v16296_v61 = vld [vmem:[#allocation36_spill] sm:$0xff] }
 0x203   :  { %v13760_v52 = vadd.f32 %v10457_v48, %v13221_v41  ;;  %3675 = vmatprep.mubr.bf16.mxu0 %v9600_v23  ;;  %v9601_v41 = vcombine.low %v1645_v63, %v1655_v4  ;;  %v11472_v63 = vld [vmem:[%s16173_s0 + $0x20] sm:$0x1] }
 0x204   :  { %v1679_v1 = vsel %vm11610_vm5, %v1674_v33, %v1678_v40  ;;  %v1748_v48 = vrot.slane %v1746_v49, 4  ;;  %v1749_v4 = vrot.slane %v11472_v63, 5 }
 0x205   :  { %v10458_v18 = vpop.f32.mrb[136].mxu0  ;;  %v9602_v57 = vcombine.low %v1669_v56, %v1679_v1 }
 0x206   :  { %v10459_v39 = vpop.f32.mrb[137].mxu0 }
 0x207   :  { %v10460_v21 = vadd.f32 %v10459_v39, %v10458_v18  ;;  %v10461_v14 = vpop.f32.mrb[138].mxu0  ;;  %v16295_v18 = vld [vmem:[#allocation7_spill] sm:$0xff] }
 0x208   :  { %v10462_v29 = vpop.f32.mrb[139].mxu0 }
 0x209   :  { %v13770_v8 = vadd.f32 %v10460_v21, %v13250_v37  ;;  %v10463_v23 = vadd.f32 %v10462_v29, %v10461_v14  ;;  %v9443_v37 = vld [vmem:[%s16173_s0 + $0x18] sm:$0xe]  ;;  %v1760_v21 = vrot.slane %v13291_v5, 5 }
 0x20a   :  { %3676 = vmatmul.mubr.bf16.gmra.mrb[244].mxu0 %v9584_v12  ;;  %v9459_v36 = vrot.slane %v9443_v37, 9  ;;  %v1750_v12 = vsel %vm11583_vm4, %v1748_v48, %v1749_v4 }
 0x20b   :  { %v13773_v10 = vadd.f32 %v10463_v23, %v16293_v50  ;;  %3683 = vmatprep.mubr.bf16.mxu0 %v9601_v41  ;;  %v9445_v41 = vld [vmem:[%s16173_s0 + $0x30] sm:$0xe]  ;;  %v1762_v1 = vrot.slane %v1760_v21, 4 }
 0x20c   :  { %v1747_v44 = vsel %vm11583_vm4, %v9459_v36, %v1746_v49  ;;  %v9461_v56 = vrot.slane %v9445_v41, 9  ;;  %v1763_v49 = vrot.slane %v16296_v61, 5 }
 0x20d   :  { %v10464_v9 = vpop.f32.mrb[140].mxu0  ;;  %v9603_v23 = vcombine.low %v1747_v44, %v1750_v12  ;;  %v16299_v44 = vld [vmem:[#allocation10_spill] sm:$0xff] }
 0x20e   :  { %v10465_v51 = vpop.f32.mrb[141].mxu0  ;;  %v1761_v45 = vsel %vm11583_vm4, %v9461_v56, %v1760_v21  ;;  %v1764_v55 = vsel %vm11583_vm4, %v1762_v1, %v1763_v49 }
 0x20f   :  { %v10466_v60 = vadd.f32 %v10465_v51, %v10464_v9  ;;  %v10467_v15 = vpop.f32.mrb[142].mxu0  ;;  %v16297_v9 = vld [vmem:[#allocation8_spill] sm:$0xff]  ;;  %v16298_v51 = vld [vmem:[#allocation9_spill] sm:$0xff]  ;;  %v9605_v63 = vcombine.low %v1761_v45, %v1764_v55  ;;  %v1791_v45 = vrot.slane %v13502_v19, 5  ;;  %v1802_v19 = vrot.slane %v13542_v30, 5  ;;  %v16308_v30 = vld [vmem:[#allocation22_spill] sm:$0xff] }
 0x210   :  { %v10468_v54 = vpop.f32.mrb[143].mxu0 }
 0x211   :  { %v13791_v34 = vadd.f32 %v10466_v60, %v16294_v58  ;;  %v10469_v25 = vadd.f32 %v10468_v54, %v10467_v15  ;;  %v1774_v60 = vrot.slane %v13395_v46, 5  ;;  %v16301_v46 = vld [vmem:[#allocation14_spill] sm:$0xff] }
 0x212   :  { %3684 = vmatmul.mubr.bf16.gmra.mrb[248].mxu0 %v9585_v59 }
 0x213   :  { %v13794_v39 = vadd.f32 %v10469_v25, %v16295_v18  ;;  %3691 = vmatprep.mubr.bf16.mxu0 %v9602_v57  ;;  %v9447_v57 = vld [vmem:[%s16173_s0 + $0x48] sm:$0xe]  ;;  %v1776_v25 = vrot.slane %v1774_v60, 4  ;;  %v1777_v18 = vrot.slane %v13439_v53, 5  ;;  %v1788_v53 = vrot.slane %v13468_v62, 5  ;;  %v16305_v62 = vld [vmem:[#allocation19_spill] sm:$0xff] }
 0x214   :  { %v9463_v58 = vrot.slane %v9447_v57, 9 }
 0x215   :  { %v10470_v14 = vpop.f32.mrb[144].mxu0 }
 0x216   :  { %v10471_v29 = vpop.f32.mrb[145].mxu0 }
 0x217   :  { %v10472_v33 = vadd.f32 %v10471_v29, %v10470_v14  ;;  %v10473_v40 = vpop.f32.mrb[146].mxu0  ;;  %v16300_v14 = vld [vmem:[#allocation12_spill] sm:$0xff]  ;;  %v16303_v29 = vld [vmem:[#allocation11_spill] sm:$0xff] }
 0x218   :  { %v10474_v50 = vpop.f32.mrb[147].mxu0  ;;  %v16302_v41 = vcombine.low %v16300_v14, %v16301_v46  ;;  %v1805_v14 = vrot.slane %v13572_v28, 5  ;;  %v1816_v28 = vrot.slane %v13596_v17, 5  ;;  %v16311_v17 = vld [vmem:[#allocation26_spill] sm:$0xff] }
 0x219   :  { %v13808_v37 = vadd.f32 %v10472_v33, %v16297_v9  ;;  %v10475_v5 = vadd.f32 %v10474_v50, %v10473_v40  ;;  %v1775_v33 = vsel %vm11583_vm4, %v9463_v58, %v1774_v60  ;;  %v1778_v40 = vsel %vm11583_vm4, %v1776_v25, %v1777_v18  ;;  %v9449_v50 = vld [vmem:[%s16173_s0 + $0x60] sm:$0xe] }
 0x21a   :  { %3692 = vmatmul.mubr.bf16.gmra.mrb[252].mxu0 %v9586_v38  ;;  %v9607_v49 = vcombine.low %v1775_v33, %v1778_v40 }
 0x21b   :  { %v13811_v59 = vadd.f32 %v10475_v5, %v16298_v51  ;;  %11000 = vmatprep.mubr.bf16.mxu0 %v9603_v23  ;;  %v9465_v5 = vrot.slane %v9449_v50, 9  ;;  %v1790_v51 = vrot.slane %v1788_v53, 4 }
 0x21d   :  { %v10476_v15 = vpop.f32.mrb[148].mxu0 }
 0x21e   :  { %v10477_v54 = vpop.f32.mrb[149].mxu0 }
 0x21f   :  { %v10478_v36 = vadd.f32 %v10477_v54, %v10476_v15  ;;  %v10479_v48 = vpop.f32.mrb[150].mxu0  ;;  %v16304_v15 = vld [vmem:[#allocation18_spill] sm:$0xff] }
 0x220   :  { %v10480_v4 = vpop.f32.mrb[151].mxu0  ;;  %v16306_v57 = vcombine.low %v16304_v15, %v16305_v62  ;;  %v16310_v15 = vld [vmem:[#allocation25_spill] sm:$0xff] }
 0x221   :  { %v13823_v12 = vadd.f32 %v10478_v36, %v16299_v44  ;;  %v10481_v21 = vadd.f32 %v10480_v4, %v10479_v48  ;;  %v1789_v36 = vsel %vm11583_vm4, %v9465_v5, %v1788_v53  ;;  %v1792_v48 = vsel %vm11583_vm4, %v1790_v51, %v1791_v45 }
 0x222   :  { %11001 = vmatmul.mubr.bf16.vlgmr.msra.gmra.mrb[0].mxu0 %v16302_v41  ;;  %v9609_v18 = vcombine.low %v1789_v36, %v1792_v48  ;;  %v1818_v5 = vrot.slane %v1816_v28, 4  ;;  %v1819_v51 = vrot.slane %v13620_v3, 5  ;;  %v16312_v62 = vcombine.low %v16310_v15, %v16311_v17  ;;  %v16320_v15 = vld [vmem:[#allocation15_spill] sm:$0xff] }
 0x223   :  { %v13829_v38 = vadd.f32 %v10481_v21, %v16303_v29  ;;  %11004 = vmatprep.mubr.bf16.mxu0 %v9605_v63  ;;  %v1804_v21 = vrot.slane %v1802_v19, 4  ;;  %v16307_v29 = vld [vmem:[#allocation21_spill] sm:$0xff]  ;;  %v1830_v3 = vrot.slane %v13652_v42, 5  ;;  %v16315_v42 = vld [vmem:[#allocation31_spill] sm:$0xff] }
 0x224   :  { %v16309_v33 = vcombine.low %v16307_v29, %v16308_v30  ;;  %v16314_v29 = vld [vmem:[#allocation29_spill] sm:$0xff] }
 0x225   :  { %v10482_v23 = vpop.f32.mrb[152].mxu0  ;;  %v16316_v30 = vcombine.low %v16314_v29, %v16315_v42  ;;  %v16324_v42 = vld [vmem:[#allocation16_spill] sm:$0xff] }
 0x226   :  { %v10483_v56 = vpop.f32.mrb[153].mxu0 }
 0x227   :  { %v10484_v1 = vadd.f32 %v10483_v56, %v10482_v23  ;;  %v10485_v61 = vpop.f32.mrb[154].mxu0  ;;  %v1806_v23 = vsel %vm11583_vm4, %v1804_v21, %v1805_v14  ;;  %v1833_v21 = vrot.slane %v13676_v16, 5  ;;  %v1844_v16 = vrot.slane %v13708_v2, 5  ;;  %v16318_v2 = vld [vmem:[#allocation34_spill] sm:$0xff] }
 0x228   :  { %v10486_v9 = vpop.f32.mrb[155].mxu0 }
 0x229   :  { %v13841_v55 = vadd.f32 %v10484_v1, %v13434_v22  ;;  %v10487_v60 = vadd.f32 %v10486_v9, %v10485_v61  ;;  %v9451_v22 = vld [vmem:[%s16173_s0 + $0x78] sm:$0xe] }
 0x22a   :  { %11005 = vmatmul.mubr.bf16.gmra.mrb[4].mxu0 %v16306_v57  ;;  %v9467_v44 = vrot.slane %v9451_v22, 9  ;;  %v16313_v57 = vld [vmem:[#allocation13_spill] sm:$0xff] }
 0x22b   :  { %v13847_v54 = vadd.f32 %v10487_v60, %v13444_v7  ;;  %11008 = vmatprep.mubr.bf16.mxu0 %v9607_v49 }
 0x22c   :  { %v1803_v53 = vsel %vm11583_vm4, %v9467_v44, %v1802_v19  ;;  %v1820_v19 = vsel %vm11583_vm4, %v1818_v5, %v1819_v51  ;;  %v1832_v44 = vrot.slane %v1830_v3, 4  ;;  %v16317_v51 = vld [vmem:[#allocation33_spill] sm:$0xff] }
 0x22d   :  { %v10488_v63 = vpop.f32.mrb[156].mxu0  ;;  %v9611_v49 = vcombine.low %v1803_v53, %v1806_v23 }
 0x22e   :  { %v10489_v4 = vpop.f32.mrb[157].mxu0  ;;  %v1834_v23 = vsel %vm11583_vm4, %v1832_v44, %v1833_v21 }
 0x22f   :  { %v10490_v58 = vadd.f32 %v10489_v4, %v10488_v63  ;;  %v10491_v25 = vpop.f32.mrb[158].mxu0 }
 0x230   :  { %v10492_v7 = vpop.f32.mrb[159].mxu0 }
 0x231   :  { %v13859_v46 = vadd.f32 %v10490_v58, %v13475_v20  ;;  %v10493_v41 = vadd.f32 %v10492_v7, %v10491_v25  ;;  %v9453_v20 = vld [vmem:[%s16173_s0 + $0x90] sm:$0xe] }
 0x232   :  { %11009 = vmatmul.mubr.bf16.gmra.mrb[8].mxu0 %v16309_v33  ;;  %v9469_v9 = vrot.slane %v9453_v20, 9 }
 0x233   :  { %v13865_v40 = vadd.f32 %v10493_v41, %v13483_v27  ;;  %11012 = vmatprep.mubr.bf16.mxu0 %v9609_v18 }
 0x234   :  { %v1817_v48 = vsel %vm11583_vm4, %v9469_v9, %v1816_v28 }
 0x235   :  { %v10494_v50 = vpop.f32.mrb[160].mxu0  ;;  %v9613_v25 = vcombine.low %v1817_v48, %v1820_v19 }
 0x236   :  { %v10495_v56 = vpop.f32.mrb[161].mxu0 }
 0x237   :  { %v10496_v1 = vadd.f32 %v10495_v56, %v10494_v50  ;;  %v10497_v61 = vpop.f32.mrb[162].mxu0 }
 0x238   :  { %v10498_v27 = vpop.f32.mrb[163].mxu0 }
 0x239   :  { %v13877_v45 = vadd.f32 %v10496_v1, %v13513_v47  ;;  %v10499_v60 = vadd.f32 %v10498_v27, %v10497_v61  ;;  %v9455_v47 = vld [vmem:[%s16173_s0 + $0xa8] sm:$0xe]  ;;  %v1847_v27 = vrot.slane %v13732_v24, 5 }
 0x23a   :  { %11013 = vmatmul.mubr.bf16.gmra.mrb[12].mxu0 %v16312_v62  ;;  %v9471_v7 = vrot.slane %v9455_v47, 9 }
 0x23b   :  { %v13883_v36 = vadd.f32 %v10499_v60, %v16313_v57  ;;  %11016 = vmatprep.mubr.bf16.mxu0 %v9611_v49  ;;  %v1846_v49 = vrot.slane %v1844_v16, 4  ;;  %v16319_v60 = vcombine.low %v16317_v51, %v16318_v2 }
 0x23c   :  { %v1831_v53 = vsel %vm11583_vm4, %v9471_v7, %v1830_v3 }
 0x23d   :  { %v10500_v63 = vpop.f32.mrb[164].mxu0  ;;  %v9615_v1 = vcombine.low %v1831_v53, %v1834_v23  ;;  %v1848_v57 = vsel %vm11583_vm4, %v1846_v49, %v1847_v27  ;;  %v16326_v23 = vld [vmem:[#allocation38_spill] sm:$0xff]  ;;  %v16329_v49 = vld [vmem:[#allocation20_spill] sm:$0xff] }
 0x23e   :  { %v10501_v22 = vpop.f32.mrb[165].mxu0 }
 0x23f   :  { %v10502_v4 = vadd.f32 %v10501_v22, %v10500_v63  ;;  %v10503_v58 = vpop.f32.mrb[166].mxu0 }
 0x240   :  { %v10504_v18 = vpop.f32.mrb[167].mxu0 }
 0x241   :  { %v13895_v14 = vadd.f32 %v10502_v4, %v13532_v31  ;;  %v10505_v41 = vadd.f32 %v10504_v18, %v10503_v58  ;;  %v9457_v31 = vld [vmem:[%s16173_s0 + $0xc0] sm:$0xe]  ;;  %v16321_v4 = vld [vmem:[#allocation5_spill] sm:$0xff] }
 0x242   :  { %11017 = vmatmul.mubr.bf16.gmra.mrb[16].mxu0 %v16316_v30  ;;  %v9473_v61 = vrot.slane %v9457_v31, 9  ;;  %v16322_v58 = vld [vmem:[#allocation35_spill] sm:$0xff] }
 0x243   :  { %v13901_v33 = vadd.f32 %v10505_v41, %v13550_v13  ;;  %11020 = vmatprep.mubr.bf16.mxu0 %v9613_v25  ;;  %v16323_v25 = vcombine.low %v16321_v4, %v16322_v58  ;;  %v16332_v4 = vld [vmem:[#allocation27_spill] sm:$0xff] }
 0x244   :  { %v1845_v62 = vsel %vm11583_vm4, %v9473_v61, %v1844_v16 }
 0x245   :  { %v10506_v28 = vpop.f32.mrb[168].mxu0  ;;  %v9617_v3 = vcombine.low %v1845_v62, %v1848_v57  ;;  %v16330_v62 = vld [vmem:[#allocation23_spill] sm:$0xff] }
 0x246   :  { %v10507_v50 = vpop.f32.mrb[169].mxu0 }
 0x247   :  { %v10508_v20 = vadd.f32 %v10507_v50, %v10506_v28  ;;  %v10509_v56 = vpop.f32.mrb[170].mxu0  ;;  %v16328_v28 = vld [vmem:[#allocation17_spill] sm:$0xff] }
 0x248   :  { %v10510_v13 = vpop.f32.mrb[171].mxu0 }
 0x249   :  { %v13913_v9 = vadd.f32 %v10508_v20, %v13567_v32  ;;  %v10511_v5 = vadd.f32 %v10510_v13, %v10509_v56 }
 0x24a   :  { %11021 = vmatmul.mubr.bf16.gmra.mrb[20].mxu0 %v16319_v60 }
 0x24b   :  { %v13919_v17 = vadd.f32 %v10511_v5, %v16320_v15  ;;  %11024 = vmatprep.mubr.bf16.mxu0 %v9615_v1 }
 0x24d   :  { %v10512_v48 = vpop.f32.mrb[172].mxu0 }
 0x24e   :  { %v10513_v24 = vpop.f32.mrb[173].mxu0 }
 0x24f   :  { %v10514_v19 = vadd.f32 %v10513_v24, %v10512_v48  ;;  %v10515_v32 = vpop.f32.mrb[174].mxu0  ;;  %v16331_v24 = vld [vmem:[#allocation24_spill] sm:$0xff] }
 0x250   :  { %v10516_v63 = vpop.f32.mrb[175].mxu0 }
 0x251   :  { %v13926_v47 = vadd.f32 %v10514_v19, %v13599_v6  ;;  %v10517_v22 = vadd.f32 %v10516_v63, %v10515_v32  ;;  %v16325_v6 = vld [vmem:[#allocation37_spill] sm:$0xff] }
 0x252   :  { %11025 = vmatmul.mubr.bf16.gmra.mrb[24].mxu0 %v16323_v25  ;;  %v16327_v16 = vcombine.low %v16325_v6, %v16326_v23 }
 0x253   :  { %v13932_v18 = vadd.f32 %v10517_v22, %v13605_v35  ;;  %11028 = vmatprep.mubr.bf16.mxu0 %v9617_v3 }
 0x255   :  { %v10518_v7 = vpop.f32.mrb[176].mxu0 }
 0x256   :  { %v10519_v44 = vpop.f32.mrb[177].mxu0 }
 0x257   :  { %v10520_v21 = vadd.f32 %v10519_v44, %v10518_v7  ;;  %v10521_v41 = vpop.f32.mrb[178].mxu0  ;;  %v16333_v7 = vld [vmem:[#allocation28_spill] sm:$0xff] }
 0x258   :  { %v10522_v29 = vpop.f32.mrb[179].mxu0 }
 0x259   :  { %v13935_v30 = vadd.f32 %v10520_v21, %v16324_v42  ;;  %v10523_v53 = vadd.f32 %v10522_v29, %v10521_v41 }
 0x25a   :  { %11029 = vmatmul.mubr.bf16.gmra.mrb[28].mxu0 %v16327_v16  ;;  %v16334_v16 = vld [vmem:[#allocation30_spill] sm:$0xff] }
 0x25b   :  { %v13941_v31 = vadd.f32 %v10523_v53, %v16328_v28 }
 0x25d   :  { %v10524_v50 = vpop.f32.mrb[180].mxu0 }
 0x25e   :  { %v10525_v35 = vpop.f32.mrb[181].mxu0 }
 0x25f   :  { %v10526_v20 = vadd.f32 %v10525_v35, %v10524_v50  ;;  %v10527_v56 = vpop.f32.mrb[182].mxu0  ;;  %v11491_v35 = vmov 0  }
 0x260   :  { %v10528_v1 = vpop.f32.mrb[183].mxu0  ;;  %4054 = vst.msk [vmem:[#allocation2 + $0x108] sm:$0xf] %vm3987_vm6, %v11491_v35  ;;  %3988 = vst.msk [vmem:[#allocation2] sm:$0xf] %vm3987_vm6, %v11491_v35 }
 0x261   :  { %v13944_v13 = vadd.f32 %v10526_v20, %v13657_v11  ;;  %v10529_v61 = vadd.f32 %v10528_v1, %v10527_v56  ;;  %3989 = vst.msk [vmem:[#allocation2 + $0x4] sm:$0xf] %vm3987_vm6, %v11491_v35  ;;  %3990 = vst.msk [vmem:[#allocation2 + $0x8] sm:$0xf] %vm3987_vm6, %v11491_v35 }
 0x262   :  { %3991 = vst.msk [vmem:[#allocation2 + $0xc] sm:$0xf] %vm3987_vm6, %v11491_v35  ;;  %3992 = vst.msk [vmem:[#allocation2 + $0x10] sm:$0xf] %vm3987_vm6, %v11491_v35 }
 0x263   :  { %v13947_v27 = vadd.f32 %v10529_v61, %v16329_v49  ;;  %3993 = vst.msk [vmem:[#allocation2 + $0x14] sm:$0xf] %vm3987_vm6, %v11491_v35  ;;  %3994 = vst.msk [vmem:[#allocation2 + $0x18] sm:$0xf] %vm3987_vm6, %v11491_v35 }
 0x264   :  { %3995 = vst.msk [vmem:[#allocation2 + $0x1c] sm:$0xf] %vm3987_vm6, %v11491_v35  ;;  %3996 = vst.msk [vmem:[#allocation2 + $0x20] sm:$0xf] %vm3987_vm6, %v11491_v35 }
 0x265   :  { %v10530_v5 = vpop.f32.mrb[184].mxu0  ;;  %3997 = vst.msk [vmem:[#allocation2 + $0x24] sm:$0xf] %vm3987_vm6, %v11491_v35  ;;  %3998 = vst.msk [vmem:[#allocation2 + $0x28] sm:$0xf] %vm3987_vm6, %v11491_v35 }
 0x266   :  { %v10531_v51 = vpop.f32.mrb[185].mxu0  ;;  %3999 = vst.msk [vmem:[#allocation2 + $0x2c] sm:$0xf] %vm3987_vm6, %v11491_v35  ;;  %4000 = vst.msk [vmem:[#allocation2 + $0x30] sm:$0xf] %vm3987_vm6, %v11491_v35 }
 0x267   :  { %v10532_v2 = vadd.f32 %v10531_v51, %v10530_v5  ;;  %v10533_v60 = vpop.f32.mrb[186].mxu0  ;;  %4001 = vst.msk [vmem:[#allocation2 + $0x34] sm:$0xf] %vm3987_vm6, %v11491_v35  ;;  %4002 = vst.msk [vmem:[#allocation2 + $0x38] sm:$0xf] %vm3987_vm6, %v11491_v35 }
 0x268   :  { %v10534_v15 = vpop.f32.mrb[187].mxu0  ;;  %4003 = vst.msk [vmem:[#allocation2 + $0x3c] sm:$0xf] %vm3987_vm6, %v11491_v35  ;;  %4004 = vst.msk [vmem:[#allocation2 + $0x40] sm:$0xf] %vm3987_vm6, %v11491_v35 }
 0x269   :  { %v13950_v57 = vadd.f32 %v10532_v2, %v16330_v62  ;;  %v10535_v48 = vadd.f32 %v10534_v15, %v10533_v60  ;;  %4005 = vst.msk [vmem:[#allocation2 + $0x44] sm:$0xf] %vm3987_vm6, %v11491_v35  ;;  %4006 = vst.msk [vmem:[#allocation2 + $0x48] sm:$0xf] %vm3987_vm6, %v11491_v35 }
 0x26a   :  { %4007 = vst.msk [vmem:[#allocation2 + $0x4c] sm:$0xf] %vm3987_vm6, %v11491_v35  ;;  %4008 = vst.msk [vmem:[#allocation2 + $0x50] sm:$0xf] %vm3987_vm6, %v11491_v35 }
 0x26b   :  { %v13953_v19 = vadd.f32 %v10535_v48, %v16331_v24  ;;  %4009 = vst.msk [vmem:[#allocation2 + $0x54] sm:$0xf] %vm3987_vm6, %v11491_v35  ;;  %4010 = vst.msk [vmem:[#allocation2 + $0x58] sm:$0xf] %vm3987_vm6, %v11491_v35 }
 0x26c   :  { %4011 = vst.msk [vmem:[#allocation2 + $0x5c] sm:$0xf] %vm3987_vm6, %v11491_v35  ;;  %4012 = vst.msk [vmem:[#allocation2 + $0x60] sm:$0xf] %vm3987_vm6, %v11491_v35 }
 0x26d   :  { %v10536_v32 = vpop.f32.mrb[188].mxu0  ;;  %4013 = vst.msk [vmem:[#allocation2 + $0x64] sm:$0xf] %vm3987_vm6, %v11491_v35  ;;  %4014 = vst.msk [vmem:[#allocation2 + $0x68] sm:$0xf] %vm3987_vm6, %v11491_v35 }
 0x26e   :  { %v10537_v3 = vpop.f32.mrb[189].mxu0  ;;  %4015 = vst.msk [vmem:[#allocation2 + $0x6c] sm:$0xf] %vm3987_vm6, %v11491_v35  ;;  %4016 = vst.msk [vmem:[#allocation2 + $0x70] sm:$0xf] %vm3987_vm6, %v11491_v35 }
 0x26f   :  { %v10538_v11 = vadd.f32 %v10537_v3, %v10536_v32  ;;  %v10539_v63 = vpop.f32.mrb[190].mxu0  ;;  %4017 = vst.msk [vmem:[#allocation2 + $0x74] sm:$0xf] %vm3987_vm6, %v11491_v35  ;;  %4018 = vst.msk [vmem:[#allocation2 + $0x78] sm:$0xf] %vm3987_vm6, %v11491_v35 }
 0x270   :  { %v10540_v22 = vpop.f32.mrb[191].mxu0  ;;  %4019 = vst.msk [vmem:[#allocation2 + $0x7c] sm:$0xf] %vm3987_vm6, %v11491_v35  ;;  %4020 = vst.msk [vmem:[#allocation2 + $0x80] sm:$0xf] %vm3987_vm6, %v11491_v35 }
 0x271   :  { %v13956_v58 = vadd.f32 %v10538_v11, %v16332_v4  ;;  %v10541_v25 = vadd.f32 %v10540_v22, %v10539_v63  ;;  %4021 = vst.msk [vmem:[#allocation2 + $0x84] sm:$0xf] %vm3987_vm6, %v11491_v35  ;;  %4022 = vst.msk [vmem:[#allocation2 + $0x88] sm:$0xf] %vm3987_vm6, %v11491_v35 }
 0x272   :  { %4023 = vst.msk [vmem:[#allocation2 + $0x8c] sm:$0xf] %vm3987_vm6, %v11491_v35  ;;  %4024 = vst.msk [vmem:[#allocation2 + $0x90] sm:$0xf] %vm3987_vm6, %v11491_v35 }
 0x273   :  { %v13959_v44 = vadd.f32 %v10541_v25, %v16333_v7  ;;  %4025 = vst.msk [vmem:[#allocation2 + $0x94] sm:$0xf] %vm3987_vm6, %v11491_v35  ;;  %4026 = vst.msk [vmem:[#allocation2 + $0x98] sm:$0xf] %vm3987_vm6, %v11491_v35 }
 0x274   :  { %4027 = vst.msk [vmem:[#allocation2 + $0x9c] sm:$0xf] %vm3987_vm6, %v11491_v35  ;;  %4028 = vst.msk [vmem:[#allocation2 + $0xa0] sm:$0xf] %vm3987_vm6, %v11491_v35 }
 0x275   :  { %v10558_v21 = vpop.f32.mrb[192].mxu0  ;;  %4029 = vst.msk [vmem:[#allocation2 + $0xa4] sm:$0xf] %vm3987_vm6, %v11491_v35  ;;  %4030 = vst.msk [vmem:[#allocation2 + $0xa8] sm:$0xf] %vm3987_vm6, %v11491_v35 }
 0x276   :  { %v10559_v41 = vpop.f32.mrb[193].mxu0  ;;  %4031 = vst.msk [vmem:[#allocation2 + $0xac] sm:$0xf] %vm3987_vm6, %v11491_v35  ;;  %4032 = vst.msk [vmem:[#allocation2 + $0xb0] sm:$0xf] %vm3987_vm6, %v11491_v35 }
 0x277   :  { %v10560_v29 = vadd.f32 %v10559_v41, %v10558_v21  ;;  %v10561_v42 = vpop.f32.mrb[194].mxu0  ;;  %4033 = vst.msk [vmem:[#allocation2 + $0xb4] sm:$0xf] %vm3987_vm6, %v11491_v35  ;;  %4034 = vst.msk [vmem:[#allocation2 + $0xb8] sm:$0xf] %vm3987_vm6, %v11491_v35 }
 0x278   :  { %v10562_v53 = vpop.f32.mrb[195].mxu0  ;;  %4035 = vst.msk [vmem:[#allocation2 + $0xbc] sm:$0xf] %vm3987_vm6, %v11491_v35  ;;  %4036 = vst.msk [vmem:[#allocation2 + $0xc0] sm:$0xf] %vm3987_vm6, %v11491_v35 }
 0x279   :  { %v10563_v6 = vadd.f32 %v10562_v53, %v10561_v42  ;;  %v13962_v23 = vadd.f32 %v10560_v29, %v13735_v43  ;;  %4037 = vst.msk [vmem:[#allocation2 + $0xc4] sm:$0xf] %vm3987_vm6, %v11491_v35  ;;  %4038 = vst.msk [vmem:[#allocation2 + $0xc8] sm:$0xf] %vm3987_vm6, %v11491_v35 }
 0x27a   :  { %4039 = vst.msk [vmem:[#allocation2 + $0xcc] sm:$0xf] %vm3987_vm6, %v11491_v35  ;;  %4040 = vst.msk [vmem:[#allocation2 + $0xd0] sm:$0xf] %vm3987_vm6, %v11491_v35 }
 0x27b   :  { %v13965_v28 = vadd.f32 %v10563_v6, %v16334_v16  ;;  %4041 = vst.msk [vmem:[#allocation2 + $0xd4] sm:$0xf] %vm3987_vm6, %v11491_v35  ;;  %4042 = vst.msk [vmem:[#allocation2 + $0xd8] sm:$0xf] %vm3987_vm6, %v11491_v35 }
 0x27c   :  { %4043 = vst.msk [vmem:[#allocation2 + $0xdc] sm:$0xf] %vm3987_vm6, %v11491_v35  ;;  %4044 = vst.msk [vmem:[#allocation2 + $0xe0] sm:$0xf] %vm3987_vm6, %v11491_v35 }
 0x27d   :  { %v13967_v50 = vpop.f32.mrb[196].mxu0  ;;  %4045 = vst.msk [vmem:[#allocation2 + $0xe4] sm:$0xf] %vm3987_vm6, %v11491_v35  ;;  %4046 = vst.msk [vmem:[#allocation2 + $0xe8] sm:$0xf] %vm3987_vm6, %v11491_v35 }
 0x27e   :  { %4047 = vst.msk [vmem:[#allocation2 + $0xec] sm:$0xf] %vm3987_vm6, %v11491_v35  ;;  %4048 = vst.msk [vmem:[#allocation2 + $0xf0] sm:$0xf] %vm3987_vm6, %v11491_v35  ;;  %v10565_v43 = vpop.f32.mrb[197].mxu0 }
 0x27f   :  { %4049 = vst.msk [vmem:[#allocation2 + $0xf4] sm:$0xf] %vm3987_vm6, %v11491_v35  ;;  %4050 = vst.msk [vmem:[#allocation2 + $0xf8] sm:$0xf] %vm3987_vm6, %v11491_v35  ;;  %v10566_v20 = vadd.f32 %v10565_v43, %v13967_v50  ;;  %v10567_v56 = vpop.f32.mrb[198].mxu0 }
 0x280   :  { %4051 = vst.msk [vmem:[#allocation2 + $0xfc] sm:$0xf] %vm3987_vm6, %v11491_v35  ;;  %4052 = vst.msk [vmem:[#allocation2 + $0x100] sm:$0xf] %vm3987_vm6, %v11491_v35  ;;  %v10568_v1 = vpop.f32.mrb[199].mxu0 }
 0x281   :  { %4053 = vst.msk [vmem:[#allocation2 + $0x104] sm:$0xf] %vm3987_vm6, %v11491_v35  ;;  %4055 = vst.msk [vmem:[#allocation2 + $0x10c] sm:$0xf] %vm3987_vm6, %v11491_v35  ;;  %v10569_v61 = vadd.f32 %v10568_v1, %v10567_v56  ;;  %v14371_v49 = vadd.f32 %v10566_v20, %v13757_v0 }
 0x282   :  { %4056 = vst.msk [vmem:[#allocation2 + $0x110] sm:$0xf] %vm3987_vm6, %v11491_v35  ;;  %4057 = vst.msk [vmem:[#allocation2 + $0x114] sm:$0xf] %vm3987_vm6, %v11491_v35 }
 0x283   :  { %4058 = vst.msk [vmem:[#allocation2 + $0x118] sm:$0xf] %vm3987_vm6, %v11491_v35  ;;  %4059 = vst.msk [vmem:[#allocation2 + $0x11c] sm:$0xf] %vm3987_vm6, %v11491_v35  ;;  %v14374_v5 = vadd.f32 %v10569_v61, %v13760_v52 }
 0x284   :  { %4060 = vst.msk [vmem:[#allocation2 + $0x120] sm:$0xf] %vm3987_vm6, %v11491_v35  ;;  %4061 = vst.msk [vmem:[#allocation2 + $0x124] sm:$0xf] %vm3987_vm6, %v11491_v35 }
 0x285   :  { %4062 = vst.msk [vmem:[#allocation2 + $0x128] sm:$0xf] %vm3987_vm6, %v11491_v35  ;;  %4063 = vst.msk [vmem:[#allocation2 + $0x12c] sm:$0xf] %vm3987_vm6, %v11491_v35  ;;  %v10570_v51 = vpop.f32.mrb[200].mxu0 }
 0x286   :  { %4064 = vst.msk [vmem:[#allocation2 + $0x130] sm:$0xf] %vm3987_vm6, %v11491_v35  ;;  %4065 = vst.msk [vmem:[#allocation2 + $0x134] sm:$0xf] %vm3987_vm6, %v11491_v35  ;;  %v10571_v2 = vpop.f32.mrb[201].mxu0 }
 0x287   :  { %4066 = vst.msk [vmem:[#allocation2 + $0x138] sm:$0xf] %vm3987_vm6, %v11491_v35  ;;  %4067 = vst.msk [vmem:[#allocation2 + $0x13c] sm:$0xf] %vm3987_vm6, %v11491_v35  ;;  %v10572_v60 = vadd.f32 %v10571_v2, %v10570_v51  ;;  %v10573_v15 = vpop.f32.mrb[202].mxu0 }
 0x288   :  { %4068 = vst.msk [vmem:[#allocation2 + $0x140] sm:$0xf] %vm3987_vm6, %v11491_v35  ;;  %4069 = vst.msk [vmem:[#allocation2 + $0x144] sm:$0xf] %vm3987_vm6, %v11491_v35  ;;  %v10574_v62 = vpop.f32.mrb[203].mxu0 }
 0x289   :  { %4070 = vst.msk [vmem:[#allocation2 + $0x148] sm:$0xf] %vm3987_vm6, %v11491_v35  ;;  %4071 = vst.msk [vmem:[#allocation2 + $0x14c] sm:$0xf] %vm3987_vm6, %v11491_v35  ;;  %v10575_v48 = vadd.f32 %v10574_v62, %v10573_v15  ;;  %v14377_v24 = vadd.f32 %v10572_v60, %v13770_v8 }
 0x28a   :  { %4072 = vst.msk [vmem:[#allocation2 + $0x150] sm:$0xf] %vm3987_vm6, %v11491_v35  ;;  %4073 = vst.msk [vmem:[#allocation2 + $0x154] sm:$0xf] %vm3987_vm6, %v11491_v35 }
 0x28b   :  { %4074 = vst.msk [vmem:[#allocation2 + $0x158] sm:$0xf] %vm3987_vm6, %v11491_v35  ;;  %4075 = vst.msk [vmem:[#allocation2 + $0x15c] sm:$0xf] %vm3987_vm6, %v11491_v35  ;;  %v14380_v32 = vadd.f32 %v10575_v48, %v13773_v10 }
 0x28c   :  { %4076 = vst.msk [vmem:[#allocation2 + $0x160] sm:$0xf] %vm3987_vm6, %v11491_v35  ;;  %4077 = vst.msk [vmem:[#allocation2 + $0x164] sm:$0xf] %vm3987_vm6, %v11491_v35 }
 0x28d   :  { %4078 = vst.msk [vmem:[#allocation2 + $0x168] sm:$0xf] %vm3987_vm6, %v11491_v35  ;;  %4079 = vst.msk [vmem:[#allocation2 + $0x16c] sm:$0xf] %vm3987_vm6, %v11491_v35  ;;  %v10576_v3 = vpop.f32.mrb[204].mxu0 }
 0x28e   :  { %4080 = vst.msk [vmem:[#allocation2 + $0x170] sm:$0xf] %vm3987_vm6, %v11491_v35  ;;  %4081 = vst.msk [vmem:[#allocation2 + $0x174] sm:$0xf] %vm3987_vm6, %v11491_v35  ;;  %v10577_v11 = vpop.f32.mrb[205].mxu0 }
 0x28f   :  { %4082 = vst.msk [vmem:[#allocation2 + $0x178] sm:$0xf] %vm3987_vm6, %v11491_v35  ;;  %4083 = vst.msk [vmem:[#allocation2 + $0x17c] sm:$0xf] %vm3987_vm6, %v11491_v35  ;;  %v10578_v63 = vadd.f32 %v10577_v11, %v10576_v3  ;;  %v10579_v0 = vpop.f32.mrb[206].mxu0 }
 0x290   :  { %4084 = vst.msk [vmem:[#allocation2 + $0x180] sm:$0xf] %vm3987_vm6, %v11491_v35  ;;  %4085 = vst.msk [vmem:[#allocation2 + $0x184] sm:$0xf] %vm3987_vm6, %v11491_v35  ;;  %v10580_v22 = vpop.f32.mrb[207].mxu0 }
 0x291   :  { %4086 = vst.msk [vmem:[#allocation2 + $0x188] sm:$0xf] %vm3987_vm6, %v11491_v35  ;;  %4087 = vst.msk [vmem:[#allocation2 + $0x18c] sm:$0xf] %vm3987_vm6, %v11491_v35  ;;  %v10581_v4 = vadd.f32 %v10580_v22, %v10579_v0  ;;  %v14383_v52 = vadd.f32 %v10578_v63, %v13791_v34 }
 0x292   :  { %4088 = vst.msk [vmem:[#allocation2 + $0x190] sm:$0xf] %vm3987_vm6, %v11491_v35  ;;  %4089 = vst.msk [vmem:[#allocation2 + $0x194] sm:$0xf] %vm3987_vm6, %v11491_v35 }
 0x293   :  { %4090 = vst.msk [vmem:[#allocation2 + $0x198] sm:$0xf] %vm3987_vm6, %v11491_v35  ;;  %4091 = vst.msk [vmem:[#allocation2 + $0x19c] sm:$0xf] %vm3987_vm6, %v11491_v35  ;;  %v14386_v25 = vadd.f32 %v10581_v4, %v13794_v39 }
 0x294   :  { %4092 = vst.msk [vmem:[#allocation2 + $0x1a0] sm:$0xf] %vm3987_vm6, %v11491_v35  ;;  %4093 = vst.msk [vmem:[#allocation2 + $0x1a4] sm:$0xf] %vm3987_vm6, %v11491_v35 }
 0x295   :  { %4094 = vst.msk [vmem:[#allocation2 + $0x1a8] sm:$0xf] %vm3987_vm6, %v11491_v35  ;;  %4095 = vst.msk [vmem:[#allocation2 + $0x1ac] sm:$0xf] %vm3987_vm6, %v11491_v35  ;;  %v10582_v7 = vpop.f32.mrb[208].mxu0 }
 0x296   :  { %4096 = vst.msk [vmem:[#allocation2 + $0x1b0] sm:$0xf] %vm3987_vm6, %v11491_v35  ;;  %4097 = vst.msk [vmem:[#allocation2 + $0x1b4] sm:$0xf] %vm3987_vm6, %v11491_v35  ;;  %v10583_v21 = vpop.f32.mrb[209].mxu0 }
 0x297   :  { %4098 = vst.msk [vmem:[#allocation2 + $0x1b8] sm:$0xf] %vm3987_vm6, %v11491_v35  ;;  %4099 = vst.msk [vmem:[#allocation2 + $0x1bc] sm:$0xf] %vm3987_vm6, %v11491_v35  ;;  %v10584_v41 = vadd.f32 %v10583_v21, %v10582_v7  ;;  %v10585_v8 = vpop.f32.mrb[210].mxu0 }
 0x298   :  { %4100 = vst.msk [vmem:[#allocation2 + $0x1c0] sm:$0xf] %vm3987_vm6, %v11491_v35  ;;  %4101 = vst.msk [vmem:[#allocation2 + $0x1c4] sm:$0xf] %vm3987_vm6, %v11491_v35  ;;  %v10586_v29 = vpop.f32.mrb[211].mxu0 }
 0x299   :  { %4102 = vst.msk [vmem:[#allocation2 + $0x1c8] sm:$0xf] %vm3987_vm6, %v11491_v35  ;;  %4103 = vst.msk [vmem:[#allocation2 + $0x1cc] sm:$0xf] %vm3987_vm6, %v11491_v35  ;;  %v10587_v42 = vadd.f32 %v10586_v29, %v10585_v8  ;;  %v14389_v10 = vadd.f32 %v10584_v41, %v13808_v37 }
 0x29a   :  { %4104 = vst.msk [vmem:[#allocation2 + $0x1d0] sm:$0xf] %vm3987_vm6, %v11491_v35  ;;  %4105 = vst.msk [vmem:[#allocation2 + $0x1d4] sm:$0xf] %vm3987_vm6, %v11491_v35 }
 0x29b   :  { %4106 = vst.msk [vmem:[#allocation2 + $0x1d8] sm:$0xf] %vm3987_vm6, %v11491_v35  ;;  %4107 = vst.msk [vmem:[#allocation2 + $0x1dc] sm:$0xf] %vm3987_vm6, %v11491_v35  ;;  %v14392_v53 = vadd.f32 %v10587_v42, %v13811_v59 }
 0x29c   :  { %4108 = vst.msk [vmem:[#allocation2 + $0x1e0] sm:$0xf] %vm3987_vm6, %v11491_v35  ;;  %4109 = vst.msk [vmem:[#allocation2 + $0x1e4] sm:$0xf] %vm3987_vm6, %v11491_v35 }
 0x29d   :  { %4110 = vst.msk [vmem:[#allocation2 + $0x1e8] sm:$0xf] %vm3987_vm6, %v11491_v35  ;;  %4111 = vst.msk [vmem:[#allocation2 + $0x1ec] sm:$0xf] %vm3987_vm6, %v11491_v35  ;;  %v10588_v6 = vpop.f32.mrb[212].mxu0 }
 0x29e   :  { %4112 = vst.msk [vmem:[#allocation2 + $0x1f0] sm:$0xf] %vm3987_vm6, %v11491_v35  ;;  %4113 = vst.msk [vmem:[#allocation2 + $0x1f4] sm:$0xf] %vm3987_vm6, %v11491_v35  ;;  %v10589_v16 = vpop.f32.mrb[213].mxu0 }
 0x29f   :  { %4114 = vst.msk [vmem:[#allocation2 + $0x1f8] sm:$0xf] %vm3987_vm6, %v11491_v35  ;;  %4115 = vst.msk [vmem:[#allocation2 + $0x1fc] sm:$0xf] %vm3987_vm6, %v11491_v35  ;;  %v10590_v50 = vadd.f32 %v10589_v16, %v10588_v6  ;;  %v10591_v34 = vpop.f32.mrb[214].mxu0 }
 0x2a0   :  { %4116 = vst.msk [vmem:[#allocation2 + $0x200] sm:$0xf] %vm3987_vm6, %v11491_v35  ;;  %4117 = vst.msk [vmem:[#allocation2 + $0x204] sm:$0xf] %vm3987_vm6, %v11491_v35 }
 0x2a1   :  { %4118 = vst.msk [vmem:[#allocation2 + $0x208] sm:$0xf] %vm3987_vm6, %v11491_v35  ;;  %4119 = vst.msk [vmem:[#allocation2 + $0x20c] sm:$0xf] %vm3987_vm6, %v11491_v35  ;;  %v14395_v39 = vadd.f32 %v10590_v50, %v13823_v12 }
 0x2a2   :  { %4120 = vst.msk [vmem:[#allocation2 + $0x210] sm:$0xf] %vm3987_vm6, %v11491_v35  ;;  %4121 = vst.msk [vmem:[#allocation2 + $0x214] sm:$0xf] %vm3987_vm6, %v11491_v35 }
 0x2a3   :  { %4122 = vst.msk [vmem:[#allocation2 + $0x218] sm:$0xf] %vm3987_vm6, %v11491_v35  ;;  %4123 = vst.msk [vmem:[#allocation2 + $0x21c] sm:$0xf] %vm3987_vm6, %v11491_v35 }
 0x2a4   :  { %4124 = vst.msk [vmem:[#allocation2 + $0x220] sm:$0xf] %vm3987_vm6, %v11491_v35  ;;  %4125 = vst.msk [vmem:[#allocation2 + $0x224] sm:$0xf] %vm3987_vm6, %v11491_v35 }
 0x2a5   :  { %4126 = vst.msk [vmem:[#allocation2 + $0x228] sm:$0xf] %vm3987_vm6, %v11491_v35  ;;  %4127 = vst.msk [vmem:[#allocation2 + $0x22c] sm:$0xf] %vm3987_vm6, %v11491_v35 }
 0x2a6   :  { %4128 = vst.msk [vmem:[#allocation2 + $0x230] sm:$0xf] %vm3987_vm6, %v11491_v35  ;;  %4129 = vst.msk [vmem:[#allocation2 + $0x234] sm:$0xf] %vm3987_vm6, %v11491_v35 }
 0x2a7   :  { %4130 = vst.msk [vmem:[#allocation2 + $0x238] sm:$0xf] %vm3987_vm6, %v11491_v35  ;;  %4131 = vst.msk [vmem:[#allocation2 + $0x23c] sm:$0xf] %vm3987_vm6, %v11491_v35 }
 0x2a8   :  { %4132 = vst.msk [vmem:[#allocation2 + $0x240] sm:$0xf] %vm3987_vm6, %v11491_v35  ;;  %4133 = vst.msk [vmem:[#allocation2 + $0x244] sm:$0xf] %vm3987_vm6, %v11491_v35 }
 0x2a9   :  { %4134 = vst.msk [vmem:[#allocation2 + $0x248] sm:$0xf] %vm3987_vm6, %v11491_v35  ;;  %4135 = vst.msk [vmem:[#allocation2 + $0x24c] sm:$0xf] %vm3987_vm6, %v11491_v35 }
 0x2aa   :  { %4136 = vst.msk [vmem:[#allocation2 + $0x250] sm:$0xf] %vm3987_vm6, %v11491_v35  ;;  %4137 = vst.msk [vmem:[#allocation2 + $0x254] sm:$0xf] %vm3987_vm6, %v11491_v35 }
 0x2ab   :  { %4138 = vst.msk [vmem:[#allocation2 + $0x258] sm:$0xf] %vm3987_vm6, %v11491_v35  ;;  %4139 = vst.msk [vmem:[#allocation2 + $0x25c] sm:$0xf] %vm3987_vm6, %v11491_v35 }
 0x2ac   :  { %4140 = vst.msk [vmem:[#allocation2 + $0x260] sm:$0xf] %vm3987_vm6, %v11491_v35  ;;  %4141 = vst.msk [vmem:[#allocation2 + $0x264] sm:$0xf] %vm3987_vm6, %v11491_v35 }
 0x2ad   :  { %4142 = vst.msk [vmem:[#allocation2 + $0x268] sm:$0xf] %vm3987_vm6, %v11491_v35  ;;  %4143 = vst.msk [vmem:[#allocation2 + $0x26c] sm:$0xf] %vm3987_vm6, %v11491_v35 }
 0x2ae   :  { %4144 = vst.msk [vmem:[#allocation2 + $0x270] sm:$0xf] %vm3987_vm6, %v11491_v35  ;;  %4145 = vst.msk [vmem:[#allocation2 + $0x274] sm:$0xf] %vm3987_vm6, %v11491_v35 }
 0x2af   :  { %4146 = vst.msk [vmem:[#allocation2 + $0x278] sm:$0xf] %vm3987_vm6, %v11491_v35  ;;  %4147 = vst.msk [vmem:[#allocation2 + $0x27c] sm:$0xf] %vm3987_vm6, %v11491_v35 }
 0x2b0   :  { %4148 = vst.msk [vmem:[#allocation2 + $0x280] sm:$0xf] %vm3987_vm6, %v11491_v35  ;;  %4149 = vst.msk [vmem:[#allocation2 + $0x284] sm:$0xf] %vm3987_vm6, %v11491_v35 }
 0x2b1   :  { %4150 = vst.msk [vmem:[#allocation2 + $0x288] sm:$0xf] %vm3987_vm6, %v11491_v35  ;;  %4151 = vst.msk [vmem:[#allocation2 + $0x28c] sm:$0xf] %vm3987_vm6, %v11491_v35 }
 0x2b2   :  { %4152 = vst.msk [vmem:[#allocation2 + $0x290] sm:$0xf] %vm3987_vm6, %v11491_v35  ;;  %4153 = vst.msk [vmem:[#allocation2 + $0x294] sm:$0xf] %vm3987_vm6, %v11491_v35 }
 0x2b3   :  { %4154 = vst.msk [vmem:[#allocation2 + $0x298] sm:$0xf] %vm3987_vm6, %v11491_v35  ;;  %4155 = vst.msk [vmem:[#allocation2 + $0x29c] sm:$0xf] %vm3987_vm6, %v11491_v35 }
 0x2b4   :  { %4156 = vst.msk [vmem:[#allocation2 + $0x2a0] sm:$0xf] %vm3987_vm6, %v11491_v35  ;;  %4157 = vst.msk [vmem:[#allocation2 + $0x2a4] sm:$0xf] %vm3987_vm6, %v11491_v35 }
 0x2b5   :  { %4158 = vst.msk [vmem:[#allocation2 + $0x2a8] sm:$0xf] %vm3987_vm6, %v11491_v35  ;;  %4159 = vst.msk [vmem:[#allocation2 + $0x2ac] sm:$0xf] %vm3987_vm6, %v11491_v35 }
 0x2b6   :  { %4160 = vst.msk [vmem:[#allocation2 + $0x2b0] sm:$0xf] %vm3987_vm6, %v11491_v35  ;;  %4161 = vst.msk [vmem:[#allocation2 + $0x2b4] sm:$0xf] %vm3987_vm6, %v11491_v35 }
 0x2b7   :  { %4162 = vst.msk [vmem:[#allocation2 + $0x2b8] sm:$0xf] %vm3987_vm6, %v11491_v35  ;;  %4163 = vst.msk [vmem:[#allocation2 + $0x2bc] sm:$0xf] %vm3987_vm6, %v11491_v35 }
 0x2b8   :  { %4164 = vst.msk [vmem:[#allocation2 + $0x2c0] sm:$0xf] %vm3987_vm6, %v11491_v35  ;;  %4165 = vst.msk [vmem:[#allocation2 + $0x2c4] sm:$0xf] %vm3987_vm6, %v11491_v35 }
 0x2b9   :  { %4166 = vst.msk [vmem:[#allocation2 + $0x2c8] sm:$0xf] %vm3987_vm6, %v11491_v35  ;;  %4167 = vst.msk [vmem:[#allocation2 + $0x2cc] sm:$0xf] %vm3987_vm6, %v11491_v35 }
 0x2ba   :  { %4168 = vst.msk [vmem:[#allocation2 + $0x2d0] sm:$0xf] %vm3987_vm6, %v11491_v35  ;;  %4169 = vst.msk [vmem:[#allocation2 + $0x2d4] sm:$0xf] %vm3987_vm6, %v11491_v35 }
 0x2bb   :  { %4170 = vst.msk [vmem:[#allocation2 + $0x2d8] sm:$0xf] %vm3987_vm6, %v11491_v35  ;;  %4171 = vst.msk [vmem:[#allocation2 + $0x2dc] sm:$0xf] %vm3987_vm6, %v11491_v35 }
 0x2bc   :  { %4172 = vst.msk [vmem:[#allocation2 + $0x2e0] sm:$0xf] %vm3987_vm6, %v11491_v35  ;;  %4173 = vst.msk [vmem:[#allocation2 + $0x2e4] sm:$0xf] %vm3987_vm6, %v11491_v35 }
 0x2bd   :  { %4174 = vst.msk [vmem:[#allocation2 + $0x2e8] sm:$0xf] %vm3987_vm6, %v11491_v35  ;;  %4175 = vst.msk [vmem:[#allocation2 + $0x2ec] sm:$0xf] %vm3987_vm6, %v11491_v35 }
 0x2be   :  { %4176 = vst.msk [vmem:[#allocation2 + $0x2f0] sm:$0xf] %vm3987_vm6, %v11491_v35  ;;  %4177 = vst.msk [vmem:[#allocation2 + $0x2f4] sm:$0xf] %vm3987_vm6, %v11491_v35 }
 0x2bf   :  { %4178 = vst.msk [vmem:[#allocation2 + $0x2f8] sm:$0xf] %vm3987_vm6, %v11491_v35  ;;  %4179 = vst.msk [vmem:[#allocation2 + $0x2fc] sm:$0xf] %vm3987_vm6, %v11491_v35 }
 0x2c0   :  { %4180 = vst.msk [vmem:[#allocation2 + $0x300] sm:$0xf] %vm3987_vm6, %v11491_v35  ;;  %4181 = vst.msk [vmem:[#allocation2 + $0x304] sm:$0xf] %vm3987_vm6, %v11491_v35 }
 0x2c1   :  { %4182 = vst.msk [vmem:[#allocation2 + $0x308] sm:$0xf] %vm3987_vm6, %v11491_v35  ;;  %4183 = vst.msk [vmem:[#allocation2 + $0x30c] sm:$0xf] %vm3987_vm6, %v11491_v35 }
 0x2c2   :  { %4184 = vst.msk [vmem:[#allocation2 + $0x310] sm:$0xf] %vm3987_vm6, %v11491_v35  ;;  %4185 = vst.msk [vmem:[#allocation2 + $0x314] sm:$0xf] %vm3987_vm6, %v11491_v35 }
 0x2c3   :  { %4186 = vst.msk [vmem:[#allocation2 + $0x318] sm:$0xf] %vm3987_vm6, %v11491_v35  ;;  %4187 = vst.msk [vmem:[#allocation2 + $0x31c] sm:$0xf] %vm3987_vm6, %v11491_v35  ;;  %v10592_v35 = vpop.f32.mrb[215].mxu0 }
 0x2c4   :  { %v10593_v43 = vadd.f32 %v10592_v35, %v10591_v34  ;;  %v10594_v56 = vpop.f32.mrb[216].mxu0 }
 0x2c5   :  { %v10595_v1 = vpop.f32.mrb[217].mxu0 }
 0x2c6   :  { %v14398_v20 = vadd.f32 %v10593_v43, %v13829_v38  ;;  %v10596_v61 = vadd.f32 %v10595_v1, %v10594_v56  ;;  %v10597_v37 = vpop.f32.mrb[218].mxu0 }
 0x2c7   :  { %v10598_v51 = vpop.f32.mrb[219].mxu0 }
 0x2c8   :  { %v10599_v2 = vadd.f32 %v10598_v51, %v10597_v37  ;;  %v14401_v59 = vadd.f32 %v10596_v61, %v13841_v55  ;;  %v10600_v15 = vpop.f32.mrb[220].mxu0 }
 0x2c9   :  { %v10601_v62 = vpop.f32.mrb[221].mxu0 }
 0x2ca   :  { %v14404_v60 = vadd.f32 %v10599_v2, %v13847_v54  ;;  %v10602_v48 = vadd.f32 %v10601_v62, %v10600_v15  ;;  %v10603_v12 = vpop.f32.mrb[222].mxu0 }
 0x2cb   :  { %v10604_v3 = vpop.f32.mrb[223].mxu0 }
 0x2cc   :  { %v10605_v11 = vadd.f32 %v10604_v3, %v10603_v12  ;;  %v14407_v38 = vadd.f32 %v10602_v48, %v13859_v46  ;;  %v10606_v0 = vpop.f32.mrb[224].mxu0 }
 0x2cd   :  { %v10607_v22 = vpop.f32.mrb[225].mxu0 }
 0x2ce   :  { %v14410_v63 = vadd.f32 %v10605_v11, %v13865_v40  ;;  %v10608_v4 = vadd.f32 %v10607_v22, %v10606_v0  ;;  %v10609_v55 = vpop.f32.mrb[226].mxu0 }
 0x2cf   :  { %v10610_v7 = vpop.f32.mrb[227].mxu0 }
 0x2d0   :  { %v10611_v21 = vadd.f32 %v10610_v7, %v10609_v55  ;;  %v14413_v54 = vadd.f32 %v10608_v4, %v13877_v45  ;;  %v10612_v8 = vpop.f32.mrb[228].mxu0 }
 0x2d1   :  { %v10613_v29 = vpop.f32.mrb[229].mxu0 }
 0x2d2   :  { %v14416_v41 = vadd.f32 %v10611_v21, %v13883_v36  ;;  %v10614_v42 = vadd.f32 %v10613_v29, %v10612_v8  ;;  %v10615_v46 = vpop.f32.mrb[230].mxu0  ;;  %v4453_v8 = vld [vmem:[#allocation2 + $0x7c] sm:$0xf] }
 0x2d3   :  { %v10616_v6 = vpop.f32.mrb[231].mxu0 }
 0x2d4   :  { %v10617_v16 = vadd.f32 %v10616_v6, %v10615_v46  ;;  %v14419_v40 = vadd.f32 %v10614_v42, %v13895_v14  ;;  %v10618_v34 = vpop.f32.mrb[232].mxu0  ;;  %v4459_v6 = vld [vmem:[#allocation2 + $0xa4] sm:$0xf] }
 0x2d5   :  { %v10619_v35 = vpop.f32.mrb[233].mxu0 }
 0x2d6   :  { %v14422_v50 = vadd.f32 %v10617_v16, %v13901_v33  ;;  %v10620_v43 = vadd.f32 %v10619_v35, %v10618_v34  ;;  %v10621_v45 = vpop.f32.mrb[234].mxu0  ;;  %v4553_v16 = vrot.slane %v4453_v8, 7  ;;  %v4452_v34 = vld [vmem:[#allocation2 + $0x78] sm:$0x8]  ;;  %v4454_v35 = vld [vmem:[#allocation2 + $0x80] sm:$0x7] }
 0x2d7   :  { %v10622_v56 = vpop.f32.mrb[235].mxu0  ;;  %v4462_v8 = vld [vmem:[#allocation2 + $0xb8] sm:$0xf] }
 0x2d8   :  { %v10623_v1 = vadd.f32 %v10622_v56, %v10621_v45  ;;  %v14425_v36 = vadd.f32 %v10620_v43, %v13913_v9  ;;  %v10624_v37 = vpop.f32.mrb[236].mxu0  ;;  %v4457_v45 = vld [vmem:[#allocation2 + $0x94] sm:$0x7]  ;;  %v4567_v56 = vrot.slane %v4459_v6, 7 }
 0x2d9   :  { %v10625_v51 = vpop.f32.mrb[237].mxu0 }
 0x2da   :  { %v14428_v61 = vadd.f32 %v10623_v1, %v13919_v17  ;;  %v10626_v2 = vadd.f32 %v10625_v51, %v10624_v37  ;;  %v10627_v14 = vpop.f32.mrb[238].mxu0  ;;  %v4458_v37 = vld [vmem:[#allocation2 + $0xa0] sm:$0x8]  ;;  %v4460_v51 = vld [vmem:[#allocation2 + $0xa8] sm:$0x7] }
 0x2db   :  { %v10628_v15 = vpop.f32.mrb[239].mxu0 }
 0x2dc   :  { %v10629_v62 = vadd.f32 %v10628_v15, %v10627_v14  ;;  %v14431_v33 = vadd.f32 %v10626_v2, %v13926_v47  ;;  %v10630_v12 = vpop.f32.mrb[240].mxu0  ;;  %v4555_v14 = vrot.slane %v4553_v16, 4  ;;  %v4663_v15 = vld [vmem:[%s16174_s5] sm:$0x1] }
 0x2dd   :  { %v10631_v3 = vpop.f32.mrb[241].mxu0  ;;  %10694 = vmatprep.mubr.msk.bf16.mxu0 %vm4712_vm9, %v4663_v15 }
 0x2de   :  { %v14434_v48 = vadd.f32 %v10629_v62, %v13932_v18  ;;  %v10632_v11 = vadd.f32 %v10631_v3, %v10630_v12  ;;  %v10633_v9 = vpop.f32.mrb[242].mxu0  ;;  %v4456_v18 = vld [vmem:[#allocation2 + $0x90] sm:$0xf] }
 0x2df   :  { %v10634_v0 = vpop.f32.mrb[243].mxu0 }
 0x2e0   :  { %v10635_v22 = vadd.f32 %v10634_v0, %v10633_v9  ;;  %v14437_v17 = vadd.f32 %v10632_v11, %v13935_v30  ;;  %v10636_v55 = vpop.f32.mrb[244].mxu0  ;;  %v4560_v30 = vrot.slane %v4456_v18, 7  ;;  %v4563_v0 = vrot.slane %v4457_v45, 7  ;;  %v4465_v18 = vld [vmem:[#allocation2 + $0xcc] sm:$0xf] }
 0x2e1   :  { %v10637_v7 = vpop.f32.mrb[245].mxu0 }
 0x2e2   :  { %v14440_v4 = vadd.f32 %v10635_v22, %v13941_v31  ;;  %v10638_v21 = vadd.f32 %v10637_v7, %v10636_v55  ;;  %v10639_v47 = vpop.f32.mrb[246].mxu0  ;;  %v4455_v31 = vld [vmem:[#allocation2 + $0x8c] sm:$0x8]  ;;  %v4562_v11 = vrot.slane %v4560_v30, 4  ;;  %v9727_v22 = vrot.slane %v4458_v37, 11 }
 0x2e3   :  { %v10640_v29 = vpop.f32.mrb[247].mxu0  ;;  %v9726_v3 = vrot.slane %v4455_v31, 11  ;;  %v4569_v55 = vrot.slane %v4567_v56, 4  ;;  %v4570_v7 = vrot.slane %v4460_v51, 7  ;;  %v14476_v51 = vld [vmem:[#allocation2 + $0x118] sm:$0x8] }
 0x2e4   :  { %v10641_v42 = vadd.f32 %v10640_v29, %v10639_v47  ;;  %v14443_v46 = vadd.f32 %v10638_v21, %v13944_v13  ;;  %v9725_v13 = vrot.slane %v4452_v34, 11  ;;  %v4568_v31 = vsel %vm14457_vm10, %v9727_v22, %v4567_v56 }
 0x2e5   :  { %v10642_v1 = vpop.f32.mrb[248].mxu0  ;;  %v4561_v34 = vsel %vm14457_vm10, %v9726_v3, %v4560_v30  ;;  %v4571_v45 = vsel %vm14457_vm10, %v4569_v55, %v4570_v7  ;;  %v4463_v30 = vld [vmem:[#allocation2 + $0xbc] sm:$0x7] }
 0x2e6   :  { %v14446_v43 = vadd.f32 %v10641_v42, %v13947_v27  ;;  %v10643_v2 = vpop.f32.mrb[249].mxu0  ;;  %v4556_v27 = vrot.slane %v4454_v35, 7  ;;  %v4554_v42 = vsel %vm14457_vm10, %v9725_v13, %v4553_v16  ;;  %v4564_v35 = vsel %vm14457_vm10, %v4562_v11, %v4563_v0  ;;  %v4464_v13 = vld [vmem:[#allocation2 + $0xc8] sm:$0x8]  ;;  %v14484_v0 = vld [vmem:[#allocation2 + $0xe0] sm:$0xf] }
 0x2e7   :  { %v10644_v62 = vadd.f32 %v10643_v2, %v10642_v1  ;;  %v10645_v12 = vpop.f32.mrb[250].mxu0  ;;  %v4461_v1 = vld [vmem:[#allocation2 + $0xb4] sm:$0x8]  ;;  %v4574_v16 = vrot.slane %v4462_v8, 7  ;;  %v14478_v2 = vld [vmem:[#allocation2 + $0x12c] sm:$0x8]  ;;  %v9742_v3 = vcombine.low %v4561_v34, %v4564_v35  ;;  %v9743_v11 = vcombine.low %v4568_v31, %v4571_v45 }
 0x2e8   :  { %v10646_v9 = vpop.f32.mrb[251].mxu0  ;;  %v4557_v6 = vsel %vm14457_vm10, %v4555_v14, %v4556_v27  ;;  %v9728_v55 = vrot.slane %v4461_v1, 11  ;;  %v9729_v8 = vrot.slane %v4464_v13, 11  ;;  %v4588_v45 = vrot.slane %v14484_v0, 7  ;;  %v14500_v1 = vld [vmem:[%s16175_s2] ss:$0 sm:$0xff] }
 0x2e9   :  { %v10647_v21 = vadd.f32 %v10646_v9, %v10645_v12  ;;  %v14453_v47 = vadd.f32 %v10644_v62, %v13950_v57  ;;  %v9741_v15 = vcombine.low %v4554_v42, %v4557_v6  ;;  %v14480_v62 = vld [vmem:[#allocation2 + $0xf0] sm:$0x8]  ;;  %v4466_v12 = vld [vmem:[#allocation2 + $0xd0] sm:$0x7]  ;;  %v14482_v9 = vld [vmem:[#allocation2 + $0x154] sm:$0x8] }
 0x2ea   :  { %16339 = vst [vmem:[#allocation6_spill] sm:$0xff] %v14480_v62  ;;  %16340 = vst [vmem:[#allocation7_spill] sm:$0xff] %v14482_v9  ;;  %v4576_v7 = vrot.slane %v4574_v16, 4  ;;  %v4575_v0 = vsel %vm14457_vm10, %v9728_v55, %v4574_v16  ;;  %v14522_v13 = vld [vmem:[#allocation2 + $0x168] sm:$0x8] }
 0x2eb   :  { %16335 = vst [vmem:[#allocation32_spill] sm:$0xff] %v14453_v47  ;;  %v14468_v57 = vadd.f32 %v10647_v21, %v13953_v19  ;;  %v4581_v19 = vrot.slane %v4465_v18, 7  ;;  %v4577_v21 = vrot.slane %v4463_v30, 7  ;;  %v14486_v18 = vld [vmem:[#allocation2 + $0x140] sm:$0x8]  ;;  %v14493_v35 = vsel %vm4712_vm9, %v9741_v15, 0 }
 0x2ec   :  { %v14508_v15 = vsel %vm4712_vm9, %v9742_v3, 0  ;;  %v14517_v30 = vld [vmem:[#allocation2 + $0x104] sm:$0x8]  ;;  %v14528_v31 = vld [vmem:[#allocation2 + $0xf0] sm:$0x8] }
 0x2ed   :  { %16338 = vst [vmem:[#allocation4_spill] sm:$0xff] %v14468_v57  ;;  %v10648_v37 = vpop.f32.mrb[252].mxu0  ;;  %v4583_v6 = vrot.slane %v4581_v19, 4  ;;  %v4582_v3 = vsel %vm14457_vm10, %v9729_v8, %v4581_v19  ;;  %16342 = vst [vmem:[#allocation8_spill] sm:$0xff] %v14528_v31  ;;  %v14536_v62 = vld [vmem:[%s16176_s3] ss:$0 sm:$0xff] }
 0x2ee   :  { %v10649_v14 = vpop.f32.mrb[253].mxu0 }
 0x2ef   :  { %v10650_v27 = vadd.f32 %v10649_v14, %v10648_v37  ;;  %v10651_v56 = vpop.f32.mrb[254].mxu0  ;;  %v4584_v37 = vrot.slane %v4466_v12, 7  ;;  %v4467_v14 = vld [vmem:[#allocation2 + $0xdc] sm:$0x8]  ;;  %v4469_v12 = vld [vmem:[#allocation2 + $0xe4] sm:$0x7] }
 0x2f0   :  { %v10652_v22 = vpop.f32.mrb[255].mxu0  ;;  %v4591_v34 = vrot.slane %v4469_v12, 7 }
 0x2f1   :  { %v10653_v26 = vadd.f32 %v10652_v22, %v10651_v56  ;;  %v14489_v42 = vadd.f32 %v10650_v27, %v13956_v58  ;;  %v14511_v56 = vld [vmem:[#allocation2 + $0x190] sm:$0x8]  ;;  %v4578_v22 = vsel %vm14457_vm10, %v4576_v7, %v4577_v21  ;;  %v4585_v27 = vsel %vm14457_vm10, %v4583_v6, %v4584_v37  ;;  %v14531_v7 = vld [vmem:[#allocation2 + $0x1a4] sm:$0x8]  ;;  %v14552_v37 = vld [vmem:[#allocation2 + $0x1b8] sm:$0x8] }
 0x2f2   :  { %v9730_v21 = vrot.slane %v4467_v14, 11 }
 0x2f3   :  { %v14504_v58 = vadd.f32 %v10653_v26, %v13959_v44  ;;  %v14520_v44 = vsel %vm4712_vm9, %v9743_v11, 0  ;;  %v4590_v11 = vrot.slane %v4588_v45, 4 }
 0x2f5   :  { %16341 = vst [vmem:[#allocation36_spill] sm:$0xff] %v14504_v58  ;;  %v11002_v26 = vpop.f32.mrb[0].mxu0  ;;  %v14544_v58 = vld [vmem:[#allocation2 + $0x118] sm:$0x8] }
 0x2f6   :  { %v3743_v16 = vadd.f32 %v11002_v26, %v14371_v49  ;;  %v3734_v55 = vpop.f32.mrb[1].mxu0  ;;  %v9744_v49 = vcombine.low %v4575_v0, %v4578_v22  ;;  %16343 = vst [vmem:[#allocation9_spill] sm:$0xff] %v14544_v58  ;;  %v9745_v0 = vcombine.low %v4582_v3, %v4585_v27  ;;  %v14550_v22 = vld [vmem:[#allocation2 + $0x17c] sm:$0x8] }
 0x2f7   :  { %v3735_v19 = vadd.f32 %v3734_v55, %v13962_v23  ;;  %v11003_v8 = vpop.f32.mrb[2].mxu0 }
 0x2f8   :  { %v3870_v26 = vmul.f32 %v14500_v1, %v3743_v16  ;;  %v3746_v14 = vadd.f32 %v11003_v8, %v14374_v5  ;;  %v3737_v57 = vpop.f32.mrb[3].mxu0  ;;  %v14558_v8 = vsel %vm14457_vm10, %v9730_v21, %v4588_v45  ;;  %v14567_v27 = vsel %vm4712_vm9, %v9744_v49, 0 }
 0x2f9   :  { %v3868_v9 = vmul.f32 %v14500_v1, %v3735_v19  ;;  %v3738_v23 = vadd.f32 %v3737_v57, %v13965_v28  ;;  %v14562_v19 = vsel %vm14457_vm10, %v4590_v11, %v4591_v34  ;;  %v14577_v11 = vld [vmem:[#allocation2 + $0x1cc] sm:$0x8]  ;;  %v14583_v47 = vsel %vm4712_vm9, %v9745_v0, 0 }
 0x2fa   :  { %v3909_v5 = vadd.f32 %v14536_v62, %v3870_v26  ;;  %v3871_v16 = vmul.f32 %v14500_v1, %v3746_v14  ;;  %v14570_v26 = vld [vmem:[#allocation2 + $0x190] sm:$0x8]  ;;  %16345 = vst [vmem:[#allocation12_spill] sm:$0xff] %v14577_v11 }
 0x2fb   :  { %v3907_v28 = vadd.f32 %v14536_v62, %v3868_v9  ;;  %v3869_v57 = vmul.f32 %v14500_v1, %v3738_v23  ;;  %16344 = vst [vmem:[#allocation10_spill] sm:$0xff] %v14570_v26 }
 0x2fc   :  { %v14572_v14 = vmax.f32 %v3909_v5, 0.0  ;;  %v3910_v45 = vadd.f32 %v14536_v62, %v3871_v16  ;;  %v9843_v16 = vld [vmem:[%s16174_s5 + $0x3] sm:$0x1] }
 0x2fd   :  { %v14579_v9 = vmax.f32 %v3907_v28, 0.0  ;;  %v3908_v23 = vadd.f32 %v14536_v62, %v3869_v57  ;;  %v11006_v49 = vpop.f32.mrb[4].mxu0  ;;  %10766 = vmatprep.mubr.msk.bf16.mxu1 %vm4712_vm9, %v9843_v16 }
 0x2fe   :  { %v10176_v3 = vpack.c.bf16 %v14572_v14, %v14572_v14  ;;  %v14592_v34 = vmax.f32 %v3910_v45, 0.0  ;;  %v3759_v28 = vadd.f32 %v11006_v49, %v14383_v52  ;;  %v3750_v21 = vpop.f32.mrb[5].mxu0 }
 0x2ff   :  { %v10174_v0 = vpack.c.bf16 %v14579_v9, %v14579_v9  ;;  %v14599_v55 = vmax.f32 %v3908_v23, 0.0  ;;  %v3751_v12 = vadd.f32 %v3750_v21, %v14377_v24  ;;  %v11007_v6 = vpop.f32.mrb[6].mxu0 }
 0x300   :  { %v4276_v31 = vrot.slane %v10176_v3, 6  ;;  %v10177_v45 = vpack.c.bf16 %v14592_v34, %v14592_v34  ;;  %v3874_v52 = vmul.f32 %v14500_v1, %v3759_v28  ;;  %v3762_v49 = vadd.f32 %v11007_v6, %v14386_v25  ;;  %v3753_v57 = vpop.f32.mrb[7].mxu0 }
 0x301   :  { %v4271_v16 = vrot.slane %v10174_v0, 6  ;;  %v10175_v24 = vpack.c.bf16 %v14599_v55, %v14599_v55  ;;  %v3872_v3 = vmul.f32 %v14500_v1, %v3751_v12  ;;  %v3754_v21 = vadd.f32 %v3753_v57, %v14380_v32 }
 0x302   :  { %v4277_v5 = vrot.slane %v4276_v31, 4  ;;  %4405 = vst.msk [vmem:[#allocation2 + $0x108] sm:$0xc] %vm4400_vm13, %v4276_v31  ;;  %v4278_v28 = vrot.slane %v10177_v45, 6  ;;  %v3913_v25 = vadd.f32 %v14536_v62, %v3874_v52  ;;  %v3875_v6 = vmul.f32 %v14500_v1, %v3762_v49 }
 0x303   :  { %v4272_v0 = vrot.slane %v4271_v16, 4  ;;  %4401 = vst.msk [vmem:[#allocation2 + $0xf4] sm:$0xc] %vm4400_vm13, %v4271_v16  ;;  %v4273_v11 = vrot.slane %v10175_v24, 6  ;;  %v3911_v26 = vadd.f32 %v14536_v62, %v3872_v3  ;;  %v3873_v58 = vmul.f32 %v14500_v1, %v3754_v21 }
 0x304   :  { %v4279_v12 = vsel %vm14609_vm15, %v4277_v5, %v4278_v28  ;;  %v4280_v32 = vrot.slane %v4278_v28, 4  ;;  %v14625_v57 = vmax.f32 %v3913_v25, 0.0  ;;  %v3914_v31 = vadd.f32 %v14536_v62, %v3875_v6 }
 0x305   :  { %4406 = vst.msk [vmem:[#allocation2 + $0x10c] sm:$0xf] %vm3987_vm6, %v4279_v12  ;;  %v4274_v45 = vsel %vm14609_vm15, %v4272_v0, %v4273_v11  ;;  %v4275_v52 = vrot.slane %v4273_v11, 4  ;;  %v14631_v49 = vmax.f32 %v3911_v26, 0.0  ;;  %v3912_v16 = vadd.f32 %v14536_v62, %v3873_v58  ;;  %v11010_v24 = vpop.f32.mrb[8].mxu0 }
 0x306   :  { %4407 = vst.msk [vmem:[#allocation2 + $0x110] sm:$0x3] %vm4403_vm14, %v4280_v32  ;;  %v10180_v5 = vpack.c.bf16 %v14625_v57, %v14625_v57  ;;  %v14638_v3 = vmax.f32 %v3914_v31, 0.0  ;;  %v3775_v21 = vadd.f32 %v11010_v24, %v14395_v39  ;;  %v3766_v28 = vpop.f32.mrb[9].mxu0 }
 0x307   :  { %4402 = vst.msk [vmem:[#allocation2 + $0xf8] sm:$0xf] %vm3987_vm6, %v4274_v45  ;;  %v10178_v58 = vpack.c.bf16 %v14631_v49, %v14631_v49  ;;  %v14646_v26 = vmax.f32 %v3912_v16, 0.0  ;;  %v3767_v25 = vadd.f32 %v3766_v28, %v14389_v10  ;;  %v11011_v6 = vpop.f32.mrb[10].mxu0 }
 0x308   :  { %4404 = vst.msk [vmem:[#allocation2 + $0xfc] sm:$0x3] %vm4403_vm14, %v4275_v52  ;;  %v4286_v12 = vrot.slane %v10180_v5, 6  ;;  %v10181_v39 = vpack.c.bf16 %v14638_v3, %v14638_v3  ;;  %v3878_v32 = vmul.f32 %v14500_v1, %v3775_v21  ;;  %v3778_v31 = vadd.f32 %v11011_v6, %v14398_v20  ;;  %v3769_v45 = vpop.f32.mrb[11].mxu0 }
 0x309   :  { %v4281_v52 = vrot.slane %v10178_v58, 6  ;;  %v10179_v16 = vpack.c.bf16 %v14646_v26, %v14646_v26  ;;  %v3876_v24 = vmul.f32 %v14500_v1, %v3767_v25  ;;  %v3770_v10 = vadd.f32 %v3769_v45, %v14392_v53 }
 0x30a   :  { %v4287_v28 = vrot.slane %v4286_v12, 4  ;;  %4411 = vst.msk [vmem:[#allocation2 + $0x130] sm:$0xc] %vm4400_vm13, %v4286_v12  ;;  %v4288_v5 = vrot.slane %v10181_v39, 6  ;;  %v3917_v0 = vadd.f32 %v14536_v62, %v3878_v32  ;;  %v3879_v11 = vmul.f32 %v14500_v1, %v3778_v31  ;;  %v14670_v39 = vld [vmem:[#allocation2 + $0xf4] sm:$0xf] }
 0x30b   :  { %v4282_v21 = vrot.slane %v4281_v52, 4  ;;  %4408 = vst.msk [vmem:[#allocation2 + $0x11c] sm:$0xc] %vm4400_vm13, %v4281_v52  ;;  %v4283_v20 = vrot.slane %v10179_v16, 6  ;;  %v3915_v58 = vadd.f32 %v14536_v62, %v3876_v24  ;;  %v3877_v6 = vmul.f32 %v14500_v1, %v3770_v10 }
 0x30c   :  { %v4289_v25 = vsel %vm14609_vm15, %v4287_v28, %v4288_v5  ;;  %v4290_v53 = vrot.slane %v4288_v5, 4  ;;  %v14667_v45 = vmax.f32 %v3917_v0, 0.0  ;;  %v3918_v12 = vadd.f32 %v14536_v62, %v3879_v11 }
 0x30d   :  { %4412 = vst.msk [vmem:[#allocation2 + $0x134] sm:$0xf] %vm3987_vm6, %v4289_v25  ;;  %v4284_v32 = vsel %vm14609_vm15, %v4282_v21, %v4283_v20  ;;  %v4285_v31 = vrot.slane %v4283_v20, 4  ;;  %v14675_v52 = vmax.f32 %v3915_v58, 0.0  ;;  %v3916_v16 = vadd.f32 %v14536_v62, %v3877_v6  ;;  %v11014_v24 = vpop.f32.mrb[12].mxu0 }
 0x30e   :  { %4413 = vst.msk [vmem:[#allocation2 + $0x138] sm:$0x3] %vm4403_vm14, %v4290_v53  ;;  %v10184_v11 = vpack.c.bf16 %v14667_v45, %v14667_v45  ;;  %v14682_v0 = vmax.f32 %v3918_v12, 0.0  ;;  %v3791_v10 = vadd.f32 %v11014_v24, %v14407_v38  ;;  %v3782_v28 = vpop.f32.mrb[13].mxu0  ;;  %v16349_v5 = vcombine.low %v14558_v8, %v14562_v19 }
 0x30f   :  { %4409 = vst.msk [vmem:[#allocation2 + $0x120] sm:$0xf] %vm3987_vm6, %v4284_v32  ;;  %v10182_v20 = vpack.c.bf16 %v14675_v52, %v14675_v52  ;;  %v14694_v58 = vmax.f32 %v3916_v16, 0.0  ;;  %v3783_v6 = vadd.f32 %v3782_v28, %v14401_v59  ;;  %v11015_v25 = vpop.f32.mrb[14].mxu0 }
 0x310   :  { %16348 = vst [vmem:[#allocation14_spill] sm:$0xff] %v14682_v0  ;;  %v14689_v21 = vsel %vm4712_vm9, %v16349_v5, 0  ;;  %4410 = vst.msk [vmem:[#allocation2 + $0x124] sm:$0x3] %vm4403_vm14, %v4285_v31  ;;  %v4296_v38 = vrot.slane %v10184_v11, 6  ;;  %v10185_v12 = vpack.c.bf16 %v14682_v0, %v14682_v0  ;;  %v3882_v8 = vmul.f32 %v14500_v1, %v3791_v10  ;;  %v3785_v32 = vpop.f32.mrb[15].mxu0 }
 0x311   :  { %v3794_v19 = vadd.f32 %v11015_v25, %v14410_v63  ;;  %v4291_v31 = vrot.slane %v10182_v20, 6  ;;  %v10183_v24 = vpack.c.bf16 %v14694_v58, %v14694_v58  ;;  %v3880_v16 = vmul.f32 %v14500_v1, %v3783_v6 }
 0x312   :  { %v3786_v59 = vadd.f32 %v3785_v32, %v14404_v60  ;;  %v4297_v28 = vrot.slane %v4296_v38, 4  ;;  %4417 = vst.msk [vmem:[#allocation2 + $0x158] sm:$0xc] %vm4400_vm13, %v4296_v38  ;;  %v4298_v11 = vrot.slane %v10185_v12, 6  ;;  %v3921_v5 = vadd.f32 %v14536_v62, %v3882_v8  ;;  %v4477_v0 = vld [vmem:[#allocation2 + $0x11c] sm:$0xf] }
 0x313   :  { %v3883_v53 = vmul.f32 %v14500_v1, %v3794_v19  ;;  %v4292_v10 = vrot.slane %v4291_v31, 4  ;;  %4414 = vst.msk [vmem:[#allocation2 + $0x144] sm:$0xc] %vm4400_vm13, %v4291_v31  ;;  %v4293_v63 = vrot.slane %v10183_v24, 6  ;;  %v3919_v20 = vadd.f32 %v14536_v62, %v3880_v16 }
 0x314   :  { %v3881_v25 = vmul.f32 %v14500_v1, %v3786_v59  ;;  %v4299_v60 = vsel %vm14609_vm15, %v4297_v28, %v4298_v11  ;;  %v4300_v6 = vrot.slane %v4298_v11, 4  ;;  %v14714_v32 = vmax.f32 %v3921_v5, 0.0 }
 0x315   :  { %v3922_v38 = vadd.f32 %v14536_v62, %v3883_v53  ;;  %4418 = vst.msk [vmem:[#allocation2 + $0x15c] sm:$0xf] %vm3987_vm6, %v4299_v60  ;;  %v4294_v12 = vsel %vm14609_vm15, %v4292_v10, %v4293_v63  ;;  %v4295_v8 = vrot.slane %v4293_v63, 4  ;;  %v14720_v19 = vmax.f32 %v3919_v20, 0.0  ;;  %v11018_v24 = vpop.f32.mrb[16].mxu0 }
 0x316   :  { %16350 = vst [vmem:[#allocation11_spill] sm:$0xff] %v14714_v32  ;;  %v3920_v31 = vadd.f32 %v14536_v62, %v3881_v25  ;;  %v4478_v16 = vld [vmem:[#allocation2 + $0x120] sm:$0x7]  ;;  %4419 = vst.msk [vmem:[#allocation2 + $0x160] sm:$0x3] %vm4403_vm14, %v4300_v6  ;;  %v10188_v59 = vpack.c.bf16 %v14714_v32, %v14714_v32  ;;  %v3807_v28 = vadd.f32 %v11018_v24, %v14419_v40  ;;  %v3798_v11 = vpop.f32.mrb[17].mxu0 }
 0x317   :  { %16351 = vst [vmem:[#allocation18_spill] sm:$0xff] %v14720_v19  ;;  %4415 = vst.msk [vmem:[#allocation2 + $0x148] sm:$0xf] %vm3987_vm6, %v4294_v12  ;;  %v14727_v53 = vmax.f32 %v3922_v38, 0.0  ;;  %v4609_v5 = vrot.slane %v4477_v0, 7  ;;  %v10186_v10 = vpack.c.bf16 %v14720_v19, %v14720_v19  ;;  %v3799_v20 = vadd.f32 %v3798_v11, %v14413_v54  ;;  %v11019_v25 = vpop.f32.mrb[18].mxu0 }
 0x318   :  { %4416 = vst.msk [vmem:[#allocation2 + $0x14c] sm:$0x3] %vm4403_vm14, %v4295_v8  ;;  %v14733_v63 = vmax.f32 %v3920_v31, 0.0  ;;  %v4612_v60 = vrot.slane %v4478_v16, 7  ;;  %v4306_v6 = vrot.slane %v10188_v59, 6  ;;  %v3886_v12 = vmul.f32 %v14500_v1, %v3807_v28  ;;  %v3801_v0 = vpop.f32.mrb[19].mxu0 }
 0x319   :  { %16352 = vst [vmem:[#allocation19_spill] sm:$0xff] %v14727_v53  ;;  %v10189_v38 = vpack.c.bf16 %v14727_v53, %v14727_v53  ;;  %v3810_v40 = vadd.f32 %v11019_v25, %v14422_v50  ;;  %v4301_v24 = vrot.slane %v10186_v10, 6  ;;  %v3884_v31 = vmul.f32 %v14500_v1, %v3799_v20 }
 0x31a   :  { %16353 = vst [vmem:[#allocation21_spill] sm:$0xff] %v14733_v63  ;;  %v10187_v8 = vpack.c.bf16 %v14733_v63, %v14733_v63  ;;  %v3802_v32 = vadd.f32 %v3801_v0, %v14416_v41  ;;  %v4307_v54 = vrot.slane %v4306_v6, 4  ;;  %4423 = vst.msk [vmem:[#allocation2 + $0x180] sm:$0xc] %vm4400_vm13, %v4306_v6  ;;  %v3925_v59 = vadd.f32 %v14536_v62, %v3886_v12 }
 0x31b   :  { %v4308_v16 = vrot.slane %v10189_v38, 6  ;;  %v3887_v11 = vmul.f32 %v14500_v1, %v3810_v40  ;;  %v4302_v28 = vrot.slane %v4301_v24, 4  ;;  %4420 = vst.msk [vmem:[#allocation2 + $0x16c] sm:$0xc] %vm4400_vm13, %v4301_v24  ;;  %v3923_v10 = vadd.f32 %v14536_v62, %v3884_v31  ;;  %v4480_v38 = vld [vmem:[#allocation2 + $0x130] sm:$0xf] }
 0x31c   :  { %v4303_v50 = vrot.slane %v10187_v8, 6  ;;  %v3885_v25 = vmul.f32 %v14500_v1, %v3802_v32  ;;  %v14752_v0 = vmax.f32 %v3925_v59, 0.0  ;;  %v16355_v63 = vrot.slane %v14478_v2, 11 }
 0x31d   :  { %v4309_v20 = vsel %vm14609_vm15, %v4307_v54, %v4308_v16  ;;  %v4310_v41 = vrot.slane %v4308_v16, 4  ;;  %v3926_v6 = vadd.f32 %v14536_v62, %v3887_v11  ;;  %v14758_v24 = vmax.f32 %v3923_v10, 0.0  ;;  %v11022_v32 = vpop.f32.mrb[20].mxu0 }
 0x31e   :  { %4424 = vst.msk [vmem:[#allocation2 + $0x184] sm:$0xf] %vm3987_vm6, %v4309_v20  ;;  %v4304_v12 = vsel %vm14609_vm15, %v4302_v28, %v4303_v50  ;;  %v4305_v40 = vrot.slane %v4303_v50, 4  ;;  %v3924_v8 = vadd.f32 %v14536_v62, %v3885_v25  ;;  %v10192_v31 = vpack.c.bf16 %v14752_v0, %v14752_v0  ;;  %v3814_v28 = vpop.f32.mrb[21].mxu0 }
 0x31f   :  { %4425 = vst.msk [vmem:[#allocation2 + $0x188] sm:$0x3] %vm4403_vm14, %v4310_v41  ;;  %v14765_v54 = vmax.f32 %v3926_v6, 0.0  ;;  %v16354_v16 = vrot.slane %v14476_v51, 11  ;;  %v4611_v11 = vrot.slane %v4609_v5, 4  ;;  %v10190_v50 = vpack.c.bf16 %v14758_v24, %v14758_v24  ;;  %v11023_v41 = vpop.f32.mrb[22].mxu0 }
 0x320   :  { %4421 = vst.msk [vmem:[#allocation2 + $0x170] sm:$0xf] %vm3987_vm6, %v4304_v12  ;;  %v14774_v10 = vmax.f32 %v3924_v8, 0.0  ;;  %v3823_v25 = vadd.f32 %v11022_v32, %v14431_v33  ;;  %v4616_v20 = vrot.slane %v4480_v38, 7  ;;  %v4316_v6 = vrot.slane %v10192_v31, 6 }
 0x321   :  { %v4610_v59 = vsel %vm14457_vm10, %v16354_v16, %v4609_v5  ;;  %4422 = vst.msk [vmem:[#allocation2 + $0x174] sm:$0x3] %vm4403_vm14, %v4305_v40  ;;  %v10193_v12 = vpack.c.bf16 %v14765_v54, %v14765_v54  ;;  %v4613_v5 = vsel %vm14457_vm10, %v4611_v11, %v4612_v60  ;;  %v4481_v40 = vld [vmem:[#allocation2 + $0x134] sm:$0x7]  ;;  %v3817_v16 = vpop.f32.mrb[23].mxu0  ;;  %v4311_v53 = vrot.slane %v10190_v50, 6 }
 0x322   :  { %v10191_v33 = vpack.c.bf16 %v14774_v10, %v14774_v10  ;;  %v9749_v38 = vcombine.low %v4610_v59, %v4613_v5  ;;  %v4317_v32 = vrot.slane %v4316_v6, 4  ;;  %4429 = vst.msk [vmem:[#allocation2 + $0x1a8] sm:$0xc] %vm4400_vm13, %v4316_v6  ;;  %v3890_v51 = vmul.f32 %v14500_v1, %v3823_v25 }
 0x323   :  { %v4318_v31 = vrot.slane %v10193_v12, 6  ;;  %v4617_v60 = vsel %vm14457_vm10, %v16355_v63, %v4616_v20  ;;  %v4312_v11 = vrot.slane %v4311_v53, 4  ;;  %4426 = vst.msk [vmem:[#allocation2 + $0x194] sm:$0xc] %vm4400_vm13, %v4311_v53  ;;  %v4618_v8 = vrot.slane %v4616_v20, 4 }
 0x324   :  { %v4313_v50 = vrot.slane %v10191_v33, 6  ;;  %11094 = vmatprep.subr.msk.bf16.mxu0 %vm4712_vm9, %v9749_v38  ;;  %v4619_v19 = vrot.slane %v4481_v40, 7  ;;  %v3929_v25 = vadd.f32 %v14536_v62, %v3890_v51  ;;  %v3815_v2 = vadd.f32 %v3814_v28, %v14425_v36  ;;  %v4483_v12 = vld [vmem:[#allocation2 + $0x144] sm:$0xf]  ;;  %v4484_v63 = vld [vmem:[#allocation2 + $0x148] sm:$0x7] }
 0x325   :  { %v4319_v59 = vsel %vm14609_vm15, %v4317_v32, %v4318_v31  ;;  %v4320_v6 = vrot.slane %v4318_v31, 4  ;;  %10679 = vmatpush3.bf16.xpose.msra.mxu0 %v14493_v35  ;;  %v3826_v40 = vadd.f32 %v11023_v41, %v14434_v48  ;;  %v11026_v33 = vpop.f32.mrb[24].mxu0  ;;  %v3818_v51 = vadd.f32 %v3817_v16, %v14428_v61 }
 0x326   :  { %4430 = vst.msk [vmem:[#allocation2 + $0x1ac] sm:$0xf] %vm3987_vm6, %v4319_v59  ;;  %v4314_v53 = vsel %vm14609_vm15, %v4312_v11, %v4313_v50  ;;  %v4315_v5 = vrot.slane %v4313_v50, 4  ;;  %v4620_v20 = vsel %vm14457_vm10, %v4618_v8, %v4619_v19  ;;  %v14808_v35 = vmax.f32 %v3929_v25, 0.0  ;;  %v3830_v38 = vpop.f32.mrb[25].mxu0 }
 0x327   :  { %4431 = vst.msk [vmem:[#allocation2 + $0x1b0] sm:$0x3] %vm4403_vm14, %v4320_v6  ;;  %v9750_v36 = vcombine.low %v4617_v60, %v4620_v20  ;;  %v3888_v28 = vmul.f32 %v14500_v1, %v3815_v2  ;;  %v3891_v32 = vmul.f32 %v14500_v1, %v3826_v40  ;;  %v3839_v19 = vadd.f32 %v11026_v33, %v14443_v46  ;;  %v11027_v8 = vpop.f32.mrb[26].mxu0 }
 0x328   :  { %4427 = vst.msk [vmem:[#allocation2 + $0x198] sm:$0xf] %vm3987_vm6, %v4314_v53  ;;  %v4623_v48 = vrot.slane %v4483_v12, 7  ;;  %v4626_v41 = vrot.slane %v4484_v63, 7  ;;  %v10196_v31 = vpack.c.bf16 %v14808_v35, %v14808_v35  ;;  %v3889_v11 = vmul.f32 %v14500_v1, %v3818_v51  ;;  %v3833_v16 = vpop.f32.mrb[27].mxu0 }
 0x329   :  { %4428 = vst.msk [vmem:[#allocation2 + $0x19c] sm:$0x3] %vm4403_vm14, %v4315_v5  ;;  %11095 = vmatprep.subr.msk.bf16.mxu0 %vm4712_vm9, %v9750_v36  ;;  %v3927_v60 = vadd.f32 %v14536_v62, %v3888_v28  ;;  %v3831_v61 = vadd.f32 %v3830_v38, %v14437_v17  ;;  %v3930_v50 = vadd.f32 %v14536_v62, %v3891_v32  ;;  %v16356_v46 = vrot.slane %v14486_v18, 11 }
 0x32a   :  { %v3894_v59 = vmul.f32 %v14500_v1, %v3839_v19  ;;  %v4625_v25 = vrot.slane %v4623_v48, 4  ;;  %v4326_v2 = vrot.slane %v10196_v31, 6  ;;  %v3928_v63 = vadd.f32 %v14536_v62, %v3889_v11 }
 0x32b   :  { %v4624_v6 = vsel %vm14457_vm10, %v16356_v46, %v4623_v48  ;;  %v14827_v12 = vmax.f32 %v3927_v60, 0.0  ;;  %v3892_v53 = vmul.f32 %v14500_v1, %v3831_v61  ;;  %v14831_v5 = vmax.f32 %v3930_v50, 0.0 }
 0x32c   :  { %v3933_v17 = vadd.f32 %v14536_v62, %v3894_v59  ;;  %v4627_v20 = vsel %vm14457_vm10, %v4625_v25, %v4626_v41  ;;  %v3842_v18 = vadd.f32 %v11027_v8, %v14446_v43  ;;  %v4327_v40 = vrot.slane %v4326_v2, 4  ;;  %4435 = vst.msk [vmem:[#allocation2 + $0x1d0] sm:$0xc] %vm4400_vm13, %v4326_v2 }
 0x32d   :  { %v10194_v33 = vpack.c.bf16 %v14827_v12, %v14827_v12  ;;  %v14840_v36 = vmax.f32 %v3928_v63, 0.0  ;;  %10681 = vmatpush3.bf16.xpose.msra.mxu0 %v14508_v15  ;;  %v9751_v28 = vcombine.low %v4624_v6, %v4627_v20  ;;  %v10197_v38 = vpack.c.bf16 %v14831_v5, %v14831_v5  ;;  %v11030_v19 = vpop.f32.mrb[28].mxu0  ;;  %v4486_v63 = vld [vmem:[#allocation2 + $0x158] sm:$0xf] }
 0x32e   :  { %v14847_v32 = vmax.f32 %v3933_v17, 0.0  ;;  %v3931_v43 = vadd.f32 %v14536_v62, %v3892_v53  ;;  %v3895_v15 = vmul.f32 %v14500_v1, %v3842_v18  ;;  %v3846_v31 = vpop.f32.mrb[29].mxu0  ;;  %v3834_v50 = vadd.f32 %v3833_v16, %v14440_v4  ;;  %v4487_v4 = vld [vmem:[#allocation2 + $0x15c] sm:$0x7] }
 0x32f   :  { %v4321_v48 = vrot.slane %v10194_v33, 6  ;;  %v10195_v8 = vpack.c.bf16 %v14840_v36, %v14840_v36  ;;  %11096 = vmatprep.subr.msk.bf16.mxu0 %vm4712_vm9, %v9751_v28  ;;  %v4328_v60 = vrot.slane %v10197_v38, 6  ;;  %v11031_v59 = vpop.f32.mrb[30].mxu0  ;;  %v3855_v2 = vadd.f32 %v11030_v19, %v14489_v42 }
 0x330   :  { %v10200_v11 = vpack.c.bf16 %v14847_v32, %v14847_v32  ;;  %v14858_v61 = vmax.f32 %v3931_v43, 0.0  ;;  %v3934_v25 = vadd.f32 %v14536_v62, %v3895_v15  ;;  %v3849_v53 = vpop.f32.mrb[31].mxu0  ;;  %v3893_v42 = vmul.f32 %v14500_v1, %v3834_v50  ;;  %v5626_v50 = vld [vmem:[#allocation2 + $0x194] sm:$0xf] }
 0x331   :  { %v4322_v46 = vrot.slane %v4321_v48, 4  ;;  %4432 = vst.msk [vmem:[#allocation2 + $0x1bc] sm:$0xc] %vm4400_vm13, %v4321_v48  ;;  %v4323_v6 = vrot.slane %v10195_v8, 6  ;;  %v4329_v17 = vsel %vm14609_vm15, %v4327_v40, %v4328_v60  ;;  %v4330_v20 = vrot.slane %v4328_v60, 4 }
 0x332   :  { %v4336_v18 = vrot.slane %v10200_v11, 6  ;;  %v10198_v33 = vpack.c.bf16 %v14858_v61, %v14858_v61  ;;  %4436 = vst.msk [vmem:[#allocation2 + $0x1d4] sm:$0xf] %vm3987_vm6, %v4329_v17  ;;  %v14871_v38 = vmax.f32 %v3934_v25, 0.0  ;;  %v3898_v19 = vmul.f32 %v14500_v1, %v3855_v2  ;;  %v16357_v25 = vld [vmem:[#allocation7_spill] sm:$0xff] }
 0x333   :  { %v4324_v16 = vsel %vm14609_vm15, %v4322_v46, %v4323_v6  ;;  %v4325_v28 = vrot.slane %v4323_v6, 4  ;;  %4437 = vst.msk [vmem:[#allocation2 + $0x1d8] sm:$0x3] %vm4403_vm14, %v4330_v20  ;;  %v4630_v48 = vrot.slane %v4486_v63, 7  ;;  %v3932_v60 = vadd.f32 %v14536_v62, %v3893_v42 }
 0x334   :  { %4433 = vst.msk [vmem:[#allocation2 + $0x1c0] sm:$0xf] %vm3987_vm6, %v4324_v16  ;;  %v4337_v40 = vrot.slane %v4336_v18, 4  ;;  %v4331_v43 = vrot.slane %v10198_v33, 6  ;;  %v10201_v15 = vpack.c.bf16 %v14871_v38, %v14871_v38  ;;  %v4633_v11 = vrot.slane %v4487_v4, 7  ;;  %v16359_v33 = vld [vmem:[#allocation32_spill] sm:$0xff] }
 0x335   :  { %4441 = vst.msk [vmem:[#allocation2 + $0x1f8] sm:$0xc] %vm4400_vm13, %v4336_v18  ;;  %10683 = vmatpush3.bf16.xpose.msra.mxu0 %v14520_v44  ;;  %v3937_v6 = vadd.f32 %v14536_v62, %v3898_v19  ;;  %v16358_v2 = vrot.slane %v16357_v25, 11  ;;  %v4632_v17 = vrot.slane %v4630_v48, 4  ;;  %v14891_v18 = vmax.f32 %v3932_v60, 0.0 }
 0x336   :  { %4434 = vst.msk [vmem:[#allocation2 + $0x1c4] sm:$0x3] %vm4403_vm14, %v4325_v28  ;;  %v4332_v46 = vrot.slane %v4331_v43, 4  ;;  %v4338_v20 = vrot.slane %v10201_v15, 6  ;;  %v3847_v16 = vadd.f32 %v3846_v31, %v16359_v33  ;;  %v16360_v28 = vld [vmem:[#allocation36_spill] sm:$0xff]  ;;  %v5755_v8 = vrot.slane %v5626_v50, 7 }
 0x337   :  { %4438 = vst.msk [vmem:[#allocation2 + $0x1e4] sm:$0xc] %vm4400_vm13, %v4331_v43  ;;  %v4631_v63 = vsel %vm14457_vm10, %v16358_v2, %v4630_v48  ;;  %v3858_v44 = vadd.f32 %v11031_v59, %v16360_v28  ;;  %v14895_v4 = vmax.f32 %v3937_v6, 0.0  ;;  %v4634_v42 = vsel %vm14457_vm10, %v4632_v17, %v4633_v11  ;;  %v16361_v43 = vld [vmem:[#allocation4_spill] sm:$0xff]  ;;  %v5603_v25 = vld [vmem:[#allocation2 + $0xf8] sm:$0x7] }
 0x338   :  { %v3850_v19 = vadd.f32 %v3849_v53, %v16361_v43  ;;  %v4339_v2 = vsel %vm14609_vm15, %v4337_v40, %v4338_v20  ;;  %v4340_v48 = vrot.slane %v4338_v20, 4  ;;  %v10199_v31 = vpack.c.bf16 %v14891_v18, %v14891_v18  ;;  %v5627_v59 = vld [vmem:[#allocation2 + $0x198] sm:$0x7]  ;;  %v4492_v15 = vld [vmem:[#allocation2 + $0x180] sm:$0xf] }
 0x339   :  { %4442 = vst.msk [vmem:[#allocation2 + $0x1fc] sm:$0xf] %vm3987_vm6, %v4339_v2  ;;  %v10204_v60 = vpack.c.bf16 %v14895_v4, %v14895_v4  ;;  %v9752_v11 = vcombine.low %v4631_v63, %v4634_v42  ;;  %v3896_v53 = vmul.f32 %v14500_v1, %v3847_v16  ;;  %v3899_v50 = vmul.f32 %v14500_v1, %v3858_v44  ;;  %v4489_v63 = vld [vmem:[#allocation2 + $0x16c] sm:$0xf] }
 0x33a   :  { %4443 = vst.msk [vmem:[#allocation2 + $0x200] sm:$0x3] %vm4403_vm14, %v4340_v48  ;;  %v4333_v40 = vrot.slane %v10199_v31, 6  ;;  %v3897_v6 = vmul.f32 %v14500_v1, %v3850_v19  ;;  %v5757_v17 = vrot.slane %v5755_v8, 4  ;;  %v5702_v20 = vrot.slane %v5603_v25, 7  ;;  %v16364_v31 = vld [vmem:[#allocation6_spill] sm:$0xff] }
 0x33b   :  { %v4346_v33 = vrot.slane %v10204_v60, 6  ;;  %11097 = vmatprep.subr.msk.bf16.mxu0 %vm4712_vm9, %v9752_v11  ;;  %v3935_v28 = vadd.f32 %v14536_v62, %v3896_v53  ;;  %v3938_v43 = vadd.f32 %v14536_v62, %v3899_v50  ;;  %v5758_v2 = vrot.slane %v5627_v59, 7  ;;  %v4490_v59 = vld [vmem:[#allocation2 + $0x170] sm:$0x7] }
 0x33c   :  { %v4334_v16 = vsel %vm14609_vm15, %v4332_v46, %v4333_v40  ;;  %v4335_v44 = vrot.slane %v4333_v40, 4  ;;  %v3936_v42 = vadd.f32 %v14536_v62, %v3897_v6  ;;  %v16362_v48 = vrot.slane %v14511_v56, 11  ;;  %v5605_v40 = vld [vmem:[#allocation2 + $0x108] sm:$0xf] }
 0x33d   :  { %10685 = vmatpush3.bf16.xpose.msra.mxu0 %v14567_v27  ;;  %4439 = vst.msk [vmem:[#allocation2 + $0x1e8] sm:$0xf] %vm3987_vm6, %v4334_v16  ;;  %v14926_v19 = vmax.f32 %v3935_v28, 0.0  ;;  %v14928_v25 = vmax.f32 %v3938_v43, 0.0  ;;  %v5759_v46 = vsel %vm14457_vm10, %v5757_v17, %v5758_v2  ;;  %v16363_v62 = vrot.slane %v14670_v39, 7 }
 0x33e   :  { %v5756_v1 = vsel %vm14457_vm10, %v16362_v48, %v5755_v8  ;;  %4447 = vst.msk [vmem:[#allocation2 + $0x220] sm:$0xc] %vm4400_vm13, %v4346_v33  ;;  %v16365_v56 = vrot.slane %v16364_v31, 11  ;;  %v14939_v27 = vmax.f32 %v3936_v42, 0.0  ;;  %v4637_v50 = vrot.slane %v4489_v63, 7 }
 0x33f   :  { %4440 = vst.msk [vmem:[#allocation2 + $0x1ec] sm:$0x3] %vm4403_vm14, %v4335_v44  ;;  %v9852_v60 = vcombine.low %v5756_v1, %v5759_v46  ;;  %v16366_v11 = vmov %v16363_v62  ;;  %v4347_v6 = vrot.slane %v4346_v33, 4  ;;  %v10202_v17 = vpack.c.bf16 %v14926_v19, %v14926_v19  ;;  %v5629_v2 = vld [vmem:[#allocation2 + $0x1a8] sm:$0xf] }
 0x340   :  { %v5700_v8 = vsel %vm14457_vm10, %v16365_v56, %v16363_v62  ;;  %v5701_v53 = vrot.slane %v16366_v11, 4  ;;  %v10205_v43 = vpack.c.bf16 %v14928_v25, %v14928_v25  ;;  %v5630_v16 = vld [vmem:[#allocation2 + $0x1ac] sm:$0x7]  ;;  %v10203_v39 = vpack.c.bf16 %v14939_v27, %v14939_v27  ;;  %v5608_v44 = vld [vmem:[#allocation2 + $0x11c] sm:$0xf] }
 0x341   :  { %11126 = vmatprep.subr.msk.bf16.mxu1 %vm4712_vm9, %v9852_v60  ;;  %v4640_v63 = vrot.slane %v4490_v59, 7  ;;  %v4341_v42 = vrot.slane %v10202_v17, 6  ;;  %v4639_v46 = vrot.slane %v4637_v50, 4  ;;  %v5606_v62 = vld [vmem:[#allocation2 + $0x10c] sm:$0x7]  ;;  %v5762_v56 = vrot.slane %v5629_v2, 7 }
 0x342   :  { %v5703_v33 = vsel %vm14457_vm10, %v5701_v53, %v5702_v20  ;;  %v4348_v48 = vrot.slane %v10205_v43, 6  ;;  %v4343_v31 = vrot.slane %v10203_v39, 6  ;;  %v5765_v11 = vrot.slane %v5630_v16, 7  ;;  %v4493_v59 = vld [vmem:[#allocation2 + $0x184] sm:$0x7] }
 0x343   :  { %v9844_v1 = vcombine.low %v5700_v8, %v5703_v33  ;;  %v5706_v28 = vrot.slane %v5605_v40, 7  ;;  %v4342_v51 = vrot.slane %v4341_v42, 4  ;;  %4444 = vst.msk [vmem:[#allocation2 + $0x20c] sm:$0xc] %vm4400_vm13, %v4341_v42  ;;  %v16367_v53 = vrot.slane %v14522_v13, 11 }
 0x344   :  { %v4349_v60 = vsel %vm14609_vm15, %v4347_v6, %v4348_v48  ;;  %v4350_v41 = vrot.slane %v4348_v48, 4  ;;  %v4345_v8 = vrot.slane %v4343_v31, 4  ;;  %v4641_v17 = vsel %vm14457_vm10, %v4639_v46, %v4640_v63  ;;  %v5632_v2 = vld [vmem:[#allocation2 + $0x1bc] sm:$0xf]  ;;  %v5633_v16 = vld [vmem:[#allocation2 + $0x1c0] sm:$0x7] }
 0x345   :  { %v5863_v20 = vsel %vm4712_vm9, %v9844_v1, 0  ;;  %4448 = vst.msk [vmem:[#allocation2 + $0x224] sm:$0xf] %vm3987_vm6, %v4349_v60  ;;  %v4638_v40 = vsel %vm14457_vm10, %v16367_v53, %v4637_v50  ;;  %v5764_v43 = vrot.slane %v5762_v56, 4  ;;  %v4344_v6 = vsel %vm14609_vm15, %v4342_v51, %v4343_v31  ;;  %v5609_v48 = vld [vmem:[#allocation2 + $0x120] sm:$0x7] }
 0x346   :  { %10751 = vmatpush3.bf16.xpose.msra.mxu1 %v5863_v20  ;;  %4449 = vst.msk [vmem:[#allocation2 + $0x228] sm:$0x3] %vm4403_vm14, %v4350_v41  ;;  %v9753_v39 = vcombine.low %v4638_v40, %v4641_v17  ;;  %v16368_v33 = vrot.slane %v14531_v7, 11  ;;  %v5708_v42 = vrot.slane %v5706_v28, 4  ;;  %4446 = vst.msk [vmem:[#allocation2 + $0x214] sm:$0x3] %vm4403_vm14, %v4345_v8 }
 0x347   :  { %4445 = vst.msk [vmem:[#allocation2 + $0x210] sm:$0xf] %vm3987_vm6, %v4344_v6  ;;  %v5766_v50 = vsel %vm14457_vm10, %v5764_v43, %v5765_v11  ;;  %v5709_v63 = vrot.slane %v5606_v62, 7  ;;  %v4644_v41 = vrot.slane %v4492_v15, 7  ;;  %v4647_v1 = vrot.slane %v4493_v59, 7 }
 0x348   :  { %v5763_v13 = vsel %vm14457_vm10, %v16368_v33, %v5762_v56  ;;  %v4495_v46 = vld [vmem:[#allocation2 + $0x194] sm:$0xf]  ;;  %11098 = vmatprep.subr.msk.bf16.mxu0 %vm4712_vm9, %v9753_v39  ;;  %v5769_v7 = vrot.slane %v5632_v2, 7  ;;  %v5772_v31 = vrot.slane %v5633_v16, 7  ;;  %v5713_v60 = vrot.slane %v5608_v44, 7 }
 0x349   :  { %v9853_v51 = vcombine.low %v5763_v13, %v5766_v50  ;;  %v4496_v56 = vld [vmem:[#allocation2 + $0x198] sm:$0x7]  ;;  %10687 = vmatpush3.bf16.xpose.msra.mxu0 %v14583_v47  ;;  %v16369_v20 = vrot.slane %v14517_v30, 11  ;;  %v5710_v62 = vsel %vm14457_vm10, %v5708_v42, %v5709_v63  ;;  %v4646_v15 = vrot.slane %v4644_v41, 4  ;;  %v5635_v59 = vld [vmem:[#allocation2 + $0x1d0] sm:$0xf] }
 0x34a   :  { %v5716_v11 = vrot.slane %v5609_v48, 7  ;;  %v16370_v40 = vrot.slane %v14550_v22, 11  ;;  %v16371_v47 = vrot.slane %v14552_v37, 11  ;;  %v4471_v17 = vld [vmem:[#allocation2 + $0xf4] sm:$0xf]  ;;  %v5715_v2 = vrot.slane %v5713_v60, 4 }
 0x34b   :  { %v5707_v8 = vsel %vm14457_vm10, %v16369_v20, %v5706_v28  ;;  %11127 = vmatprep.subr.msk.bf16.mxu1 %vm4712_vm9, %v9853_v51  ;;  %v5771_v28 = vrot.slane %v5769_v7, 4  ;;  %v4648_v43 = vsel %vm14457_vm10, %v4646_v15, %v4647_v1  ;;  %v4651_v16 = vrot.slane %v4495_v46, 7  ;;  %v5636_v39 = vld [vmem:[#allocation2 + $0x1d4] sm:$0x7]  ;;  %v14997_v33 = vld [vmem:[#allocation2 + $0x12c] sm:$0x8] }
 0x34c   :  { %v9845_v53 = vcombine.low %v5707_v8, %v5710_v62  ;;  %v4645_v44 = vsel %vm14457_vm10, %v16370_v40, %v4644_v41  ;;  %v5770_v30 = vsel %vm14457_vm10, %v16371_v47, %v5769_v7  ;;  %v4654_v6 = vrot.slane %v4496_v56, 7  ;;  %v4472_v48 = vld [vmem:[#allocation2 + $0xf8] sm:$0x7]  ;;  %v5611_v50 = vld [vmem:[#allocation2 + $0x130] sm:$0xf] }
 0x34d   :  { %v9754_v13 = vcombine.low %v4645_v44, %v4648_v43  ;;  %v5773_v37 = vsel %vm14457_vm10, %v5771_v28, %v5772_v31  ;;  %v5776_v42 = vrot.slane %v5635_v59, 7  ;;  %v16372_v41 = vld [vmem:[#allocation9_spill] sm:$0xff]  ;;  %v5717_v46 = vsel %vm14457_vm10, %v5715_v2, %v5716_v11  ;;  %v4497_v20 = vld [vmem:[#allocation2 + $0x1a4] sm:$0x8]  ;;  %v16374_v31 = vld [vmem:[#allocation10_spill] sm:$0xff] }
 0x34e   :  { %v5866_v22 = vsel %vm4712_vm9, %v9845_v53, 0  ;;  %v9854_v63 = vcombine.low %v5770_v30, %v5773_v37  ;;  %v16373_v51 = vrot.slane %v16372_v41, 11  ;;  %v4653_v7 = vrot.slane %v4651_v16, 4  ;;  %v5612_v56 = vld [vmem:[#allocation2 + $0x134] sm:$0x7] }
 0x34f   :  { %10753 = vmatpush3.bf16.xpose.msra.mxu1 %v5866_v22  ;;  %11099 = vmatprep.subr.msk.bf16.mxu0 %vm4712_vm9, %v9754_v13  ;;  %v16375_v62 = vrot.slane %v16374_v31, 11  ;;  %v5778_v59 = vrot.slane %v5776_v42, 4  ;;  %v5779_v53 = vrot.slane %v5636_v39, 7  ;;  %v4498_v40 = vld [vmem:[#allocation2 + $0x1a8] sm:$0xf]  ;;  %v4595_v11 = vrot.slane %v4471_v17, 7 }
 0x350   :  { %v5714_v1 = vsel %vm14457_vm10, %v16373_v51, %v5713_v60  ;;  %v4499_v44 = vld [vmem:[#allocation2 + $0x1ac] sm:$0x7]  ;;  %11128 = vmatprep.subr.msk.bf16.mxu1 %vm4712_vm9, %v9854_v63  ;;  %v4655_v60 = vsel %vm14457_vm10, %v4653_v7, %v4654_v6  ;;  %v4598_v47 = vrot.slane %v4472_v48, 7  ;;  %v5720_v30 = vrot.slane %v5611_v50, 7  ;;  %v5638_v28 = vld [vmem:[#allocation2 + $0x1e4] sm:$0xf] }
 0x351   :  { %v9846_v8 = vcombine.low %v5714_v1, %v5717_v46  ;;  %v4652_v15 = vsel %vm14457_vm10, %v16375_v62, %v4651_v16  ;;  %v9830_v2 = vrot.slane %v14997_v33, 11  ;;  %v9740_v22 = vrot.slane %v4497_v20, 11  ;;  %v4474_v13 = vld [vmem:[#allocation2 + $0x108] sm:$0xf]  ;;  %10689 = vmatpush3.bf16.xpose.msra.mxu0 %v14689_v21  ;;  %v4475_v1 = vld [vmem:[#allocation2 + $0x10c] sm:$0x7] }
 0x352   :  { %v9755_v43 = vcombine.low %v4652_v15, %v4655_v60  ;;  %v16376_v16 = vld [vmem:[#allocation12_spill] sm:$0xff]  ;;  %v5780_v63 = vsel %vm14457_vm10, %v5778_v59, %v5779_v53  ;;  %v4597_v6 = vrot.slane %v4595_v11, 4  ;;  %v5723_v17 = vrot.slane %v5612_v56, 7  ;;  %v5614_v56 = vld [vmem:[#allocation2 + $0x144] sm:$0xf] }
 0x353   :  { %v16377_v39 = vrot.slane %v16376_v16, 11  ;;  %v5639_v48 = vld [vmem:[#allocation2 + $0x1e8] sm:$0x7]  ;;  %v5722_v50 = vrot.slane %v5720_v30, 4  ;;  %v4658_v41 = vrot.slane %v4498_v40, 7  ;;  %v4661_v33 = vrot.slane %v4499_v44, 7 }
 0x354   :  { %11100 = vmatprep.subr.msk.bf16.mxu0 %vm4712_vm9, %v9755_v43  ;;  %v5783_v51 = vrot.slane %v5638_v28, 7  ;;  %v5869_v21 = vsel %vm4712_vm9, %v9846_v8, 0  ;;  %v16378_v46 = vld [vmem:[#allocation8_spill] sm:$0xff]  ;;  %v4599_v20 = vsel %vm14457_vm10, %v4597_v6, %v4598_v47  ;;  %v4602_v31 = vrot.slane %v4474_v13, 7  ;;  %v5637_v53 = vld [vmem:[#allocation2 + $0x1e0] sm:$0x8] }
 0x355   :  { %v5777_v37 = vsel %vm14457_vm10, %v16377_v39, %v5776_v42  ;;  %v16379_v7 = vrot.slane %v16378_v46, 11  ;;  %v4660_v59 = vrot.slane %v4658_v41, 4  ;;  %v5786_v40 = vrot.slane %v5639_v48, 7  ;;  %v4473_v44 = vld [vmem:[#allocation2 + $0x104] sm:$0x8] }
 0x356   :  { %v9855_v62 = vcombine.low %v5777_v37, %v5780_v63  ;;  %v5724_v8 = vsel %vm14457_vm10, %v5722_v50, %v5723_v17  ;;  %v5785_v60 = vrot.slane %v5783_v51, 4  ;;  %v4605_v28 = vrot.slane %v4475_v1, 7  ;;  %v5615_v43 = vld [vmem:[#allocation2 + $0x148] sm:$0x7]  ;;  %v5641_v16 = vld [vmem:[#allocation2 + $0x1f8] sm:$0xf] }
 0x357   :  { %v4596_v42 = vsel %vm14457_vm10, %v16379_v7, %v4595_v11  ;;  %10755 = vmatpush3.bf16.xpose.msra.mxu1 %v5869_v21  ;;  %v4662_v11 = vsel %vm14457_vm10, %v4660_v59, %v4661_v33  ;;  %v4604_v47 = vrot.slane %v4602_v31, 4  ;;  %v5727_v13 = vrot.slane %v5614_v56, 7  ;;  %v5613_v33 = vld [vmem:[#allocation2 + $0x140] sm:$0x8]  ;;  %v5640_v59 = vld [vmem:[#allocation2 + $0x1f4] sm:$0x8] }
 0x358   :  { %v9747_v15 = vcombine.low %v4596_v42, %v4599_v20  ;;  %11129 = vmatprep.subr.msk.bf16.mxu1 %vm4712_vm9, %v9855_v62  ;;  %v5721_v39 = vsel %vm14457_vm10, %v9830_v2, %v5720_v30  ;;  %v4659_v37 = vsel %vm14457_vm10, %v9740_v22, %v4658_v41  ;;  %v9839_v63 = vrot.slane %v5637_v53, 11  ;;  %v5642_v2 = vld [vmem:[#allocation2 + $0x1fc] sm:$0x7]  ;;  %v5617_v22 = vld [vmem:[#allocation2 + $0x158] sm:$0xf] }
 0x359   :  { %v9732_v6 = vrot.slane %v4473_v44, 11  ;;  %v9847_v48 = vcombine.low %v5721_v39, %v5724_v8  ;;  %v9756_v50 = vcombine.low %v4659_v37, %v4662_v11  ;;  %v5787_v1 = vsel %vm14457_vm10, %v5785_v60, %v5786_v40  ;;  %v5618_v60 = vld [vmem:[#allocation2 + $0x15c] sm:$0x7] }
 0x35a   :  { %v4735_v17 = vsel %vm4712_vm9, %v9747_v15, 0  ;;  %v4606_v21 = vsel %vm14457_vm10, %v4604_v47, %v4605_v28  ;;  %v5729_v46 = vrot.slane %v5727_v13, 4  ;;  %v5730_v7 = vrot.slane %v5615_v43, 7  ;;  %v5616_v43 = vld [vmem:[#allocation2 + $0x154] sm:$0x8] }
 0x35b   :  { %10691 = vmatpush3.bf16.xpose.msra.mxu0 %v4735_v17  ;;  %v5790_v30 = vrot.slane %v5641_v16, 7  ;;  %v5784_v41 = vsel %vm14457_vm10, %v9839_v63, %v5783_v51  ;;  %v4603_v42 = vsel %vm14457_vm10, %v9732_v6, %v4602_v31  ;;  %v9831_v20 = vrot.slane %v5613_v33, 11  ;;  %v5644_v51 = vld [vmem:[#allocation2 + $0x20c] sm:$0xf]  ;;  %v5645_v17 = vld [vmem:[#allocation2 + $0x210] sm:$0x7] }
 0x35c   :  { %11101 = vmatprep.subr.msk.bf16.mxu0 %vm4712_vm9, %v9756_v50  ;;  %v5872_v56 = vsel %vm4712_vm9, %v9847_v48, 0  ;;  %v9856_v62 = vcombine.low %v5784_v41, %v5787_v1  ;;  %v9748_v15 = vcombine.low %v4603_v42, %v4606_v21  ;;  %v5731_v53 = vsel %vm14457_vm10, %v5729_v46, %v5730_v7  ;;  %v5620_v48 = vld [vmem:[#allocation2 + $0x16c] sm:$0xf]  ;;  %v5643_v21 = vld [vmem:[#allocation2 + $0x208] sm:$0x8] }
 0x35d   :  { %v5792_v40 = vrot.slane %v5790_v30, 4  ;;  %v5793_v44 = vrot.slane %v5642_v2, 7  ;;  %v5734_v8 = vrot.slane %v5617_v22, 7  ;;  %v5728_v31 = vsel %vm14457_vm10, %v9831_v20, %v5727_v13  ;;  %v11473_v20 = vld [vmem:[%s16174_s5] sm:$0x1] }
 0x35e   :  { %v9840_v28 = vrot.slane %v5640_v59, 11  ;;  %v4738_v11 = vsel %vm4712_vm9, %v9748_v15, 0  ;;  %v9848_v47 = vcombine.low %v5728_v31, %v5731_v53  ;;  %v5737_v37 = vrot.slane %v5618_v60, 7  ;;  %v5619_v59 = vld [vmem:[#allocation2 + $0x168] sm:$0x8] }
 0x35f   :  { %10757 = vmatpush3.bf16.xpose.msra.mxu1 %v5872_v56  ;;  %v5794_v16 = vsel %vm14457_vm10, %v5792_v40, %v5793_v44  ;;  %v5736_v39 = vrot.slane %v5734_v8, 4  ;;  %v5797_v63 = vrot.slane %v5644_v51, 7  ;;  %v16380_v6 = vpack.c.bf16 %v14774_v10, %v14758_v24  ;;  %v5621_v24 = vld [vmem:[#allocation2 + $0x170] sm:$0x7]  ;;  %v5647_v10 = vld [vmem:[#allocation2 + $0x220] sm:$0xf] }
 0x360   :  { %11130 = vmatprep.subr.msk.bf16.mxu1 %vm4712_vm9, %v9856_v62  ;;  %v5791_v13 = vsel %vm14457_vm10, %v9840_v28, %v5790_v30  ;;  %v9832_v50 = vrot.slane %v5616_v43, 11  ;;  %v5875_v1 = vsel %vm4712_vm9, %v9848_v47, 0  ;;  %v5800_v2 = vrot.slane %v5645_v17, 7  ;;  %v15073_v30 = vld [vmem:[%s16177_s4] sm:$0x1] }
 0x361   :  { %v9857_v33 = vcombine.low %v5791_v13, %v5794_v16  ;;  %v5738_v46 = vsel %vm14457_vm10, %v5736_v39, %v5737_v37  ;;  %v5799_v7 = vrot.slane %v5797_v63, 4  ;;  %v5741_v22 = vrot.slane %v5620_v48, 7  ;;  %v5646_v47 = vld [vmem:[#allocation2 + $0x21c] sm:$0x8] }
 0x362   :  { %v5735_v41 = vsel %vm14457_vm10, %v9832_v50, %v5734_v8  ;;  %v9841_v42 = vrot.slane %v5643_v21, 11  ;;  %v16381_v56 = vpack.c.bf16 %v14599_v55, %v14579_v9  ;;  %v5744_v44 = vrot.slane %v5621_v24, 7  ;;  %v5648_v55 = vld [vmem:[#allocation2 + $0x224] sm:$0x7]  ;;  %v5623_v9 = vld [vmem:[#allocation2 + $0x180] sm:$0xf] }
 0x363   :  { %10693 = vmatpush3.bf16.xpose.msra.mxu0 %v4738_v11  ;;  %v9849_v15 = vcombine.low %v5735_v41, %v5738_v46  ;;  %v5801_v53 = vsel %vm14457_vm10, %v5799_v7, %v5800_v2  ;;  %v5743_v40 = vrot.slane %v5741_v22, 4  ;;  %v5804_v8 = vrot.slane %v5647_v10, 7  ;;  %v5622_v50 = vld [vmem:[#allocation2 + $0x17c] sm:$0x8]  ;;  %v5979_v2 = vld [vmem:[#allocation2 + $0x1a0] sm:$0x1] }
 0x364   :  { %11102 = vmatprep.subr.msk.bf16.mxu0 %vm4712_vm9, %v16380_v6  ;;  %v4809_v62 = vsel %vm4712_vm9, %v16381_v56, 0  ;;  %v16382_v60 = vpack.c.bf16 %v14765_v54, %v14752_v0  ;;  %v5798_v51 = vsel %vm14457_vm10, %v9841_v42, %v5797_v63  ;;  %v9833_v31 = vrot.slane %v5619_v59, 11  ;;  %v5624_v0 = vld [vmem:[#allocation2 + $0x184] sm:$0x7]  ;;  %v5978_v54 = vld [vmem:[#allocation2 + $0x19c] sm:$0xf] }
 0x365   :  { %v5878_v28 = vsel %vm4712_vm9, %v9849_v15, 0  ;;  %v9858_v11 = vcombine.low %v5798_v51, %v5801_v53  ;;  %v5745_v43 = vsel %vm14457_vm10, %v5743_v40, %v5744_v44  ;;  %v5806_v16 = vrot.slane %v5804_v8, 4  ;;  %v5977_v42 = vld [vmem:[#allocation2 + $0x198] sm:$0xe]  ;;  %v5981_v15 = vld [vmem:[#allocation2 + $0x1b0] sm:$0xf] }
 0x366   :  { %v5807_v39 = vrot.slane %v5648_v55, 7  ;;  %v5748_v37 = vrot.slane %v5623_v9, 7  ;;  %v5742_v6 = vsel %vm14457_vm10, %v9833_v31, %v5741_v22  ;;  %v9842_v63 = vrot.slane %v5646_v47, 11  ;;  %v5954_v22 = vld [vmem:[#allocation2 + $0xfc] sm:$0xf] }
 0x367   :  { %10759 = vmatpush3.bf16.xpose.msra.mxu1 %v5875_v1  ;;  %v16383_v17 = vpack.c.bf16 %v14592_v34, %v14572_v14  ;;  %v9850_v13 = vcombine.low %v5742_v6, %v5745_v43  ;;  %v5751_v21 = vrot.slane %v5624_v0, 7  ;;  %v6107_v46 = vrot.slane %v5978_v54, 5  ;;  %v5982_v31 = vld [vmem:[#allocation2 + $0x1b4] sm:$0x1] }
 0x368   :  { %11131 = vmatprep.subr.msk.bf16.mxu1 %vm4712_vm9, %v9857_v33  ;;  %v5808_v1 = vsel %vm14457_vm10, %v5806_v16, %v5807_v39  ;;  %v5750_v33 = vrot.slane %v5748_v37, 4  ;;  %v16384_v7 = vpack.c.bf16 %v14840_v36, %v14827_v12  ;;  %v5805_v14 = vsel %vm14457_vm10, %v9842_v63, %v5804_v8  ;;  %v5958_v6 = vld [vmem:[#allocation2 + $0x114] sm:$0x1]  ;;  %v5984_v63 = vld [vmem:[#allocation2 + $0x1c4] sm:$0xf] }
 0x369   :  { %v4812_v48 = vsel %vm4712_vm9, %v16383_v17, 0  ;;  %v9834_v34 = vrot.slane %v5622_v50, 11  ;;  %v5881_v24 = vsel %vm4712_vm9, %v9850_v13, 0  ;;  %v9859_v10 = vcombine.low %v5805_v14, %v5808_v1 }
 0x36a   :  { %10695 = vmatmul.mubr.msk.bf16.vlgmr.msra.gmra.mrb[32].mxu0 %vm4712_vm9, %v11473_v20  ;;  %v3973_v41 = vpack.c.bf16 %v14646_v26, %v14631_v49  ;;  %v5752_v20 = vsel %vm14457_vm10, %v5750_v33, %v5751_v21  ;;  %v6109_v12 = vrot.slane %v6107_v46, 4  ;;  %v6110_v36 = vrot.slane %v5979_v2, 5  ;;  %v5953_v49 = vld [vmem:[#allocation2 + $0xf8] sm:$0xe]  ;;  %v5960_v2 = vld [vmem:[#allocation2 + $0x124] sm:$0xf] }
 0x36b   :  { %10697 = vmatpush3.bf16.xpose.msra.mxu0 %v4809_v62  ;;  %10712 = vmatprep.mubr.msk.bf16.mxu0 %vm4712_vm9, %v15073_v30  ;;  %v6051_v56 = vrot.slane %v5954_v22, 5  ;;  %v5955_v62 = vld [vmem:[#allocation2 + $0x100] sm:$0x1]  ;;  %v5749_v59 = vsel %vm14457_vm10, %v9834_v34, %v5748_v37  ;;  %v9869_v53 = vrot.slane %v5977_v42, 9  ;;  %v6114_v9 = vrot.slane %v5981_v15, 5  ;;  %v11354_v26 = vld [vmem:[#allocation2 + $0x14] sm:$0xff]  }
 0x36c   :  { %11103 = vmatprep.subr.msk.bf16.mxu0 %vm4712_vm9, %v16382_v60  ;;  %v4815_v40 = vsel %vm4712_vm9, %v3973_v41, 0  ;;  %v9851_v44 = vcombine.low %v5749_v59, %v5752_v20  ;;  %v6111_v8 = vsel %vm11583_vm4, %v6109_v12, %v6110_v36  ;;  %v6054_v55 = vrot.slane %v5955_v62, 5  ;;  %v5980_v37 = vld [vmem:[#allocation2 + $0x1ac] sm:$0xe]  ;;  %v15148_v22 = vld [vmem:[%s16174_s5 + $0x4] sm:$0x1] }
 0x36d   :  { %v6053_v60 = vrot.slane %v6051_v56, 4  ;;  %v16386_v51 = vpack.c.bf16 %v14831_v5, %v14808_v35  ;;  %v9861_v47 = vrot.slane %v5953_v49, 9  ;;  %v3974_v39 = vpack.c.bf16 %v14638_v3, %v14625_v57  ;;  %v5956_v57 = vld [vmem:[#allocation2 + $0x10c] sm:$0xe]  ;;  %v5983_v41 = vld [vmem:[#allocation2 + $0x1c0] sm:$0xe] }
 0x36e   :  { %v5884_v43 = vsel %vm4712_vm9, %v9851_v44, 0  ;;  %v6116_v35 = vrot.slane %v6114_v9, 4  ;;  %v6117_v5 = vrot.slane %v5982_v31, 5  ;;  %v6061_v33 = vrot.slane %v5958_v6, 5  ;;  %v5987_v62 = vld [vmem:[#allocation2 + $0x1d8] sm:$0xf] }
 0x36f   :  { %10761 = vmatpush3.bf16.xpose.msra.mxu1 %v5878_v28  ;;  %v5957_v28 = vld [vmem:[#allocation2 + $0x110] sm:$0xf]  ;;  %v6055_v0 = vsel %vm11583_vm4, %v6053_v60, %v6054_v55  ;;  %v6052_v17 = vsel %vm11583_vm4, %v9861_v47, %v6051_v56  ;;  %v4818_v13 = vsel %vm4712_vm9, %v3974_v39, 0  ;;  %v6121_v21 = vrot.slane %v5984_v63, 5  ;;  %v5961_v56 = vld [vmem:[#allocation2 + $0x128] sm:$0x1] }
 0x370   :  { %11132 = vmatprep.subr.msk.bf16.mxu1 %vm4712_vm9, %v9858_v11  ;;  %v6108_v11 = vsel %vm11583_vm4, %v9869_v53, %v6107_v46  ;;  %v6058_v54 = vrot.slane %v5957_v28, 5  ;;  %v9878_v50 = vcombine.low %v6052_v17, %v6055_v0  ;;  %v6118_v3 = vsel %vm11583_vm4, %v6116_v35, %v6117_v5  ;;  %v5959_v53 = vld [vmem:[#allocation2 + $0x120] sm:$0xe]  ;;  %v5988_v55 = vld [vmem:[#allocation2 + $0x1dc] sm:$0x1] }
 0x371   :  { %v9886_v16 = vcombine.low %v6108_v11, %v6111_v8  ;;  %v16387_v46 = vpack.c.bf16 %v14891_v18, %v14858_v61  ;;  %v9862_v34 = vrot.slane %v5956_v57, 9  ;;  %v6123_v20 = vrot.slane %v6121_v21, 4  ;;  %v15175_v28 = vld [vmem:[#allocation2 + $0x1ec] sm:$0xf]  ;;  %v5986_v39 = vld [vmem:[#allocation2 + $0x1d4] sm:$0xe] }
 0x372   :  { %v6060_v1 = vrot.slane %v6058_v54, 4  ;;  %v6215_v61 = vsel %vm4712_vm9, %v9878_v50, 0  ;;  %v6065_v36 = vrot.slane %v5960_v2, 5  ;;  %v9871_v59 = vrot.slane %v5983_v41, 9  ;;  %v5962_v35 = vld [vmem:[#allocation2 + $0x134] sm:$0xe] }
 0x373   :  { %10699 = vmatpush3.bf16.xpose.msra.mxu0 %v4812_v48  ;;  %v9870_v48 = vrot.slane %v5980_v37, 9  ;;  %v6059_v15 = vsel %vm11583_vm4, %v9862_v34, %v6058_v54  ;;  %v6068_v49 = vrot.slane %v5961_v56, 5  ;;  %v6128_v8 = vrot.slane %v5987_v62, 5  ;;  %v5964_v5 = vld [vmem:[#allocation2 + $0x13c] sm:$0x1] }
 0x374   :  { %11104 = vmatprep.subr.msk.bf16.mxu0 %vm4712_vm9, %v16384_v7  ;;  %v5985_v7 = vld [vmem:[#allocation2 + $0x1c8] sm:$0x1]  ;;  %v6062_v42 = vsel %vm11583_vm4, %v6060_v1, %v6061_v33  ;;  %v6067_v44 = vrot.slane %v6065_v36, 4  ;;  %v16388_v60 = vpack.c.bf16 %v14871_v38, %v14847_v32  ;;  %v9863_v31 = vrot.slane %v5959_v53, 9  ;;  %v5991_v17 = vld [vmem:[#allocation2 + $0x1f0] sm:$0x1] }
 0x375   :  { %v6115_v14 = vsel %vm11583_vm4, %v9870_v48, %v6114_v9  ;;  %v6124_v12 = vrot.slane %v5985_v7, 5  ;;  %v5963_v9 = vld [vmem:[#allocation2 + $0x138] sm:$0xf]  ;;  %v6130_v38 = vrot.slane %v6128_v8, 4  ;;  %v6131_v37 = vrot.slane %v5988_v55, 5 }
 0x376   :  { %v9887_v18 = vcombine.low %v6115_v14, %v6118_v3  ;;  %v6069_v32 = vsel %vm11583_vm4, %v6067_v44, %v6068_v49  ;;  %v6072_v0 = vrot.slane %v5963_v9, 5  ;;  %v6135_v54 = vrot.slane %v15175_v28, 5  ;;  %v15189_v50 = vld [vmem:[#allocation2 + $0x120] sm:$0xf]  ;;  %v5965_v62 = vld [vmem:[#allocation2 + $0x148] sm:$0xe] }
 0x377   :  { %10763 = vmatpush3.bf16.xpose.msra.mxu1 %v5881_v24  ;;  %v11474_v24 = vld [vmem:[%s16174_s5 + $0x3] sm:$0x1]  ;;  %v6066_v6 = vsel %vm11583_vm4, %v9863_v31, %v6065_v36  ;;  %v9872_v63 = vrot.slane %v5986_v39, 9  ;;  %v6132_v57 = vsel %vm11583_vm4, %v6130_v38, %v6131_v37  ;;  %v6075_v1 = vrot.slane %v5964_v5, 5  ;;  %v4921_v53 = vld [vmem:[#allocation2 + $0x11c] sm:$0xc] }
 0x378   :  { %11133 = vmatprep.subr.msk.bf16.mxu1 %vm4712_vm9, %v9859_v10  ;;  %v3975_v10 = vpack.c.bf16 %v14694_v58, %v14675_v52  ;;  %v9879_v58 = vcombine.low %v6059_v15, %v6062_v42  ;;  %v6074_v3 = vrot.slane %v6072_v0, 4  ;;  %v16390_v33 = vpack.c.bf16 %v14939_v27, %v14926_v19  ;;  %v16391_v42 = vld [vmem:[#allocation18_spill] sm:$0xff]  ;;  %v16392_v19 = vld [vmem:[#allocation21_spill] sm:$0xff]  ;;  %v4899_v28 = vld [vmem:[#allocation2 + $0x84] sm:$0x3] }
 0x379   :  { %v6137_v7 = vrot.slane %v6135_v54, 4  ;;  %v6138_v2 = vrot.slane %v5991_v17, 5  ;;  %v6129_v34 = vsel %vm11583_vm4, %v9872_v63, %v6128_v8  ;;  %v3977_v27 = vpack.c.bf16 %v16392_v19, %v16391_v42  ;;  %v15219_v38 = vld [vmem:[#allocation2 + $0x134] sm:$0xf]  ;;  %v5992_v5 = vld [vmem:[#allocation2 + $0x1fc] sm:$0xe] }
 0x37a   :  { %v4821_v52 = vsel %vm4712_vm9, %v3975_v10, 0  ;;  %v6218_v11 = vsel %vm4712_vm9, %v9879_v58, 0  ;;  %v9889_v41 = vcombine.low %v6129_v34, %v6132_v57  ;;  %v6076_v36 = vsel %vm11583_vm4, %v6074_v3, %v6075_v1  ;;  %v5968_v57 = vld [vmem:[#allocation2 + $0x15c] sm:$0xe] }
 0x37b   :  { %10701 = vmatpush3.bf16.xpose.msra.mxu0 %v4815_v40  ;;  %v6125_v40 = vsel %vm11583_vm4, %v6123_v20, %v6124_v12  ;;  %v15204_v20 = vld [vmem:[#allocation2 + $0x200] sm:$0xf]  ;;  %v4827_v9 = vsel %vm4712_vm9, %v3977_v27, 0  ;;  %v9865_v31 = vrot.slane %v5965_v62, 9  ;;  %v9767_v39 = vrot.slane %v4921_v53, 10 }
 0x37c   :  { %11105 = vmatprep.subr.msk.bf16.mxu0 %vm4712_vm9, %v16386_v51  ;;  %v6122_v51 = vsel %vm11583_vm4, %v9871_v59, %v6121_v21  ;;  %v9864_v21 = vrot.slane %v5962_v35, 9  ;;  %v4898_v12 = vld [vmem:[#allocation2 + $0x80] sm:$0xf]  ;;  %v6139_v59 = vsel %vm11583_vm4, %v6137_v7, %v6138_v2  ;;  %v6142_v8 = vrot.slane %v15204_v20, 5  ;;  %v4926_v7 = vld [vmem:[#allocation2 + $0x138] sm:$0x3] }
 0x37d   :  { %v9888_v47 = vcombine.low %v6122_v51, %v6125_v40  ;;  %v5994_v40 = vld [vmem:[#allocation2 + $0x204] sm:$0x1]  ;;  %v4995_v55 = vrot.slane %v4898_v12, 6  ;;  %v16395_v37 = vpack.c.bf16 %v14928_v25, %v14895_v4  ;;  %v5058_v1 = vrot.slane %v15219_v38, 6  ;;  %v5996_v2 = vld [vmem:[#allocation2 + $0x214] sm:$0xf] }
 0x37e   :  { %v6073_v15 = vsel %vm11583_vm4, %v9864_v21, %v6072_v0  ;;  %v9866_v19 = vrot.slane %v5968_v57, 9  ;;  %v4900_v20 = vld [vmem:[#allocation2 + $0x90] sm:$0xc]  ;;  %v4902_v12 = vld [vmem:[#allocation2 + $0x98] sm:$0x3]  ;;  %v5061_v62 = vrot.slane %v4926_v7, 6 }
 0x37f   :  { %10765 = vmatpush3.bf16.xpose.msra.mxu1 %v5884_v43  ;;  %v16389_v43 = vld [vmem:[#allocation14_spill] sm:$0xff]  ;;  %v9881_v51 = vcombine.low %v6073_v15, %v6076_v36  ;;  %v5995_v15 = vld [vmem:[#allocation2 + $0x210] sm:$0xe] }
 0x380   :  { %11134 = vmatprep.subr.msk.bf16.mxu1 %vm4712_vm9, %v9886_v16  ;;  %v3976_v16 = vpack.c.bf16 %v16389_v43, %v14667_v45  ;;  %v15186_v45 = vld [vmem:[#allocation2 + $0x14c] sm:$0xf]  ;;  %v16394_v43 = vld [vmem:[#allocation19_spill] sm:$0xff]  ;;  %v5997_v53 = vld [vmem:[#allocation2 + $0x218] sm:$0x1] }
 0x381   :  { %v6079_v14 = vrot.slane %v15186_v45, 5  ;;  %v6144_v45 = vrot.slane %v6142_v8, 4  ;;  %v6224_v4 = vsel %vm4712_vm9, %v9881_v51, 0  ;;  %v4928_v51 = vld [vmem:[#allocation2 + $0x148] sm:$0xf] }
 0x382   :  { %v4824_v48 = vsel %vm4712_vm9, %v3976_v16, 0  ;;  %v5971_v38 = vld [vmem:[#allocation2 + $0x170] sm:$0xe] }
 0x383   :  { %10703 = vmatpush3.bf16.xpose.msra.mxu0 %v4818_v13  ;;  %v9880_v13 = vcombine.low %v6066_v6, %v6069_v32  ;;  %v5969_v32 = vld [vmem:[#allocation2 + $0x160] sm:$0xf]  ;;  %v6145_v6 = vrot.slane %v5994_v40, 5  ;;  %v6080_v25 = vsel %vm11583_vm4, %v9865_v31, %v6079_v14  ;;  %v5973_v40 = vld [vmem:[#allocation2 + $0x178] sm:$0x1] }
 0x384   :  { %11106 = vmatprep.subr.msk.bf16.mxu0 %vm4712_vm9, %v16387_v46  ;;  %v5989_v46 = vld [vmem:[#allocation2 + $0x1e8] sm:$0xe]  ;;  %v6086_v3 = vrot.slane %v5969_v32, 5  ;;  %v6152_v32 = vrot.slane %v5997_v53, 5  ;;  %v15300_v53 = vld [vmem:[#allocation2 + $0x20c] sm:$0xf] }
 0x385   :  { %v6221_v10 = vsel %vm4712_vm9, %v9880_v13, 0  ;;  %v9873_v56 = vrot.slane %v5989_v46, 9  ;;  %v4998_v13 = vrot.slane %v4899_v28, 6  ;;  %v9874_v46 = vrot.slane %v5992_v5, 9 }
 0x386   :  { %10767 = vmatmul.mubr.msk.bf16.vlgmr.msra.gmra.mrb[0].mxu1 %vm4712_vm9, %v11474_v24  ;;  %v5967_v24 = vld [vmem:[#allocation2 + $0x150] sm:$0x1]  ;;  %v6146_v42 = vsel %vm11583_vm4, %v6144_v45, %v6145_v6  ;;  %v6088_v36 = vrot.slane %v6086_v3, 4  ;;  %v6087_v28 = vsel %vm11583_vm4, %v9866_v19, %v6086_v3  ;;  %v6096_v5 = vrot.slane %v5973_v40, 5  ;;  %v4929_v6 = vld [vmem:[#allocation2 + $0x14c] sm:$0x3] }
 0x387   :  { %10769 = vmatpush3.bf16.xpose.msra.mxu1 %v6215_v61  ;;  %10784 = vmatprep.mubr.msk.bf16.mxu1 %vm4712_vm9, %v15148_v22  ;;  %v4923_v61 = vld [vmem:[#allocation2 + $0x124] sm:$0x3]  ;;  %v6082_v58 = vrot.slane %v5967_v24, 5  ;;  %v4903_v3 = vld [vmem:[#allocation2 + $0xa4] sm:$0xc] }
 0x388   :  { %11135 = vmatprep.subr.msk.bf16.mxu1 %vm4712_vm9, %v9887_v18  ;;  %v5051_v18 = vrot.slane %v15189_v50, 6  ;;  %v5054_v49 = vrot.slane %v4923_v61, 6  ;;  %v15229_v50 = vld [vmem:[#allocation2 + $0x94] sm:$0xf]  ;;  %v4924_v61 = vld [vmem:[#allocation2 + $0x130] sm:$0xc] }
 0x389   :  { %v4907_v40 = vld [vmem:[#allocation2 + $0xbc] sm:$0xf] }
 0x38a   :  { %v5053_v44 = vrot.slane %v5051_v18, 4  ;;  %v5052_v21 = vsel %vm14609_vm15, %v9767_v39, %v5051_v18 }
 0x38b   :  { %10705 = vmatpush3.bf16.xpose.msra.mxu0 %v4821_v52  ;;  %v6081_v52 = vrot.slane %v6079_v14, 4 }
 0x38c   :  { %11107 = vmatprep.subr.msk.bf16.mxu0 %vm4712_vm9, %v16388_v60  ;;  %v4897_v60 = vld [vmem:[#allocation2 + $0x7c] sm:$0xc]  ;;  %v5055_v17 = vsel %vm14609_vm15, %v5053_v44, %v5054_v49 }
 0x38d   :  { %v6083_v35 = vsel %vm11583_vm4, %v6081_v52, %v6082_v58  ;;  %v9759_v63 = vrot.slane %v4897_v60, 10  ;;  %v9784_v24 = vcombine.low %v5052_v21, %v5055_v17  ;;  %v6143_v58 = vsel %vm11583_vm4, %v9874_v46, %v6142_v8 }
 0x38e   :  { %v9760_v60 = vrot.slane %v4900_v20, 10  ;;  %v9891_v31 = vcombine.low %v6143_v58, %v6146_v42  ;;  %v9867_v46 = vrot.slane %v5971_v38, 9  ;;  %v5016_v38 = vrot.slane %v4907_v40, 6  ;;  %v4933_v40 = vld [vmem:[#allocation2 + $0x16c] sm:$0xc] }
 0x38f   :  { %10771 = vmatpush3.bf16.xpose.msra.mxu1 %v6218_v11  ;;  %v6136_v11 = vsel %vm11583_vm4, %v9873_v56, %v6135_v54  ;;  %v5970_v54 = vld [vmem:[#allocation2 + $0x164] sm:$0x1]  ;;  %v4996_v14 = vsel %vm14609_vm15, %v9759_v63, %v4995_v55  ;;  %v5060_v56 = vrot.slane %v5058_v1, 4  ;;  %v5065_v63 = vrot.slane %v4928_v51, 6  ;;  %v5974_v51 = vld [vmem:[#allocation2 + $0x184] sm:$0xe] }
 0x390   :  { %11136 = vmatprep.subr.msk.bf16.mxu1 %vm4712_vm9, %v9888_v47  ;;  %v16393_v47 = vld [vmem:[#allocation11_spill] sm:$0xff]  ;;  %v9890_v0 = vcombine.low %v6136_v11, %v6139_v59  ;;  %v6089_v27 = vrot.slane %v5970_v54, 5  ;;  %v6149_v59 = vrot.slane %v5996_v2, 5  ;;  %v9768_v11 = vrot.slane %v4924_v61, 10 }
 0x391   :  { %v3978_v16 = vpack.c.bf16 %v16394_v43, %v16393_v47  ;;  %v9875_v47 = vrot.slane %v5995_v15, 9  ;;  %v15255_v43 = vld [vmem:[#allocation2 + $0xa8] sm:$0xf]  ;;  %v5068_v2 = vrot.slane %v4929_v6, 6  ;;  %v5067_v61 = vrot.slane %v5065_v63, 4 }
 0x392   :  { %v6090_v8 = vsel %vm11583_vm4, %v6088_v36, %v6089_v27  ;;  %v6151_v39 = vrot.slane %v6149_v59, 4  ;;  %v5976_v36 = vld [vmem:[#allocation2 + $0x18c] sm:$0x1] }
 0x393   :  { %10707 = vmatpush3.bf16.xpose.msra.mxu0 %v4824_v48  ;;  %v4997_v48 = vrot.slane %v4995_v55, 4  ;;  %v4830_v34 = vsel %vm4712_vm9, %v3978_v16, 0  ;;  %v5062_v16 = vsel %vm14609_vm15, %v5060_v56, %v5061_v62  ;;  %v6150_v57 = vsel %vm11583_vm4, %v9875_v47, %v6149_v59  ;;  %v4932_v56 = vld [vmem:[#allocation2 + $0x160] sm:$0x3]  ;;  %v4930_v47 = vld [vmem:[#allocation2 + $0x158] sm:$0xc] }
 0x394   :  { %11108 = vmatprep.subr.msk.bf16.mxu0 %vm4712_vm9, %v16390_v33  ;;  %v9882_v33 = vcombine.low %v6080_v25, %v6083_v35  ;;  %v6153_v21 = vsel %vm11583_vm4, %v6151_v39, %v6152_v32  ;;  %v6460_v39 = vrot.slane %v15300_v53, 7  ;;  %v4906_v32 = vld [vmem:[#allocation2 + $0xb8] sm:$0xc] }
 0x395   :  { %v4999_v18 = vsel %vm14609_vm15, %v4997_v48, %v4998_v13  ;;  %v15269_v48 = vld [vmem:[#allocation2 + $0x228] sm:$0xf]  ;;  %v5009_v13 = vrot.slane %v15255_v43, 6  ;;  %v6332_v43 = vld [vmem:[#allocation2 + $0x210] sm:$0x7] }
 0x396   :  { %v6227_v52 = vsel %vm4712_vm9, %v9882_v33, 0  ;;  %v9776_v49 = vcombine.low %v4996_v14, %v4999_v18  ;;  %v15279_v33 = vld [vmem:[#allocation2 + $0x188] sm:$0xf]  ;;  %v6156_v42 = vrot.slane %v15269_v48, 5  ;;  %v6307_v48 = vld [vmem:[#allocation2 + $0x16c] sm:$0xf] }
 0x397   :  { %10773 = vmatpush3.bf16.xpose.msra.mxu1 %v6221_v10  ;;  %v5002_v10 = vrot.slane %v15229_v50, 6  ;;  %v15275_v50 = vld [vmem:[%s16174_s5 + $0x1] sm:$0x1]  ;;  %v5011_v18 = vrot.slane %v5009_v13, 4  ;;  %v6100_v27 = vrot.slane %v15279_v33, 5 }
 0x398   :  { %11137 = vmatprep.subr.msk.bf16.mxu1 %vm4712_vm9, %v9889_v41  ;;  %v15242_v41 = vld [vmem:[#allocation2 + $0x174] sm:$0xf]  ;;  %v5159_v54 = vsel %vm4712_vm9, %v9776_v49, 0 }
 0x399   :  { %v6093_v44 = vrot.slane %v15242_v41, 5  ;;  %v5004_v55 = vrot.slane %v5002_v10, 4  ;;  %v5003_v17 = vsel %vm14609_vm15, %v9760_v60, %v5002_v10  ;;  %v5998_v10 = vld [vmem:[#allocation2 + $0x224] sm:$0xe]  ;;  %v6000_v41 = vld [vmem:[#allocation2 + $0x22c] sm:$0x1] }
 0x39a   :  { %v6159_v58 = vrot.slane %v6000_v41, 5  ;;  %v15328_v41 = vld [vmem:[#allocation2 + $0x220] sm:$0xf] }
 0x39b   :  { %10709 = vmatpush3.bf16.xpose.msra.mxu0 %v4827_v9  ;;  %v5005_v9 = vrot.slane %v4902_v12, 6  ;;  %v6095_v35 = vrot.slane %v6093_v44, 4  ;;  %v9892_v12 = vcombine.low %v6150_v57, %v6153_v21  ;;  %v6094_v15 = vsel %vm11583_vm4, %v9867_v46, %v6093_v44 }
 0x39c   :  { %11109 = vmatprep.subr.msk.bf16.mxu0 %vm4712_vm9, %v16395_v37  ;;  %v4927_v37 = vld [vmem:[#allocation2 + $0x144] sm:$0xc]  ;;  %v6463_v57 = vrot.slane %v6332_v43, 7  ;;  %v6462_v21 = vrot.slane %v6460_v39, 4  ;;  %v5018_v46 = vrot.slane %v5016_v38, 4 }
 0x39d   :  { %v5006_v45 = vsel %vm14609_vm15, %v5004_v55, %v5005_v9  ;;  %v9769_v7 = vrot.slane %v4927_v37, 10  ;;  %v6097_v14 = vsel %vm11583_vm4, %v6095_v35, %v6096_v5  ;;  %v5069_v55 = vsel %vm14609_vm15, %v5067_v61, %v5068_v2  ;;  %v6330_v35 = vld [vmem:[#allocation2 + $0x208] sm:$0x8]  ;;  %v4908_v5 = vld [vmem:[#allocation2 + $0xc0] sm:$0x3] }
 0x39e   :  { %v9884_v60 = vcombine.low %v6094_v15, %v6097_v14  ;;  %v6158_v9 = vrot.slane %v6156_v42, 4  ;;  %v6308_v2 = vld [vmem:[#allocation2 + $0x170] sm:$0x7]  ;;  %v6404_v14 = vrot.slane %v6307_v48, 7  ;;  %v4935_v61 = vld [vmem:[#allocation2 + $0x174] sm:$0x3] }
 0x39f   :  { %10775 = vmatpush3.bf16.xpose.msra.mxu1 %v6224_v4  ;;  %v9883_v4 = vcombine.low %v6087_v28, %v6090_v8  ;;  %v5066_v59 = vsel %vm14609_vm15, %v9769_v7, %v5065_v63  ;;  %v6102_v28 = vrot.slane %v6100_v27, 4  ;;  %v5019_v7 = vrot.slane %v4908_v5, 6  ;;  %v4909_v15 = vld [vmem:[#allocation2 + $0xcc] sm:$0xc]  ;;  %v6333_v5 = vld [vmem:[#allocation2 + $0x21c] sm:$0x8] }
 0x3a0   :  { %11138 = vmatprep.subr.msk.bf16.mxu1 %vm4712_vm9, %v9890_v0  ;;  %v5059_v0 = vsel %vm14609_vm15, %v9768_v11, %v5058_v1  ;;  %v4905_v1 = vld [vmem:[#allocation2 + $0xac] sm:$0x3]  ;;  %v6103_v11 = vrot.slane %v5976_v36, 5  ;;  %v9786_v37 = vcombine.low %v5066_v59, %v5069_v55  ;;  %v6233_v6 = vsel %vm4712_vm9, %v9884_v60, 0  ;;  %v4911_v59 = vld [vmem:[#allocation2 + $0xd4] sm:$0x3] }
 0x3a1   :  { %v9785_v25 = vcombine.low %v5059_v0, %v5062_v16  ;;  %v5012_v19 = vrot.slane %v4905_v1, 6  ;;  %v6230_v20 = vsel %vm4712_vm9, %v9883_v4, 0  ;;  %v5075_v16 = vrot.slane %v4932_v56, 6  ;;  %v4910_v1 = vld [vmem:[#allocation2 + $0xd0] sm:$0xf] }
 0x3a2   :  { %v9868_v0 = vrot.slane %v5974_v51, 9  ;;  %v6104_v4 = vsel %vm11583_vm4, %v6102_v28, %v6103_v11  ;;  %v6406_v60 = vrot.slane %v6404_v14, 4  ;;  %v6335_v51 = vld [vmem:[#allocation2 + $0x224] sm:$0x7]  ;;  %v5026_v11 = vrot.slane %v4911_v59, 6 }
 0x3a3   :  { %10711 = vmatpush3.bf16.xpose.msra.mxu0 %v4830_v34  ;;  %v15285_v34 = vld [vmem:[#allocation2 + $0x15c] sm:$0xf] }
 0x3a4   :  { %11110 = vmatprep.subr.msk.bf16.mxu0 %vm4712_vm9, %v9784_v24  ;;  %v9777_v24 = vcombine.low %v5003_v17, %v5006_v45  ;;  %v5072_v62 = vrot.slane %v15285_v34, 6  ;;  %v6306_v45 = vld [vmem:[#allocation2 + $0x168] sm:$0x8] }
 0x3a5   :  { %v9895_v56 = vrot.slane %v6306_v45, 11 }
 0x3a6   :  { %v5162_v49 = vsel %vm4712_vm9, %v9777_v24, 0  ;;  %v5074_v8 = vrot.slane %v5072_v62, 4  ;;  %v6101_v24 = vsel %vm11583_vm4, %v9868_v0, %v6100_v27 }
 0x3a7   :  { %10777 = vmatpush3.bf16.xpose.msra.mxu1 %v6227_v52  ;;  %v9876_v52 = vrot.slane %v5998_v10, 9 }
 0x3a8   :  { %11139 = vmatprep.subr.msk.bf16.mxu1 %vm4712_vm9, %v9891_v31  ;;  %v5013_v31 = vsel %vm14609_vm15, %v5011_v18, %v5012_v19  ;;  %v5076_v33 = vsel %vm14609_vm15, %v5074_v8, %v5075_v16  ;;  %v9903_v18 = vrot.slane %v6330_v35, 11  ;;  %v5023_v19 = vrot.slane %v4910_v1, 6  ;;  %v6338_v1 = vld [vmem:[#allocation2 + $0x238] sm:$0x7] }
 0x3a9   :  { %v6157_v63 = vsel %vm11583_vm4, %v9876_v52, %v6156_v42  ;;  %v6464_v52 = vsel %vm14457_vm10, %v6462_v21, %v6463_v57  ;;  %v6405_v35 = vsel %vm14457_vm10, %v9895_v56, %v6404_v14  ;;  %v4936_v56 = vld [vmem:[#allocation2 + $0x180] sm:$0xc] }
 0x3aa   :  { %10713 = vmatmul.mubr.msk.bf16.vlgmr.msra.gmra.mrb[32].mxu0 %vm4712_vm9, %v15073_v30  ;;  %v9761_v30 = vrot.slane %v4903_v3, 10  ;;  %v9762_v3 = vrot.slane %v4906_v32, 10  ;;  %v5025_v28 = vrot.slane %v5023_v19, 4  ;;  %v6461_v8 = vsel %vm14457_vm10, %v9903_v18, %v6460_v39  ;;  %v15373_v18 = vld [vmem:[#allocation2 + $0x194] sm:$0xf] }
 0x3ab   :  { %10715 = vmatpush3.bf16.xpose.msra.mxu0 %v5159_v54  ;;  %10730 = vmatprep.mubr.msk.bf16.mxu0 %vm4712_vm9, %v15275_v50  ;;  %v6160_v54 = vsel %vm11583_vm4, %v6158_v9, %v6159_v58  ;;  %v6407_v58 = vrot.slane %v6308_v2, 7  ;;  %v5082_v9 = vrot.slane %v4935_v61, 6  ;;  %v9771_v32 = vrot.slane %v4933_v40, 10  ;;  %v4912_v2 = vld [vmem:[#allocation2 + $0xe0] sm:$0xc] }
 0x3ac   :  { %11111 = vmatprep.subr.msk.bf16.mxu0 %vm4712_vm9, %v9785_v25  ;;  %v5010_v44 = vsel %vm14609_vm15, %v9761_v30, %v5009_v13  ;;  %v15316_v13 = vld [vmem:[#allocation2 + $0x170] sm:$0xf]  ;;  %v9770_v25 = vrot.slane %v4930_v47, 10  ;;  %v9893_v34 = vcombine.low %v6157_v63, %v6160_v54  ;;  %v5017_v36 = vsel %vm14609_vm15, %v9762_v3, %v5016_v38  ;;  %v6311_v47 = vld [vmem:[#allocation2 + $0x184] sm:$0x7] }
 0x3ad   :  { %v9778_v17 = vcombine.low %v5010_v44, %v5013_v31  ;;  %v5079_v10 = vrot.slane %v15316_v13, 6  ;;  %v9763_v31 = vrot.slane %v4909_v15, 10  ;;  %v15350_v38 = vld [vmem:[#allocation2 + $0x184] sm:$0xf]  ;;  %v9920_v0 = vcombine.low %v6461_v8, %v6464_v52  ;;  %v4938_v13 = vld [vmem:[#allocation2 + $0x188] sm:$0x3] }
 0x3ae   :  { %v5073_v30 = vsel %vm14609_vm15, %v9770_v25, %v5072_v62  ;;  %v5020_v62 = vsel %vm14609_vm15, %v5018_v46, %v5019_v7  ;;  %v6470_v63 = vrot.slane %v6335_v51, 7  ;;  %v4913_v54 = vld [vmem:[#allocation2 + $0xe4] sm:$0xf]  ;;  %v6408_v53 = vsel %vm14457_vm10, %v6406_v60, %v6407_v58  ;;  %v6336_v3 = vld [vmem:[#allocation2 + $0x230] sm:$0x8] }
 0x3af   :  { %10779 = vmatpush3.bf16.xpose.msra.mxu1 %v6230_v20  ;;  %v5165_v42 = vsel %vm4712_vm9, %v9778_v17, 0  ;;  %v15333_v20 = vld [vmem:[#allocation2 + $0x180] sm:$0xf]  ;;  %v9787_v27 = vcombine.low %v5073_v30, %v5076_v33  ;;  %v5081_v55 = vrot.slane %v5079_v10, 4  ;;  %v9779_v16 = vcombine.low %v5017_v36, %v5020_v62  ;;  %v6309_v17 = vld [vmem:[#allocation2 + $0x17c] sm:$0x8] }
 0x3b0   :  { %11140 = vmatprep.subr.msk.bf16.mxu1 %vm4712_vm9, %v9892_v12  ;;  %v9885_v12 = vcombine.low %v6101_v24, %v6104_v4  ;;  %v6411_v44 = vrot.slane %v15333_v20, 7  ;;  %v6414_v48 = vrot.slane %v6311_v47, 7  ;;  %v5024_v4 = vsel %vm14609_vm15, %v9763_v31, %v5023_v19  ;;  %v4914_v30 = vld [vmem:[#allocation2 + $0xe8] sm:$0x3]  ;;  %v15403_v20 = vld [vmem:[#allocation2 + $0xf8] sm:$0xf] }
 0x3b1   :  { %v5083_v39 = vsel %vm14609_vm15, %v5081_v55, %v5082_v9  ;;  %v5027_v25 = vsel %vm14609_vm15, %v5025_v28, %v5026_v11  ;;  %v5086_v57 = vrot.slane %v15350_v38, 6  ;;  %v5168_v21 = vsel %vm4712_vm9, %v9779_v16, 0  ;;  %v15386_v55 = vld [vmem:[%s16174_s5 + $0x5] sm:$0x1]  ;;  %v6312_v28 = vld [vmem:[#allocation2 + $0x190] sm:$0x8] }
 0x3b2   :  { %v6236_v43 = vsel %vm4712_vm9, %v9885_v12, 0  ;;  %v6413_v45 = vrot.slane %v6411_v44, 4  ;;  %v5080_v46 = vsel %vm14609_vm15, %v9771_v32, %v5079_v10  ;;  %v9904_v7 = vrot.slane %v6333_v5, 11  ;;  %v15379_v10 = vld [vmem:[#allocation2 + $0x198] sm:$0xf] }
 0x3b3   :  { %10717 = vmatpush3.bf16.xpose.msra.mxu0 %v5162_v49  ;;  %v6467_v49 = vrot.slane %v15328_v41, 7  ;;  %v9912_v24 = vcombine.low %v6405_v35, %v6408_v53  ;;  %v9788_v14 = vcombine.low %v5080_v46, %v5083_v39  ;;  %v9780_v19 = vcombine.low %v5024_v4, %v5027_v25  ;;  %v6314_v11 = vld [vmem:[#allocation2 + $0x198] sm:$0x7]  ;;  %v4941_v32 = vld [vmem:[#allocation2 + $0x19c] sm:$0x3] }
 0x3b4   :  { %11112 = vmatprep.subr.msk.bf16.mxu0 %vm4712_vm9, %v9786_v37  ;;  %v6337_v37 = vld [vmem:[#allocation2 + $0x234] sm:$0xf]  ;;  %v15377_v12 = vsel %vm14457_vm10, %v6413_v45, %v6414_v48  ;;  %v9905_v36 = vrot.slane %v6336_v3, 11  ;;  %v5088_v15 = vrot.slane %v5086_v57, 4  ;;  %v6477_v52 = vrot.slane %v6338_v1, 7 }
 0x3b5   :  { %v6474_v33 = vrot.slane %v6337_v37, 7  ;;  %v9764_v62 = vrot.slane %v4912_v2, 10  ;;  %v5033_v40 = vrot.slane %v4914_v30, 6  ;;  %v6418_v60 = vrot.slane %v15373_v18, 7  ;;  %v6339_v35 = vld [vmem:[#allocation2 + $0x244] sm:$0x8] }
 0x3b6   :  { %v6568_v9 = vsel %vm4712_vm9, %v9912_v24, 0  ;;  %v6468_v51 = vsel %vm14457_vm10, %v9904_v7, %v6467_v49  ;;  %v5093_v47 = vrot.slane %v15379_v10, 6  ;;  %v9772_v41 = vrot.slane %v4936_v56, 10  ;;  %v4915_v3 = vld [vmem:[#allocation2 + $0xf4] sm:$0xc] }
 0x3b7   :  { %10781 = vmatpush3.bf16.xpose.msra.mxu1 %v6233_v6  ;;  %v6469_v6 = vrot.slane %v6467_v49, 4  ;;  %v6476_v59 = vrot.slane %v6474_v33, 4  ;;  %v6475_v49 = vsel %vm14457_vm10, %v9905_v36, %v6474_v33  ;;  %v5096_v45 = vrot.slane %v4941_v32, 6  ;;  %v4917_v1 = vld [vmem:[#allocation2 + $0xfc] sm:$0x3] }
 0x3b8   :  { %11141 = vmatprep.subr.msk.bf16.mxu1 %vm4712_vm9, %v9893_v34  ;;  %v5030_v34 = vrot.slane %v4913_v54, 6  ;;  %v6341_v54 = vld [vmem:[#allocation2 + $0x24c] sm:$0x7]  ;;  %v5087_v39 = vsel %vm14609_vm15, %v9772_v41, %v5086_v57  ;;  %v5037_v48 = vrot.slane %v15403_v20, 6  ;;  %v9897_v25 = vrot.slane %v6312_v28, 11 }
 0x3b9   :  { %v6471_v61 = vsel %vm14457_vm10, %v6469_v6, %v6470_v63  ;;  %v6478_v37 = vsel %vm14457_vm10, %v6476_v59, %v6477_v52  ;;  %v6420_v6 = vrot.slane %v6418_v60, 4  ;;  %v6421_v63 = vrot.slane %v6314_v11, 7  ;;  %v15422_v2 = vld [vmem:[#allocation2 + $0x1ac] sm:$0xf]  ;;  %v4944_v56 = vld [vmem:[#allocation2 + $0x1b0] sm:$0x3] }
 0x3ba   :  { %v5032_v58 = vrot.slane %v5030_v34, 4  ;;  %v9921_v8 = vcombine.low %v6468_v51, %v6471_v61  ;;  %v9922_v33 = vcombine.low %v6475_v49, %v6478_v37  ;;  %v9906_v7 = vrot.slane %v6339_v35, 11  ;;  %v6315_v61 = vld [vmem:[#allocation2 + $0x1a4] sm:$0x8]  ;;  %v6342_v59 = vld [vmem:[#allocation2 + $0x258] sm:$0x8] }
 0x3bb   :  { %10719 = vmatpush3.bf16.xpose.msra.mxu0 %v5165_v42  ;;  %v9896_v42 = vrot.slane %v6309_v17, 11  ;;  %v5095_v17 = vrot.slane %v5093_v47, 4  ;;  %v6422_v57 = vsel %vm14457_vm10, %v6420_v6, %v6421_v63  ;;  %v6419_v36 = vsel %vm14457_vm10, %v9897_v25, %v6418_v60  ;;  %v6344_v51 = vld [vmem:[#allocation2 + $0x260] sm:$0x7]  ;;  %v6319_v35 = vld [vmem:[#allocation2 + $0x1bc] sm:$0xf] }
 0x3bc   :  { %11113 = vmatprep.subr.msk.bf16.mxu0 %vm4712_vm9, %v9787_v27  ;;  %v5089_v27 = vrot.slane %v4938_v13, 6  ;;  %v5034_v5 = vsel %vm14609_vm15, %v5032_v58, %v5033_v40  ;;  %v15420_v13 = vld [vmem:[#allocation2 + $0x1a8] sm:$0xf]  ;;  %v9914_v58 = vcombine.low %v6419_v36, %v6422_v57  ;;  %v5103_v41 = vrot.slane %v4944_v56, 6  ;;  %v5273_v25 = vld [vmem:[#allocation2 + $0x120] sm:$0xe] }
 0x3bd   :  { %v6412_v31 = vsel %vm14457_vm10, %v9896_v42, %v6411_v44  ;;  %v5171_v44 = vsel %vm4712_vm9, %v9780_v19, 0  ;;  %v6425_v42 = vrot.slane %v15420_v13, 7  ;;  %v5097_v18 = vsel %vm14609_vm15, %v5095_v17, %v5096_v45  ;;  %v5274_v17 = vld [vmem:[#allocation2 + $0x124] sm:$0xf] }
 0x3be   :  { %v9913_v16 = vcombine.low %v6412_v31, %v15377_v12  ;;  %v5090_v38 = vsel %vm14609_vm15, %v5088_v15, %v5089_v27  ;;  %v5039_v19 = vrot.slane %v5037_v48, 4  ;;  %v5040_v12 = vrot.slane %v4917_v1, 6  ;;  %v6317_v27 = vld [vmem:[#allocation2 + $0x1ac] sm:$0x7]  ;;  %v6346_v1 = vld [vmem:[#allocation2 + $0x270] sm:$0xf] }
 0x3bf   :  { %10783 = vmatpush3.bf16.xpose.msra.mxu1 %v6236_v43  ;;  %v6340_v43 = vld [vmem:[#allocation2 + $0x248] sm:$0xf]  ;;  %v9789_v4 = vcombine.low %v5087_v39, %v5090_v38  ;;  %v5100_v15 = vrot.slane %v15422_v2, 6  ;;  %v15439_v31 = vld [vmem:[#allocation2 + $0x10c] sm:$0xf]  ;;  %v6427_v11 = vrot.slane %v6425_v42, 4 }
 0x3c0   :  { %11142 = vmatprep.subr.msk.bf16.mxu1 %vm4712_vm9, %v9920_v0  ;;  %v4939_v0 = vld [vmem:[#allocation2 + $0x194] sm:$0xc]  ;;  %v6481_v53 = vrot.slane %v6340_v43, 7  ;;  %v6571_v30 = vsel %vm4712_vm9, %v9913_v16, 0  ;;  %v5041_v43 = vsel %vm14609_vm15, %v5039_v19, %v5040_v12  ;;  %v4942_v16 = vld [vmem:[#allocation2 + $0x1a8] sm:$0xc] }
 0x3c1   :  { %v9773_v46 = vrot.slane %v4939_v0, 10  ;;  %v9907_v49 = vrot.slane %v6342_v59, 11  ;;  %v5102_v32 = vrot.slane %v5100_v15, 4  ;;  %v4920_v38 = vld [vmem:[#allocation2 + $0x110] sm:$0x3]  ;;  %v5044_v37 = vrot.slane %v15439_v31, 6 }
 0x3c2   :  { %v6483_v24 = vrot.slane %v6481_v53, 4  ;;  %v6482_v40 = vsel %vm14457_vm10, %v9906_v7, %v6481_v53  ;;  %v4918_v0 = vld [vmem:[#allocation2 + $0x108] sm:$0xc]  ;;  %v6318_v53 = vld [vmem:[#allocation2 + $0x1b8] sm:$0x8]  ;;  %v9774_v13 = vrot.slane %v4942_v16, 10 }
 0x3c3   :  { %10721 = vmatpush3.bf16.xpose.msra.mxu0 %v5168_v21  ;;  %v5094_v10 = vsel %vm14609_vm15, %v9773_v46, %v5093_v47  ;;  %v6428_v47 = vrot.slane %v6317_v27, 7  ;;  %v6320_v39 = vld [vmem:[#allocation2 + $0x1c0] sm:$0x7]  ;;  %v5046_v7 = vrot.slane %v5044_v37, 4  ;;  %v6432_v2 = vrot.slane %v6319_v35, 7 }
 0x3c4   :  { %11114 = vmatprep.subr.msk.bf16.mxu0 %vm4712_vm9, %v9788_v14  ;;  %v6484_v14 = vrot.slane %v6341_v54, 7  ;;  %v9790_v60 = vcombine.low %v5094_v10, %v5097_v18  ;;  %v9766_v18 = vrot.slane %v4918_v0, 10  ;;  %v6495_v19 = vrot.slane %v6346_v1, 7  ;;  %v5249_v59 = vld [vmem:[#allocation2 + $0x80] sm:$0xe] }
 0x3c5   :  { %v6429_v54 = vsel %vm14457_vm10, %v6427_v11, %v6428_v47  ;;  %v9899_v10 = vrot.slane %v6318_v53, 11  ;;  %v6435_v56 = vrot.slane %v6320_v39, 7  ;;  %v9793_v47 = vrot.slane %v5249_v59, 9  ;;  %v6323_v16 = vld [vmem:[#allocation2 + $0x1d4] sm:$0x7] }
 0x3c6   :  { %10785 = vmatmul.mubr.msk.bf16.vlgmr.msra.gmra.mrb[0].mxu1 %vm4712_vm9, %v15148_v22  ;;  %v5031_v22 = vsel %vm14609_vm15, %v9764_v62, %v5030_v34  ;;  %v6343_v34 = vld [vmem:[#allocation2 + $0x25c] sm:$0xf]  ;;  %v6485_v28 = vsel %vm14457_vm10, %v6483_v24, %v6484_v14  ;;  %v5101_v24 = vsel %vm14609_vm15, %v9774_v13, %v5100_v15  ;;  %v5403_v14 = vrot.slane %v5274_v17, 5  ;;  %v6321_v35 = vld [vmem:[#allocation2 + $0x1cc] sm:$0x8] }
 0x3c7   :  { %10787 = vmatpush3.bf16.xpose.msra.mxu1 %v6568_v9  ;;  %10802 = vmatprep.mubr.msk.bf16.mxu1 %vm4712_vm9, %v15386_v55  ;;  %v9781_v21 = vcombine.low %v5031_v22, %v5034_v5  ;;  %v6488_v52 = vrot.slane %v6343_v34, 7  ;;  %v9765_v9 = vrot.slane %v4915_v3, 10  ;;  %v6574_v5 = vsel %vm4712_vm9, %v9914_v58, 0  ;;  %v5275_v3 = vld [vmem:[#allocation2 + $0x128] sm:$0x1] }
 0x3c8   :  { %11143 = vmatprep.subr.msk.bf16.mxu1 %vm4712_vm9, %v9921_v8  ;;  %v9898_v8 = vrot.slane %v6315_v61, 11  ;;  %v9923_v6 = vcombine.low %v6482_v40, %v6485_v28  ;;  %v6345_v34 = vld [vmem:[#allocation2 + $0x26c] sm:$0x8]  ;;  %v6347_v61 = vld [vmem:[#allocation2 + $0x274] sm:$0x7]  ;;  %v9801_v58 = vrot.slane %v5273_v25, 9 }
 0x3c9   :  { %v5174_v62 = vsel %vm4712_vm9, %v9781_v21, 0  ;;  %v6490_v20 = vrot.slane %v6488_v52, 4  ;;  %v5038_v22 = vsel %vm14609_vm15, %v9765_v9, %v5037_v48  ;;  %v15457_v48 = vsel %vm14457_vm10, %v9907_v49, %v6488_v52  ;;  %v5251_v52 = vld [vmem:[#allocation2 + $0x88] sm:$0x1]  ;;  %v15472_v9 = vld [vmem:[#allocation2 + $0x138] sm:$0xf] }
 0x3ca   :  { %v9782_v63 = vcombine.low %v5038_v22, %v5041_v43  ;;  %v6426_v45 = vsel %vm14457_vm10, %v9898_v8, %v6425_v42  ;;  %v5104_v21 = vsel %vm14609_vm15, %v5102_v32, %v5103_v41  ;;  %v15465_v42 = vld [vmem:[#allocation2 + $0x1d0] sm:$0xf]  ;;  %v5406_v40 = vrot.slane %v5275_v3, 5  ;;  %v5276_v39 = vld [vmem:[#allocation2 + $0x134] sm:$0xe] }
 0x3cb   :  { %10723 = vmatpush3.bf16.xpose.msra.mxu0 %v5171_v44  ;;  %v6491_v44 = vrot.slane %v6344_v51, 7  ;;  %v9915_v57 = vcombine.low %v6426_v45, %v6429_v54  ;;  %v9791_v27 = vcombine.low %v5101_v24, %v5104_v21  ;;  %v5405_v51 = vrot.slane %v5403_v14, 4  ;;  %v6348_v17 = vld [vmem:[#allocation2 + $0x280] sm:$0x8]  ;;  %v5252_v3 = vld [vmem:[#allocation2 + $0x94] sm:$0xe] }
 0x3cc   :  { %11115 = vmatprep.subr.msk.bf16.mxu0 %vm4712_vm9, %v9789_v4  ;;  %v5047_v4 = vrot.slane %v4920_v38, 6  ;;  %v9908_v31 = vrot.slane %v6345_v34, 11  ;;  %v6439_v28 = vrot.slane %v15465_v42, 7  ;;  %v6497_v11 = vrot.slane %v6495_v19, 4  ;;  %v15501_v24 = vld [vmem:[#allocation2 + $0x1e4] sm:$0xf] }
 0x3cd   :  { %v6492_v46 = vsel %vm14457_vm10, %v6490_v20, %v6491_v44  ;;  %v5350_v8 = vrot.slane %v5251_v52, 5  ;;  %v6577_v41 = vsel %vm4712_vm9, %v9915_v57, 0  ;;  %v5045_v49 = vsel %vm14609_vm15, %v9766_v18, %v5044_v37  ;;  %v6349_v20 = vld [vmem:[#allocation2 + $0x284] sm:$0xf]  ;;  %v6326_v59 = vld [vmem:[#allocation2 + $0x1e8] sm:$0x7] }
 0x3ce   :  { %v9924_v36 = vcombine.low %v15457_v48, %v6492_v46  ;;  %v5048_v15 = vsel %vm14609_vm15, %v5046_v7, %v5047_v4  ;;  %v5410_v32 = vrot.slane %v15472_v9, 5  ;;  %v6433_v38 = vsel %vm14457_vm10, %v9899_v10, %v6432_v2  ;;  %v6350_v4 = vld [vmem:[#allocation2 + $0x288] sm:$0x7]  ;;  %v5254_v46 = vld [vmem:[#allocation2 + $0x9c] sm:$0x1] }
 0x3cf   :  { %10789 = vmatpush3.bf16.xpose.msra.mxu1 %v6571_v30  ;;  %v5177_v30 = vsel %vm4712_vm9, %v9782_v63, 0  ;;  %v9783_v44 = vcombine.low %v5045_v49, %v5048_v15  ;;  %v5404_v0 = vsel %vm11583_vm4, %v9801_v58, %v5403_v14  ;;  %v5407_v37 = vsel %vm11583_vm4, %v5405_v51, %v5406_v40  ;;  %v15503_v14 = vld [vmem:[#allocation2 + $0x14c] sm:$0xf]  ;;  %v5279_v9 = vld [vmem:[#allocation2 + $0x148] sm:$0xe] }
 0x3d0   :  { %11144 = vmatprep.subr.msk.bf16.mxu1 %vm4712_vm9, %v9922_v33  ;;  %v5250_v33 = vld [vmem:[#allocation2 + $0x84] sm:$0xf]  ;;  %v6496_v63 = vsel %vm14457_vm10, %v9908_v31, %v6495_v19  ;;  %v6441_v54 = vrot.slane %v6439_v28, 4  ;;  %v6442_v53 = vrot.slane %v6323_v16, 7  ;;  %v6502_v25 = vrot.slane %v6349_v20, 7 }
 0x3d1   :  { %v5347_v12 = vrot.slane %v5250_v33, 5  ;;  %v9900_v1 = vrot.slane %v6321_v35, 11  ;;  %v5412_v33 = vrot.slane %v5410_v32, 4  ;;  %v9818_v57 = vcombine.low %v5404_v0, %v5407_v37  ;;  %v6324_v19 = vld [vmem:[#allocation2 + $0x1e0] sm:$0x8] }
 0x3d2   :  { %v6443_v42 = vsel %vm14457_vm10, %v6441_v54, %v6442_v53  ;;  %v9909_v18 = vrot.slane %v6348_v17, 11  ;;  %v6505_v10 = vrot.slane %v6350_v4, 7  ;;  %v15510_v52 = vld [vmem:[#allocation2 + $0xac] sm:$0xf]  ;;  %v5357_v40 = vrot.slane %v5254_v46, 5 }
 0x3d3   :  { %10725 = vmatpush3.bf16.xpose.msra.mxu0 %v5174_v62  ;;  %v6434_v62 = vrot.slane %v6432_v2, 4  ;;  %v5349_v43 = vrot.slane %v5347_v12, 4  ;;  %v5348_v13 = vsel %vm11583_vm4, %v9793_v47, %v5347_v12  ;;  %v5180_v2 = vsel %vm4712_vm9, %v9783_v44, 0  ;;  %v15507_v12 = vld [vmem:[#allocation2 + $0x298] sm:$0xf] }
 0x3d4   :  { %11116 = vmatprep.subr.msk.bf16.mxu0 %vm4712_vm9, %v9790_v60  ;;  %v6498_v60 = vrot.slane %v6347_v61, 7  ;;  %v6440_v15 = vsel %vm14457_vm10, %v9900_v1, %v6439_v28  ;;  %v5281_v51 = vld [vmem:[#allocation2 + $0x150] sm:$0x1]  ;;  %v6351_v31 = vld [vmem:[#allocation2 + $0x294] sm:$0x8]  ;;  %v6446_v47 = vrot.slane %v15501_v24, 7  ;;  %v6503_v28 = vsel %vm14457_vm10, %v9909_v18, %v6502_v25 }
 0x3d5   :  { %v6436_v22 = vsel %vm14457_vm10, %v6434_v62, %v6435_v56  ;;  %v5351_v48 = vsel %vm11583_vm4, %v5349_v43, %v5350_v8  ;;  %v9794_v56 = vrot.slane %v5252_v3, 9  ;;  %v5417_v16 = vrot.slane %v15503_v14, 5  ;;  %v5255_v49 = vld [vmem:[#allocation2 + $0xa8] sm:$0xe]  ;;  %v5257_v0 = vld [vmem:[#allocation2 + $0xb0] sm:$0x1] }
 0x3d6   :  { %v6499_v45 = vsel %vm14457_vm10, %v6497_v11, %v6498_v60  ;;  %v9916_v34 = vcombine.low %v6433_v38, %v6436_v22  ;;  %v9810_v61 = vcombine.low %v5348_v13, %v5351_v48  ;;  %v9917_v11 = vcombine.low %v6440_v15, %v6443_v42  ;;  %v15533_v37 = vld [vmem:[#allocation2 + $0x1f8] sm:$0xf]  ;;  %v15537_v17 = vld [vmem:[#allocation2 + $0x160] sm:$0xf]  ;;  %v6329_v1 = vld [vmem:[#allocation2 + $0x1fc] sm:$0x7] }
 0x3d7   :  { %10791 = vmatpush3.bf16.xpose.msra.mxu1 %v6574_v5  ;;  %v5278_v5 = vld [vmem:[#allocation2 + $0x13c] sm:$0x1]  ;;  %v9901_v38 = vrot.slane %v6324_v19, 11  ;;  %v6509_v22 = vrot.slane %v15507_v12, 7  ;;  %v9803_v54 = vrot.slane %v5279_v9, 9  ;;  %v5420_v53 = vrot.slane %v5281_v51, 5 }
 0x3d8   :  { %11145 = vmatprep.subr.msk.bf16.mxu1 %vm4712_vm9, %v9923_v6  ;;  %v15486_v6 = vld [vmem:[#allocation2 + $0x98] sm:$0xf]  ;;  %v5413_v21 = vrot.slane %v5278_v5, 5  ;;  %v6580_v60 = vsel %vm4712_vm9, %v9916_v34, 0  ;;  %v5511_v43 = vsel %vm4712_vm9, %v9810_v61, 0  ;;  %v6449_v5 = vrot.slane %v6326_v59, 7 }
 0x3d9   :  { %v5354_v7 = vrot.slane %v15486_v6, 5  ;;  %v5361_v6 = vrot.slane %v15510_v52, 5  ;;  %v9795_v3 = vrot.slane %v5255_v49, 9  ;;  %v6583_v46 = vsel %vm4712_vm9, %v9917_v11, 0  ;;  %v5259_v34 = vld [vmem:[#allocation2 + $0xc0] sm:$0xf] }
 0x3da   :  { %v5414_v62 = vsel %vm11583_vm4, %v5412_v33, %v5413_v21  ;;  %v5364_v21 = vrot.slane %v5257_v0, 5  ;;  %v5418_v24 = vsel %vm11583_vm4, %v9803_v54, %v5417_v16  ;;  %v5282_v61 = vld [vmem:[#allocation2 + $0x15c] sm:$0xe]  ;;  %v5284_v42 = vld [vmem:[#allocation2 + $0x164] sm:$0x1]  ;;  %v6456_v15 = vrot.slane %v6329_v1, 7 }
 0x3db   :  { %10727 = vmatpush3.bf16.xpose.msra.mxu0 %v5177_v30  ;;  %v9802_v30 = vrot.slane %v5276_v39, 9  ;;  %v5356_v58 = vrot.slane %v5354_v7, 4  ;;  %v9910_v39 = vrot.slane %v6351_v31, 11  ;;  %v5363_v33 = vrot.slane %v5361_v6, 4  ;;  %v15551_v18 = vld [vmem:[#allocation2 + $0x210] sm:$0xf] }
 0x3dc   :  { %11117 = vmatprep.subr.msk.bf16.mxu0 %vm4712_vm9, %v9791_v27  ;;  %v9925_v27 = vcombine.low %v6496_v63, %v6499_v45  ;;  %v6448_v63 = vrot.slane %v6446_v47, 4  ;;  %v5419_v45 = vrot.slane %v5417_v16, 4  ;;  %v6812_v51 = vrot.slane %v15551_v18, 6  ;;  %v15564_v31 = vld [vmem:[#allocation2 + $0x170] sm:$0xf] }
 0x3dd   :  { %v5411_v8 = vsel %vm11583_vm4, %v9802_v30, %v5410_v32  ;;  %v5355_v32 = vsel %vm11583_vm4, %v9794_v56, %v5354_v7  ;;  %v5358_v35 = vsel %vm11583_vm4, %v5356_v58, %v5357_v40  ;;  %v6447_v7 = vsel %vm14457_vm10, %v9901_v38, %v6446_v47  ;;  %v5260_v56 = vld [vmem:[#allocation2 + $0xc4] sm:$0x1]  ;;  %v15567_v16 = vld [vmem:[#allocation2 + $0x174] sm:$0xf] }
 0x3de   :  { %v9819_v20 = vcombine.low %v5411_v8, %v5414_v62  ;;  %v9811_v4 = vcombine.low %v5355_v32, %v5358_v35  ;;  %v5421_v14 = vsel %vm11583_vm4, %v5419_v45, %v5420_v53  ;;  %v5424_v30 = vrot.slane %v15537_v17, 5  ;;  %v6684_v62 = vld [vmem:[#allocation2 + $0x214] sm:$0x3]  ;;  %v15580_v54 = vld [vmem:[#allocation2 + $0x224] sm:$0xf] }
 0x3df   :  { %10793 = vmatpush3.bf16.xpose.msra.mxu1 %v6577_v41  ;;  %v6353_v41 = vld [vmem:[#allocation2 + $0x29c] sm:$0x7]  ;;  %v6510_v12 = vsel %vm14457_vm10, %v9910_v39, %v6509_v22  ;;  %v5365_v59 = vsel %vm11583_vm4, %v5363_v33, %v5364_v21  ;;  %v5368_v58 = vrot.slane %v5259_v34, 5  ;;  %v9820_v9 = vcombine.low %v5418_v24, %v5421_v14  ;;  %v15572_v32 = vld [vmem:[#allocation2 + $0xd4] sm:$0xf] }
 0x3e0   :  { %11146 = vmatprep.subr.msk.bf16.mxu1 %vm4712_vm9, %v9924_v36  ;;  %v6504_v36 = vrot.slane %v6502_v25, 4  ;;  %v6512_v13 = vrot.slane %v6353_v41, 7  ;;  %v6511_v25 = vrot.slane %v6509_v22, 4  ;;  %v5514_v19 = vsel %vm4712_vm9, %v9811_v4, 0  ;;  %v6660_v17 = vld [vmem:[#allocation2 + $0x174] sm:$0x3] }
 0x3e1   :  { %v5426_v11 = vrot.slane %v5424_v30, 4  ;;  %v5427_v47 = vrot.slane %v5284_v42, 5  ;;  %v6814_v22 = vrot.slane %v6812_v51, 4  ;;  %v6815_v0 = vrot.slane %v6684_v62, 6  ;;  %v5287_v45 = vld [vmem:[#allocation2 + $0x178] sm:$0x1] }
 0x3e2   :  { %v6506_v44 = vsel %vm14457_vm10, %v6504_v36, %v6505_v10  ;;  %v5362_v36 = vsel %vm11583_vm4, %v9795_v3, %v5361_v6  ;;  %v5258_v10 = vld [vmem:[#allocation2 + $0xbc] sm:$0xe]  ;;  %v6682_v6 = vld [vmem:[#allocation2 + $0x20c] sm:$0xc]  ;;  %v5375_v3 = vrot.slane %v15572_v32, 5  ;;  %v6759_v34 = vrot.slane %v6660_v17, 6 }
 0x3e3   :  { %10729 = vmatpush3.bf16.xpose.msra.mxu0 %v5180_v2  ;;  %v9926_v48 = vcombine.low %v6503_v28, %v6506_v44  ;;  %v6327_v2 = vld [vmem:[#allocation2 + $0x1f4] sm:$0x8]  ;;  %v9812_v8 = vcombine.low %v5362_v36, %v5365_v59  ;;  %v9804_v28 = vrot.slane %v5282_v61, 9  ;;  %v9796_v49 = vrot.slane %v5258_v10, 9  ;;  %v6658_v4 = vld [vmem:[#allocation2 + $0x16c] sm:$0xc] }
 0x3e4   :  { %11118 = vmatprep.subr.msk.bf16.mxu0 %vm4712_vm9, %v9818_v57  ;;  %v6450_v57 = vsel %vm14457_vm10, %v6448_v63, %v6449_v5  ;;  %v5371_v44 = vrot.slane %v5260_v56, 5  ;;  %v5428_v5 = vsel %vm11583_vm4, %v5426_v11, %v5427_v47  ;;  %v5431_v63 = vrot.slane %v15567_v16, 5  ;;  %v6685_v14 = vld [vmem:[#allocation2 + $0x220] sm:$0xc]  ;;  %v6687_v61 = vld [vmem:[#allocation2 + $0x228] sm:$0x3] }
 0x3e5   :  { %v9918_v40 = vcombine.low %v6447_v7, %v6450_v57  ;;  %v5517_v53 = vsel %vm4712_vm9, %v9812_v8, 0  ;;  %v5425_v29 = vsel %vm11583_vm4, %v9804_v28, %v5424_v30  ;;  %v9937_v33 = vrot.slane %v6682_v6, 10  ;;  %v5263_v7 = vld [vmem:[#allocation2 + $0xd8] sm:$0x1]  ;;  %v5288_v11 = vld [vmem:[#allocation2 + $0x184] sm:$0xe] }
 0x3e6   :  { %v9821_v1 = vcombine.low %v5425_v29, %v5428_v5  ;;  %v6816_v21 = vsel %vm14609_vm15, %v6814_v22, %v6815_v0  ;;  %v5433_v57 = vrot.slane %v5431_v63, 4  ;;  %v5434_v24 = vrot.slane %v5287_v45, 5  ;;  %v15602_v59 = vld [vmem:[#allocation2 + $0x238] sm:$0xf]  ;;  %v5290_v47 = vld [vmem:[#allocation2 + $0x18c] sm:$0x1] }
 0x3e7   :  { %10795 = vmatpush3.bf16.xpose.msra.mxu1 %v6580_v60  ;;  %v9902_v60 = vrot.slane %v6327_v2, 11  ;;  %v6586_v38 = vsel %vm4712_vm9, %v9918_v40, 0  ;;  %v6813_v42 = vsel %vm14609_vm15, %v9937_v33, %v6812_v51  ;;  %v5377_v10 = vrot.slane %v5375_v3, 4  ;;  %v6663_v40 = vld [vmem:[#allocation2 + $0x188] sm:$0x3] }
 0x3e8   :  { %11147 = vmatprep.subr.msk.bf16.mxu1 %vm4712_vm9, %v9925_v27  ;;  %v6513_v27 = vsel %vm14457_vm10, %v6511_v25, %v6512_v13  ;;  %v5369_v13 = vsel %vm11583_vm4, %v9796_v49, %v5368_v58  ;;  %v5285_v25 = vld [vmem:[#allocation2 + $0x170] sm:$0xe]  ;;  %v5378_v56 = vrot.slane %v5263_v7, 5  ;;  %v6688_v8 = vld [vmem:[#allocation2 + $0x234] sm:$0xc]  ;;  %v9938_v49 = vrot.slane %v6685_v14, 10 }
 0x3e9   :  { %v9805_v18 = vrot.slane %v5285_v25, 9  ;;  %v6661_v0 = vld [vmem:[#allocation2 + $0x180] sm:$0xc]  ;;  %v6826_v32 = vrot.slane %v15602_v59, 6  ;;  %v15635_v17 = vld [vmem:[%s16174_s5 + $0x6] sm:$0x1] }
 0x3ea   :  { %10731 = vmatmul.mubr.msk.bf16.vlgmr.msra.gmra.mrb[32].mxu0 %vm4712_vm9, %v15275_v50  ;;  %v6453_v50 = vrot.slane %v15533_v37, 7  ;;  %v6756_v37 = vrot.slane %v15564_v31, 6  ;;  %v5435_v31 = vsel %vm11583_vm4, %v5433_v57, %v5434_v24  ;;  %v5379_v22 = vsel %vm11583_vm4, %v5377_v10, %v5378_v56  ;;  %v6692_v57 = vld [vmem:[#allocation2 + $0x24c] sm:$0xf] }
 0x3eb   :  { %10733 = vmatpush3.bf16.xpose.msra.mxu0 %v5511_v43  ;;  %v9927_v43 = vcombine.low %v6510_v12, %v6513_v27  ;;  %v15599_v12 = vld [vmem:[#allocation2 + $0x188] sm:$0xf]  ;;  %v6766_v29 = vrot.slane %v6663_v40, 6  ;;  %v9806_v25 = vrot.slane %v5288_v11, 9  ;;  %v6828_v33 = vrot.slane %v6826_v32, 4 }
 0x3ec   :  { %11119 = vmatprep.subr.msk.bf16.mxu0 %vm4712_vm9, %v9819_v20  ;;  %v6455_v52 = vrot.slane %v6453_v50, 4  ;;  %v5370_v20 = vrot.slane %v5368_v58, 4  ;;  %v6454_v35 = vsel %vm14457_vm10, %v9902_v60, %v6453_v50  ;;  %v6819_v50 = vrot.slane %v15580_v54, 6 }
 0x3ed   :  { %v6758_v2 = vrot.slane %v6756_v37, 4  ;;  %v6822_v58 = vrot.slane %v6687_v61, 6  ;;  %v6666_v61 = vld [vmem:[#allocation2 + $0x19c] sm:$0x3] }
 0x3ee   :  { %v6457_v41 = vsel %vm14457_vm10, %v6455_v52, %v6456_v15  ;;  %v9954_v52 = vcombine.low %v6813_v42, %v6816_v21  ;;  %v9929_v15 = vrot.slane %v6658_v4, 10  ;;  %v6821_v62 = vrot.slane %v6819_v50, 4 }
 0x3ef   :  { %10797 = vmatpush3.bf16.xpose.msra.mxu1 %v6583_v46  ;;  %v9919_v39 = vcombine.low %v6454_v35, %v6457_v41  ;;  %v5261_v46 = vld [vmem:[#allocation2 + $0xd0] sm:$0xe]  ;;  %v6760_v51 = vsel %vm14609_vm15, %v6758_v2, %v6759_v34  ;;  %v5432_v41 = vsel %vm11583_vm4, %v9805_v18, %v5431_v63  ;;  %v5266_v35 = vld [vmem:[#allocation2 + $0xec] sm:$0x1]  ;;  %v6820_v63 = vsel %vm14609_vm15, %v9938_v49, %v6819_v50 }
 0x3f0   :  { %11148 = vmatprep.subr.msk.bf16.mxu1 %vm4712_vm9, %v9926_v48  ;;  %v5372_v48 = vsel %vm11583_vm4, %v5370_v20, %v5371_v44  ;;  %v9797_v36 = vrot.slane %v5261_v46, 9  ;;  %v6757_v16 = vsel %vm14609_vm15, %v9929_v15, %v6756_v37  ;;  %v6690_v20 = vld [vmem:[#allocation2 + $0x23c] sm:$0x3]  ;;  %v5264_v44 = vld [vmem:[#allocation2 + $0xe4] sm:$0xe]  ;;  %v9822_v37 = vcombine.low %v5432_v41, %v5435_v31 }
 0x3f1   :  { %v9813_v30 = vcombine.low %v5369_v13, %v5372_v48  ;;  %v6589_v27 = vsel %vm4712_vm9, %v9919_v39, 0  ;;  %v9946_v6 = vcombine.low %v6757_v16, %v6760_v51  ;;  %v6823_v54 = vsel %vm14609_vm15, %v6821_v62, %v6822_v58  ;;  %v15630_v39 = vld [vmem:[#allocation2 + $0x19c] sm:$0xf]  ;;  %v5291_v15 = vld [vmem:[#allocation2 + $0x198] sm:$0xe] }
 0x3f2   :  { %v5441_v48 = vrot.slane %v5290_v47, 5  ;;  %v9798_v21 = vrot.slane %v5264_v44, 9  ;;  %v5385_v46 = vrot.slane %v5266_v35, 5  ;;  %v9955_v2 = vcombine.low %v6820_v63, %v6823_v54  ;;  %v6691_v62 = vld [vmem:[#allocation2 + $0x248] sm:$0xc] }
 0x3f3   :  { %10735 = vmatpush3.bf16.xpose.msra.mxu0 %v5514_v19  ;;  %v15597_v19 = vld [vmem:[#allocation2 + $0x184] sm:$0xf]  ;;  %v5520_v28 = vsel %vm4712_vm9, %v9813_v30, 0  ;;  %v6920_v7 = vsel %vm4712_vm9, %v9946_v6, 0  ;;  %v9930_v34 = vrot.slane %v6661_v0, 10  ;;  %v5445_v30 = vrot.slane %v15630_v39, 5 }
 0x3f4   :  { %11120 = vmatprep.subr.msk.bf16.mxu0 %vm4712_vm9, %v9820_v9  ;;  %v15604_v9 = vld [vmem:[#allocation2 + $0xe8] sm:$0xf]  ;;  %v6763_v60 = vrot.slane %v15597_v19, 6  ;;  %v6833_v58 = vrot.slane %v6692_v57, 6  ;;  %v6773_v51 = vrot.slane %v6666_v61, 6  ;;  %v9807_v49 = vrot.slane %v5291_v15, 9 }
 0x3f5   :  { %v5382_v5 = vrot.slane %v15604_v9, 5  ;;  %v6693_v31 = vld [vmem:[#allocation2 + $0x250] sm:$0x3]  ;;  %v5447_v47 = vrot.slane %v5445_v30, 4  ;;  %v6694_v57 = vld [vmem:[#allocation2 + $0x25c] sm:$0xc] }
 0x3f6   :  { %v6765_v45 = vrot.slane %v6763_v60, 4  ;;  %v6764_v18 = vsel %vm14609_vm15, %v9930_v34, %v6763_v60  ;;  %v5269_v60 = vld [vmem:[#allocation2 + $0x100] sm:$0x1]  ;;  %v5295_v44 = vld [vmem:[#allocation2 + $0x1b0] sm:$0xf]  ;;  %v6835_v0 = vrot.slane %v6833_v58, 4 }
 0x3f7   :  { %10799 = vmatpush3.bf16.xpose.msra.mxu1 %v6586_v38  ;;  %v5376_v38 = vsel %vm11583_vm4, %v9797_v36, %v5375_v3  ;;  %v9939_v3 = vrot.slane %v6688_v8, 10  ;;  %v5384_v50 = vrot.slane %v5382_v5, 4  ;;  %v15657_v36 = vld [vmem:[#allocation2 + $0xfc] sm:$0xf]  ;;  %v5383_v56 = vsel %vm11583_vm4, %v9798_v21, %v5382_v5  ;;  %v6669_v35 = vld [vmem:[#allocation2 + $0x1b0] sm:$0x3] }
 0x3f8   :  { %11149 = vmatprep.subr.msk.bf16.mxu1 %vm4712_vm9, %v9927_v43  ;;  %v5438_v43 = vrot.slane %v15599_v12, 5  ;;  %v9814_v4 = vcombine.low %v5376_v38, %v5379_v22  ;;  %v6767_v24 = vsel %vm14609_vm15, %v6765_v45, %v6766_v29  ;;  %v5389_v8 = vrot.slane %v15657_v36, 5  ;;  %v15669_v38 = vld [vmem:[#allocation2 + $0x260] sm:$0xf]  ;;  %v5294_v21 = vld [vmem:[#allocation2 + $0x1ac] sm:$0xe] }
 0x3f9   :  { %v6827_v12 = vsel %vm14609_vm15, %v9939_v3, %v6826_v32  ;;  %v5386_v59 = vsel %vm11583_vm4, %v5384_v50, %v5385_v46  ;;  %v9947_v40 = vcombine.low %v6764_v18, %v6767_v24  ;;  %v9940_v22 = vrot.slane %v6691_v62, 10  ;;  %v6696_v24 = vld [vmem:[#allocation2 + $0x264] sm:$0x3]  ;;  %v6667_v61 = vld [vmem:[#allocation2 + $0x1a8] sm:$0xc] }
 0x3fa   :  { %v5440_v13 = vrot.slane %v5438_v43, 4  ;;  %v5439_v19 = vsel %vm11583_vm4, %v9806_v25, %v5438_v43  ;;  %v9815_v41 = vcombine.low %v5383_v56, %v5386_v59  ;;  %v6836_v32 = vrot.slane %v6693_v31, 6  ;;  %v5271_v25 = vld [vmem:[#allocation2 + $0x110] sm:$0xf] }
 0x3fb   :  { %10737 = vmatpush3.bf16.xpose.msra.mxu0 %v5517_v53  ;;  %v15628_v53 = vld [vmem:[#allocation2 + $0x198] sm:$0xf]  ;;  %v6923_v5 = vsel %vm4712_vm9, %v9947_v40, 0  ;;  %v5391_v39 = vrot.slane %v5389_v8, 4  ;;  %v5452_v45 = vrot.slane %v5295_v44, 5  ;;  %v6834_v3 = vsel %vm14609_vm15, %v9940_v22, %v6833_v58 }
 0x3fc   :  { %11121 = vmatprep.subr.msk.bf16.mxu0 %vm4712_vm9, %v9821_v1  ;;  %v6829_v1 = vrot.slane %v6690_v20, 6  ;;  %v5442_v14 = vsel %vm11583_vm4, %v5440_v13, %v5441_v48  ;;  %v6770_v42 = vrot.slane %v15628_v53, 6  ;;  %v5267_v20 = vld [vmem:[#allocation2 + $0xf8] sm:$0xe]  ;;  %v5526_v29 = vsel %vm4712_vm9, %v9815_v41, 0 }
 0x3fd   :  { %v9823_v9 = vcombine.low %v5439_v19, %v5442_v14  ;;  %v5446_v48 = vsel %vm11583_vm4, %v9807_v49, %v5445_v30  ;;  %v6840_v50 = vrot.slane %v15669_v38, 6  ;;  %v6780_v34 = vrot.slane %v6669_v35, 6  ;;  %v5270_v40 = vld [vmem:[#allocation2 + $0x10c] sm:$0xe]  ;;  %v6697_v22 = vld [vmem:[#allocation2 + $0x270] sm:$0xc] }
 0x3fe   :  { %v6830_v10 = vsel %vm14609_vm15, %v6828_v33, %v6829_v1  ;;  %v6772_v11 = vrot.slane %v6770_v42, 4  ;;  %v6837_v1 = vsel %vm14609_vm15, %v6835_v0, %v6836_v32  ;;  %v9799_v33 = vrot.slane %v5267_v20, 9  ;;  %v6699_v0 = vld [vmem:[#allocation2 + $0x278] sm:$0x3] }
 0x3ff   :  { %10801 = vmatpush3.bf16.xpose.msra.mxu1 %v6589_v27  ;;  %v5293_v27 = vld [vmem:[#allocation2 + $0x1a0] sm:$0x1]  ;;  %v9956_v16 = vcombine.low %v6827_v12, %v6830_v10  ;;  %v9957_v18 = vcombine.low %v6834_v3, %v6837_v1  ;;  %v9808_v19 = vrot.slane %v5294_v21, 9  ;;  %v5272_v12 = vld [vmem:[#allocation2 + $0x114] sm:$0x1]  ;;  %v9941_v10 = vrot.slane %v6694_v57, 10 }
 0x400   :  { %11150 = vmatprep.subr.msk.bf16.mxu1 %vm4712_vm9, %v9954_v52  ;;  %v6664_v52 = vld [vmem:[#allocation2 + $0x194] sm:$0xc]  ;;  %v5448_v43 = vrot.slane %v5293_v27, 5  ;;  %v6774_v54 = vsel %vm14609_vm15, %v6772_v11, %v6773_v51  ;;  %v6671_v27 = vld [vmem:[#allocation2 + $0x1c0] sm:$0xf]  ;;  %v5390_v36 = vsel %vm11583_vm4, %v9799_v33, %v5389_v8  ;;  %v6842_v56 = vrot.slane %v6840_v50, 4 }
 0x401   :  { %v9931_v6 = vrot.slane %v6664_v52, 10  ;;  %v6843_v59 = vrot.slane %v6696_v24, 6  ;;  %v9932_v62 = vrot.slane %v6667_v61, 10  ;;  %v6784_v11 = vrot.slane %v6671_v27, 6  ;;  %v6672_v8 = vld [vmem:[#allocation2 + $0x1c4] sm:$0x3] }
 0x402   :  { %v5449_v53 = vsel %vm11583_vm4, %v5447_v47, %v5448_v43  ;;  %v5453_v43 = vsel %vm11583_vm4, %v9808_v19, %v5452_v45  ;;  %v9800_v41 = vrot.slane %v5270_v40, 9  ;;  %v6675_v1 = vld [vmem:[#allocation2 + $0x1d8] sm:$0x3]  ;;  %v6702_v57 = vld [vmem:[#allocation2 + $0x28c] sm:$0x3] }
 0x403   :  { %10739 = vmatpush3.bf16.xpose.msra.mxu0 %v5520_v28  ;;  %v15666_v28 = vld [vmem:[#allocation2 + $0x1ac] sm:$0xf]  ;;  %v6771_v13 = vsel %vm14609_vm15, %v9931_v6, %v6770_v42  ;;  %v5454_v42 = vrot.slane %v5452_v45, 4  ;;  %v6786_v35 = vrot.slane %v6784_v11, 4  ;;  %v6850_v45 = vrot.slane %v6699_v0, 6 }
 0x404   :  { %11122 = vmatprep.subr.msk.bf16.mxu0 %vm4712_vm9, %v9822_v37  ;;  %v5392_v37 = vrot.slane %v5269_v60, 5  ;;  %v6777_v63 = vrot.slane %v15666_v28, 6  ;;  %v9948_v46 = vcombine.low %v6771_v13, %v6774_v54  ;;  %v5399_v60 = vrot.slane %v5272_v12, 5  ;;  %v6704_v27 = vld [vmem:[#allocation2 + $0x29c] sm:$0xf] }
 0x405   :  { %v6841_v28 = vsel %vm14609_vm15, %v9941_v10, %v6840_v50  ;;  %v6857_v19 = vrot.slane %v6702_v57, 6 }
 0x406   :  { %10803 = vmatmul.mubr.msk.bf16.vlgmr.msra.gmra.mrb[0].mxu1 %vm4712_vm9, %v15386_v55  ;;  %v5523_v55 = vsel %vm4712_vm9, %v9814_v4, 0  ;;  %v5296_v4 = vld [vmem:[#allocation2 + $0x1b4] sm:$0x1]  ;;  %v5393_v14 = vsel %vm11583_vm4, %v5391_v39, %v5392_v37  ;;  %v6926_v52 = vsel %vm4712_vm9, %v9948_v46, 0  ;;  %v6778_v47 = vsel %vm14609_vm15, %v9932_v62, %v6777_v63  ;;  %v6670_v37 = vld [vmem:[#allocation2 + $0x1bc] sm:$0xc] }
 0x407   :  { %10805 = vmatpush3.bf16.xpose.msra.mxu1 %v6920_v7  ;;  %10820 = vmatprep.mubr.msk.bf16.mxu1 %vm4712_vm9, %v15635_v17  ;;  %v9824_v7 = vcombine.low %v5446_v48, %v5449_v53  ;;  %v5455_v30 = vrot.slane %v5296_v4, 5  ;;  %v9816_v15 = vcombine.low %v5390_v36, %v5393_v14  ;;  %v9942_v53 = vrot.slane %v6697_v22, 10  ;;  %v6701_v48 = vld [vmem:[#allocation2 + $0x288] sm:$0xf]  ;;  %v7035_v22 = vld [vmem:[#allocation2 + $0x214] sm:$0xf] }
 0x408   :  { %11151 = vmatprep.subr.msk.bf16.mxu1 %vm4712_vm9, %v9955_v2  ;;  %v6779_v2 = vrot.slane %v6777_v63, 4  ;;  %v6674_v63 = vld [vmem:[#allocation2 + $0x1d4] sm:$0xf]  ;;  %v9933_v4 = vrot.slane %v6670_v37, 10  ;;  %v6854_v46 = vrot.slane %v6701_v48, 6  ;;  %v6794_v14 = vrot.slane %v6675_v1, 6 }
 0x409   :  { %v5456_v51 = vsel %vm11583_vm4, %v5454_v42, %v5455_v30  ;;  %v5529_v20 = vsel %vm4712_vm9, %v9816_v15, 0  ;;  %v6791_v3 = vrot.slane %v6674_v63, 6  ;;  %v6673_v42 = vld [vmem:[#allocation2 + $0x1d0] sm:$0xc]  ;;  %v6677_v30 = vld [vmem:[#allocation2 + $0x1e8] sm:$0xf] }
 0x40a   :  { %v6781_v58 = vsel %vm14609_vm15, %v6779_v2, %v6780_v34  ;;  %v9825_v38 = vcombine.low %v5453_v43, %v5456_v51  ;;  %v6785_v33 = vsel %vm14609_vm15, %v9933_v4, %v6784_v11  ;;  %v6700_v34 = vld [vmem:[#allocation2 + $0x284] sm:$0xc]  ;;  %v9934_v36 = vrot.slane %v6673_v42, 10  ;;  %v6705_v51 = vld [vmem:[#allocation2 + $0x2a0] sm:$0x3] }
 0x40b   :  { %10741 = vmatpush3.bf16.xpose.msra.mxu0 %v5523_v55  ;;  %v5396_v55 = vrot.slane %v5271_v25, 5  ;;  %v9949_v44 = vcombine.low %v6778_v47, %v6781_v58  ;;  %v6793_v24 = vrot.slane %v6791_v3, 4  ;;  %v6861_v58 = vrot.slane %v6704_v27, 6  ;;  %v6676_v47 = vld [vmem:[#allocation2 + $0x1e4] sm:$0xc] }
 0x40c   :  { %11123 = vmatprep.subr.msk.bf16.mxu0 %vm4712_vm9, %v9823_v9  ;;  %v6698_v9 = vld [vmem:[#allocation2 + $0x274] sm:$0xf]  ;;  %v6680_v43 = vld [vmem:[#allocation2 + $0x1fc] sm:$0xf]  ;;  %v7034_v48 = vld [vmem:[#allocation2 + $0x210] sm:$0xe] }
 0x40d   :  { %v5398_v31 = vrot.slane %v5396_v55, 4  ;;  %v6847_v49 = vrot.slane %v6698_v9, 6  ;;  %v5397_v54 = vsel %vm11583_vm4, %v9800_v41, %v5396_v55  ;;  %v9943_v55 = vrot.slane %v6700_v34, 10  ;;  %v6703_v9 = vld [vmem:[#allocation2 + $0x298] sm:$0xc] }
 0x40e   :  { %v6795_v10 = vsel %vm14609_vm15, %v6793_v24, %v6794_v14  ;;  %v7014_v42 = vld [vmem:[#allocation2 + $0x188] sm:$0xf]  ;;  %v7041_v27 = vld [vmem:[#allocation2 + $0x23c] sm:$0xf] }
 0x40f   :  { %10807 = vmatpush3.bf16.xpose.msra.mxu1 %v6923_v5  ;;  %v5400_v32 = vsel %vm11583_vm4, %v5398_v31, %v5399_v60  ;;  %v6787_v5 = vrot.slane %v6672_v8, 6  ;;  %v6849_v39 = vrot.slane %v6847_v49, 4  ;;  %v6848_v21 = vsel %vm14609_vm15, %v9942_v53, %v6847_v49 }
 0x410   :  { %11152 = vmatprep.subr.msk.bf16.mxu1 %vm4712_vm9, %v9956_v16  ;;  %v6844_v16 = vsel %vm14609_vm15, %v6842_v56, %v6843_v59  ;;  %v9817_v13 = vcombine.low %v5397_v54, %v5400_v32  ;;  %v6798_v56 = vrot.slane %v6677_v30, 6  ;;  %v6678_v59 = vld [vmem:[#allocation2 + $0x1ec] sm:$0x3]  ;;  %v6855_v15 = vsel %vm14609_vm15, %v9943_v55, %v6854_v46 }
 0x411   :  { %v9958_v6 = vcombine.low %v6841_v28, %v6844_v16  ;;  %v6788_v25 = vsel %vm14609_vm15, %v6786_v35, %v6787_v5  ;;  %v6851_v50 = vsel %vm14609_vm15, %v6849_v39, %v6850_v45  ;;  %v6801_v60 = vrot.slane %v6678_v59, 6  ;;  %v7036_v39 = vld [vmem:[#allocation2 + $0x218] sm:$0x1]  ;;  %v7011_v45 = vld [vmem:[#allocation2 + $0x174] sm:$0xf] }
 0x412   :  { %v9950_v2 = vcombine.low %v6785_v33, %v6788_v25  ;;  %v9959_v61 = vcombine.low %v6848_v21, %v6851_v50  ;;  %v6800_v31 = vrot.slane %v6798_v56, 4  ;;  %v9944_v8 = vrot.slane %v6703_v9, 10  ;;  %v7012_v33 = vld [vmem:[#allocation2 + $0x178] sm:$0x1]  ;;  %v7038_v21 = vld [vmem:[#allocation2 + $0x228] sm:$0xf] }
 0x413   :  { %10743 = vmatpush3.bf16.xpose.msra.mxu0 %v5526_v29  ;;  %v6929_v29 = vsel %vm4712_vm9, %v9949_v44, 0  ;;  %v6863_v28 = vrot.slane %v6861_v58, 4  ;;  %v6864_v16 = vrot.slane %v6705_v51, 6  ;;  %v9935_v49 = vrot.slane %v6676_v47, 10  ;;  %v7040_v51 = vld [vmem:[#allocation2 + $0x238] sm:$0xe] }
 0x414   :  { %11124 = vmatprep.subr.msk.bf16.mxu0 %vm4712_vm9, %v9824_v7  ;;  %v5532_v7 = vsel %vm4712_vm9, %v9817_v13, 0  ;;  %v6932_v12 = vsel %vm4712_vm9, %v9950_v2, 0  ;;  %v6805_v44 = vrot.slane %v6680_v43, 6  ;;  %v6862_v32 = vsel %vm14609_vm15, %v9944_v8, %v6861_v58  ;;  %v7010_v2 = vld [vmem:[#allocation2 + $0x170] sm:$0xe] }
 0x415   :  { %v6799_v0 = vsel %vm14609_vm15, %v9935_v49, %v6798_v56  ;;  %v6865_v35 = vsel %vm14609_vm15, %v6863_v28, %v6864_v16  ;;  %v7164_v54 = vrot.slane %v7035_v22, 5  ;;  %v7108_v1 = vrot.slane %v7011_v45, 5  ;;  %v7013_v58 = vld [vmem:[#allocation2 + $0x184] sm:$0xe]  ;;  %v7017_v8 = vld [vmem:[#allocation2 + $0x19c] sm:$0xf] }
 0x416   :  { %v6807_v37 = vrot.slane %v6805_v44, 4  ;;  %v9961_v53 = vcombine.low %v6862_v32, %v6865_v35  ;;  %v7111_v24 = vrot.slane %v7012_v33, 5  ;;  %v7171_v14 = vrot.slane %v7038_v21, 5  ;;  %v15765_v28 = vld [vmem:[%s16174_s5 + $0x7] sm:$0x1] }
 0x417   :  { %10809 = vmatpush3.bf16.xpose.msra.mxu1 %v6926_v52  ;;  %v6792_v52 = vsel %vm14609_vm15, %v9934_v36, %v6791_v3  ;;  %v7166_v25 = vrot.slane %v7164_v54, 4  ;;  %v7167_v3 = vrot.slane %v7036_v39, 5  ;;  %v7110_v57 = vrot.slane %v7108_v1, 4  ;;  %v7044_v22 = vld [vmem:[#allocation2 + $0x250] sm:$0xf] }
 0x418   :  { %11153 = vmatprep.subr.msk.bf16.mxu1 %vm4712_vm9, %v9957_v18  ;;  %v6856_v18 = vrot.slane %v6854_v46, 4  ;;  %v9951_v40 = vcombine.low %v6792_v52, %v6795_v10  ;;  %v9971_v46 = vrot.slane %v7034_v48, 9  ;;  %v9963_v55 = vrot.slane %v7010_v2, 9  ;;  %v7015_v52 = vld [vmem:[#allocation2 + $0x18c] sm:$0x1] }
 0x419   :  { %v7168_v34 = vsel %vm11583_vm4, %v7166_v25, %v7167_v3  ;;  %v7112_v36 = vsel %vm11583_vm4, %v7110_v57, %v7111_v24  ;;  %v7173_v10 = vrot.slane %v7171_v14, 4  ;;  %v7115_v59 = vrot.slane %v7014_v42, 5  ;;  %v7018_v35 = vld [vmem:[#allocation2 + $0x1a0] sm:$0x1]  ;;  %v7045_v39 = vld [vmem:[#allocation2 + $0x254] sm:$0x1] }
 0x41a   :  { %v6858_v62 = vsel %vm14609_vm15, %v6856_v18, %v6857_v19  ;;  %v6935_v41 = vsel %vm4712_vm9, %v9951_v40, 0  ;;  %v7165_v30 = vsel %vm11583_vm4, %v9971_v46, %v7164_v54  ;;  %v7178_v40 = vrot.slane %v7041_v27, 5  ;;  %v7016_v54 = vld [vmem:[#allocation2 + $0x198] sm:$0xe]  ;;  %v7020_v48 = vld [vmem:[#allocation2 + $0x1b0] sm:$0xf] }
 0x41b   :  { %10745 = vmatpush3.bf16.xpose.msra.mxu0 %v5529_v20  ;;  %v9960_v11 = vcombine.low %v6855_v15, %v6858_v62  ;;  %v6802_v20 = vsel %vm14609_vm15, %v6800_v31, %v6801_v60  ;;  %v9988_v19 = vcombine.low %v7165_v30, %v7168_v34  ;;  %v7109_v15 = vsel %vm11583_vm4, %v9963_v55, %v7108_v1  ;;  %v7042_v31 = vld [vmem:[#allocation2 + $0x240] sm:$0x1]  ;;  %v7047_v21 = vld [vmem:[#allocation2 + $0x264] sm:$0xf]  ;;  %v7046_v42 = vld [vmem:[#allocation2 + $0x260] sm:$0xe] }
 0x41c   :  { %11125 = vmatprep.subr.msk.bf16.mxu0 %vm4712_vm9, %v9825_v38  ;;  %v6681_v38 = vld [vmem:[#allocation2 + $0x200] sm:$0x3]  ;;  %v9952_v5 = vcombine.low %v6799_v0, %v6802_v20  ;;  %v9980_v9 = vcombine.low %v7109_v15, %v7112_v36  ;;  %v7118_v47 = vrot.slane %v7015_v52, 5  ;;  %v9964_v43 = vrot.slane %v7013_v58, 9  ;;  %v7048_v30 = vld [vmem:[#allocation2 + $0x268] sm:$0x1] }
 0x41d   :  { %v6808_v63 = vrot.slane %v6681_v38, 6  ;;  %v7180_v49 = vrot.slane %v7178_v40, 4  ;;  %v7181_v20 = vrot.slane %v7042_v31, 5  ;;  %v7122_v32 = vrot.slane %v7017_v8, 5  ;;  %v7050_v52 = vld [vmem:[#allocation2 + $0x278] sm:$0xf] }
 0x41e   :  { %v7188_v1 = vrot.slane %v7045_v39, 5  ;;  %v7129_v46 = vrot.slane %v7020_v48, 5  ;;  %v7192_v24 = vrot.slane %v7047_v21, 5  ;;  %v9975_v36 = vrot.slane %v7046_v42, 9  ;;  %v7024_v58 = vld [vmem:[#allocation2 + $0x1c8] sm:$0x1] }
 0x41f   :  { %10811 = vmatpush3.bf16.xpose.msra.mxu1 %v6929_v29  ;;  %v6938_v29 = vsel %vm4712_vm9, %v9952_v5, 0  ;;  %v6809_v4 = vsel %vm14609_vm15, %v6807_v37, %v6808_v63  ;;  %v7116_v5 = vsel %vm11583_vm4, %v9964_v43, %v7115_v59  ;;  %v7185_v37 = vrot.slane %v7044_v22, 5  ;;  %v7051_v43 = vld [vmem:[#allocation2 + $0x27c] sm:$0x1]  ;;  %v7025_v39 = vld [vmem:[#allocation2 + $0x1d4] sm:$0xe] }
 0x420   :  { %11154 = vmatprep.subr.msk.bf16.mxu1 %vm4712_vm9, %v9958_v6  ;;  %v6679_v6 = vld [vmem:[#allocation2 + $0x1f8] sm:$0xc]  ;;  %v7124_v45 = vrot.slane %v7122_v32, 4  ;;  %v7131_v55 = vrot.slane %v7129_v46, 4  ;;  %v7199_v31 = vrot.slane %v7050_v52, 5  ;;  %v7202_v22 = vrot.slane %v7051_v43, 5 }
 0x421   :  { %v9936_v13 = vrot.slane %v6679_v6, 10  ;;  %v7182_v6 = vsel %vm11583_vm4, %v7180_v49, %v7181_v20  ;;  %v7187_v3 = vrot.slane %v7185_v37, 4  ;;  %v7026_v49 = vld [vmem:[#allocation2 + $0x1d8] sm:$0xf] }
 0x423   :  { %10747 = vmatpush3.bf16.xpose.msra.mxu0 %v5532_v7  ;;  %v6806_v50 = vsel %vm14609_vm15, %v9936_v13, %v6805_v44  ;;  %v7272_v44 = vsel %vm4712_vm9, %v9980_v9, 0  ;;  %v7189_v57 = vsel %vm11583_vm4, %v7187_v3, %v7188_v1  ;;  %v7193_v9 = vsel %vm11583_vm4, %v9975_v36, %v7192_v24  ;;  %v7032_v36 = vld [vmem:[#allocation2 + $0x200] sm:$0xf] }
 0x424   :  { %v9953_v7 = vcombine.low %v6806_v50, %v6809_v4  ;;  %v9965_v4 = vrot.slane %v7016_v54, 9  ;;  %v9968_v3 = vrot.slane %v7025_v39, 9  ;;  %v11359_v39 = vld [vmem:[#allocation2 + $0xf0] sm:$0xff]  }
 0x426   :  { %v6941_v18 = vsel %vm4712_vm9, %v9953_v7, 0  ;;  %v7021_v7 = vld [vmem:[#allocation2 + $0x1b4] sm:$0x1]  ;;  %v7123_v2 = vsel %vm11583_vm4, %v9965_v4, %v7122_v32  ;;  %v7053_v32 = vld [vmem:[#allocation2 + $0x28c] sm:$0xf] }
 0x427   :  { %10813 = vmatpush3.bf16.xpose.msra.mxu1 %v6932_v12  ;;  %v7037_v12 = vld [vmem:[#allocation2 + $0x224] sm:$0xe]  ;;  %v7206_v54 = vrot.slane %v7053_v32, 5 }
 0x428   :  { %11155 = vmatprep.subr.msk.bf16.mxu1 %vm4712_vm9, %v9959_v61  ;;  %v7039_v61 = vld [vmem:[#allocation2 + $0x22c] sm:$0x1]  ;;  %v9972_v62 = vrot.slane %v7037_v12, 9  ;;  %v7023_v12 = vld [vmem:[#allocation2 + $0x1c4] sm:$0xf] }
 0x429   :  { %v7174_v56 = vrot.slane %v7039_v61, 5  ;;  %v7019_v61 = vld [vmem:[#allocation2 + $0x1ac] sm:$0xe] }
 0x42a   :  { %v7172_v16 = vsel %vm11583_vm4, %v9972_v62, %v7171_v14  ;;  %v9966_v27 = vrot.slane %v7019_v61, 9  ;;  %v7136_v62 = vrot.slane %v7023_v12, 5 }
 0x42b   :  { %v7175_v60 = vsel %vm11583_vm4, %v7173_v10, %v7174_v56  ;;  %v7194_v10 = vrot.slane %v7192_v24, 4  ;;  %v7195_v56 = vrot.slane %v7048_v30, 5  ;;  %v7028_v30 = vld [vmem:[#allocation2 + $0x1e8] sm:$0xe] }
 0x42c   :  { %v9989_v38 = vcombine.low %v7172_v16, %v7175_v60  ;;  %v7138_v8 = vrot.slane %v7136_v62, 4  ;;  %v7139_v16 = vrot.slane %v7024_v58, 5  ;;  %v7157_v58 = vrot.slane %v7032_v36, 5 }
 0x42f   :  { %10815 = vmatpush3.bf16.xpose.msra.mxu1 %v6935_v41  ;;  %v9973_v41 = vrot.slane %v7040_v51, 9  ;;  %v7196_v51 = vsel %vm11583_vm4, %v7194_v10, %v7195_v56  ;;  %v9969_v10 = vrot.slane %v7028_v30, 9  ;;  %v7598_v30 = vld [vmem:[#allocation2 + $0xbc] sm:$0xf] }
 0x430   :  { %11156 = vmatprep.subr.msk.bf16.mxu1 %vm4712_vm9, %v9960_v11  ;;  %v7117_v11 = vrot.slane %v7115_v59, 4 }
 0x432   :  { %v7119_v0 = vsel %vm11583_vm4, %v7117_v11, %v7118_v47  ;;  %v7022_v11 = vld [vmem:[#allocation2 + $0x1c0] sm:$0xe]  ;;  %v7049_v47 = vld [vmem:[#allocation2 + $0x274] sm:$0xe] }
 0x433   :  { %v9981_v63 = vcombine.low %v7116_v5, %v7119_v0  ;;  %v9967_v20 = vrot.slane %v7022_v11, 9  ;;  %v7143_v5 = vrot.slane %v7026_v49, 5  ;;  %v7031_v11 = vld [vmem:[#allocation2 + $0x1fc] sm:$0xe] }
 0x435   :  { %v7275_v33 = vsel %vm4712_vm9, %v9981_v63, 0 }
 0x437   :  { %10817 = vmatpush3.bf16.xpose.msra.mxu1 %v6938_v29  ;;  %v7125_v29 = vrot.slane %v7018_v35, 5  ;;  %v7140_v35 = vsel %vm11583_vm4, %v7138_v8, %v7139_v16  ;;  %v9970_v16 = vrot.slane %v7031_v11, 9  ;;  %v7575_v11 = vld [vmem:[#allocation2 + $0x20] sm:$0x3] }
 0x438   :  { %11157 = vmatprep.subr.msk.bf16.mxu1 %vm4712_vm9, %v9961_v53  ;;  %v7043_v53 = vld [vmem:[#allocation2 + $0x24c] sm:$0xe] }
 0x439   :  { %v9974_v25 = vrot.slane %v7043_v53, 9  ;;  %v7126_v50 = vsel %vm11583_vm4, %v7124_v45, %v7125_v29  ;;  %v7052_v45 = vld [vmem:[#allocation2 + $0x288] sm:$0xe]  ;;  %v7054_v29 = vld [vmem:[#allocation2 + $0x290] sm:$0x1] }
 0x43a   :  { %v9982_v14 = vcombine.low %v7123_v2, %v7126_v50  ;;  %v9977_v1 = vrot.slane %v7052_v45, 9  ;;  %v7209_v21 = vrot.slane %v7054_v29, 5  ;;  %v11360_v45 = vld [vmem:[#allocation2 + $0x50] sm:$0xff]  }
 0x43b   :  { %v7186_v34 = vsel %vm11583_vm4, %v9974_v25, %v7185_v37  ;;  %v7029_v25 = vld [vmem:[#allocation2 + $0x1ec] sm:$0xf]  ;;  %v7492_v29 = vsel %vm4712_vm9, %v11360_v45, 0  ;;  %v7578_v45 = vld [vmem:[#allocation2 + $0x34] sm:$0x3] }
 0x43c   :  { %v7278_v59 = vsel %vm4712_vm9, %v9982_v14, 0  ;;  %v7150_v2 = vrot.slane %v7029_v25, 5  ;;  %v7207_v24 = vsel %vm11583_vm4, %v9977_v1, %v7206_v54  ;;  %v11363_v25 = vld [vmem:[#allocation2 + $0x118] sm:$0xff]  }
 0x43d   :  { %v11364_v1 = vld [vmem:[#allocation2 + $0x78] sm:$0xff]  }
 0x43f   :  { %10819 = vmatpush3.bf16.xpose.msra.mxu1 %v6941_v18  ;;  %v7132_v18 = vrot.slane %v7021_v7, 5 }
 0x440   :  { %11158 = vmatprep.subr.msk.bf16.mxu1 %vm4712_vm9, %v9988_v19  ;;  %v9991_v19 = vcombine.low %v7186_v34, %v7189_v57  ;;  %v7030_v34 = vld [vmem:[#allocation2 + $0x1f0] sm:$0x1]  ;;  %v7144_v57 = vsel %vm11583_vm4, %v9968_v3, %v7143_v5  ;;  %v7595_v3 = vld [vmem:[#allocation2 + $0xa8] sm:$0xf] }
 0x441   :  { %v7133_v15 = vsel %vm11583_vm4, %v7131_v55, %v7132_v18  ;;  %v7055_v55 = vld [vmem:[#allocation2 + $0x29c] sm:$0xe]  ;;  %v7057_v18 = vld [vmem:[#allocation2 + $0x2a4] sm:$0x1]  ;;  %v7153_v12 = vrot.slane %v7030_v34, 5 }
 0x442   :  { %v9978_v56 = vrot.slane %v7055_v55, 9  ;;  %v7216_v52 = vrot.slane %v7057_v18, 5  ;;  %v11366_v55 = vld [vmem:[#allocation2 + $0x8c] sm:$0xff]  }
 0x446   :  { %10821 = vmatmul.mubr.msk.bf16.vlgmr.msra.gmra.mrb[0].mxu1 %vm4712_vm9, %v15635_v17  ;;  %v7179_v17 = vsel %vm11583_vm4, %v9973_v41, %v7178_v40  ;;  %v7130_v40 = vsel %vm11583_vm4, %v9966_v27, %v7129_v46  ;;  %v9992_v41 = vcombine.low %v7193_v9, %v7196_v51  ;;  %v7056_v46 = vld [vmem:[#allocation2 + $0x2a0] sm:$0xf]  ;;  %v7151_v9 = vsel %vm11583_vm4, %v9969_v10, %v7150_v2  ;;  %v7597_v10 = vld [vmem:[#allocation2 + $0xb8] sm:$0xc] }
 0x447   :  { %10823 = vmatpush3.bf16.xpose.msra.mxu1 %v7272_v44  ;;  %10838 = vmatprep.mubr.msk.bf16.mxu1 %vm4712_vm9, %v15765_v28  ;;  %v9990_v13 = vcombine.low %v7179_v17, %v7182_v6  ;;  %v9983_v60 = vcombine.low %v7130_v40, %v7133_v15  ;;  %v9976_v44 = vrot.slane %v7049_v47, 9  ;;  %v7027_v17 = vld [vmem:[#allocation2 + $0x1dc] sm:$0x1]  ;;  %v7137_v6 = vsel %vm11583_vm4, %v9967_v20, %v7136_v62  ;;  %v7033_v40 = vld [vmem:[#allocation2 + $0x204] sm:$0x1] }
 0x448   :  { %11159 = vmatprep.subr.msk.bf16.mxu1 %vm4712_vm9, %v9989_v38  ;;  %v7201_v38 = vrot.slane %v7199_v31, 4  ;;  %v9984_v53 = vcombine.low %v7137_v6, %v7140_v35  ;;  %v7146_v48 = vrot.slane %v7027_v17, 5  ;;  %v7213_v61 = vrot.slane %v7056_v46, 5  ;;  %v11353_v35 = vld [vmem:[#allocation2 + $0xb4] sm:$0xff]   ;;  %v11355_v6 = vld [vmem:[#allocation2 + $0xc8] sm:$0xff]  }
 0x449   :  { %v7281_v0 = vsel %vm4712_vm9, %v9983_v60, 0  ;;  %v7200_v37 = vsel %vm11583_vm4, %v9976_v44, %v7199_v31  ;;  %v7159_v47 = vrot.slane %v7157_v58, 4  ;;  %v7160_v43 = vrot.slane %v7033_v40, 5  ;;  %v7571_v46 = vld [vmem:[#allocation2 + $0x8] sm:$0xf] }
 0x44a   :  { %v7203_v63 = vsel %vm11583_vm4, %v7201_v38, %v7202_v22  ;;  %v7284_v50 = vsel %vm4712_vm9, %v9984_v53, 0  ;;  %v7214_v51 = vsel %vm11583_vm4, %v9978_v56, %v7213_v61  ;;  %v7158_v20 = vsel %vm11583_vm4, %v9970_v16, %v7157_v58  ;;  %v11351_v38 = vld [vmem:[#allocation2 + $0xa0] sm:$0xff]  }
 0x44b   :  { %v9993_v4 = vcombine.low %v7200_v37, %v7203_v63  ;;  %v7161_v49 = vsel %vm11583_vm4, %v7159_v47, %v7160_v43  ;;  %v7483_v17 = vsel %vm4712_vm9, %v11354_v26, 0  ;;  %v11356_v37 = vld [vmem:[#allocation2 + $0x28] sm:$0xff]   ;;  %v7599_v56 = vld [vmem:[#allocation2 + $0xc0] sm:$0x3]  ;;  %v10024_v58 = vrot.slane %v7597_v10, 10 }
 0x44c   :  { %v9987_v44 = vcombine.low %v7158_v20, %v7161_v49  ;;  %v7486_v63 = vsel %vm4712_vm9, %v11356_v37, 0  ;;  %v7734_v40 = vrot.slane %v7599_v56, 6  ;;  %v7601_v43 = vld [vmem:[#allocation2 + $0xd0] sm:$0xf]  ;;  %v15882_v37 = vld [vmem:[%s16174_s5 + $0x9] sm:$0x1] }
 0x44d   :  { %v7583_v56 = vld [vmem:[#allocation2 + $0x58] sm:$0xf] }
 0x44e   :  { %v7293_v22 = vsel %vm4712_vm9, %v9987_v44, 0 }
 0x44f   :  { %10825 = vmatpush3.bf16.xpose.msra.mxu1 %v7275_v33  ;;  %v7208_v33 = vrot.slane %v7206_v54, 4  ;;  %v11357_v54 = vld [vmem:[#allocation2 + $0xdc] sm:$0xff]  }
 0x450   :  { %11160 = vmatprep.subr.msk.bf16.mxu1 %vm4712_vm9, %v9990_v13  ;;  %v7145_v13 = vrot.slane %v7143_v5, 4  ;;  %v15845_v5 = vld [vmem:[%s16174_s5 + $0x8] sm:$0x1] }
 0x451   :  { %v7210_v14 = vsel %vm11583_vm4, %v7208_v33, %v7209_v21  ;;  %v7594_v33 = vld [vmem:[#allocation2 + $0xa4] sm:$0xc]  ;;  %v7596_v21 = vld [vmem:[#allocation2 + $0xac] sm:$0x3] }
 0x452   :  { %v7147_v7 = vsel %vm11583_vm4, %v7145_v13, %v7146_v48  ;;  %v9994_v27 = vcombine.low %v7207_v24, %v7210_v14  ;;  %v11361_v13 = vld [vmem:[#allocation2 + $0x104] sm:$0xff]   ;;  %v7727_v34 = vrot.slane %v7596_v21, 6  ;;  %v7572_v14 = vld [vmem:[#allocation2 + $0xc] sm:$0x3]  ;;  %v7603_v21 = vld [vmem:[#allocation2 + $0xe0] sm:$0xc] }
 0x453   :  { %v9985_v42 = vcombine.low %v7144_v57, %v7147_v7  ;;  %v11362_v48 = vld [vmem:[#allocation2 + $0x64] sm:$0xff]   ;;  %v7498_v7 = vsel %vm4712_vm9, %v11364_v1, 0 }
 0x454   :  { %v7570_v24 = vld [vmem:[#allocation2 + $0x4] sm:$0xc] }
 0x455   :  { %v7287_v15 = vsel %vm4712_vm9, %v9985_v42, 0  ;;  %v11365_v42 = vld [vmem:[#allocation2 + $0x12c] sm:$0xff]   ;;  %v10015_v18 = vrot.slane %v7570_v24, 10 }
 0x457   :  { %10827 = vmatpush3.bf16.xpose.msra.mxu1 %v7278_v59  ;;  %v7215_v59 = vrot.slane %v7213_v61, 4  ;;  %v7668_v61 = vrot.slane %v7571_v46, 6 }
 0x458   :  { %11161 = vmatprep.subr.msk.bf16.mxu1 %vm4712_vm9, %v9991_v19  ;;  %v7152_v19 = vrot.slane %v7150_v2, 4  ;;  %v10023_v2 = vrot.slane %v7594_v33, 10 }
 0x459   :  { %v7217_v31 = vsel %vm11583_vm4, %v7215_v59, %v7216_v52  ;;  %v7670_v36 = vrot.slane %v7668_v61, 4  ;;  %v7731_v59 = vrot.slane %v7598_v30, 6  ;;  %v7574_v52 = vld [vmem:[#allocation2 + $0x1c] sm:$0xf]  ;;  %v7581_v30 = vld [vmem:[#allocation2 + $0x48] sm:$0x3] }
 0x45a   :  { %v7154_v62 = vsel %vm11583_vm4, %v7152_v19, %v7153_v12  ;;  %v9995_v8 = vcombine.low %v7214_v51, %v7217_v31  ;;  %v7671_v19 = vrot.slane %v7572_v14, 6  ;;  %v7675_v47 = vrot.slane %v7574_v52, 6 }
 0x45b   :  { %v9986_v60 = vcombine.low %v7151_v9, %v7154_v62  ;;  %v7669_v9 = vsel %vm14609_vm15, %v10015_v18, %v7668_v61  ;;  %v7733_v31 = vrot.slane %v7731_v59, 4  ;;  %v7732_v49 = vsel %vm14609_vm15, %v10024_v58, %v7731_v59  ;;  %v7579_v61 = vld [vmem:[#allocation2 + $0x40] sm:$0xc] }
 0x45c   :  { %v7672_v51 = vsel %vm14609_vm15, %v7670_v36, %v7671_v19  ;;  %v7677_v44 = vrot.slane %v7675_v47, 4  ;;  %v10018_v18 = vrot.slane %v7579_v61, 10  ;;  %v7607_v19 = vld [vmem:[#allocation2 + $0xf8] sm:$0xf]  ;;  %v7692_v10 = vrot.slane %v7581_v30, 6 }
 0x45d   :  { %v7735_v20 = vsel %vm14609_vm15, %v7733_v31, %v7734_v40  ;;  %v7752_v59 = vrot.slane %v7607_v19, 6  ;;  %v7584_v31 = vld [vmem:[#allocation2 + $0x5c] sm:$0x3] }
 0x45e   :  { %v10041_v26 = vcombine.low %v7732_v49, %v7735_v20  ;;  %v7699_v49 = vrot.slane %v7584_v31, 6  ;;  %v7586_v20 = vld [vmem:[#allocation2 + $0x6c] sm:$0xf]  ;;  %v7591_v31 = vld [vmem:[#allocation2 + $0x90] sm:$0xc] }
 0x45f   :  { %10829 = vmatpush3.bf16.xpose.msra.mxu1 %v7281_v0  ;;  %v11352_v0 = vld [vmem:[#allocation2] sm:$0xff]  }
 0x460   :  { %11162 = vmatprep.subr.msk.bf16.mxu1 %vm4712_vm9, %v9992_v41  ;;  %v7290_v41 = vsel %vm4712_vm9, %v9986_v60, 0  ;;  %v7480_v32 = vsel %vm4712_vm9, %v11352_v0, 0  ;;  %v7573_v60 = vld [vmem:[#allocation2 + $0x18] sm:$0xc]  ;;  %v7577_v0 = vld [vmem:[#allocation2 + $0x30] sm:$0xf] }
 0x461   :  { %v10016_v16 = vrot.slane %v7573_v60, 10  ;;  %v7754_v60 = vrot.slane %v7752_v59, 4 }
 0x467   :  { %10831 = vmatpush3.bf16.xpose.msra.mxu1 %v7284_v50  ;;  %v7724_v50 = vrot.slane %v7595_v3, 6 }
 0x468   :  { %11163 = vmatprep.subr.msk.bf16.mxu1 %vm4712_vm9, %v9993_v4  ;;  %v7495_v4 = vsel %vm4712_vm9, %v11362_v48, 0 }
 0x469   :  { %v7726_v57 = vrot.slane %v7724_v50, 4  ;;  %v7725_v12 = vsel %vm14609_vm15, %v10023_v2, %v7724_v50  ;;  %v7580_v50 = vld [vmem:[#allocation2 + $0x44] sm:$0xf] }
 0x46f   :  { %10833 = vmatpush3.bf16.xpose.msra.mxu1 %v7287_v15  ;;  %v7501_v15 = vsel %vm4712_vm9, %v11366_v55, 0 }
 0x470   :  { %11164 = vmatprep.subr.msk.bf16.mxu1 %vm4712_vm9, %v9994_v27  ;;  %v7728_v27 = vsel %vm14609_vm15, %v7726_v57, %v7727_v34  ;;  %v10026_v57 = vrot.slane %v7603_v21, 10 }
 0x471   :  { %v10040_v62 = vcombine.low %v7725_v12, %v7728_v27 }
 0x477   :  { %10835 = vmatpush3.bf16.xpose.msra.mxu1 %v7290_v41  ;;  %v7678_v41 = vrot.slane %v7575_v11, 6 }
 0x478   :  { %11165 = vmatprep.subr.msk.bf16.mxu1 %vm4712_vm9, %v9995_v8  ;;  %v10032_v8 = vcombine.low %v7669_v9, %v7672_v51  ;;  %v7696_v9 = vrot.slane %v7583_v56, 6  ;;  %v7582_v51 = vld [vmem:[#allocation2 + $0x54] sm:$0xc] }
 0x47f   :  { %10837 = vmatpush3.bf16.xpose.msra.mxu1 %v7293_v22  ;;  %v7738_v22 = vrot.slane %v7601_v43, 6  ;;  %v7606_v43 = vld [vmem:[#allocation2 + $0xf4] sm:$0xc] }
 0x480   :  { %11166 = vmatprep.subr.msk.bf16.mxu1 %vm4712_vm9, %v11351_v38  ;;  %v7600_v38 = vld [vmem:[#allocation2 + $0xcc] sm:$0xc] }
 0x486   :  { %10839 = vmatmul.mubr.msk.bf16.vlgmr.msra.gmra.mrb[0].mxu1 %vm4712_vm9, %v15765_v28  ;;  %v11358_v28 = vld [vmem:[#allocation2 + $0x3c] sm:$0xff]  }
 0x487   :  { %10841 = vmatpush3.bf16.xpose.msra.mxu1 %v7480_v32  ;;  %10856 = vmatprep.mubr.msk.bf16.mxu1 %vm4712_vm9, %v15845_v5  ;;  %v7489_v53 = vsel %vm4712_vm9, %v11358_v28, 0  ;;  %v7602_v32 = vld [vmem:[#allocation2 + $0xd4] sm:$0x3]  ;;  %v7740_v28 = vrot.slane %v7738_v22, 4 }
 0x488   :  { %11167 = vmatprep.subr.msk.bf16.mxu1 %vm4712_vm9, %v11353_v35  ;;  %v7832_v35 = vsel %vm4712_vm9, %v10032_v8, 0  ;;  %v7610_v8 = vld [vmem:[#allocation2 + $0x10c] sm:$0xf] }
 0x48f   :  { %10843 = vmatpush3.bf16.xpose.msra.mxu1 %v7483_v17  ;;  %v10025_v17 = vrot.slane %v7600_v38, 10 }
 0x490   :  { %11168 = vmatprep.subr.msk.bf16.mxu1 %vm4712_vm9, %v11355_v6  ;;  %v7682_v6 = vrot.slane %v7577_v0, 6 }
 0x491   :  { %v7739_v3 = vsel %vm14609_vm15, %v10025_v17, %v7738_v22  ;;  %v7759_v22 = vrot.slane %v7610_v8, 6  ;;  %v7615_v8 = vld [vmem:[#allocation2 + $0x130] sm:$0xc] }
 0x497   :  { %10845 = vmatpush3.bf16.xpose.msra.mxu1 %v7486_v63  ;;  %v7676_v63 = vsel %vm14609_vm15, %v10016_v16, %v7675_v47  ;;  %v10019_v16 = vrot.slane %v7582_v51, 10 }
 0x498   :  { %11169 = vmatprep.subr.msk.bf16.mxu1 %vm4712_vm9, %v11357_v54  ;;  %v7679_v54 = vsel %vm14609_vm15, %v7677_v44, %v7678_v41  ;;  %v7698_v41 = vrot.slane %v7696_v9, 4  ;;  %v10027_v44 = vrot.slane %v7606_v43, 10 }
 0x49a   :  { %v7700_v17 = vsel %vm14609_vm15, %v7698_v41, %v7699_v49 }
 0x49f   :  { %10847 = vmatpush3.bf16.xpose.msra.mxu1 %v7489_v53  ;;  %v7741_v53 = vrot.slane %v7602_v32, 6  ;;  %v7611_v32 = vld [vmem:[#allocation2 + $0x110] sm:$0x3] }
 0x4a0   :  { %11170 = vmatprep.subr.msk.bf16.mxu1 %vm4712_vm9, %v11359_v39  ;;  %v7576_v39 = vld [vmem:[#allocation2 + $0x2c] sm:$0xc] }
 0x4a1   :  { %v10017_v48 = vrot.slane %v7576_v39, 10  ;;  %v7742_v1 = vsel %vm14609_vm15, %v7740_v28, %v7741_v53  ;;  %v7587_v28 = vld [vmem:[#allocation2 + $0x70] sm:$0x3]  ;;  %v7761_v53 = vrot.slane %v7759_v22, 4  ;;  %v7762_v39 = vrot.slane %v7611_v32, 6 }
 0x4a3   :  { %v7683_v2 = vsel %vm14609_vm15, %v10017_v48, %v7682_v6 }
 0x4a7   :  { %10849 = vmatpush3.bf16.xpose.msra.mxu1 %v7492_v29  ;;  %v7604_v29 = vld [vmem:[#allocation2 + $0xe4] sm:$0xf] }
 0x4a8   :  { %11171 = vmatprep.subr.msk.bf16.mxu1 %vm4712_vm9, %v11361_v13  ;;  %v10033_v13 = vcombine.low %v7676_v63, %v7679_v54  ;;  %v7745_v33 = vrot.slane %v7604_v29, 6  ;;  %v7585_v54 = vld [vmem:[#allocation2 + $0x68] sm:$0xc] }
 0x4a9   :  { %v7609_v29 = vld [vmem:[#allocation2 + $0x108] sm:$0xc]  ;;  %v10020_v48 = vrot.slane %v7585_v54, 10 }
 0x4aa   :  { %v7835_v46 = vsel %vm4712_vm9, %v10033_v13, 0  ;;  %v7747_v24 = vrot.slane %v7745_v33, 4  ;;  %v7746_v12 = vsel %vm14609_vm15, %v10026_v57, %v7745_v33  ;;  %v7613_v13 = vld [vmem:[#allocation2 + $0x120] sm:$0xf]  ;;  %v7763_v33 = vsel %vm14609_vm15, %v7761_v53, %v7762_v39  ;;  %v10049_v53 = vld [vmem:[%s16174_s5 + $0xa] sm:$0x1] }
 0x4ab   :  { %v7766_v21 = vrot.slane %v7613_v13, 6  ;;  %v11370_v39 = vld [vmem:[#allocation2 + $0x20] sm:$0xff]   ;;  %v11372_v13 = vld [vmem:[#allocation2 + $0x34] sm:$0xff]  }
 0x4ad   :  { %v7768_v61 = vrot.slane %v7766_v21, 4 }
 0x4af   :  { %10851 = vmatpush3.bf16.xpose.msra.mxu1 %v7495_v4  ;;  %v7684_v4 = vrot.slane %v7682_v6, 4  ;;  %v7703_v6 = vrot.slane %v7586_v20, 6  ;;  %v10030_v20 = vrot.slane %v7615_v8, 10  ;;  %v8346_v8 = vld [vmem:[#allocation2 + $0x1a0] sm:$0xf] }
 0x4b0   :  { %11172 = vmatprep.subr.msk.bf16.mxu1 %vm4712_vm9, %v11363_v25  ;;  %v7685_v25 = vrot.slane %v7578_v45, 6 }
 0x4b2   :  { %v7686_v34 = vsel %vm14609_vm15, %v7684_v4, %v7685_v25  ;;  %v7705_v4 = vrot.slane %v7703_v6, 4  ;;  %v7706_v25 = vrot.slane %v7587_v28, 6  ;;  %v11369_v28 = vld [vmem:[#allocation2 + $0xc0] sm:$0xff]  }
 0x4b3   :  { %v10034_v55 = vcombine.low %v7683_v2, %v7686_v34 }
 0x4b4   :  { %v7707_v2 = vsel %vm14609_vm15, %v7705_v4, %v7706_v25  ;;  %v11373_v4 = vld [vmem:[#allocation2 + $0xe8] sm:$0xff]  }
 0x4b5   :  { %v7838_v52 = vsel %vm4712_vm9, %v10034_v55, 0  ;;  %v7612_v55 = vld [vmem:[#allocation2 + $0x11c] sm:$0xc] }
 0x4b7   :  { %10853 = vmatpush3.bf16.xpose.msra.mxu1 %v7498_v7  ;;  %v10042_v7 = vcombine.low %v7739_v3, %v7742_v1  ;;  %v7589_v3 = vld [vmem:[#allocation2 + $0x80] sm:$0xf]  ;;  %v10028_v1 = vrot.slane %v7609_v29, 10  ;;  %v11371_v29 = vld [vmem:[#allocation2 + $0xd4] sm:$0xff]  }
 0x4b8   :  { %11173 = vmatprep.subr.msk.bf16.mxu1 %vm4712_vm9, %v11365_v42  ;;  %v7689_v42 = vrot.slane %v7580_v50, 6  ;;  %v7614_v50 = vld [vmem:[#allocation2 + $0x124] sm:$0x3]  ;;  %v7710_v34 = vrot.slane %v7589_v3, 6  ;;  %v11375_v3 = vld [vmem:[#allocation2 + $0xfc] sm:$0xff]  }
 0x4ba   :  { %v7691_v36 = vrot.slane %v7689_v42, 4  ;;  %v7690_v58 = vsel %vm14609_vm15, %v10018_v18, %v7689_v42  ;;  %v7769_v42 = vrot.slane %v7614_v50, 6  ;;  %v7616_v18 = vld [vmem:[#allocation2 + $0x134] sm:$0xf] }
 0x4bc   :  { %v7693_v40 = vsel %vm14609_vm15, %v7691_v36, %v7692_v10  ;;  %v7592_v36 = vld [vmem:[#allocation2 + $0x94] sm:$0xf]  ;;  %v10029_v10 = vrot.slane %v7612_v55, 10  ;;  %v7770_v56 = vsel %vm14609_vm15, %v7768_v61, %v7769_v42  ;;  %v9809_v61 = vld [vmem:[%s16174_s5 + $0x2] sm:$0x1] }
 0x4bd   :  { %v10035_v47 = vcombine.low %v7690_v58, %v7693_v40  ;;  %10748 = vmatprep.mubr.msk.bf16.mxu0 %vm4712_vm9, %v9809_v61  ;;  %v11384_v42 = vld [vmem:[#allocation2 + $0xf0] sm:$0xff]  }
 0x4be   :  { %10749 = vmatmul.mubr.msk.bf16.vlgmr.msra.gmra.mrb[32].mxu0 %vm4712_vm9, %v9809_v61  ;;  %v8248_v55 = vsel %vm4712_vm9, %v11384_v42, 0  ;;  %v8343_v42 = vld [vmem:[#allocation2 + $0x164] sm:$0xf] }
 0x4bf   :  { %10855 = vmatpush3.bf16.xpose.msra.mxu1 %v7501_v15  ;;  %v7841_v0 = vsel %vm4712_vm9, %v10035_v47, 0 }
 0x4c0   :  { %11174 = vmatprep.subr.msk.bf16.mxu1 %vm4712_vm9, %v10040_v62  ;;  %v7608_v62 = vld [vmem:[#allocation2 + $0xfc] sm:$0x3] }
 0x4c1   :  { %v7755_v11 = vrot.slane %v7608_v62, 6  ;;  %v7767_v62 = vsel %vm14609_vm15, %v10029_v10, %v7766_v21  ;;  %v11377_v21 = vld [vmem:[#allocation2 + $0x110] sm:$0xff]  }
 0x4c2   :  { %v10046_v51 = vcombine.low %v7767_v62, %v7770_v56  ;;  %v11389_v56 = vld [vmem:[#allocation2 + $0x1cc] sm:$0xff]   ;;  %v11392_v62 = vld [vmem:[#allocation2 + $0x140] sm:$0xff]  }
 0x4c3   :  { %v7756_v38 = vsel %vm14609_vm15, %v7754_v60, %v7755_v11  ;;  %v7593_v60 = vld [vmem:[#allocation2 + $0x98] sm:$0x3] }
 0x4c4   :  { %v7720_v49 = vrot.slane %v7593_v60, 6  ;;  %v11396_v60 = vld [vmem:[#allocation2 + $0x168] sm:$0xff]  }
 0x4c6   :  { %10857 = vmatmul.mubr.msk.bf16.vlgmr.msra.gmra.mrb[0].mxu1 %vm4712_vm9, %v15845_v5  ;;  %v7605_v5 = vld [vmem:[#allocation2 + $0xe8] sm:$0x3] }
 0x4c7   :  { %10859 = vmatpush3.bf16.xpose.msra.mxu1 %v7832_v35  ;;  %10874 = vmatprep.mubr.msk.bf16.mxu1 %vm4712_vm9, %v15882_v37  ;;  %v7748_v14 = vrot.slane %v7605_v5, 6  ;;  %v7753_v35 = vsel %vm14609_vm15, %v10027_v44, %v7752_v59  ;;  %v7773_v59 = vrot.slane %v7616_v18, 6  ;;  %v11385_v18 = vld [vmem:[#allocation2 + $0x1a4] sm:$0xff]  }
 0x4c8   :  { %11175 = vmatprep.subr.msk.bf16.mxu1 %vm4712_vm9, %v10041_v26  ;;  %v7697_v26 = vsel %vm14609_vm15, %v10019_v16, %v7696_v9  ;;  %v10044_v63 = vcombine.low %v7753_v35, %v7756_v38  ;;  %v7717_v9 = vrot.slane %v7592_v36, 6  ;;  %v10022_v16 = vrot.slane %v7591_v31, 10  ;;  %v11388_v36 = vld [vmem:[#allocation2 + $0x118] sm:$0xff]   ;;  %v11395_v31 = vld [vmem:[#allocation2 + $0x208] sm:$0xff]  }
 0x4c9   :  { %v7749_v27 = vsel %vm14609_vm15, %v7747_v24, %v7748_v14  ;;  %v10036_v45 = vcombine.low %v7697_v26, %v7700_v17  ;;  %v7588_v24 = vld [vmem:[#allocation2 + $0x7c] sm:$0xc]  ;;  %v7590_v14 = vld [vmem:[#allocation2 + $0x84] sm:$0x3]  ;;  %v7775_v11 = vrot.slane %v7773_v59, 4  ;;  %v8254_v10 = vsel %vm4712_vm9, %v11388_v36, 0 }
 0x4ca   :  { %v10043_v15 = vcombine.low %v7746_v12, %v7749_v27  ;;  %v10021_v19 = vrot.slane %v7588_v24, 10  ;;  %v7712_v12 = vrot.slane %v7710_v34, 4  ;;  %v7713_v27 = vrot.slane %v7590_v14, 6  ;;  %v11383_v14 = vld [vmem:[#allocation2 + $0x190] sm:$0xff]   ;;  %v8344_v36 = vld [vmem:[#allocation2 + $0x178] sm:$0xf] }
 0x4cb   :  { %v7844_v5 = vsel %vm4712_vm9, %v10036_v45, 0  ;;  %v7719_v41 = vrot.slane %v7717_v9, 4  ;;  %v8043_v45 = vsel %vm4712_vm9, %v11370_v39, 0 }
 0x4cc   :  { %v7711_v58 = vsel %vm14609_vm15, %v10021_v19, %v7710_v34  ;;  %v7714_v40 = vsel %vm14609_vm15, %v7712_v12, %v7713_v27  ;;  %v11381_v34 = vld [vmem:[#allocation2 + $0x138] sm:$0xff]   ;;  %v11386_v19 = vld [vmem:[#allocation2 + $0x104] sm:$0xff]  }
 0x4cd   :  { %v10038_v43 = vcombine.low %v7711_v58, %v7714_v40  ;;  %v7721_v32 = vsel %vm14609_vm15, %v7719_v41, %v7720_v49  ;;  %v8251_v12 = vsel %vm4712_vm9, %v11386_v19, 0  ;;  %v11387_v27 = vld [vmem:[#allocation2 + $0x1b8] sm:$0xff]   ;;  %v8260_v58 = vsel %vm4712_vm9, %v11392_v62, 0 }
 0x4ce   :  { %v11393_v40 = vld [vmem:[#allocation2 + $0x1f4] sm:$0xff]   ;;  %v11475_v41 = vld [vmem:[#allocation2 + $0x19c] sm:$0xf] }
 0x4cf   :  { %10861 = vmatpush3.bf16.xpose.msra.mxu1 %v7835_v46  ;;  %v7760_v46 = vsel %vm14609_vm15, %v10028_v1, %v7759_v22  ;;  %v7850_v38 = vsel %vm4712_vm9, %v10038_v43, 0  ;;  %v7774_v22 = vsel %vm14609_vm15, %v10030_v20, %v7773_v59  ;;  %v11376_v1 = vld [vmem:[#allocation2 + $0x5c] sm:$0xff]   ;;  %v11390_v59 = vld [vmem:[#allocation2 + $0x12c] sm:$0xff]   ;;  %v10094_v49 = vcombine.low %v11475_v41, %v8346_v8  ;;  %v11418_v8 = vld [vmem:[#allocation2 + $0x1f4] sm:$0xff]  }
 0x4d0   :  { %11176 = vmatprep.subr.msk.bf16.mxu1 %vm4712_vm9, %v10042_v7  ;;  %v7704_v7 = vsel %vm14609_vm15, %v10020_v48, %v7703_v6  ;;  %v10045_v57 = vcombine.low %v7760_v46, %v7763_v33  ;;  %v11367_v6 = vld [vmem:[#allocation2 + $0xac] sm:$0xff]   ;;  %v8046_v48 = vsel %vm4712_vm9, %v11372_v13, 0  ;;  %v8052_v33 = vsel %vm4712_vm9, %v11376_v1, 0  ;;  %v11379_v46 = vld [vmem:[#allocation2 + $0x124] sm:$0xff]   ;;  %v11398_v43 = vld [vmem:[#allocation2 + $0x17c] sm:$0xff]  }
 0x4d1   :  { %v10037_v30 = vcombine.low %v7704_v7, %v7707_v2  ;;  %v11380_v7 = vld [vmem:[#allocation2 + $0x84] sm:$0xff]   ;;  %v8338_v20 = vld [vmem:[#allocation2 + $0x100] sm:$0xf]  ;;  %v11482_v1 = vld [vmem:[#allocation2 + $0x138] sm:$0xf]  ;;  %v8636_v41 = vsel %vm4712_vm9, %v11418_v8, 0 }
 0x4d2   :  { %v8058_v2 = vsel %vm4712_vm9, %v11380_v7, 0  ;;  %v8342_v7 = vld [vmem:[#allocation2 + $0x150] sm:$0xf] }
 0x4d7   :  { %10863 = vmatpush3.bf16.xpose.msra.mxu1 %v7838_v52  ;;  %v7847_v52 = vsel %vm4712_vm9, %v10037_v30, 0  ;;  %v10067_v30 = vld [vmem:[%s16174_s5 + $0xb] sm:$0x1] }
 0x4d8   :  { %11177 = vmatprep.subr.msk.bf16.mxu1 %vm4712_vm9, %v10043_v15  ;;  %v7617_v15 = vld [vmem:[#allocation2 + $0x138] sm:$0x3] }
 0x4d9   :  { %v7776_v47 = vrot.slane %v7617_v15, 6  ;;  %v11391_v15 = vld [vmem:[#allocation2 + $0x1e0] sm:$0xff]  }
 0x4db   :  { %v7777_v44 = vsel %vm14609_vm15, %v7775_v11, %v7776_v47  ;;  %v8266_v11 = vsel %vm4712_vm9, %v11396_v60, 0  ;;  %v11397_v47 = vld [vmem:[#allocation2 + $0x21c] sm:$0xff]  }
 0x4dc   :  { %v10047_v35 = vcombine.low %v7774_v22, %v7777_v44  ;;  %v11476_v44 = vld [vmem:[#allocation2 + $0xfc] sm:$0xf]  ;;  %v8347_v22 = vld [vmem:[#allocation2 + $0x1b4] sm:$0xf]  ;;  %v11416_v60 = vld [vmem:[#allocation2 + $0x1e0] sm:$0xff]  }
 0x4df   :  { %10865 = vmatpush3.bf16.xpose.msra.mxu1 %v7841_v0  ;;  %v7718_v0 = vsel %vm14609_vm15, %v10022_v16, %v7717_v9  ;;  %v11394_v9 = vld [vmem:[#allocation2 + $0x154] sm:$0xff]   ;;  %v8269_v16 = vsel %vm4712_vm9, %v11398_v43, 0  ;;  %v8633_v43 = vsel %vm4712_vm9, %v11416_v60, 0 }
 0x4e0   :  { %11178 = vmatprep.subr.msk.bf16.mxu1 %vm4712_vm9, %v10044_v63  ;;  %v10039_v26 = vcombine.low %v7718_v0, %v7721_v32  ;;  %v11368_v63 = vld [vmem:[#allocation2 + $0xc] sm:$0xff]   ;;  %v8726_v60 = vld [vmem:[#allocation2 + $0x1f8] sm:$0xc] }
 0x4e1   :  { %v8040_v54 = vsel %vm4712_vm9, %v11368_v63, 0  ;;  %v16006_v0 = vld [vmem:[%s16174_s5 + $0xc] sm:$0x1] }
 0x4e2   :  { %v7853_v17 = vsel %vm4712_vm9, %v10039_v26, 0 }
 0x4e7   :  { %10867 = vmatpush3.bf16.xpose.msra.mxu1 %v7844_v5  ;;  %v11378_v5 = vld [vmem:[#allocation2 + $0x70] sm:$0xff]  }
 0x4e8   :  { %11179 = vmatprep.subr.msk.bf16.mxu1 %vm4712_vm9, %v10045_v57  ;;  %v8055_v50 = vsel %vm4712_vm9, %v11378_v5, 0  ;;  %v11382_v57 = vld [vmem:[#allocation2 + $0x98] sm:$0xff]  }
 0x4e9   :  { %v8061_v24 = vsel %vm4712_vm9, %v11382_v57, 0  ;;  %v8351_v57 = vld [vmem:[#allocation2 + $0x204] sm:$0xf] }
 0x4ef   :  { %10869 = vmatpush3.bf16.xpose.msra.mxu1 %v7847_v52  ;;  %v8257_v52 = vsel %vm4712_vm9, %v11390_v59, 0  ;;  %v8353_v59 = vld [vmem:[#allocation2 + $0x22c] sm:$0xf] }
 0x4f0   :  { %11180 = vmatprep.subr.msk.bf16.mxu1 %vm4712_vm9, %v10046_v51  ;;  %v8263_v51 = vsel %vm4712_vm9, %v11394_v9, 0 }
 0x4f7   :  { %10871 = vmatpush3.bf16.xpose.msra.mxu1 %v7850_v38  ;;  %v10086_v38 = vcombine.low %v11476_v44, %v8338_v20  ;;  %v11421_v20 = vld [vmem:[#allocation2 + $0x2bc] sm:$0xff]  }
 0x4f8   :  { %11181 = vmatprep.subr.msk.bf16.mxu1 %vm4712_vm9, %v10047_v35  ;;  %v11477_v35 = vld [vmem:[#allocation2 + $0x1b0] sm:$0xf] }
 0x4f9   :  { %v8424_v32 = vsel %vm4712_vm9, %v10086_v38, 0  ;;  %v10095_v26 = vcombine.low %v11477_v35, %v8347_v22  ;;  %v11422_v38 = vld [vmem:[#allocation2 + $0x21c] sm:$0xff]   ;;  %v11423_v22 = vld [vmem:[#allocation2 + $0x2d0] sm:$0xff]  }
 0x4ff   :  { %10873 = vmatpush3.bf16.xpose.msra.mxu1 %v7853_v17  ;;  %v8339_v17 = vld [vmem:[#allocation2 + $0x114] sm:$0xf] }
 0x500   :  { %11182 = vmatprep.subr.msk.bf16.mxu1 %vm4712_vm9, %v11367_v6  ;;  %v11478_v6 = vld [vmem:[#allocation2 + $0x110] sm:$0xf] }
 0x501   :  { %v10087_v63 = vcombine.low %v11478_v6, %v8339_v17  ;;  %v11426_v17 = vld [vmem:[#allocation2 + $0x244] sm:$0xff]  }
 0x502   :  { %v8648_v6 = vsel %vm4712_vm9, %v11426_v17, 0 }
 0x506   :  { %10875 = vmatmul.mubr.msk.bf16.vlgmr.msra.gmra.mrb[0].mxu1 %vm4712_vm9, %v15882_v37  ;;  %v11374_v37 = vld [vmem:[#allocation2 + $0x48] sm:$0xff]  }
 0x507   :  { %10877 = vmatpush3.bf16.xpose.msra.mxu1 %v8040_v54  ;;  %10892 = vmatprep.mubr.msk.bf16.mxu1 %vm4712_vm9, %v10049_v53  ;;  %v8049_v25 = vsel %vm4712_vm9, %v11374_v37, 0  ;;  %v8348_v54 = vld [vmem:[#allocation2 + $0x1c8] sm:$0xf]  ;;  %v11481_v37 = vld [vmem:[#allocation2 + $0x1d8] sm:$0xf] }
 0x508   :  { %11183 = vmatprep.subr.msk.bf16.mxu1 %vm4712_vm9, %v11369_v28  ;;  %v8427_v28 = vsel %vm4712_vm9, %v10087_v63, 0  ;;  %v11427_v63 = vld [vmem:[#allocation2 + $0x2f8] sm:$0xff]  }
 0x50f   :  { %10879 = vmatpush3.bf16.xpose.msra.mxu1 %v8043_v45  ;;  %v8340_v45 = vld [vmem:[#allocation2 + $0x128] sm:$0xf] }
 0x510   :  { %11184 = vmatprep.subr.msk.bf16.mxu1 %vm4712_vm9, %v11371_v29  ;;  %v11480_v29 = vld [vmem:[#allocation2 + $0x124] sm:$0xf] }
 0x511   :  { %v10088_v13 = vcombine.low %v11480_v29, %v8340_v45  ;;  %v8749_v45 = vld [vmem:[#allocation2 + $0x28c] sm:$0x3] }
 0x517   :  { %10881 = vmatpush3.bf16.xpose.msra.mxu1 %v8046_v48  ;;  %v8349_v48 = vld [vmem:[#allocation2 + $0x1dc] sm:$0xf] }
 0x518   :  { %11185 = vmatprep.subr.msk.bf16.mxu1 %vm4712_vm9, %v11373_v4  ;;  %v8430_v4 = vsel %vm4712_vm9, %v10088_v13, 0  ;;  %v11429_v13 = vld [vmem:[#allocation2 + $0x30c] sm:$0xff]  }
 0x51f   :  { %10883 = vmatpush3.bf16.xpose.msra.mxu1 %v8049_v25  ;;  %v10097_v25 = vcombine.low %v11481_v37, %v8349_v48  ;;  %v8724_v48 = vld [vmem:[#allocation2 + $0x1e8] sm:$0xf] }
 0x520   :  { %11186 = vmatprep.subr.msk.bf16.mxu1 %vm4712_vm9, %v11375_v3  ;;  %v8341_v3 = vld [vmem:[#allocation2 + $0x13c] sm:$0xf] }
 0x527   :  { %10885 = vmatpush3.bf16.xpose.msra.mxu1 %v8052_v33  ;;  %v10089_v33 = vcombine.low %v11482_v1, %v8341_v3  ;;  %v8751_v3 = vld [vmem:[#allocation2 + $0x29c] sm:$0xf]  ;;  %v8821_v1 = vrot.slane %v8724_v48, 6 }
 0x528   :  { %11187 = vmatprep.subr.msk.bf16.mxu1 %vm4712_vm9, %v11377_v21  ;;  %v8350_v21 = vld [vmem:[#allocation2 + $0x1f0] sm:$0xf] }
 0x529   :  { %v8433_v5 = vsel %vm4712_vm9, %v10089_v33, 0  ;;  %v11430_v33 = vld [vmem:[#allocation2 + $0x26c] sm:$0xff]  }
 0x52f   :  { %10887 = vmatpush3.bf16.xpose.msra.mxu1 %v8055_v50  ;;  %v11483_v50 = vld [vmem:[#allocation2 + $0x1ec] sm:$0xf] }
 0x530   :  { %11188 = vmatprep.subr.msk.bf16.mxu1 %vm4712_vm9, %v11379_v46  ;;  %v10098_v46 = vcombine.low %v11483_v50, %v8350_v21  ;;  %v8725_v21 = vld [vmem:[#allocation2 + $0x1ec] sm:$0x3] }
 0x537   :  { %10889 = vmatpush3.bf16.xpose.msra.mxu1 %v8058_v2  ;;  %v11484_v2 = vld [vmem:[#allocation2 + $0x14c] sm:$0xf] }
 0x538   :  { %11189 = vmatprep.subr.msk.bf16.mxu1 %vm4712_vm9, %v11381_v34  ;;  %v10090_v34 = vcombine.low %v11484_v2, %v8342_v7  ;;  %v8750_v7 = vld [vmem:[#allocation2 + $0x298] sm:$0xc]  ;;  %v8752_v2 = vld [vmem:[#allocation2 + $0x2a0] sm:$0x3] }
 0x53f   :  { %10891 = vmatpush3.bf16.xpose.msra.mxu1 %v8061_v24  ;;  %v8436_v24 = vsel %vm4712_vm9, %v10090_v34, 0  ;;  %v8823_v34 = vrot.slane %v8821_v1, 4 }
 0x540   :  { %11190 = vmatprep.subr.msk.bf16.mxu1 %vm4712_vm9, %v11383_v14  ;;  %v11485_v14 = vld [vmem:[#allocation2 + $0x200] sm:$0xf] }
 0x541   :  { %v10099_v61 = vcombine.low %v11485_v14, %v8351_v57  ;;  %v8824_v57 = vrot.slane %v8725_v21, 6 }
 0x546   :  { %10893 = vmatmul.mubr.msk.bf16.vlgmr.msra.gmra.mrb[0].mxu1 %vm4712_vm9, %v10049_v53  ;;  %v11479_v53 = vld [vmem:[#allocation2 + $0x1c4] sm:$0xf] }
 0x547   :  { %10895 = vmatpush3.bf16.xpose.msra.mxu1 %v8248_v55  ;;  %10910 = vmatprep.mubr.msk.bf16.mxu1 %vm4712_vm9, %v10067_v30  ;;  %v10096_v39 = vcombine.low %v11479_v53, %v8348_v54  ;;  %v8748_v54 = vld [vmem:[#allocation2 + $0x288] sm:$0xf] }
 0x548   :  { %11191 = vmatprep.subr.msk.bf16.mxu1 %vm4712_vm9, %v11385_v18  ;;  %v8352_v18 = vld [vmem:[#allocation2 + $0x218] sm:$0xf]  ;;  %v8877_v53 = vrot.slane %v8748_v54, 6 }
 0x54a   :  { %v8879_v37 = vrot.slane %v8877_v53, 4 }
 0x54f   :  { %10897 = vmatpush3.bf16.xpose.msra.mxu1 %v8251_v12  ;;  %v11487_v12 = vld [vmem:[#allocation2 + $0x214] sm:$0xf] }
 0x550   :  { %11192 = vmatprep.subr.msk.bf16.mxu1 %vm4712_vm9, %v11387_v27  ;;  %v10100_v27 = vcombine.low %v11487_v12, %v8352_v18  ;;  %v8887_v18 = vrot.slane %v8752_v2, 6 }
 0x557   :  { %10899 = vmatpush3.bf16.xpose.msra.mxu1 %v8254_v10  ;;  %v11488_v10 = vld [vmem:[#allocation2 + $0x174] sm:$0xf] }
 0x558   :  { %11193 = vmatprep.subr.msk.bf16.mxu1 %vm4712_vm9, %v11389_v56  ;;  %v10092_v56 = vcombine.low %v11488_v10, %v8344_v36  ;;  %v8728_v10 = vld [vmem:[#allocation2 + $0x200] sm:$0x3] }
 0x55f   :  { %10901 = vmatpush3.bf16.xpose.msra.mxu1 %v8257_v52  ;;  %v8442_v52 = vsel %vm4712_vm9, %v10092_v56, 0 }
 0x560   :  { %11194 = vmatprep.subr.msk.bf16.mxu1 %vm4712_vm9, %v11391_v15  ;;  %v11489_v15 = vld [vmem:[#allocation2 + $0x228] sm:$0xf] }
 0x561   :  { %v10101_v62 = vcombine.low %v11489_v15, %v8353_v59 }
 0x567   :  { %10903 = vmatpush3.bf16.xpose.msra.mxu1 %v8260_v58  ;;  %v8345_v58 = vld [vmem:[#allocation2 + $0x18c] sm:$0xf] }
 0x568   :  { %11195 = vmatprep.subr.msk.bf16.mxu1 %vm4712_vm9, %v11393_v40  ;;  %v11490_v40 = vld [vmem:[#allocation2 + $0x188] sm:$0xf] }
 0x569   :  { %v10093_v9 = vcombine.low %v11490_v40, %v8345_v58  ;;  %v8753_v58 = vld [vmem:[#allocation2 + $0x2ac] sm:$0xc]  ;;  %v8755_v40 = vld [vmem:[#allocation2 + $0x2b4] sm:$0x3] }
 0x56a   :  { %v10131_v8 = vrot.slane %v8753_v58, 10 }
 0x56f   :  { %10905 = vmatpush3.bf16.xpose.msra.mxu1 %v8263_v51  ;;  %v11415_v51 = vld [vmem:[#allocation2 + $0x280] sm:$0xff]  }
 0x570   :  { %11196 = vmatprep.subr.msk.bf16.mxu1 %vm4712_vm9, %v11395_v31  ;;  %v8445_v31 = vsel %vm4712_vm9, %v10093_v9, 0 }
 0x577   :  { %10907 = vmatpush3.bf16.xpose.msra.mxu1 %v8266_v11  ;;  %v11417_v11 = vld [vmem:[#allocation2 + $0x294] sm:$0xff]  }
 0x578   :  { %11197 = vmatprep.subr.msk.bf16.mxu1 %vm4712_vm9, %v11397_v47  ;;  %v16030_v47 = vld [vmem:[%s16174_s5 + $0xd] sm:$0x1] }
 0x57f   :  { %10909 = vmatpush3.bf16.xpose.msra.mxu1 %v8269_v16  ;;  %v11419_v16 = vld [vmem:[#allocation2 + $0x2a8] sm:$0xff]  }
 0x580   :  { %11198 = vmatprep.subr.msk.bf16.mxu1 %vm4712_vm9, %v10094_v49  ;;  %v11420_v49 = vld [vmem:[#allocation2 + $0x208] sm:$0xff]  }
 0x581   :  { %v8639_v44 = vsel %vm4712_vm9, %v11420_v49, 0 }
 0x586   :  { %10911 = vmatmul.mubr.msk.bf16.vlgmr.msra.gmra.mrb[0].mxu1 %vm4712_vm9, %v10067_v30  ;;  %v11486_v30 = vld [vmem:[#allocation2 + $0x160] sm:$0xf] }
 0x587   :  { %10913 = vmatpush3.bf16.xpose.msra.mxu1 %v8424_v32  ;;  %10928 = vmatprep.mubr.msk.bf16.mxu1 %vm4712_vm9, %v16006_v0  ;;  %v10091_v55 = vcombine.low %v11486_v30, %v8343_v42  ;;  %v11424_v32 = vld [vmem:[#allocation2 + $0x230] sm:$0xff]   ;;  %v8727_v42 = vld [vmem:[#allocation2 + $0x1fc] sm:$0xf]  ;;  %v10130_v30 = vrot.slane %v8750_v7, 10 }
 0x588   :  { %11199 = vmatprep.subr.msk.bf16.mxu1 %vm4712_vm9, %v10095_v26  ;;  %v8645_v35 = vsel %vm4712_vm9, %v11424_v32, 0  ;;  %v11425_v26 = vld [vmem:[#allocation2 + $0x2e4] sm:$0xff]   ;;  %v8828_v36 = vrot.slane %v8727_v42, 6 }
 0x589   :  { %v8439_v19 = vsel %vm4712_vm9, %v10091_v55, 0 }
 0x58a   :  { %v8830_v9 = vrot.slane %v8828_v36, 4 }
 0x58f   :  { %10915 = vmatpush3.bf16.xpose.msra.mxu1 %v8427_v28  ;;  %v11428_v28 = vld [vmem:[#allocation2 + $0x258] sm:$0xff]  }
 0x590   :  { %11200 = vmatprep.subr.msk.bf16.mxu1 %vm4712_vm9, %v10096_v39  ;;  %v8747_v39 = vld [vmem:[#allocation2 + $0x284] sm:$0xc]  ;;  %v8651_v29 = vsel %vm4712_vm9, %v11428_v28, 0 }
 0x597   :  { %10917 = vmatpush3.bf16.xpose.msra.mxu1 %v8430_v4  ;;  %v10129_v4 = vrot.slane %v8747_v39, 10  ;;  %v8729_v39 = vld [vmem:[#allocation2 + $0x20c] sm:$0xc] }
 0x598   :  { %11201 = vmatprep.subr.msk.bf16.mxu1 %vm4712_vm9, %v10097_v25  ;;  %v8880_v25 = vrot.slane %v8749_v45, 6  ;;  %v8733_v45 = vld [vmem:[#allocation2 + $0x224] sm:$0xf] }
 0x59a   :  { %v8881_v50 = vsel %vm14609_vm15, %v8879_v37, %v8880_v25  ;;  %v8760_v37 = vld [vmem:[#allocation2 + $0x2d8] sm:$0xf]  ;;  %v10123_v25 = vrot.slane %v8729_v39, 10 }
 0x59b   :  { %v8905_v7 = vrot.slane %v8760_v37, 6  ;;  %v8767_v37 = vld [vmem:[#allocation2 + $0x304] sm:$0x3] }
 0x59f   :  { %10919 = vmatpush3.bf16.xpose.msra.mxu1 %v8433_v5  ;;  %v8878_v5 = vsel %vm14609_vm15, %v10129_v4, %v8877_v53 }
 0x5a0   :  { %11202 = vmatprep.subr.msk.bf16.mxu1 %vm4712_vm9, %v10098_v46  ;;  %v8884_v46 = vrot.slane %v8751_v3, 6  ;;  %v10146_v14 = vcombine.low %v8878_v5, %v8881_v50 }
 0x5a2   :  { %v8886_v55 = vrot.slane %v8884_v46, 4  ;;  %v8885_v59 = vsel %vm14609_vm15, %v10130_v30, %v8884_v46  ;;  %v8759_v46 = vld [vmem:[#allocation2 + $0x2d4] sm:$0xc] }
 0x5a3   :  { %v10133_v30 = vrot.slane %v8759_v46, 10  ;;  %v8922_v46 = vrot.slane %v8767_v37, 6 }
 0x5a7   :  { %10921 = vmatpush3.bf16.xpose.msra.mxu1 %v8436_v24  ;;  %v8654_v24 = vsel %vm4712_vm9, %v11430_v33, 0  ;;  %v8734_v33 = vld [vmem:[#allocation2 + $0x228] sm:$0x3] }
 0x5a8   :  { %11203 = vmatprep.subr.msk.bf16.mxu1 %vm4712_vm9, %v10099_v61  ;;  %v8723_v61 = vld [vmem:[#allocation2 + $0x1e4] sm:$0xc] }
 0x5a9   :  { %v10121_v12 = vrot.slane %v8723_v61, 10  ;;  %v8845_v61 = vrot.slane %v8734_v33, 6 }
 0x5ab   :  { %v8822_v56 = vsel %vm14609_vm15, %v10121_v12, %v8821_v1  ;;  %v8842_v1 = vrot.slane %v8733_v45, 6 }
 0x5af   :  { %10923 = vmatpush3.bf16.xpose.msra.mxu1 %v8439_v19  ;;  %v8754_v19 = vld [vmem:[#allocation2 + $0x2b0] sm:$0xf] }
 0x5b0   :  { %11204 = vmatprep.subr.msk.bf16.mxu1 %vm4712_vm9, %v10100_v27  ;;  %v8825_v27 = vsel %vm14609_vm15, %v8823_v34, %v8824_v57  ;;  %v8891_v15 = vrot.slane %v8754_v19, 6  ;;  %v8761_v34 = vld [vmem:[#allocation2 + $0x2dc] sm:$0x3]  ;;  %v8736_v57 = vld [vmem:[#allocation2 + $0x238] sm:$0xf]  ;;  %v8907_v19 = vrot.slane %v8905_v7, 4 }
 0x5b1   :  { %v8908_v12 = vrot.slane %v8761_v34, 6  ;;  %v8769_v34 = vld [vmem:[#allocation2 + $0x314] sm:$0xf] }
 0x5b7   :  { %10925 = vmatpush3.bf16.xpose.msra.mxu1 %v8442_v52  ;;  %v8888_v52 = vsel %vm14609_vm15, %v8886_v55, %v8887_v18  ;;  %v8735_v55 = vld [vmem:[#allocation2 + $0x234] sm:$0xc]  ;;  %v16093_v18 = vpop.f32.mrb[32].mxu0 }
 0x5b8   :  { %11205 = vmatprep.subr.msk.bf16.mxu1 %vm4712_vm9, %v10101_v62  ;;  %v10138_v62 = vcombine.low %v8822_v56, %v8825_v27  ;;  %v8737_v27 = vld [vmem:[#allocation2 + $0x23c] sm:$0x3] }
 0x5ba   :  { %v8985_v49 = vsel %vm4712_vm9, %v10138_v62, 0 }
 0x5bf   :  { %10927 = vmatpush3.bf16.xpose.msra.mxu1 %v8445_v31  ;;  %v10147_v31 = vcombine.low %v8885_v59, %v8888_v52  ;;  %v8763_v52 = vld [vmem:[#allocation2 + $0x2ec] sm:$0xf] }
 0x5c0   :  { %11206 = vmatprep.subr.msk.bf16.mxu1 %vm4712_vm9, %v11415_v51  ;;  %v8831_v51 = vrot.slane %v8728_v10, 6  ;;  %v16095_v10 = vpop.f32.mrb[33].mxu0 }
 0x5c6   :  { %10929 = vmatmul.mubr.msk.bf16.vlgmr.msra.gmra.mrb[0].mxu1 %vm4712_vm9, %v16006_v0  ;;  %v8642_v0 = vsel %vm4712_vm9, %v11422_v38, 0  ;;  %v8832_v38 = vsel %vm14609_vm15, %v8830_v9, %v8831_v51  ;;  %v10125_v9 = vrot.slane %v8735_v55, 10  ;;  %v8852_v51 = vrot.slane %v8737_v27, 6  ;;  %v8745_v27 = vld [vmem:[#allocation2 + $0x274] sm:$0xf] }
 0x5c7   :  { %10931 = vmatpush3.bf16.xpose.msra.mxu1 %v8633_v43  ;;  %10946 = vmatprep.mubr.msk.bf16.mxu1 %vm4712_vm9, %v16030_v47  ;;  %v16067_v43 = vld [vmem:[%s16174_s5 + $0xe] sm:$0x1]  ;;  %v8926_v55 = vrot.slane %v8769_v34, 6 }
 0x5c8   :  { %11207 = vmatprep.subr.msk.bf16.mxu1 %vm4712_vm9, %v11417_v11  ;;  %v8730_v11 = vld [vmem:[#allocation2 + $0x210] sm:$0xf] }
 0x5cf   :  { %10933 = vmatpush3.bf16.xpose.msra.mxu1 %v8636_v41  ;;  %v8894_v41 = vrot.slane %v8755_v40, 6 }
 0x5d0   :  { %11208 = vmatprep.subr.msk.bf16.mxu1 %vm4712_vm9, %v11419_v16  ;;  %v8893_v16 = vrot.slane %v8891_v15, 4 }
 0x5d7   :  { %10935 = vmatpush3.bf16.xpose.msra.mxu1 %v8639_v44  ;;  %v10122_v44 = vrot.slane %v8726_v60, 10  ;;  %v8909_v60 = vsel %vm14609_vm15, %v8907_v19, %v8908_v12  ;;  %v8768_v19 = vld [vmem:[#allocation2 + $0x310] sm:$0xc]  ;;  %v8770_v12 = vld [vmem:[#allocation2 + $0x318] sm:$0x3] }
 0x5d8   :  { %11209 = vmatprep.subr.msk.bf16.mxu1 %vm4712_vm9, %v11421_v20  ;;  %v8757_v20 = vld [vmem:[#allocation2 + $0x2c4] sm:$0xf] }
 0x5d9   :  { %v8829_v32 = vsel %vm14609_vm15, %v10122_v44, %v8828_v36  ;;  %v8849_v36 = vrot.slane %v8736_v57, 6 }
 0x5da   :  { %v10139_v17 = vcombine.low %v8829_v32, %v8832_v38 }
 0x5dc   :  { %v8988_v4 = vsel %vm4712_vm9, %v10139_v17, 0 }
 0x5df   :  { %10937 = vmatpush3.bf16.xpose.msra.mxu1 %v8642_v0  ;;  %v8731_v0 = vld [vmem:[#allocation2 + $0x214] sm:$0x3] }
 0x5e0   :  { %11210 = vmatprep.subr.msk.bf16.mxu1 %vm4712_vm9, %v11423_v22  ;;  %v8835_v22 = vrot.slane %v8730_v11, 6  ;;  %v8838_v28 = vrot.slane %v8731_v0, 6  ;;  %v8851_v11 = vrot.slane %v8849_v36, 4  ;;  %v8850_v0 = vsel %vm14609_vm15, %v10125_v9, %v8849_v36 }
 0x5e1   :  { %v8870_v9 = vrot.slane %v8745_v27, 6 }
 0x5e2   :  { %v8837_v54 = vrot.slane %v8835_v22, 4  ;;  %v8836_v21 = vsel %vm14609_vm15, %v10123_v25, %v8835_v22  ;;  %v8853_v32 = vsel %vm14609_vm15, %v8851_v11, %v8852_v51  ;;  %v8746_v51 = vld [vmem:[#allocation2 + $0x278] sm:$0x3] }
 0x5e4   :  { %v8839_v3 = vsel %vm14609_vm15, %v8837_v54, %v8838_v28  ;;  %v10142_v54 = vcombine.low %v8850_v0, %v8853_v32  ;;  %v11431_v32 = vld [vmem:[#allocation2 + $0x28c] sm:$0xff]  }
 0x5e5   :  { %v10140_v2 = vcombine.low %v8836_v21, %v8839_v3 }
 0x5e6   :  { %v8997_v25 = vsel %vm4712_vm9, %v10142_v54, 0  ;;  %v11436_v54 = vld [vmem:[#allocation2 + $0x214] sm:$0xff]  }
 0x5e7   :  { %10939 = vmatpush3.bf16.xpose.msra.mxu1 %v8645_v35  ;;  %v8895_v35 = vsel %vm14609_vm15, %v8893_v16, %v8894_v41  ;;  %v8991_v56 = vsel %vm4712_vm9, %v10140_v2, 0  ;;  %v8764_v16 = vld [vmem:[#allocation2 + $0x2f0] sm:$0x3]  ;;  %v8912_v41 = vrot.slane %v8763_v52, 6  ;;  %v8743_v2 = vld [vmem:[#allocation2 + $0x264] sm:$0x3] }
 0x5e8   :  { %11211 = vmatprep.subr.msk.bf16.mxu1 %vm4712_vm9, %v11425_v26  ;;  %v8898_v26 = vrot.slane %v8757_v20, 6  ;;  %v8739_v20 = vld [vmem:[#allocation2 + $0x24c] sm:$0xf]  ;;  %v8915_v22 = vrot.slane %v8764_v16, 6  ;;  %v8872_v16 = vrot.slane %v8870_v9, 4 }
 0x5e9   :  { %v8856_v17 = vrot.slane %v8739_v20, 6 }
 0x5ef   :  { %10941 = vmatpush3.bf16.xpose.msra.mxu1 %v8648_v6  ;;  %v8756_v6 = vld [vmem:[#allocation2 + $0x2c0] sm:$0xc] }
 0x5f0   :  { %11212 = vmatprep.subr.msk.bf16.mxu1 %vm4712_vm9, %v11427_v63  ;;  %v8758_v63 = vld [vmem:[#allocation2 + $0x2c8] sm:$0x3] }
 0x5f1   :  { %v8901_v48 = vrot.slane %v8758_v63, 6  ;;  %v8766_v63 = vld [vmem:[#allocation2 + $0x300] sm:$0xf] }
 0x5f7   :  { %10943 = vmatpush3.bf16.xpose.msra.mxu1 %v8651_v29  ;;  %v10132_v29 = vrot.slane %v8756_v6, 10 }
 0x5f8   :  { %11213 = vmatprep.subr.msk.bf16.mxu1 %vm4712_vm9, %v11429_v13  ;;  %v8900_v13 = vrot.slane %v8898_v26, 4 }
 0x5f9   :  { %v8899_v5 = vsel %vm14609_vm15, %v10132_v29, %v8898_v26  ;;  %v8740_v26 = vld [vmem:[#allocation2 + $0x250] sm:$0x3]  ;;  %v8858_v29 = vrot.slane %v8856_v17, 4 }
 0x5fa   :  { %v8902_v50 = vsel %vm14609_vm15, %v8900_v13, %v8901_v48  ;;  %v8765_v13 = vld [vmem:[#allocation2 + $0x2fc] sm:$0xc]  ;;  %v8919_v48 = vrot.slane %v8766_v63, 6 }
 0x5fb   :  { %v10149_v42 = vcombine.low %v8899_v5, %v8902_v50 }
 0x5fc   :  { %v8921_v50 = vrot.slane %v8919_v48, 4 }
 0x5ff   :  { %10945 = vmatpush3.bf16.xpose.msra.mxu1 %v8654_v24  ;;  %v8732_v24 = vld [vmem:[#allocation2 + $0x220] sm:$0xc] }
 0x600   :  { %11214 = vmatprep.subr.msk.bf16.mxu1 %vm4712_vm9, %v10146_v14  ;;  %v8844_v14 = vrot.slane %v8842_v1, 4  ;;  %v10124_v59 = vrot.slane %v8732_v24, 10 }
 0x602   :  { %v8846_v62 = vsel %vm14609_vm15, %v8844_v14, %v8845_v61  ;;  %v8843_v40 = vsel %vm14609_vm15, %v10124_v59, %v8842_v1  ;;  %v10135_v1 = vrot.slane %v8765_v13, 10  ;;  %v8866_v61 = vrot.slane %v8743_v2, 6 }
 0x606   :  { %10947 = vmatmul.mubr.msk.bf16.vlgmr.msra.gmra.mrb[0].mxu1 %vm4712_vm9, %v16030_v47  ;;  %v8892_v47 = vsel %vm14609_vm15, %v10131_v8, %v8891_v15  ;;  %v5596_v15 = vpop.f32.mrb[34].mxu0  ;;  %v8762_v8 = vld [vmem:[#allocation2 + $0x2e8] sm:$0xc] }
 0x607   :  { %10949 = vmatpush3.bf16.xpose.msra.mxu1 %v8985_v49  ;;  %10964 = vmatprep.mubr.msk.bf16.mxu1 %vm4712_vm9, %v16067_v43  ;;  %v10148_v53 = vcombine.low %v8892_v47, %v8895_v35  ;;  %v5597_v58 = vpop.f32.mrb[35].mxu0  ;;  %v10141_v49 = vcombine.low %v8843_v40, %v8846_v62  ;;  %v10134_v38 = vrot.slane %v8762_v8, 10  ;;  %v8914_v47 = vrot.slane %v8912_v41, 4  ;;  %v8738_v35 = vld [vmem:[#allocation2 + $0x248] sm:$0xc] }
 0x608   :  { %11215 = vmatprep.subr.msk.bf16.mxu1 %vm4712_vm9, %v10147_v31  ;;  %v8906_v31 = vsel %vm14609_vm15, %v10133_v30, %v8905_v7  ;;  %v10126_v28 = vrot.slane %v8738_v35, 10  ;;  %v8741_v7 = vld [vmem:[#allocation2 + $0x25c] sm:$0xc]  ;;  %v8923_v30 = vsel %vm14609_vm15, %v8921_v50, %v8922_v46  ;;  %v10136_v15 = vrot.slane %v8768_v19, 10  ;;  %v8744_v40 = vld [vmem:[#allocation2 + $0x270] sm:$0xc] }
 0x609   :  { %v10150_v44 = vcombine.low %v8906_v31, %v8909_v60  ;;  %v8994_v6 = vsel %vm4712_vm9, %v10141_v49, 0  ;;  %v8913_v39 = vsel %vm14609_vm15, %v10134_v38, %v8912_v41  ;;  %v8916_v45 = vsel %vm14609_vm15, %v8914_v47, %v8915_v22  ;;  %v11432_v47 = vld [vmem:[#allocation2 + $0x1ec] sm:$0xff]   ;;  %v11433_v35 = vld [vmem:[#allocation2 + $0x2a0] sm:$0xff]  }
 0x60a   :  { %v10151_v3 = vcombine.low %v8913_v39, %v8916_v45  ;;  %v8857_v21 = vsel %vm14609_vm15, %v10126_v28, %v8856_v17  ;;  %v10127_v24 = vrot.slane %v8741_v7, 10  ;;  %v8928_v62 = vrot.slane %v8926_v55, 4  ;;  %v11434_v17 = vld [vmem:[#allocation2 + $0x200] sm:$0xff]   ;;  %v11437_v28 = vld [vmem:[#allocation2 + $0x2c8] sm:$0xff]  }
 0x60b   :  { %v8929_v58 = vrot.slane %v8770_v12, 6  ;;  %v10128_v60 = vrot.slane %v8744_v40, 10  ;;  %v8927_v11 = vsel %vm14609_vm15, %v10136_v15, %v8926_v55  ;;  %v8873_v41 = vrot.slane %v8746_v51, 6  ;;  %v11439_v39 = vld [vmem:[#allocation2 + $0x2dc] sm:$0xff]  }
 0x60c   :  { %v9193_v23 = vsel %vm4712_vm9, %v11432_v47, 0  ;;  %v9196_v63 = vsel %vm4712_vm9, %v11434_v17, 0 }
 0x60d   :  { %v8930_v8 = vsel %vm14609_vm15, %v8928_v62, %v8929_v58  ;;  %v8874_v38 = vsel %vm14609_vm15, %v8872_v16, %v8873_v41 }
 0x60e   :  { %v10153_v20 = vcombine.low %v8927_v11, %v8930_v8 }
 0x60f   :  { %10951 = vmatpush3.bf16.xpose.msra.mxu1 %v8988_v4  ;;  %v8742_v4 = vld [vmem:[#allocation2 + $0x260] sm:$0xf] }
 0x610   :  { %11216 = vmatprep.subr.msk.bf16.mxu1 %vm4712_vm9, %v10148_v53  ;;  %v8859_v53 = vrot.slane %v8740_v26, 6  ;;  %v8863_v33 = vrot.slane %v8742_v4, 6  ;;  %v10155_v26 = vld [vmem:[%s16174_s5 + $0xf] sm:$0x1]  ;;  %v11442_v4 = vld [vmem:[#allocation2 + $0x250] sm:$0xff]  }
 0x611   :  { %v9208_v37 = vsel %vm4712_vm9, %v11442_v4, 0 }
 0x612   :  { %v8860_v5 = vsel %vm14609_vm15, %v8858_v29, %v8859_v53  ;;  %v8865_v14 = vrot.slane %v8863_v33, 4  ;;  %v8864_v59 = vsel %vm14609_vm15, %v10127_v24, %v8863_v33  ;;  %v9199_v53 = vsel %vm4712_vm9, %v11436_v54, 0  ;;  %v11440_v29 = vld [vmem:[#allocation2 + $0x23c] sm:$0xff]  }
 0x613   :  { %v10143_v57 = vcombine.low %v8857_v21, %v8860_v5  ;;  %v9205_v13 = vsel %vm4712_vm9, %v11440_v29, 0  ;;  %v11445_v33 = vld [vmem:[#allocation2 + $0x318] sm:$0xff]  }
 0x614   :  { %v8867_v52 = vsel %vm14609_vm15, %v8865_v14, %v8866_v61  ;;  %v11446_v21 = vld [vmem:[#allocation2 + $0x278] sm:$0xff]  }
 0x615   :  { %v9000_v36 = vsel %vm4712_vm9, %v10143_v57, 0  ;;  %v10144_v31 = vcombine.low %v8864_v59, %v8867_v52  ;;  %v9214_v5 = vsel %vm4712_vm9, %v11446_v21, 0 }
 0x617   :  { %10953 = vmatpush3.bf16.xpose.msra.mxu1 %v8991_v56  ;;  %v9003_v49 = vsel %vm4712_vm9, %v10144_v31, 0 }
 0x618   :  { %11217 = vmatprep.subr.msk.bf16.mxu1 %vm4712_vm9, %v10149_v42  ;;  %v8920_v42 = vsel %vm14609_vm15, %v10135_v1, %v8919_v48  ;;  %v11441_v48 = vld [vmem:[#allocation2 + $0x2f0] sm:$0xff]  }
 0x619   :  { %v10152_v56 = vcombine.low %v8920_v42, %v8923_v30 }
 0x61f   :  { %10955 = vmatpush3.bf16.xpose.msra.mxu1 %v8994_v6  ;;  %v11435_v6 = vld [vmem:[#allocation2 + $0x2b4] sm:$0xff]  }
 0x620   :  { %11218 = vmatprep.subr.msk.bf16.mxu1 %vm4712_vm9, %v10150_v44  ;;  %v8871_v44 = vsel %vm14609_vm15, %v10128_v60, %v8870_v9 }
 0x621   :  { %v10145_v22 = vcombine.low %v8871_v44, %v8874_v38 }
 0x623   :  { %v9006_v0 = vsel %vm4712_vm9, %v10145_v22, 0 }
 0x627   :  { %10957 = vmatpush3.bf16.xpose.msra.mxu1 %v8997_v25  ;;  %v11443_v25 = vld [vmem:[#allocation2 + $0x304] sm:$0xff]  }
 0x628   :  { %11219 = vmatprep.subr.msk.bf16.mxu1 %vm4712_vm9, %v10151_v3  ;;  %v11444_v3 = vld [vmem:[#allocation2 + $0x264] sm:$0xff]  }
 0x629   :  { %v9211_v1 = vsel %vm4712_vm9, %v11444_v3, 0 }
 0x62f   :  { %10959 = vmatpush3.bf16.xpose.msra.mxu1 %v9000_v36 }
 0x630   :  { %11220 = vmatprep.subr.msk.bf16.mxu1 %vm4712_vm9, %v10152_v56 }
 0x637   :  { %10961 = vmatpush3.bf16.xpose.msra.mxu1 %v9003_v49 }
 0x638   :  { %11221 = vmatprep.subr.msk.bf16.mxu1 %vm4712_vm9, %v10153_v20 }
 0x63f   :  { %10963 = vmatpush3.bf16.xpose.msra.mxu1 %v9006_v0 }
 0x640   :  { %11222 = vmatprep.subr.msk.bf16.mxu1 %vm4712_vm9, %v11431_v32 }
 0x646   :  { %10965 = vmatmul.mubr.msk.bf16.vlgmr.msra.gmra.mrb[0].mxu1 %vm4712_vm9, %v16067_v43  ;;  %v11438_v43 = vld [vmem:[#allocation2 + $0x228] sm:$0xff]  }
 0x647   :  { %10967 = vmatpush3.bf16.xpose.msra.mxu1 %v9193_v23  ;;  %10982 = vmatprep.mubr.msk.bf16.mxu1 %vm4712_vm9, %v10155_v26  ;;  %v9202_v45 = vsel %vm4712_vm9, %v11438_v43, 0 }
 0x648   :  { %11223 = vmatprep.subr.msk.bf16.mxu1 %vm4712_vm9, %v11433_v35 }
 0x64f   :  { %10969 = vmatpush3.bf16.xpose.msra.mxu1 %v9196_v63 }
 0x650   :  { %11224 = vmatprep.subr.msk.bf16.mxu1 %vm4712_vm9, %v11435_v6 }
 0x657   :  { %10971 = vmatpush3.bf16.xpose.msra.mxu1 %v9199_v53 }
 0x658   :  { %11225 = vmatprep.subr.msk.bf16.mxu1 %vm4712_vm9, %v11437_v28 }
 0x65f   :  { %10973 = vmatpush3.bf16.xpose.msra.mxu1 %v9202_v45 }
 0x660   :  { %11226 = vmatprep.subr.msk.bf16.mxu1 %vm4712_vm9, %v11439_v39 }
 0x667   :  { %10975 = vmatpush3.bf16.xpose.msra.mxu1 %v9205_v13 }
 0x668   :  { %11227 = vmatprep.subr.msk.bf16.mxu1 %vm4712_vm9, %v11441_v48 }
 0x66f   :  { %10977 = vmatpush3.bf16.xpose.msra.mxu1 %v9208_v37 }
 0x670   :  { %11228 = vmatprep.subr.msk.bf16.mxu1 %vm4712_vm9, %v11443_v25 }
 0x677   :  { %10979 = vmatpush3.bf16.xpose.msra.mxu1 %v9211_v1 }
 0x678   :  { %11229 = vmatprep.subr.msk.bf16.mxu1 %vm4712_vm9, %v11445_v33 }
 0x67f   :  { %10981 = vmatpush3.bf16.xpose.msra.mxu1 %v9214_v5 }
 0x686   :  { %10983 = vmatmul.mubr.msk.bf16.vlgmr.msra.gmra.mrb[0].mxu1 %vm4712_vm9, %v10155_v26 }
 0x759   :  { %v9274_v50 = vpop.f32.mrb[0].mxu1 }
 0x75a   :  { %v11032_v46 = vadd.f32 %v9274_v50, %v16093_v18  ;;  %v9276_v7 = vpop.f32.mrb[1].mxu1 }
 0x75b   :  { %v11033_v2 = vadd.f32 %v9276_v7, %v16095_v10  ;;  %v9278_v34 = vpop.f32.mrb[2].mxu1 }
 0x75c   :  { %v9279_v57 = vpop.f32.mrb[3].mxu1 }
 0x75d   :  { %v9285_v24 = vcombine.low %v11032_v46, %v11033_v2 }
 0x75f   :  { %10173 = vst.sshfl [vmem:[%s16178_s6] sm:$0x33 pattern:$0x76325410] %v9285_v24 }

</bundles_post_ra>
